<compile_context>
chip_gen: v6e
topology: v6e:2x2x1
jax: 0.10.0
libtpu: 0.0.40
codegen_flags: <defaults>
</compile_context>

<pallas_src>
import functools

import jax
import jax.numpy as jnp
from jax.experimental import pallas as pl
from jax.experimental.pallas import tpu as pltpu

# ----- module hyperparameters (from AC_Args) -----
ADAPT_HIDDEN = [256, 128]
ACTOR_HIDDEN = [512, 256, 128]
CRITIC_HIDDEN = [512, 256, 128]
INIT_NOISE_STD = 1.0


def _elu(x):
    # nn.ELU(alpha=1.0); exp(min(x,0))-1 keeps the positive branch exact and the
    # negative branch within f32 rounding of expm1 (negligible vs bf16 weight quant).
    return jnp.where(x > 0, x, jnp.exp(jnp.minimum(x, 0.0)) - 1.0)


def _dot(x, w_ref):
    # bf16 x bf16 MXU matmul with f32 accumulation.
    return jnp.dot(x.astype(jnp.bfloat16), w_ref[...],
                   preferred_element_type=jnp.float32)


def ac_kernel(
    obs_ref, priv_ref,
    # adaptation module weights
    aw0, aw1, aw2,
    # actor body weights (first layer split into obs / latent parts)
    pw0_obs, pw0_lat, pw1, pw2, pw3,
    # critic body weights (first layer split into obs / priv parts)
    cw0_obs, cw0_prv, cw1, cw2, cw3,
    # all biases packed into one lane-dense (1, sum_out) f32 buffer
    bias_ref,
    # packed output block: [latent | mean | value | zero pad] -> (TB, out_w)
    out_ref,
    *, boffs, lat_dim, act_dim,
):
    def b(i):
        lo, hi = boffs[i]
        return bias_ref[:, lo:hi]

    obs = obs_ref[...]
    priv = priv_ref[...]

    # --- adaptation_module(obs_history) ---
    h = _elu(_dot(obs, aw0) + b(0))
    h = _elu(_dot(h, aw1) + b(1))
    latent = _dot(h, aw2) + b(2)

    # --- actor_body(cat(obs_history, latent)) : fused split-K first layer ---
    h = _elu(_dot(obs, pw0_obs) + _dot(latent, pw0_lat) + b(3))
    h = _elu(_dot(h, pw1) + b(4))
    h = _elu(_dot(h, pw2) + b(5))
    mean = _dot(h, pw3) + b(6)

    # --- critic_body(cat(obs_history, privileged_obs)) : fused split-K first layer ---
    h = _elu(_dot(obs, cw0_obs) + _dot(priv, cw0_prv) + b(7))
    h = _elu(_dot(h, cw1) + b(8))
    h = _elu(_dot(h, cw2) + b(9))
    value = _dot(h, cw3) + b(10)

    # single lane-dense output block (one writeback DMA per grid step)
    out_ref[...] = jnp.zeros_like(out_ref)
    out_ref[:, 0:lat_dim] = latent
    out_ref[:, lat_dim:lat_dim + act_dim] = mean
    out_ref[:, lat_dim + act_dim:lat_dim + act_dim + 1] = value


def _round_up(x, m):
    return (x + m - 1) // m * m


def make_params(key, num_obs_history, num_privileged_obs, num_actions):
    """Synthetic params: weights bf16 stored as (in, out), biases f32 stored as (1, out)."""
    dims_adapt = [num_obs_history] + ADAPT_HIDDEN + [num_privileged_obs]
    dims_actor = [num_obs_history + num_privileged_obs] + ACTOR_HIDDEN + [num_actions]
    dims_critic = [num_obs_history + num_privileged_obs] + CRITIC_HIDDEN + [1]

    params = {}

    def init_stack(name, dims, key):
        ws, bs = [], []
        for i in range(len(dims) - 1):
            key, kw, kb = jax.random.split(key, 3)
            fan_in = dims[i]
            w = (jax.random.normal(kw, (dims[i], dims[i + 1]), jnp.float32)
                 / jnp.sqrt(fan_in)).astype(jnp.bfloat16)
            b = 0.01 * jax.random.normal(kb, (1, dims[i + 1]), jnp.float32)
            ws.append(w)
            bs.append(b)
        params[name] = (ws, bs)
        return key

    key = init_stack("adapt", dims_adapt, key)
    key = init_stack("actor", dims_actor, key)
    key = init_stack("critic", dims_critic, key)
    params["std"] = INIT_NOISE_STD * jnp.ones((num_actions,), jnp.float32)
    return params


def actor_critic_forward(obs_history, privileged_obs, params, *, block_b=128):
    B, n_obs = obs_history.shape
    n_priv = privileged_obs.shape[1]

    aw, ab = params["adapt"]
    pw, pb = params["actor"]
    cw, cb = params["critic"]
    n_act = pw[-1].shape[1]

    # split actor/critic first-layer weights to match torch.cat order
    pw0_obs, pw0_lat = pw[0][:n_obs], pw[0][n_obs:]
    cw0_obs, cw0_prv = cw[0][:n_obs], cw[0][n_obs:]

    weights = [aw[0], aw[1], aw[2],
               pw0_obs, pw0_lat, pw[1], pw[2], pw[3],
               cw0_obs, cw0_prv, cw[1], cw[2], cw[3]]

    # pack all biases into one lane-dense buffer with static offsets
    biases = list(ab) + list(pb) + list(cb)
    boffs, off = [], 0
    for b_ in biases:
        w_ = b_.shape[1]
        boffs.append((off, off + w_))
        off += w_
    bias_packed = jnp.concatenate(biases, axis=1)  # (1, sum_out) f32

    # batch tiling (MXU-sized tile where possible; pad batch to a tile multiple)
    tb = min(block_b, _round_up(B, 8))
    B_pad = _round_up(B, tb)
    pad = B_pad - B
    obs_p = jnp.pad(obs_history.astype(jnp.bfloat16), ((0, pad), (0, 0)))
    priv_p = jnp.pad(privileged_obs.astype(jnp.bfloat16), ((0, pad), (0, 0)))

    out_w = _round_up(n_priv + n_act + 1, 128)  # lane-dense packed output width

    kernel = functools.partial(
        ac_kernel, boffs=tuple(boffs), lat_dim=n_priv, act_dim=n_act)

    # advisory cost estimate
    flops = 2 * B_pad * sum(int(w.shape[0]) * int(w.shape[1]) for w in aw + pw + cw)
    transcendentals = B_pad * sum(int(w.shape[1]) for w in aw[:-1] + pw[:-1] + cw[:-1])
    bytes_accessed = (sum(int(w.size) * 2 for w in weights)
                      + int(bias_packed.size) * 4
                      + B_pad * (n_obs + n_priv) * 2
                      + B_pad * out_w * 4)

    act_spec = lambda feat: pl.BlockSpec((tb, feat), lambda i: (i, 0))
    weight_specs = [pl.BlockSpec(w.shape, lambda i: (0, 0)) for w in weights]

    packed = pl.pallas_call(
        kernel,
        out_shape=jax.ShapeDtypeStruct((B_pad, out_w), jnp.float32),
        grid=(B_pad // tb,),
        in_specs=[act_spec(n_obs), act_spec(n_priv)]
                 + weight_specs
                 + [pl.BlockSpec(bias_packed.shape, lambda i: (0, 0))],
        out_specs=pl.BlockSpec((tb, out_w), lambda i: (i, 0)),
        compiler_params=pltpu.CompilerParams(
            dimension_semantics=("parallel",),
            vmem_limit_bytes=32 * 1024 * 1024),
        cost_estimate=pl.CostEstimate(
            flops=flops, transcendentals=transcendentals,
            bytes_accessed=bytes_accessed),
    )(obs_p, priv_p, *weights, bias_packed)

    latent = packed[:B, 0:n_priv]
    mean = packed[:B, n_priv:n_priv + n_act]
    value = packed[:B, n_priv + n_act:n_priv + n_act + 1]
    return latent, mean, value


def reference_forward(obs_history, privileged_obs, params):
    """Pure-JAX reference matching the PyTorch module semantics (bf16 weights/activations,
    f32 accumulation — same numerics as the kernel)."""
    def elu(x):
        return jnp.where(x > 0, x, jnp.exp(jnp.minimum(x, 0.0)) - 1.0)

    def mlp(x, ws, bs):
        h = x
        for i, (w, b) in enumerate(zip(ws, bs)):
            h = jnp.dot(h.astype(jnp.bfloat16), w,
                        preferred_element_type=jnp.float32) + b
            if i < len(ws) - 1:
                h = elu(h)
        return h

    aw, ab = params["adapt"]
    pw, pb = params["actor"]
    cw, cb = params["critic"]
    latent = mlp(obs_history, aw, ab)
    mean = mlp(jnp.concatenate([obs_history, latent], axis=-1), pw, pb)
    value = mlp(jnp.concatenate([obs_history, privileged_obs], axis=-1), cw, cb)
    return latent, mean, value


if __name__ == "__main__":
    # small but representative shapes (two batch tiles -> exercises the grid + pipelining)
    B = 256
    num_obs_history = 64
    num_privileged_obs = 16
    num_actions = 12

    key = jax.random.PRNGKey(0)
    k_obs, k_priv, k_params = jax.random.split(key, 3)

    obs_history = jax.random.normal(k_obs, (B, num_obs_history), jnp.float32)
    privileged_obs = jax.random.normal(k_priv, (B, num_privileged_obs), jnp.float32)
    params = make_params(k_params, num_obs_history, num_privileged_obs, num_actions)

    latent, mean, value = actor_critic_forward(
        obs_history, privileged_obs, params, block_b=128)
    jax.block_until_ready((latent, mean, value))

    # distribution pieces (Normal(mean, std)) — plain JAX glue, like the nn.Parameter std
    action_std = jnp.broadcast_to(params["std"], mean.shape)
    jax.block_until_ready(action_std)

    # correctness check against pure-JAX reference (same bf16 weight/activation numerics)
    ref_latent, ref_mean, ref_value = reference_forward(obs_history, privileged_obs, params)
    assert jnp.allclose(latent, ref_latent, atol=1e-2, rtol=1e-2)
    assert jnp.allclose(mean, ref_mean, atol=1e-2, rtol=1e-2)
    assert jnp.allclose(value, ref_value, atol=1e-2, rtol=1e-2)
    assert latent.shape == (B, num_privileged_obs)
    assert mean.shape == (B, num_actions)
    assert value.shape == (B, 1)

    print("KERNEL_OK")
</pallas_src>

<mosaic_0001>
module attributes {stable_mosaic.version = 11 : i64} {
  func.func @ac_kernel(%arg0: i32, %arg1: memref<128x64xbf16, #tpu.memory_space<vmem>>, %arg2: memref<128x16xbf16, #tpu.memory_space<vmem>>, %arg3: memref<64x256xbf16, #tpu.memory_space<vmem>>, %arg4: memref<256x128xbf16, #tpu.memory_space<vmem>>, %arg5: memref<128x16xbf16, #tpu.memory_space<vmem>>, %arg6: memref<64x512xbf16, #tpu.memory_space<vmem>>, %arg7: memref<16x512xbf16, #tpu.memory_space<vmem>>, %arg8: memref<512x256xbf16, #tpu.memory_space<vmem>>, %arg9: memref<256x128xbf16, #tpu.memory_space<vmem>>, %arg10: memref<128x12xbf16, #tpu.memory_space<vmem>>, %arg11: memref<64x512xbf16, #tpu.memory_space<vmem>>, %arg12: memref<16x512xbf16, #tpu.memory_space<vmem>>, %arg13: memref<512x256xbf16, #tpu.memory_space<vmem>>, %arg14: memref<256x128xbf16, #tpu.memory_space<vmem>>, %arg15: memref<128x1xbf16, #tpu.memory_space<vmem>>, %arg16: memref<1x2205xf32, #tpu.memory_space<vmem>>, %arg17: memref<128x128xf32, #tpu.memory_space<vmem>>) attributes {dimension_semantics = [#tpu.dimension_semantics<parallel>], iteration_bounds = array<i64: 2>, scalar_prefetch = 0 : i64, scratch_operands = 0 : i64, tpu.core_type = #tpu.core_type<tc>, window_params = [{transform_indices = @transform_0, window_bounds = array<i64: 128, 64>}, {transform_indices = @transform_1, window_bounds = array<i64: 128, 16>}, {pipeline_mode = #tpu.pipeline_mode<synchronous>, transform_indices = @transform_2, window_bounds = array<i64: 64, 256>}, {pipeline_mode = #tpu.pipeline_mode<synchronous>, transform_indices = @transform_3, window_bounds = array<i64: 256, 128>}, {pipeline_mode = #tpu.pipeline_mode<synchronous>, transform_indices = @transform_4, window_bounds = array<i64: 128, 16>}, {pipeline_mode = #tpu.pipeline_mode<synchronous>, transform_indices = @transform_5, window_bounds = array<i64: 64, 512>}, {pipeline_mode = #tpu.pipeline_mode<synchronous>, transform_indices = @transform_6, window_bounds = array<i64: 16, 512>}, {pipeline_mode = #tpu.pipeline_mode<synchronous>, transform_indices = @transform_7, window_bounds = array<i64: 512, 256>}, {pipeline_mode = #tpu.pipeline_mode<synchronous>, transform_indices = @transform_8, window_bounds = array<i64: 256, 128>}, {pipeline_mode = #tpu.pipeline_mode<synchronous>, transform_indices = @transform_9, window_bounds = array<i64: 128, 12>}, {pipeline_mode = #tpu.pipeline_mode<synchronous>, transform_indices = @transform_10, window_bounds = array<i64: 64, 512>}, {pipeline_mode = #tpu.pipeline_mode<synchronous>, transform_indices = @transform_11, window_bounds = array<i64: 16, 512>}, {pipeline_mode = #tpu.pipeline_mode<synchronous>, transform_indices = @transform_12, window_bounds = array<i64: 512, 256>}, {pipeline_mode = #tpu.pipeline_mode<synchronous>, transform_indices = @transform_13, window_bounds = array<i64: 256, 128>}, {pipeline_mode = #tpu.pipeline_mode<synchronous>, transform_indices = @transform_14, window_bounds = array<i64: 128, 1>}, {pipeline_mode = #tpu.pipeline_mode<synchronous>, transform_indices = @transform_15, window_bounds = array<i64: 1, 2205>}, {transform_indices = @transform_16, window_bounds = array<i64: 128, 128>}]} {
    %c0 = arith.constant 0 : index
    %c0_0 = arith.constant 0 : index
    %0 = vector.load %arg1[%c0, %c0_0] : memref<128x64xbf16, #tpu.memory_space<vmem>>, vector<128x64xbf16>
    %c0_1 = arith.constant 0 : index
    %c0_2 = arith.constant 0 : index
    %1 = vector.load %arg2[%c0_1, %c0_2] : memref<128x16xbf16, #tpu.memory_space<vmem>>, vector<128x16xbf16>
    %c0_3 = arith.constant 0 : index
    %c0_4 = arith.constant 0 : index
    %2 = vector.load %arg3[%c0_3, %c0_4] : memref<64x256xbf16, #tpu.memory_space<vmem>>, vector<64x256xbf16>
    %cst = arith.constant dense<0.000000e+00> : vector<128x256xf32>
    %3 = tpu.matmul %0, %2, %cst {dimension_numbers = #tpu.dot_dimension_numbers<[1], [0], [0], [1], [0, 0, 1, 1], [], []>} : vector<128x64xbf16>, vector<64x256xbf16>, vector<128x256xf32> -> vector<128x256xf32>
    %c0_5 = arith.constant 0 : index
    %c0_6 = arith.constant 0 : index
    %4 = vector.load %arg16[%c0_5, %c0_6] : memref<1x2205xf32, #tpu.memory_space<vmem>>, vector<1x256xf32>
    %5 = vector.broadcast %4 : vector<1x256xf32> to vector<128x256xf32>
    %6 = arith.addf %3, %5 : vector<128x256xf32>
    %cst_7 = arith.constant 0.000000e+00 : f32
    %7 = vector.broadcast %cst_7 : f32 to vector<128x256xf32>
    %8 = arith.cmpf ogt, %6, %7 : vector<128x256xf32>
    %cst_8 = arith.constant 0.000000e+00 : f32
    %9 = vector.broadcast %cst_8 : f32 to vector<128x256xf32>
    %10 = arith.minimumf %6, %9 : vector<128x256xf32>
    %11 = math.exp %10 : vector<128x256xf32>
    %cst_9 = arith.constant 1.000000e+00 : f32
    %12 = vector.broadcast %cst_9 : f32 to vector<128x256xf32>
    %13 = arith.subf %11, %12 : vector<128x256xf32>
    %14 = arith.select %8, %6, %13 : vector<128x256xi1>, vector<128x256xf32>
    %15 = arith.truncf %14 : vector<128x256xf32> to vector<128x256xbf16>
    %c0_10 = arith.constant 0 : index
    %c0_11 = arith.constant 0 : index
    %16 = vector.load %arg4[%c0_10, %c0_11] : memref<256x128xbf16, #tpu.memory_space<vmem>>, vector<256x128xbf16>
    %cst_12 = arith.constant dense<0.000000e+00> : vector<128x128xf32>
    %17 = tpu.matmul %15, %16, %cst_12 {dimension_numbers = #tpu.dot_dimension_numbers<[1], [0], [0], [1], [0, 0, 1, 1], [], []>} : vector<128x256xbf16>, vector<256x128xbf16>, vector<128x128xf32> -> vector<128x128xf32>
    %c0_13 = arith.constant 0 : index
    %c256 = arith.constant 256 : index
    %18 = vector.load %arg16[%c0_13, %c256] : memref<1x2205xf32, #tpu.memory_space<vmem>>, vector<1x128xf32>
    %19 = vector.broadcast %18 : vector<1x128xf32> to vector<128x128xf32>
    %20 = arith.addf %17, %19 : vector<128x128xf32>
    %cst_14 = arith.constant 0.000000e+00 : f32
    %21 = vector.broadcast %cst_14 : f32 to vector<128x128xf32>
    %22 = arith.cmpf ogt, %20, %21 : vector<128x128xf32>
    %cst_15 = arith.constant 0.000000e+00 : f32
    %23 = vector.broadcast %cst_15 : f32 to vector<128x128xf32>
    %24 = arith.minimumf %20, %23 : vector<128x128xf32>
    %25 = math.exp %24 : vector<128x128xf32>
    %cst_16 = arith.constant 1.000000e+00 : f32
    %26 = vector.broadcast %cst_16 : f32 to vector<128x128xf32>
    %27 = arith.subf %25, %26 : vector<128x128xf32>
    %28 = arith.select %22, %20, %27 : vector<128x128xi1>, vector<128x128xf32>
    %29 = arith.truncf %28 : vector<128x128xf32> to vector<128x128xbf16>
    %c0_17 = arith.constant 0 : index
    %c0_18 = arith.constant 0 : index
    %30 = vector.load %arg5[%c0_17, %c0_18] : memref<128x16xbf16, #tpu.memory_space<vmem>>, vector<128x16xbf16>
    %cst_19 = arith.constant dense<0.000000e+00> : vector<128x16xf32>
    %31 = tpu.matmul %29, %30, %cst_19 {dimension_numbers = #tpu.dot_dimension_numbers<[1], [0], [0], [1], [0, 0, 1, 1], [], []>} : vector<128x128xbf16>, vector<128x16xbf16>, vector<128x16xf32> -> vector<128x16xf32>
    %c0_20 = arith.constant 0 : index
    %c384 = arith.constant 384 : index
    %32 = vector.load %arg16[%c0_20, %c384] : memref<1x2205xf32, #tpu.memory_space<vmem>>, vector<1x16xf32>
    %33 = vector.broadcast %32 : vector<1x16xf32> to vector<128x16xf32>
    %34 = arith.addf %31, %33 : vector<128x16xf32>
    %c0_21 = arith.constant 0 : index
    %c0_22 = arith.constant 0 : index
    %35 = vector.load %arg6[%c0_21, %c0_22] : memref<64x512xbf16, #tpu.memory_space<vmem>>, vector<64x512xbf16>
    %cst_23 = arith.constant dense<0.000000e+00> : vector<128x512xf32>
    %36 = tpu.matmul %0, %35, %cst_23 {dimension_numbers = #tpu.dot_dimension_numbers<[1], [0], [0], [1], [0, 0, 1, 1], [], []>} : vector<128x64xbf16>, vector<64x512xbf16>, vector<128x512xf32> -> vector<128x512xf32>
    %37 = arith.truncf %34 : vector<128x16xf32> to vector<128x16xbf16>
    %c0_24 = arith.constant 0 : index
    %c0_25 = arith.constant 0 : index
    %38 = vector.load %arg7[%c0_24, %c0_25] : memref<16x512xbf16, #tpu.memory_space<vmem>>, vector<16x512xbf16>
    %cst_26 = arith.constant dense<0.000000e+00> : vector<128x512xf32>
    %39 = tpu.matmul %37, %38, %cst_26 {dimension_numbers = #tpu.dot_dimension_numbers<[1], [0], [0], [1], [0, 0, 1, 1], [], []>} : vector<128x16xbf16>, vector<16x512xbf16>, vector<128x512xf32> -> vector<128x512xf32>
    %40 = arith.addf %36, %39 : vector<128x512xf32>
    %c0_27 = arith.constant 0 : index
    %c400 = arith.constant 400 : index
    %41 = vector.load %arg16[%c0_27, %c400] : memref<1x2205xf32, #tpu.memory_space<vmem>>, vector<1x512xf32>
    %42 = vector.broadcast %41 : vector<1x512xf32> to vector<128x512xf32>
    %43 = arith.addf %40, %42 : vector<128x512xf32>
    %cst_28 = arith.constant 0.000000e+00 : f32
    %44 = vector.broadcast %cst_28 : f32 to vector<128x512xf32>
    %45 = arith.cmpf ogt, %43, %44 : vector<128x512xf32>
    %cst_29 = arith.constant 0.000000e+00 : f32
    %46 = vector.broadcast %cst_29 : f32 to vector<128x512xf32>
    %47 = arith.minimumf %43, %46 : vector<128x512xf32>
    %48 = math.exp %47 : vector<128x512xf32>
    %cst_30 = arith.constant 1.000000e+00 : f32
    %49 = vector.broadcast %cst_30 : f32 to vector<128x512xf32>
    %50 = arith.subf %48, %49 : vector<128x512xf32>
    %51 = arith.select %45, %43, %50 : vector<128x512xi1>, vector<128x512xf32>
    %52 = arith.truncf %51 : vector<128x512xf32> to vector<128x512xbf16>
    %c0_31 = arith.constant 0 : index
    %c0_32 = arith.constant 0 : index
    %53 = vector.load %arg8[%c0_31, %c0_32] : memref<512x256xbf16, #tpu.memory_space<vmem>>, vector<512x256xbf16>
    %cst_33 = arith.constant dense<0.000000e+00> : vector<128x256xf32>
    %54 = tpu.matmul %52, %53, %cst_33 {dimension_numbers = #tpu.dot_dimension_numbers<[1], [0], [0], [1], [0, 0, 1, 1], [], []>} : vector<128x512xbf16>, vector<512x256xbf16>, vector<128x256xf32> -> vector<128x256xf32>
    %c0_34 = arith.constant 0 : index
    %c912 = arith.constant 912 : index
    %55 = vector.load %arg16[%c0_34, %c912] : memref<1x2205xf32, #tpu.memory_space<vmem>>, vector<1x256xf32>
    %56 = vector.broadcast %55 : vector<1x256xf32> to vector<128x256xf32>
    %57 = arith.addf %54, %56 : vector<128x256xf32>
    %cst_35 = arith.constant 0.000000e+00 : f32
    %58 = vector.broadcast %cst_35 : f32 to vector<128x256xf32>
    %59 = arith.cmpf ogt, %57, %58 : vector<128x256xf32>
    %cst_36 = arith.constant 0.000000e+00 : f32
    %60 = vector.broadcast %cst_36 : f32 to vector<128x256xf32>
    %61 = arith.minimumf %57, %60 : vector<128x256xf32>
    %62 = math.exp %61 : vector<128x256xf32>
    %cst_37 = arith.constant 1.000000e+00 : f32
    %63 = vector.broadcast %cst_37 : f32 to vector<128x256xf32>
    %64 = arith.subf %62, %63 : vector<128x256xf32>
    %65 = arith.select %59, %57, %64 : vector<128x256xi1>, vector<128x256xf32>
    %66 = arith.truncf %65 : vector<128x256xf32> to vector<128x256xbf16>
    %c0_38 = arith.constant 0 : index
    %c0_39 = arith.constant 0 : index
    %67 = vector.load %arg9[%c0_38, %c0_39] : memref<256x128xbf16, #tpu.memory_space<vmem>>, vector<256x128xbf16>
    %cst_40 = arith.constant dense<0.000000e+00> : vector<128x128xf32>
    %68 = tpu.matmul %66, %67, %cst_40 {dimension_numbers = #tpu.dot_dimension_numbers<[1], [0], [0], [1], [0, 0, 1, 1], [], []>} : vector<128x256xbf16>, vector<256x128xbf16>, vector<128x128xf32> -> vector<128x128xf32>
    %c0_41 = arith.constant 0 : index
    %c1168 = arith.constant 1168 : index
    %69 = vector.load %arg16[%c0_41, %c1168] : memref<1x2205xf32, #tpu.memory_space<vmem>>, vector<1x128xf32>
    %70 = vector.broadcast %69 : vector<1x128xf32> to vector<128x128xf32>
    %71 = arith.addf %68, %70 : vector<128x128xf32>
    %cst_42 = arith.constant 0.000000e+00 : f32
    %72 = vector.broadcast %cst_42 : f32 to vector<128x128xf32>
    %73 = arith.cmpf ogt, %71, %72 : vector<128x128xf32>
    %cst_43 = arith.constant 0.000000e+00 : f32
    %74 = vector.broadcast %cst_43 : f32 to vector<128x128xf32>
    %75 = arith.minimumf %71, %74 : vector<128x128xf32>
    %76 = math.exp %75 : vector<128x128xf32>
    %cst_44 = arith.constant 1.000000e+00 : f32
    %77 = vector.broadcast %cst_44 : f32 to vector<128x128xf32>
    %78 = arith.subf %76, %77 : vector<128x128xf32>
    %79 = arith.select %73, %71, %78 : vector<128x128xi1>, vector<128x128xf32>
    %80 = arith.truncf %79 : vector<128x128xf32> to vector<128x128xbf16>
    %c0_45 = arith.constant 0 : index
    %c0_46 = arith.constant 0 : index
    %81 = vector.load %arg10[%c0_45, %c0_46] : memref<128x12xbf16, #tpu.memory_space<vmem>>, vector<128x12xbf16>
    %cst_47 = arith.constant dense<0.000000e+00> : vector<128x12xf32>
    %82 = tpu.matmul %80, %81, %cst_47 {dimension_numbers = #tpu.dot_dimension_numbers<[1], [0], [0], [1], [0, 0, 1, 1], [], []>} : vector<128x128xbf16>, vector<128x12xbf16>, vector<128x12xf32> -> vector<128x12xf32>
    %c0_48 = arith.constant 0 : index
    %c1296 = arith.constant 1296 : index
    %83 = vector.load %arg16[%c0_48, %c1296] : memref<1x2205xf32, #tpu.memory_space<vmem>>, vector<1x12xf32>
    %84 = vector.broadcast %83 : vector<1x12xf32> to vector<128x12xf32>
    %85 = arith.addf %82, %84 : vector<128x12xf32>
    %c0_49 = arith.constant 0 : index
    %c0_50 = arith.constant 0 : index
    %86 = vector.load %arg11[%c0_49, %c0_50] : memref<64x512xbf16, #tpu.memory_space<vmem>>, vector<64x512xbf16>
    %cst_51 = arith.constant dense<0.000000e+00> : vector<128x512xf32>
    %87 = tpu.matmul %0, %86, %cst_51 {dimension_numbers = #tpu.dot_dimension_numbers<[1], [0], [0], [1], [0, 0, 1, 1], [], []>} : vector<128x64xbf16>, vector<64x512xbf16>, vector<128x512xf32> -> vector<128x512xf32>
    %c0_52 = arith.constant 0 : index
    %c0_53 = arith.constant 0 : index
    %88 = vector.load %arg12[%c0_52, %c0_53] : memref<16x512xbf16, #tpu.memory_space<vmem>>, vector<16x512xbf16>
    %cst_54 = arith.constant dense<0.000000e+00> : vector<128x512xf32>
    %89 = tpu.matmul %1, %88, %cst_54 {dimension_numbers = #tpu.dot_dimension_numbers<[1], [0], [0], [1], [0, 0, 1, 1], [], []>} : vector<128x16xbf16>, vector<16x512xbf16>, vector<128x512xf32> -> vector<128x512xf32>
    %90 = arith.addf %87, %89 : vector<128x512xf32>
    %c0_55 = arith.constant 0 : index
    %c1308 = arith.constant 1308 : index
    %91 = vector.load %arg16[%c0_55, %c1308] : memref<1x2205xf32, #tpu.memory_space<vmem>>, vector<1x512xf32>
    %92 = vector.broadcast %91 : vector<1x512xf32> to vector<128x512xf32>
    %93 = arith.addf %90, %92 : vector<128x512xf32>
    %cst_56 = arith.constant 0.000000e+00 : f32
    %94 = vector.broadcast %cst_56 : f32 to vector<128x512xf32>
    %95 = arith.cmpf ogt, %93, %94 : vector<128x512xf32>
    %cst_57 = arith.constant 0.000000e+00 : f32
    %96 = vector.broadcast %cst_57 : f32 to vector<128x512xf32>
    %97 = arith.minimumf %93, %96 : vector<128x512xf32>
    %98 = math.exp %97 : vector<128x512xf32>
    %cst_58 = arith.constant 1.000000e+00 : f32
    %99 = vector.broadcast %cst_58 : f32 to vector<128x512xf32>
    %100 = arith.subf %98, %99 : vector<128x512xf32>
    %101 = arith.select %95, %93, %100 : vector<128x512xi1>, vector<128x512xf32>
    %102 = arith.truncf %101 : vector<128x512xf32> to vector<128x512xbf16>
    %c0_59 = arith.constant 0 : index
    %c0_60 = arith.constant 0 : index
    %103 = vector.load %arg13[%c0_59, %c0_60] : memref<512x256xbf16, #tpu.memory_space<vmem>>, vector<512x256xbf16>
    %cst_61 = arith.constant dense<0.000000e+00> : vector<128x256xf32>
    %104 = tpu.matmul %102, %103, %cst_61 {dimension_numbers = #tpu.dot_dimension_numbers<[1], [0], [0], [1], [0, 0, 1, 1], [], []>} : vector<128x512xbf16>, vector<512x256xbf16>, vector<128x256xf32> -> vector<128x256xf32>
    %c0_62 = arith.constant 0 : index
    %c1820 = arith.constant 1820 : index
    %105 = vector.load %arg16[%c0_62, %c1820] : memref<1x2205xf32, #tpu.memory_space<vmem>>, vector<1x256xf32>
    %106 = vector.broadcast %105 : vector<1x256xf32> to vector<128x256xf32>
    %107 = arith.addf %104, %106 : vector<128x256xf32>
    %cst_63 = arith.constant 0.000000e+00 : f32
    %108 = vector.broadcast %cst_63 : f32 to vector<128x256xf32>
    %109 = arith.cmpf ogt, %107, %108 : vector<128x256xf32>
    %cst_64 = arith.constant 0.000000e+00 : f32
    %110 = vector.broadcast %cst_64 : f32 to vector<128x256xf32>
    %111 = arith.minimumf %107, %110 : vector<128x256xf32>
    %112 = math.exp %111 : vector<128x256xf32>
    %cst_65 = arith.constant 1.000000e+00 : f32
    %113 = vector.broadcast %cst_65 : f32 to vector<128x256xf32>
    %114 = arith.subf %112, %113 : vector<128x256xf32>
    %115 = arith.select %109, %107, %114 : vector<128x256xi1>, vector<128x256xf32>
    %116 = arith.truncf %115 : vector<128x256xf32> to vector<128x256xbf16>
    %c0_66 = arith.constant 0 : index
    %c0_67 = arith.constant 0 : index
    %117 = vector.load %arg14[%c0_66, %c0_67] : memref<256x128xbf16, #tpu.memory_space<vmem>>, vector<256x128xbf16>
    %cst_68 = arith.constant dense<0.000000e+00> : vector<128x128xf32>
    %118 = tpu.matmul %116, %117, %cst_68 {dimension_numbers = #tpu.dot_dimension_numbers<[1], [0], [0], [1], [0, 0, 1, 1], [], []>} : vector<128x256xbf16>, vector<256x128xbf16>, vector<128x128xf32> -> vector<128x128xf32>
    %c0_69 = arith.constant 0 : index
    %c2076 = arith.constant 2076 : index
    %119 = vector.load %arg16[%c0_69, %c2076] : memref<1x2205xf32, #tpu.memory_space<vmem>>, vector<1x128xf32>
    %120 = vector.broadcast %119 : vector<1x128xf32> to vector<128x128xf32>
    %121 = arith.addf %118, %120 : vector<128x128xf32>
    %cst_70 = arith.constant 0.000000e+00 : f32
    %122 = vector.broadcast %cst_70 : f32 to vector<128x128xf32>
    %123 = arith.cmpf ogt, %121, %122 : vector<128x128xf32>
    %cst_71 = arith.constant 0.000000e+00 : f32
    %124 = vector.broadcast %cst_71 : f32 to vector<128x128xf32>
    %125 = arith.minimumf %121, %124 : vector<128x128xf32>
    %126 = math.exp %125 : vector<128x128xf32>
    %cst_72 = arith.constant 1.000000e+00 : f32
    %127 = vector.broadcast %cst_72 : f32 to vector<128x128xf32>
    %128 = arith.subf %126, %127 : vector<128x128xf32>
    %129 = arith.select %123, %121, %128 : vector<128x128xi1>, vector<128x128xf32>
    %130 = arith.truncf %129 : vector<128x128xf32> to vector<128x128xbf16>
    %c0_73 = arith.constant 0 : index
    %c0_74 = arith.constant 0 : index
    %131 = vector.load %arg15[%c0_73, %c0_74] : memref<128x1xbf16, #tpu.memory_space<vmem>>, vector<128x1xbf16>
    %cst_75 = arith.constant dense<0.000000e+00> : vector<128x1xf32>
    %132 = tpu.matmul %130, %131, %cst_75 {dimension_numbers = #tpu.dot_dimension_numbers<[1], [0], [0], [1], [0, 0, 1, 1], [], []>} : vector<128x128xbf16>, vector<128x1xbf16>, vector<128x1xf32> -> vector<128x1xf32>
    %c0_76 = arith.constant 0 : index
    %c2204 = arith.constant 2204 : index
    %133 = vector.load %arg16[%c0_76, %c2204] : memref<1x2205xf32, #tpu.memory_space<vmem>>, vector<1x1xf32>
    %134 = vector.broadcast %133 : vector<1x1xf32> to vector<128x1xf32>
    %135 = arith.addf %132, %134 : vector<128x1xf32>
    %cst_77 = arith.constant 0.000000e+00 : f32
    %136 = vector.broadcast %cst_77 : f32 to vector<128x128xf32>
    %c0_78 = arith.constant 0 : index
    %c0_79 = arith.constant 0 : index
    %137 = vector.load %arg17[%c0_78, %c0_79] : memref<128x128xf32, #tpu.memory_space<vmem>>, vector<128x128xf32>
    tpu.vector_store %arg17[%c0_78, %c0_79], %136 {strides = array<i32>} : memref<128x128xf32, #tpu.memory_space<vmem>>, vector<128x128xf32>,
    %c0_80 = arith.constant 0 : index
    %c0_81 = arith.constant 0 : index
    %138 = vector.load %arg17[%c0_80, %c0_81] : memref<128x128xf32, #tpu.memory_space<vmem>>, vector<128x16xf32>
    tpu.vector_store %arg17[%c0_80, %c0_81], %34 {strides = array<i32>} : memref<128x128xf32, #tpu.memory_space<vmem>>, vector<128x16xf32>,
    %c0_82 = arith.constant 0 : index
    %c16 = arith.constant 16 : index
    %139 = vector.load %arg17[%c0_82, %c16] : memref<128x128xf32, #tpu.memory_space<vmem>>, vector<128x12xf32>
    tpu.vector_store %arg17[%c0_82, %c16], %85 {strides = array<i32>} : memref<128x128xf32, #tpu.memory_space<vmem>>, vector<128x12xf32>,
    %c0_83 = arith.constant 0 : index
    %c28 = arith.constant 28 : index
    %140 = vector.load %arg17[%c0_83, %c28] : memref<128x128xf32, #tpu.memory_space<vmem>>, vector<128x1xf32>
    tpu.vector_store %arg17[%c0_83, %c28], %135 {strides = array<i32>} : memref<128x128xf32, #tpu.memory_space<vmem>>, vector<128x1xf32>,
    return
  }
  func.func @transform_0(%arg0: i32) -> (i32, i32) {
    %c0_i32 = arith.constant 0 : i32
    %c0_i32_0 = arith.constant 0 : i32
    return %arg0, %c0_i32 : i32, i32
  }
  func.func @transform_1(%arg0: i32) -> (i32, i32) {
    %c0_i32 = arith.constant 0 : i32
    %c0_i32_0 = arith.constant 0 : i32
    return %arg0, %c0_i32 : i32, i32
  }
  func.func @transform_2(%arg0: i32) -> (i32, i32) {
    %c0_i32 = arith.constant 0 : i32
    %c0_i32_0 = arith.constant 0 : i32
    %c0_i32_1 = arith.constant 0 : i32
    return %c0_i32, %c0_i32_0 : i32, i32
  }
  func.func @transform_3(%arg0: i32) -> (i32, i32) {
    %c0_i32 = arith.constant 0 : i32
    %c0_i32_0 = arith.constant 0 : i32
    %c0_i32_1 = arith.constant 0 : i32
    return %c0_i32, %c0_i32_0 : i32, i32
  }
  func.func @transform_4(%arg0: i32) -> (i32, i32) {
    %c0_i32 = arith.constant 0 : i32
    %c0_i32_0 = arith.constant 0 : i32
    %c0_i32_1 = arith.constant 0 : i32
    return %c0_i32, %c0_i32_0 : i32, i32
  }
  func.func @transform_5(%arg0: i32) -> (i32, i32) {
    %c0_i32 = arith.constant 0 : i32
    %c0_i32_0 = arith.constant 0 : i32
    %c0_i32_1 = arith.constant 0 : i32
    return %c0_i32, %c0_i32_0 : i32, i32
  }
  func.func @transform_6(%arg0: i32) -> (i32, i32) {
    %c0_i32 = arith.constant 0 : i32
    %c0_i32_0 = arith.constant 0 : i32
    %c0_i32_1 = arith.constant 0 : i32
    return %c0_i32, %c0_i32_0 : i32, i32
  }
  func.func @transform_7(%arg0: i32) -> (i32, i32) {
    %c0_i32 = arith.constant 0 : i32
    %c0_i32_0 = arith.constant 0 : i32
    %c0_i32_1 = arith.constant 0 : i32
    return %c0_i32, %c0_i32_0 : i32, i32
  }
  func.func @transform_8(%arg0: i32) -> (i32, i32) {
    %c0_i32 = arith.constant 0 : i32
    %c0_i32_0 = arith.constant 0 : i32
    %c0_i32_1 = arith.constant 0 : i32
    return %c0_i32, %c0_i32_0 : i32, i32
  }
  func.func @transform_9(%arg0: i32) -> (i32, i32) {
    %c0_i32 = arith.constant 0 : i32
    %c0_i32_0 = arith.constant 0 : i32
    %c0_i32_1 = arith.constant 0 : i32
    return %c0_i32, %c0_i32_0 : i32, i32
  }
  func.func @transform_10(%arg0: i32) -> (i32, i32) {
    %c0_i32 = arith.constant 0 : i32
    %c0_i32_0 = arith.constant 0 : i32
    %c0_i32_1 = arith.constant 0 : i32
    return %c0_i32, %c0_i32_0 : i32, i32
  }
  func.func @transform_11(%arg0: i32) -> (i32, i32) {
    %c0_i32 = arith.constant 0 : i32
    %c0_i32_0 = arith.constant 0 : i32
    %c0_i32_1 = arith.constant 0 : i32
    return %c0_i32, %c0_i32_0 : i32, i32
  }
  func.func @transform_12(%arg0: i32) -> (i32, i32) {
    %c0_i32 = arith.constant 0 : i32
    %c0_i32_0 = arith.constant 0 : i32
    %c0_i32_1 = arith.constant 0 : i32
    return %c0_i32, %c0_i32_0 : i32, i32
  }
  func.func @transform_13(%arg0: i32) -> (i32, i32) {
    %c0_i32 = arith.constant 0 : i32
    %c0_i32_0 = arith.constant 0 : i32
    %c0_i32_1 = arith.constant 0 : i32
    return %c0_i32, %c0_i32_0 : i32, i32
  }
  func.func @transform_14(%arg0: i32) -> (i32, i32) {
    %c0_i32 = arith.constant 0 : i32
    %c0_i32_0 = arith.constant 0 : i32
    %c0_i32_1 = arith.constant 0 : i32
    return %c0_i32, %c0_i32_0 : i32, i32
  }
  func.func @transform_15(%arg0: i32) -> (i32, i32) {
    %c0_i32 = arith.constant 0 : i32
    %c0_i32_0 = arith.constant 0 : i32
    %c0_i32_1 = arith.constant 0 : i32
    return %c0_i32, %c0_i32_0 : i32, i32
  }
  func.func @transform_16(%arg0: i32) -> (i32, i32) {
    %c0_i32 = arith.constant 0 : i32
    %c0_i32_0 = arith.constant 0 : i32
    return %arg0, %c0_i32 : i32, i32
  }
}

</mosaic_0001>

<bundles_post_ra>
// kernel: tpu_custom_call.1
= control target key start
LH: loop header
LB: loop body
LE: loop exit
PB: predicated region body
PF: predicated region fallthrough
CT: control target
= control target key end

     0   :  { %s12812_s0 = inlined_call_operand.vmem [shape: bf16[256,64], index: 0, kind: input, shape index: {}]   ;;  %s12813_s1 = inlined_call_operand.vmem [shape: bf16[256,16], index: 1, kind: input, shape index: {}]   ;;  %s12814_s2 = inlined_call_operand.hbm [shape: bf16[64,256], index: 2, kind: input, shape index: {}]   ;;  %s12815_s3 = inlined_call_operand.hbm [shape: bf16[256,128], index: 3, kind: input, shape index: {}]   ;;  %s12816_s4 = inlined_call_operand.vmem [shape: bf16[128,16], index: 4, kind: input, shape index: {}]   ;;  %s12817_s5 = inlined_call_operand.hbm [shape: bf16[64,512], index: 5, kind: input, shape index: {}]   ;;  %s12818_s6 = inlined_call_operand.vmem [shape: bf16[16,512], index: 6, kind: input, shape index: {}]   ;;  %s12819_s7 = inlined_call_operand.vmem [shape: bf16[512,256], index: 7, kind: input, shape index: {}]   ;;  %s12820_s8 = inlined_call_operand.hbm [shape: bf16[256,128], index: 8, kind: input, shape index: {}]   ;;  %s12821_s9 = inlined_call_operand.vmem [shape: bf16[128,12], index: 9, kind: input, shape index: {}]   ;;  %s12822_s10 = inlined_call_operand.hbm [shape: bf16[64,512], index: 10, kind: input, shape index: {}]   ;;  %s12823_s11 = inlined_call_operand.hbm [shape: bf16[16,512], index: 11, kind: input, shape index: {}]   ;;  %s12824_s12 = inlined_call_operand.hbm [shape: bf16[512,256], index: 12, kind: input, shape index: {}]   ;;  %s12825_s13 = inlined_call_operand.hbm [shape: bf16[256,128], index: 13, kind: input, shape index: {}]   ;;  %s12826_s14 = inlined_call_operand.vmem [shape: bf16[128,1], index: 14, kind: input, shape index: {}]   ;;  %s12827_s15 = inlined_call_operand.vmem [shape: f32[1,2205], index: 15, kind: input, shape index: {}]   ;;  %s12828_s16 = inlined_call_operand.hbm [shape: f32[256,128], index: 16, kind: output, shape index: {}]  }
   0x1   :  { %12889 = sst [smem:[#allocation74_spill]] %s12812_s0 }
   0x2   :  { %12890 = sst [smem:[#allocation75_spill]] %s12815_s3 }
   0x3   :  { %12891 = sst [smem:[#allocation76_spill]] %s12828_s16 }
   0x4   :  { %21 = vsyncpa [#allocation3], 0 }
   0x5   :  { %22 = vsyncpa [#allocation6], 0 }
   0x6   :  { %23 = vsyncpa [#allocation9], 0 }
   0x7   :  { %24 = vsyncpa [#allocation12], 0 }
   0x8   :  { %25 = vsyncpa [#allocation15], 0 }
   0x9   :  { %26 = vsyncpa [#allocation4], 0 }
   0xa   :  { %28 = vsyncpa [#allocation4 + $0x1], 0  ;;  %s9447_s21 = smov 0   ;;  %s9449_s22 = smov 0  }
   0xb   :  { %s9451_s23 = smov 0   ;;  %s9453_s24 = smov 0  }
   0xc LB: > { %12892 = sst [smem:[#allocation23_spill]] %s9325_s21  ;;  %s9468_s25 = sadd.s32 4294967295, %s9337_s24   ;;  %s9337_s24 = sphi %s9453_s24, %s13040_s24   ;;  %s9333_s23 = sphi %s9451_s23, %s13042_s23   ;;  %s9329_s22 = sphi %s9449_s22, %s13044_s22   ;;  %s9325_s21 = sphi %s9447_s21, %s13043_s21  }
   0xd   : > { %12893 = sst [smem:[#allocation24_spill]] %s9333_s23  ;;  %s7003_s26 = sadd.s32 4294967294, %s9337_s24  }
   0xe   : > { %12894 = sst [smem:[#allocation25_spill]] %s9337_s24  ;;  %s9472_s27 = sadd.s32 1, %s9337_s24  }
   0xf   : > { %12895 = sst [smem:[#allocation26_spill]] %s9472_s27  ;;  %s387_s28 = sadd.s32 1, %s9333_s23 }
  0x10   : > { %s384_s29 = ssub.s32 %s9337_s24, %s9472_s27  ;;  %p397_p0 = scmp.ne.s32.totalorder %s9333_s23, %s9329_s22 }
  0x11   : > { %p385_p1 = scmp.eq.s32.totalorder %s384_s29, 0  ;;  %p398_p2 = scmp.eq.s32.totalorder %s9468_s25, 1 }
  0x12   : > { %p403_p3 = scmp.ne.s32.totalorder %s9329_s22, %s9325_s21  ;;  %p404_p4 = scmp.eq.s32.totalorder %s7003_s26, 1 }
  0x13   : > { %s9483_s30 = scalar_select %p385_p1, %s9333_s23, %s387_s28  }
  0x14   : > { %p9485_p5 = por %p398_p2, %p397_p0  ;;  %p9489_p6 = por %p404_p4, %p403_p3 }
  0x15   : > { %12896 = sst [smem:[#allocation27_spill]] %s9483_s30  ;;  %p7004_p7 = scmp.ge.s32.totalorder %s9337_s24, 1 }
  0x16   : > { %s12898_s17 = scalar_select %p9489_p6, 1, 0 }
  0x17   : > { %p411_p8 = scmp.lt.s32.totalorder %s9337_s24, 3  ;;  %p12840_p9 = scmp.eq.s32.totalorder %s9468_s25, 0 }
  0x18   : > { %12899 = sst [smem:[#allocation28_spill]] %s12898_s17  ;;  %s9339_s19 = smov [#allocation5]  }
  0x19   : > { %p9496_p10 = pnand %p7004_p7, %p411_p8  ;;  %s436_s20 = sshll.u32 %s9339_s19, 4  ;;  %s437_s20 = int_to_ptr.vmem [resolvable:$true] %s436_s20 }
  0x1a   : > { %s9340_s28 = smov [#allocation8]   ;;  %s9060_s23 = scalar_lea.vmem %s437_s20, 2048 }
  0x1b   : > { %p8032_p11 = pneg %p9496_p10  ;;  %s471_s29 = sshll.u32 %s9340_s28, 4  ;;  %s472_s29 = int_to_ptr.vmem [resolvable:$true] %s471_s29 }
  0x1c   : > { %p9061_p0 = scmp.ne.s32.totalorder %s437_s20, %s9060_s23  ;;  %p9068_p3 = scmp.lt.s32.totalorder %s437_s20, %s437_s20 }
  0x1d   : > { %p9504_p12 = pnand %p12840_p9, %p8032_p11  ;;  %p9069_p4 = scmp.lt.s32.totalorder %s9060_s23, %s9060_s23 }
  0x1f   : > { %p9510_p13 = pneg %p9504_p12  ;;  %p9070_p7 = por %p9069_p4, %p9068_p3 }
  0x21   : > { %p9063_p1 = pnand %p9061_p0, %p9510_p13 }
  0x23   : > { %p9064_p2 = pneg %p9063_p1 }
  0x25   : > { %p9071_p8 = pnand %p9070_p7, %p9064_p2 }
  0x27   : > { %9074 = shalt.err (!%p9071_p8)
}
  0x28   : > { %s12836_s19 = smov 64   ;;  %s12837_s28 = smov 4  }
  0x29   : > { %s12903_s3 = sld [smem:[#allocation75_spill]]  ;;  %s9086_s21 = scalar_lea.vmem %s472_s29, 2048 }
  0x2a   : > { %p9087_p11 = scmp.ne.s32.totalorder %s472_s29, %s9086_s21  ;;  %p9094_p3 = scmp.lt.s32.totalorder %s472_s29, %s472_s29 }
  0x2b   : > { %p9095_p2 = scmp.lt.s32.totalorder %s9086_s21, %s9086_s21 }
  0x2c   : > { %p9089_p0 = pnand %p9087_p11, %p9510_p13 }
  0x2d   : > { %p9096_p4 = por %p9095_p2, %p9094_p3 }
  0x2e   : > { %p9090_p1 = pneg %p9089_p0 }
  0x2f   : > { %8038 = dma.hbm_to_vmem [thread:$0]  (!%p9504_p12), %s12903_s3, 2048, %s437_s20, [#allocation6], %s12836_s19, %s12836_s19, %s12837_s28  }
  0x30   : > { %p9097_p7 = pnand %p9096_p4, %p9090_p1 }
  0x32   : > { %9100 = shalt.err (!%p9097_p7)
}
  0x33   : > { %8044 = dma.hbm_to_vmem [thread:$0]  (!%p9504_p12), %s12820_s8, 2048, %s472_s29, [#allocation9], %s12836_s19, %s12836_s19, %s12837_s28  }
  0x34   : > { %s9343_s27 = smov [#allocation11]   ;;  %s9344_s20 = smov [#allocation2]  }
  0x35   : > { %s500_s17 = sshll.u32 %s9343_s27, 4  ;;  %s423_s3 = sshll.u32 %s9344_s20, 4  ;;  %s501_s17 = int_to_ptr.vmem [resolvable:$true] %s500_s17  ;;  %s424_s3 = int_to_ptr.vmem [resolvable:$true] %s423_s3 }
  0x36   : > { %s9112_s21 = scalar_lea.vmem %s501_s17, 512  ;;  %p9120_p1 = scmp.lt.s32.totalorder %s501_s17, %s501_s17 }
  0x37   : > { %p9113_p8 = scmp.ne.s32.totalorder %s501_s17, %s9112_s21  ;;  %p9121_p3 = scmp.lt.s32.totalorder %s9112_s21, %s9112_s21 }
  0x39   : > { %p9115_p11 = pnand %p9113_p8, %p9510_p13  ;;  %p9122_p2 = por %p9121_p3, %p9120_p1 }
  0x3b   : > { %p9116_p0 = pneg %p9115_p11 }
  0x3d   : > { %p9123_p4 = pnand %p9122_p2, %p9116_p0 }
  0x3f   : > { %9126 = shalt.err (!%p9123_p4)
}
  0x40   : > { %s12838_s16 = smov 256   ;;  %s9346_s24 = smov 16  }
  0x41   : > { %8050 = dma.hbm_to_vmem [thread:$0]  (!%p9504_p12), %s12823_s11, 512, %s501_s17, [#allocation12], %s12838_s16, %s12838_s16, %s9346_s24  }
  0x42   : > { %s9138_s27 = scalar_lea.vmem %s424_s3, 1024  ;;  %p9146_p1 = scmp.lt.s32.totalorder %s424_s3, %s424_s3 }
  0x43   : > { %p9139_p7 = scmp.ne.s32.totalorder %s424_s3, %s9138_s27  ;;  %p9147_p0 = scmp.lt.s32.totalorder %s9138_s27, %s9138_s27 }
  0x45   : > { %p9141_p8 = pnand %p9139_p7, %p9510_p13  ;;  %p9148_p3 = por %p9147_p0, %p9146_p1 }
  0x47   : > { %p9142_p11 = pneg %p9141_p8 }
  0x49   : > { %p9149_p2 = pnand %p9148_p3, %p9142_p11 }
  0x4b   : > { %9152 = shalt.err (!%p9149_p2)
}
  0x4c   : > { %s12841_s20 = smov 128   ;;  %s9348_s21 = smov 8  }
  0x4d   : > { %8035 = dma.hbm_to_vmem [thread:$0]  (!%p9504_p12), %s12814_s2, 1024, %s424_s3, [#allocation3], %s12841_s20, %s12841_s20, %s9348_s21  }
  0x4e   : > { %s9349_s23 = smov [#allocation7]   ;;  %s9350_s28 = smov [#allocation10]  }
  0x4f   : > { %s452_s19 = sshll.u32 %s9349_s23, 4  ;;  %s487_s16 = sshll.u32 %s9350_s28, 4  ;;  %s453_s19 = int_to_ptr.vmem [resolvable:$true] %s452_s19  ;;  %s488_s16 = int_to_ptr.vmem [resolvable:$true] %s487_s16 }
  0x50   : > { %s9164_s27 = scalar_lea.vmem %s453_s19, 2048  ;;  %p9172_p11 = scmp.lt.s32.totalorder %s453_s19, %s453_s19 }
  0x51   : > { %p9165_p4 = scmp.ne.s32.totalorder %s453_s19, %s9164_s27  ;;  %p9173_p1 = scmp.lt.s32.totalorder %s9164_s27, %s9164_s27 }
  0x53   : > { %p9167_p7 = pnand %p9165_p4, %p9510_p13  ;;  %p9174_p0 = por %p9173_p1, %p9172_p11 }
  0x55   : > { %p9168_p8 = pneg %p9167_p7 }
  0x57   : > { %p9175_p3 = pnand %p9174_p0, %p9168_p8 }
  0x59   : > { %9178 = shalt.err (!%p9175_p3)
}
  0x5a   : > { %s12904_s3 = smov 256   ;;  %s9190_s28 = scalar_lea.vmem %s488_s16, 2048 }
  0x5b   : > { %8041 = dma.hbm_to_vmem [thread:$0]  (!%p9504_p12), %s12817_s5, 2048, %s453_s19, [#allocation6], %s12904_s3, %s12904_s3, %s9346_s24  }
  0x5c   : > { %p9191_p2 = scmp.ne.s32.totalorder %s488_s16, %s9190_s28  ;;  %p9198_p9 = scmp.lt.s32.totalorder %s488_s16, %s488_s16 }
  0x5d   : > { %p9199_p6 = scmp.lt.s32.totalorder %s9190_s28, %s9190_s28 }
  0x5e   : > { %p9193_p4 = pnand %p9191_p2, %p9510_p13 }
  0x5f   : > { %p9200_p11 = por %p9199_p6, %p9198_p9 }
  0x60   : > { %p9194_p7 = pneg %p9193_p4 }
  0x62   : > { %p9201_p8 = pnand %p9200_p11, %p9194_p7 }
  0x64   : > { %9204 = shalt.err (!%p9201_p8)
}
  0x65   : > { %8047 = dma.hbm_to_vmem [thread:$0]  (!%p9504_p12), %s12822_s10, 2048, %s488_s16, [#allocation9], %s12904_s3, %s12904_s3, %s9346_s24  }
  0x66   : > { %s9351_s19 = smov [#allocation13]   ;;  %s9352_s17 = smov [#allocation14]  }
  0x67   : > { %s513_s29 = sshll.u32 %s9351_s19, 4  ;;  %s526_s20 = sshll.u32 %s9352_s17, 4  ;;  %s514_s29 = int_to_ptr.vmem [resolvable:$true] %s513_s29  ;;  %s527_s20 = int_to_ptr.vmem [resolvable:$true] %s526_s20 }
  0x68   : > { %s9216_s28 = scalar_lea.vmem %s514_s29, 8192  ;;  %p9224_p0 = scmp.lt.s32.totalorder %s514_s29, %s514_s29 }
  0x69   : > { %p9217_p6 = scmp.ne.s32.totalorder %s514_s29, %s9216_s28  ;;  %p9225_p3 = scmp.lt.s32.totalorder %s9216_s28, %s9216_s28 }
  0x6b   : > { %p9219_p9 = pnand %p9217_p6, %p9510_p13  ;;  %p9226_p2 = por %p9225_p3, %p9224_p0 }
  0x6d   : > { %p9220_p1 = pneg %p9219_p9 }
  0x6f   : > { %p9227_p4 = pnand %p9226_p2, %p9220_p1 }
  0x71   : > { %9230 = shalt.err (!%p9227_p4)
}
  0x72   : > { %s12905_s16 = smov 128   ;;  %s9242_s23 = scalar_lea.vmem %s527_s20, 2048 }
  0x73   : > { %8053 = dma.hbm_to_vmem [thread:$0]  (!%p9504_p12), %s12824_s12, 8192, %s514_s29, [#allocation12], %s12905_s16, %s12905_s16, %s9348_s21  }
  0x74   : > { %p9243_p7 = scmp.ne.s32.totalorder %s527_s20, %s9242_s23  ;;  %p9250_p6 = scmp.lt.s32.totalorder %s527_s20, %s527_s20 }
  0x75   : > { %p9251_p9 = scmp.lt.s32.totalorder %s9242_s23, %s9242_s23 }
  0x76   : > { %p9245_p11 = pnand %p9243_p7, %p9510_p13 }
  0x77   : > { %p9252_p0 = por %p9251_p9, %p9250_p6 }
  0x78   : > { %p9246_p8 = pneg %p9245_p11 }
  0x7a   : > { %p9253_p1 = pnand %p9252_p0, %p9246_p8 }
  0x7c   : > { %9256 = shalt.err (!%p9253_p1)
}
  0x7d   : > { %s12906_s27 = smov 4   ;;  %s12907_s19 = smov 64  }
  0x7e   : > { %8056 = dma.hbm_to_vmem [thread:$0]  (!%p9504_p12), %s12825_s13, 2048, %s527_s20, [#allocation15], %s12907_s19, %s12907_s19, %s12906_s27  }
  0x7f   : > { %566 = sbr.rel (%p9496_p10) target bundleno = 2835 (0xb13), region = 84 }
  0x84   : > { %p12908_p13 = scmp.eq.s32.totalorder %s9468_s25, 0 }
  0x86   : > { %9300 = dma.done.wait (%p12908_p13), [#allocation3], 1024   ;;  %p12909_p3 = pmov %p12908_p13 }
  0x88   : > { %9302 = vsyncadd (%p12909_p3), [#allocation3], 4294966272  ;;  %p12910_p2 = pmov %p12909_p3 }
  0x8a   : > { %9304 = dma.done.wait (%p12910_p2), [#allocation6], 4096   ;;  %p12911_p4 = pmov %p12910_p2 }
  0x8b   : > { %p12912_p7 = pmov %p12910_p2 }
  0x8c   : > { %9306 = vsyncadd (%p12911_p4), [#allocation6], 4294963200 }
  0x8d   : > { %9308 = dma.done.wait (%p12912_p7), [#allocation9], 4096   ;;  %p12913_p12 = pmov %p12910_p2 }
  0x8e   : > { %p12914_p10 = pmov %p12910_p2 }
  0x8f   : > { %9310 = vsyncadd (%p12913_p12), [#allocation9], 4294963200 }
  0x90   : > { %9312 = dma.done.wait (%p12914_p10), [#allocation12], 8704   ;;  %p12915_p11 = pmov %p12910_p2 }
  0x91   : > { %p12916_p8 = pmov %p12910_p2 }
  0x92   : > { %9314 = vsyncadd (%p12915_p11), [#allocation12], 4294958592 }
  0x93   : > { %9316 = dma.done.wait (%p12916_p8), [#allocation15], 2048   ;;  %p12917_p6 = pmov %p12910_p2 }
  0x94   : > { %s7024_s30 = sshll.u32 %s9468_s25, 4  ;;  %v12845_v0 = vmov 0   ;;  %v8132_v1 = vld [vmem:[#allocation2 + $0x34] ss:$8 sps:$4 sm:$0xff]   ;;  %v8134_v2 = vld [vmem:[#allocation2 + $0x30] ss:$8 sps:$4 sm:$0xff]   ;;  %v705_v36 = vlaneseq }
  0x95   : > { %9318 = vsyncadd (%p12917_p6), [#allocation15], 4294965248  ;;  %852 = vmatprep.mubr.bf16.mxu0 %v12845_v0  ;;  %p650_p9 = scmp.lt.s32.totalorder %s7024_s30, 31  ;;  %828 = vmatprep.subr.bf16.mxu0 %v8132_v1  ;;  %v8135_v3 = vld [vmem:[#allocation2 + $0x24] ss:$8 sps:$4 sm:$0xff]   ;;  %s12918_s21 = sld [smem:[#allocation74_spill]] }
  0x96   : > { %829 = vmatpush1.bf16.msra.mxu0 %v8134_v2  ;;  %v8137_v4 = vld [vmem:[#allocation2 + $0x20] ss:$8 sps:$4 sm:$0xff]   ;;  %v8138_v5 = vld [vmem:[#allocation2 + $0x14] ss:$8 sps:$4 sm:$0xff]   ;;  %v8140_v6 = vld [vmem:[#allocation2 + $0x10] ss:$8 sps:$4 sm:$0xff]  }
  0x97   : > { %s13046_s30 = smov (!%p650_p9, %s7024_s30), 31  ;;  %830 = vmatprep.subr.bf16.mxu0 %v8135_v3  ;;  %v8141_v7 = vld [vmem:[#allocation2 + $0x4] ss:$8 sps:$4 sm:$0xff]   ;;  %v8143_v8 = vld [vmem:[#allocation2] ss:$8 sps:$4 sm:$0xff]   ;;  %vm795_vm0 = vcmask 523264  }
  0x98   : > { %s7025_s18 = sshll.u32 %s13046_s30, 2  ;;  %v8152_v17 = vld [vmem:[#allocation5 + $0x78] sm:$0xff]   ;;  %v8154_v19 = vld [vmem:[#allocation5 + $0x70] sm:$0xff]   ;;  %v8156_v21 = vld [vmem:[#allocation5 + $0x68] sm:$0xff]   ;;  %v9680_v37 = vshrl.u32 %v705_v36, 7  ;;  %s12842_s28 = sand.u32 1, %s9329_s22  }
  0x99   : > { %s9654_s3 = scalar_lea.vmem %s12813_s1, %s7025_s18  ;;  %v8153_v18 = vld [vmem:[#allocation5 + $0x38] sm:$0xff]   ;;  %7646 = vmatprep.subr.bf16.mxu1 %v8152_v17  ;;  %v8155_v20 = vld [vmem:[#allocation5 + $0x30] sm:$0xff]   ;;  %v8157_v22 = vld [vmem:[#allocation5 + $0x28] sm:$0xff]   ;;  %s7023_s30 = sshll.u32 %s12842_s28, 7 }
  0x9a   : > { %831 = vmatpush1.bf16.msra.mxu0 %v8137_v4  ;;  %7647 = vmatpush3.bf16.msra.mxu1 %v8153_v18  ;;  %v8158_v23 = vld [vmem:[#allocation5 + $0x60] sm:$0xff]   ;;  %v8160_v25 = vld [vmem:[#allocation5 + $0x58] sm:$0xff]   ;;  %v8162_v27 = vld [vmem:[#allocation5 + $0x50] sm:$0xff]   ;;  %12919 = vst [vmem:[#allocation29_spill] sm:$0xff] %v9680_v37  ;;  %v9683_v38 = vsub.s32 0, %v9680_v37  ;;  %v9689_v40 = vsub.s32 1, %v9680_v37 }
  0x9b   : > { %s9626_s29 = scalar_lea.vmem %s12918_s21, %s7025_s18  ;;  %832 = vmatprep.subr.bf16.mxu0 %v8138_v5  ;;  %7648 = vmatprep.subr.bf16.mxu1 %v8154_v19  ;;  %v8159_v24 = vld [vmem:[#allocation5 + $0x20] sm:$0xff]   ;;  %v8161_v26 = vld [vmem:[#allocation5 + $0x18] sm:$0xff]   ;;  %v8163_v28 = vld [vmem:[#allocation5 + $0x10] sm:$0xff]   ;;  %s9984_s18 = scalar_lea.vmem [#allocation16], %s7023_s30 }
  0x9c   : > { %v8144_v9 = vld [vmem:[%s9626_s29] sm:$0xff]   ;;  %v8145_v10 = vld [vmem:[%s9626_s29 + $0x8] sm:$0xff]   ;;  %v8146_v11 = vld [vmem:[%s9626_s29 + $0x10] sm:$0xff]   ;;  %12920 = vst [vmem:[#allocation30_spill] sm:$0xff] %v9683_v38  ;;  %s9355_s24 = smov 112   ;;  %s9356_s16 = smov 100  }
  0x9d   : > { %v8147_v12 = vld [vmem:[%s9626_s29 + $0x18] sm:$0xff]   ;;  %v8148_v13 = vld [vmem:[%s9626_s29 + $0x20] sm:$0xff]   ;;  %v8149_v14 = vld [vmem:[%s9626_s29 + $0x28] sm:$0xff]   ;;  %12921 = vst [vmem:[#allocation31_spill] sm:$0xff] %v9689_v40  ;;  %s9357_s20 = smov 16   ;;  %s7645_s23 = sshll.u32 %s9468_s25, 11 }
  0x9e   : > { %833 = vmatpush1.bf16.msra.mxu0 %v8140_v6  ;;  %v8150_v15 = vld [vmem:[%s9626_s29 + $0x30] sm:$0xff]   ;;  %v8151_v16 = vld [vmem:[%s9626_s29 + $0x38] sm:$0xff]   ;;  %7649 = vmatpush3.bf16.msra.mxu1 %v8155_v20  ;;  %v8164_v29 = vld [vmem:[#allocation5 + $0x48] sm:$0xff]   ;;  %s6850_s27 = sshll.u32 %s9984_s18, 4  ;;  %s13034_s30 = sld [smem:[#allocation76_spill]]  ;;  %s12766_s27 = int_to_ptr.vmem [resolvable:$true] %s6850_s27 }
  0x9f   : > { %834 = vmatprep.subr.bf16.mxu0 %v8141_v7  ;;  %7650 = vmatprep.subr.bf16.mxu1 %v8156_v21  ;;  %v8165_v30 = vld [vmem:[#allocation5 + $0x8] sm:$0xff]   ;;  %v8166_v31 = vld [vmem:[#allocation5 + $0x40] sm:$0xff]   ;;  %v9661_v33 = vld [vmem:[%s12816_s4 + $0x38] sm:$0xff]   ;;  %s13035_s25 = sand.u32 1, %s9329_s22   ;;  %s9257_s28 = scalar_lea.vmem %s12766_s27, 2048 }
  0xa0   : > { %v8167_v32 = vld [vmem:[#allocation5] sm:$0xff]   ;;  %v9666_v34 = vld [vmem:[%s12816_s4 + $0x30] sm:$0xff]   ;;  %v9675_v35 = vld [vmem:[%s12816_s4 + $0x28] sm:$0xff]   ;;  %p9258_p0 = scmp.ne.s32.totalorder %s12766_s27, %s9257_s28 }
  0xa1   : > { %v703_v39 = vld [vmem:[%s12827_s15] sm:$0x3] }
  0xa2   : > { %835 = vmatpush1.bf16.msra.mxu0 %v8143_v8  ;;  %7651 = vmatpush3.bf16.msra.mxu1 %v8157_v22  ;;  %v9692_v41 = vrot.slane %v703_v39, %v9683_v38  ;;  %v9695_v42 = vrot.slane %v703_v39, %v9689_v40  ;;  %p9259_p1 = pnand %p9258_p0, %p9485_p5 }
  0xa3   : > { %7652 = vmatprep.subr.bf16.mxu1 %v8158_v23  ;;  %7886 = vmatprep.subr.bf16.mxu0 %v9661_v33 }
  0xa4   : > { %s12764_s26 = scalar_lea.hbm %s13034_s30, %s7645_s23  ;;  %p9260_p13 = pneg %p9259_p1 }
  0xa5   : > { %7044 = vmatmul.mubr.msk.bf16.vlgmr.msra.gmra.mxu0 %vm795_vm0, %v8144_v9 }
  0xa6   : > { %862 = vmatprep.mubr.bf16.mxu0 %v12845_v0  ;;  %7653 = vmatpush3.bf16.msra.mxu1 %v8159_v24 }
  0xa7   : > { %7654 = vmatprep.subr.bf16.mxu1 %v8160_v25  ;;  %7887 = vmatpush3.bf16.msra.mxu0 %v9661_v33 }
  0xa8   : > { %7888 = vmatprep.subr.bf16.mxu0 %v9666_v34 }
  0xaa   : > { %7655 = vmatpush3.bf16.msra.mxu1 %v8161_v26 }
  0xab   : > { %7656 = vmatprep.subr.bf16.mxu1 %v8162_v27  ;;  %7889 = vmatpush3.bf16.msra.mxu0 %v9666_v34 }
  0xac   : > { %7890 = vmatprep.subr.bf16.mxu0 %v9675_v35 }
  0xad   : > { %7045 = vmatmul.mubr.msk.bf16.gmra.mxu0 %vm795_vm0, %v8145_v10 }
  0xae   : > { %872 = vmatprep.mubr.bf16.mxu0 %v12845_v0  ;;  %7657 = vmatpush3.bf16.msra.mxu1 %v8163_v28 }
  0xaf   : > { %7658 = vmatprep.subr.bf16.mxu1 %v8164_v29  ;;  %7891 = vmatpush3.bf16.msra.mxu0 %v9675_v35 }
  0xb2   : > { %7659 = vmatpush3.bf16.msra.mxu1 %v8165_v30 }
  0xb3   : > { %7660 = vmatprep.subr.bf16.mxu1 %v8166_v31 }
  0xb5   : > { %7046 = vmatmul.mubr.msk.bf16.gmra.mxu0 %vm795_vm0, %v8146_v11 }
  0xb6   : > { %882 = vmatprep.mubr.bf16.mxu0 %v12845_v0  ;;  %7661 = vmatpush3.bf16.msra.mxu1 %v8167_v32 }
  0xb7   : > { %7982 = vmatprep.subr.bf16.mxu1 %v9661_v33 }
  0xbd   : > { %7047 = vmatmul.mubr.msk.bf16.gmra.mxu0 %vm795_vm0, %v8147_v12 }
  0xbe   : > { %892 = vmatprep.mubr.bf16.mxu0 %v12845_v0 }
  0xc5   : > { %7048 = vmatmul.mubr.msk.bf16.gmra.mxu0 %vm795_vm0, %v8148_v13 }
  0xc6   : > { %902 = vmatprep.mubr.bf16.mxu0 %v12845_v0 }
  0xcd   : > { %7049 = vmatmul.mubr.msk.bf16.gmra.mxu0 %vm795_vm0, %v8149_v14 }
  0xce   : > { %912 = vmatprep.mubr.bf16.mxu0 %v12845_v0 }
  0xd5   : > { %7050 = vmatmul.mubr.msk.bf16.gmra.mxu0 %vm795_vm0, %v8150_v15 }
  0xd6   : > { %922 = vmatprep.mubr.bf16.mxu0 %v12845_v0 }
  0xdd   : > { %7051 = vmatmul.mubr.msk.bf16.gmra.mxu0 %vm795_vm0, %v8151_v16 }
 0x165   : > { %v854_v43 = vpop.f32.mrf.mxu0 }
 0x166   : > { %v9698_v44 = vadd.f32 %v854_v43, %v9692_v41 }
 0x167   : > { %v856_v45 = vpop.f32.mrf.mxu0 }
 0x168   : > { %v9701_v46 = vadd.f32 %v856_v45, %v9695_v42  ;;  %v965_v47 = vmin.f32 %v9698_v44, 0.0  ;;  %vm933_vm4 = vcmp.gt.f32.partialorder %v9698_v44, 0.0 }
 0x169   : > { %v858_v48 = vpop.f32.mrf.mxu0 }
 0x16a   : > { %v966_v49 = vmin.f32 %v9701_v46, 0.0  ;;  %v9706_v50 = vadd.f32 %v858_v48, %v9692_v41  ;;  %v997_v54 = vmul.f32 1.442695, %v965_v47  ;;  %vm934_vm3 = vcmp.gt.f32.partialorder %v9701_v46, 0.0 }
 0x16b   : > { %v860_v51 = vpop.f32.mrf.mxu0 }
 0x16c   : > { %v999_v52 = vmul.f32 1.442695, %v966_v49  ;;  %v967_v53 = vmin.f32 %v9706_v50, 0.0  ;;  %v9710_v55 = vadd.f32 %v860_v51, %v9695_v42  ;;  %vm935_vm1 = vcmp.gt.f32.partialorder %v9706_v50, 0.0 }
 0x16d   : > { %v864_v56 = vpop.f32.mrf.mxu0 }
 0x16e   : > { %v1001_v57 = vmul.f32 1.442695, %v967_v53  ;;  %v9713_v58 = vadd.f32 %v864_v56, %v9692_v41  ;;  %8484 = vpow2.f32 %v999_v52  ;;  %v968_v59 = vmin.f32 %v9710_v55, 0.0 }
 0x16f   : > { %v866_v60 = vpop.f32.mrf.mxu0  ;;  %vm936_vm2 = vcmp.gt.f32.partialorder %v9710_v55, 0.0 }
 0x170   : > { %8486 = vpow2.f32 %v1001_v57  ;;  %v9717_v61 = vadd.f32 %v866_v60, %v9695_v42  ;;  %v1003_v62 = vmul.f32 1.442695, %v968_v59  ;;  %v969_v63 = vmin.f32 %v9713_v58, 0.0 }
 0x171   : > { %8488 = vpow2.f32 %v997_v54  ;;  %v868_v1 = vpop.f32.mrf.mxu0  ;;  %vm937_vm8 = vcmp.gt.f32.partialorder %v9713_v58, 0.0 }
 0x172   : > { %v970_v2 = vmin.f32 %v9717_v61, 0.0  ;;  %v9722_v3 = vadd.f32 %v868_v1, %v9692_v41  ;;  %8490 = vpow2.f32 %v1003_v62  ;;  %v1005_v7 = vmul.f32 1.442695, %v969_v63 }
 0x173   : > { %v870_v4 = vpop.f32.mrf.mxu0  ;;  %vm938_vm7 = vcmp.gt.f32.partialorder %v9717_v61, 0.0 }
 0x174   : > { %v1007_v5 = vmul.f32 1.442695, %v970_v2  ;;  %v971_v6 = vmin.f32 %v9722_v3, 0.0  ;;  %v9726_v8 = vadd.f32 %v870_v4, %v9695_v42  ;;  %vm939_vm5 = vcmp.gt.f32.partialorder %v9722_v3, 0.0 }
 0x175   : > { %v874_v9 = vpop.f32.mrf.mxu0 }
 0x176   : > { %v1009_v10 = vmul.f32 1.442695, %v971_v6  ;;  %v9729_v11 = vadd.f32 %v874_v9, %v9692_v41  ;;  %8492 = vpow2.f32 %v1007_v5  ;;  %v972_v12 = vmin.f32 %v9726_v8, 0.0 }
 0x177   : > { %v876_v13 = vpop.f32.mrf.mxu0  ;;  %vm940_vm6 = vcmp.gt.f32.partialorder %v9726_v8, 0.0 }
 0x178   : > { %8494 = vpow2.f32 %v1009_v10  ;;  %v9733_v14 = vadd.f32 %v876_v13, %v9695_v42  ;;  %v1011_v15 = vmul.f32 1.442695, %v972_v12  ;;  %v973_v16 = vmin.f32 %v9729_v11, 0.0 }
 0x179   : > { %8496 = vpow2.f32 %v1005_v7  ;;  %v878_v17 = vpop.f32.mrf.mxu0  ;;  %vm941_vm12 = vcmp.gt.f32.partialorder %v9729_v11, 0.0 }
 0x17a   : > { %v974_v18 = vmin.f32 %v9733_v14, 0.0  ;;  %v9738_v19 = vadd.f32 %v878_v17, %v9692_v41  ;;  %8498 = vpow2.f32 %v1011_v15  ;;  %v1013_v25 = vmul.f32 1.442695, %v973_v16 }
 0x17b   : > { %v880_v20 = vpop.f32.mrf.mxu0  ;;  %v8485_v21 = vpop.eup %8484  ;;  %vm942_vm11 = vcmp.gt.f32.partialorder %v9733_v14, 0.0 }
 0x17c   : > { %v1015_v22 = vmul.f32 1.442695, %v974_v18  ;;  %v975_v23 = vmin.f32 %v9738_v19, 0.0  ;;  %v9742_v26 = vadd.f32 %v880_v20, %v9695_v42  ;;  %v7053_v47 = vadd.f32 -1.0, %v8485_v21 }
 0x17d   : > { %v8487_v24 = vpop.eup %8486  ;;  %v884_v27 = vpop.f32.mrf.mxu0  ;;  %vm943_vm9 = vcmp.gt.f32.partialorder %v9738_v19, 0.0 }
 0x17e   : > { %v8489_v28 = vpop.eup %8488  ;;  %v1017_v29 = vmul.f32 1.442695, %v975_v23  ;;  %v9745_v30 = vadd.f32 %v884_v27, %v9692_v41  ;;  %8500 = vpow2.f32 %v1015_v22  ;;  %v976_v31 = vmin.f32 %v9742_v26, 0.0 }
 0x17f   : > { %v886_v32 = vpop.f32.mrf.mxu0  ;;  %v7054_v36 = vadd.f32 -1.0, %v8487_v24  ;;  %v8491_v39 = vpop.eup %8490  ;;  %v7052_v52 = vadd.f32 -1.0, %v8489_v28  ;;  %v1094_v2 = vsel %vm934_vm3, %v9701_v46, %v7053_v47  ;;  %vm944_vm10 = vcmp.gt.f32.partialorder %v9742_v26, 0.0 }
 0x180   : > { %8502 = vpow2.f32 %v1017_v29  ;;  %v977_v43 = vmin.f32 %v9745_v30, 0.0  ;;  %v9751_v45 = vadd.f32 %v886_v32, %v9695_v42  ;;  %v1019_v48 = vmul.f32 1.442695, %v976_v31 }
 0x181   : > { %8504 = vpow2.f32 %v1013_v25  ;;  %v888_v49 = vpop.f32.mrf.mxu0  ;;  %v7055_v51 = vadd.f32 -1.0, %v8491_v39  ;;  %v1095_v60 = vsel %vm935_vm1, %v9706_v50, %v7054_v36  ;;  %vm945_vm1 = vcmp.gt.f32.partialorder %v9745_v30, 0.0 }
 0x182   : > { %v1021_v53 = vmul.f32 1.442695, %v977_v43  ;;  %v978_v54 = vmin.f32 %v9751_v45, 0.0  ;;  %v9755_v56 = vadd.f32 %v888_v49, %v9692_v41  ;;  %8506 = vpow2.f32 %v1019_v48 }
 0x183   : > { %v890_v57 = vpop.f32.mrf.mxu0  ;;  %v1096_v59 = vsel %vm936_vm2, %v9710_v55, %v7055_v51  ;;  %v8493_v62 = vpop.eup %8492  ;;  %v1093_v55 = vsel %vm933_vm4, %v9698_v44, %v7052_v52  ;;  %vm946_vm15 = vcmp.gt.f32.partialorder %v9751_v45, 0.0 }
 0x184   : > { %v1023_v63 = vmul.f32 1.442695, %v978_v54  ;;  %v979_v1 = vmin.f32 %v9755_v56, 0.0  ;;  %v9767_v5 = vadd.f32 %v890_v57, %v9695_v42  ;;  %v1126_v7 = vpack.c.bf16 %v1096_v59, %v1094_v2 }
 0x185   : > { %v8495_v4 = vpop.eup %8494  ;;  %v894_v6 = vpop.f32.mrf.mxu0  ;;  %8508 = vpow2.f32 %v1021_v53  ;;  %v1125_v12 = vpack.c.bf16 %v1095_v60, %v1093_v55  ;;  %v7057_v18 = vadd.f32 -1.0, %v8493_v62  ;;  %vm947_vm13 = vcmp.gt.f32.partialorder %v9755_v56, 0.0 }
 0x186   : > { %v8497_v9 = vpop.eup %8496  ;;  %v1025_v10 = vmul.f32 1.442695, %v979_v1  ;;  %v9771_v50 = vadd.f32 %v894_v6, %v9692_v41  ;;  %8510 = vpow2.f32 %v1023_v63  ;;  %v980_v13 = vmin.f32 %v9767_v5, 0.0  ;;  %1308 = vmatprep.mubr.bf16.mxu1 %v1126_v7 }
 0x187   : > { %v896_v46 = vpop.f32.mrf.mxu0  ;;  %v7058_v15 = vadd.f32 -1.0, %v8495_v4  ;;  %v8499_v16 = vpop.eup %8498  ;;  %1309 = vmatmul.mubr.bf16.vlgmr.msra.gmra.mxu1 %v1125_v12  ;;  %v7056_v23 = vadd.f32 -1.0, %v8497_v9  ;;  %v1098_v39 = vsel %vm938_vm7, %v9717_v61, %v7057_v18  ;;  %vm948_vm14 = vcmp.gt.f32.partialorder %v9767_v5, 0.0 }
 0x188   : > { %8512 = vpow2.f32 %v1025_v10  ;;  %v981_v17 = vmin.f32 %v9771_v50, 0.0  ;;  %v9776_v44 = vadd.f32 %v896_v46, %v9695_v42  ;;  %v1027_v20 = vmul.f32 1.442695, %v980_v13  ;;  %7990 = vmatpush3.bf16.msra.mxu1 %v9661_v33 }
 0x189   : > { %v898_v21 = vpop.f32.mrf.mxu0  ;;  %v7059_v22 = vadd.f32 -1.0, %v8499_v16  ;;  %7983 = vmatprep.subr.bf16.mxu1 %v9666_v34  ;;  %v1099_v31 = vsel %vm939_vm5, %v9722_v3, %v7058_v15  ;;  %v1097_v51 = vsel %vm937_vm8, %v9713_v58, %v7056_v23  ;;  %vm949_vm5 = vcmp.gt.f32.partialorder %v9771_v50, 0.0 }
 0x18a   : > { %v1029_v24 = vmul.f32 1.442695, %v981_v17  ;;  %v982_v25 = vmin.f32 %v9776_v44, 0.0  ;;  %v9783_v27 = vadd.f32 %v898_v21, %v9692_v41  ;;  %8514 = vpow2.f32 %v1027_v20 }
 0x18b   : > { %v900_v28 = vpop.f32.mrf.mxu0  ;;  %v1100_v29 = vsel %vm940_vm6, %v9726_v8, %v7059_v22  ;;  %v8501_v32 = vpop.eup %8500  ;;  %v1127_v53 = vpack.c.bf16 %v1099_v31, %v1097_v51  ;;  %vm950_vm4 = vcmp.gt.f32.partialorder %v9776_v44, 0.0 }
 0x18c   : > { %v1031_v33 = vmul.f32 1.442695, %v982_v25  ;;  %v983_v36 = vmin.f32 %v9783_v27, 0.0  ;;  %v9793_v47 = vadd.f32 %v900_v28, %v9695_v42  ;;  %v1128_v49 = vpack.c.bf16 %v1100_v29, %v1098_v39  ;;  %7991 = vmatpush3.bf16.msra.mxu1 %v9666_v34 }
 0x18d   : > { %v8503_v43 = vpop.eup %8502  ;;  %v904_v48 = vpop.f32.mrf.mxu0  ;;  %8516 = vpow2.f32 %v1029_v24  ;;  %7984 = vmatprep.subr.bf16.mxu1 %v9675_v35  ;;  %v7061_v58 = vadd.f32 -1.0, %v8501_v32  ;;  %vm951_vm2 = vcmp.gt.f32.partialorder %v9783_v27, 0.0 }
 0x18e   : > { %v8505_v8 = vpop.eup %8504  ;;  %v1033_v3 = vmul.f32 1.442695, %v983_v36  ;;  %v9798_v52 = vadd.f32 %v904_v48, %v9692_v41  ;;  %8518 = vpow2.f32 %v1031_v33  ;;  %v984_v61 = vmin.f32 %v9793_v47, 0.0  ;;  %1316 = vmatprep.mubr.bf16.mxu1 %v1128_v49 }
 0x18f   : > { %v906_v54 = vpop.f32.mrf.mxu0  ;;  %v7062_v57 = vadd.f32 -1.0, %v8503_v43  ;;  %v8507_v59 = vpop.eup %8506  ;;  %1317 = vmatmul.mubr.bf16.gmra.mxu1 %v1127_v53  ;;  %v7060_v2 = vadd.f32 -1.0, %v8505_v8  ;;  %v1102_v46 = vsel %vm942_vm11, %v9733_v14, %v7061_v58  ;;  %vm952_vm3 = vcmp.gt.f32.partialorder %v9793_v47, 0.0 }
 0x190   : > { %8520 = vpow2.f32 %v1033_v3  ;;  %v9803_v34 = vadd.f32 %v906_v54, %v9695_v42  ;;  %v1035_v60 = vmul.f32 1.442695, %v984_v61  ;;  %v985_v62 = vmin.f32 %v9798_v52, 0.0  ;;  %7992 = vmatpush3.bf16.msra.mxu1 %v9675_v35 }
 0x191   : > { %v908_v63 = vpop.f32.mrf.mxu0  ;;  %v7063_v1 = vadd.f32 -1.0, %v8507_v59  ;;  %v1103_v10 = vsel %vm943_vm9, %v9738_v19, %v7062_v57  ;;  %v1101_v21 = vsel %vm941_vm12, %v9729_v11, %v7060_v2  ;;  %vm953_vm9 = vcmp.gt.f32.partialorder %v9798_v52, 0.0 }
 0x192   : > { %v986_v4 = vmin.f32 %v9803_v34, 0.0  ;;  %v9811_v6 = vadd.f32 %v908_v63, %v9692_v41  ;;  %v8509_v7 = vpop.eup %8508  ;;  %8522 = vpow2.f32 %v1035_v60  ;;  %v1037_v16 = vmul.f32 1.442695, %v985_v62 }
 0x193   : > { %v910_v55 = vpop.f32.mrf.mxu0  ;;  %v1104_v9 = vsel %vm944_vm10, %v9742_v26, %v7063_v1  ;;  %v8511_v12 = vpop.eup %8510  ;;  %v1129_v22 = vpack.c.bf16 %v1103_v10, %v1101_v21  ;;  %v7064_v31 = vadd.f32 -1.0, %v8509_v7  ;;  %vm954_vm6 = vcmp.gt.f32.partialorder %v9803_v34, 0.0 }
 0x194   : > { %v1039_v35 = vmul.f32 1.442695, %v986_v4  ;;  %v987_v13 = vmin.f32 %v9811_v6, 0.0  ;;  %v9820_v17 = vadd.f32 %v910_v55, %v9695_v42  ;;  %v1130_v20 = vpack.c.bf16 %v1104_v9, %v1102_v46 }
 0x195   : > { %v8513_v15 = vpop.eup %8512  ;;  %v914_v18 = vpop.f32.mrf.mxu0  ;;  %v7065_v29 = vadd.f32 -1.0, %v8511_v12  ;;  %v1105_v63 = vsel %vm945_vm1, %v9745_v30, %v7064_v31  ;;  %vm955_vm7 = vcmp.gt.f32.partialorder %v9811_v6, 0.0 }
 0x196   : > { %v1041_v26 = vmul.f32 1.442695, %v987_v13  ;;  %v9824_v19 = vadd.f32 %v914_v18, %v9692_v41  ;;  %8524 = vpow2.f32 %v1039_v35  ;;  %v988_v23 = vmin.f32 %v9820_v17, 0.0  ;;  %1324 = vmatprep.mubr.bf16.mxu1 %v1130_v20 }
 0x197   : > { %v916_v24 = vpop.f32.mrf.mxu0  ;;  %v7066_v14 = vadd.f32 -1.0, %v8513_v15  ;;  %v8515_v25 = vpop.eup %8514  ;;  %1325 = vmatmul.mubr.bf16.gmra.mxu1 %v1129_v22  ;;  %v1106_v54 = vsel %vm946_vm15, %v9751_v45, %v7065_v29  ;;  %vm956_vm8 = vcmp.gt.f32.partialorder %v9820_v17, 0.0 }
 0x198   : > { %8526 = vpow2.f32 %v1041_v26  ;;  %v9828_v28 = vadd.f32 %v916_v24, %v9695_v42  ;;  %v1043_v11 = vmul.f32 1.442695, %v988_v23  ;;  %v989_v32 = vmin.f32 %v9824_v19, 0.0 }
 0x199   : > { %8528 = vpow2.f32 %v1037_v16  ;;  %v918_v33 = vpop.f32.mrf.mxu0  ;;  %v7067_v36 = vadd.f32 -1.0, %v8515_v25  ;;  %v1107_v8 = vsel %vm947_vm13, %v9755_v56, %v7066_v14  ;;  %vm957_vm13 = vcmp.gt.f32.partialorder %v9824_v19, 0.0 }
 0x19a   : > { %v990_v39 = vmin.f32 %v9828_v28, 0.0  ;;  %v9835_v43 = vadd.f32 %v918_v33, %v9692_v41  ;;  %v8517_v48 = vpop.eup %8516  ;;  %8530 = vpow2.f32 %v1043_v11  ;;  %v1045_v59 = vmul.f32 1.442695, %v989_v32 }
 0x19b   : > { %v920_v49 = vpop.f32.mrf.mxu0  ;;  %v1108_v51 = vsel %vm948_vm14, %v9767_v5, %v7067_v36  ;;  %v8519_v3 = vpop.eup %8518  ;;  %v1131_v1 = vpack.c.bf16 %v1107_v8, %v1105_v63  ;;  %v7068_v10 = vadd.f32 -1.0, %v8517_v48  ;;  %vm958_vm10 = vcmp.gt.f32.partialorder %v9828_v28, 0.0 }
 0x19c   : > { %v1047_v53 = vmul.f32 1.442695, %v990_v39  ;;  %v991_v61 = vmin.f32 %v9835_v43, 0.0  ;;  %v9844_v58 = vadd.f32 %v920_v49, %v9695_v42  ;;  %v1132_v62 = vpack.c.bf16 %v1108_v51, %v1106_v54 }
 0x19d   : > { %v8521_v57 = vpop.eup %8520  ;;  %v924_v60 = vpop.f32.mrf.mxu0  ;;  %v7069_v9 = vadd.f32 -1.0, %v8519_v3  ;;  %v1109_v29 = vsel %vm949_vm5, %v9771_v50, %v7068_v10  ;;  %vm959_vm11 = vcmp.gt.f32.partialorder %v9835_v43, 0.0 }
 0x19e   : > { %v1049_v5 = vmul.f32 1.442695, %v991_v61  ;;  %v9848_v56 = vadd.f32 %v924_v60, %v9692_v41  ;;  %8532 = vpow2.f32 %v1047_v53  ;;  %v992_v2 = vmin.f32 %v9844_v58, 0.0  ;;  %1332 = vmatprep.mubr.bf16.mxu1 %v1132_v62 }
 0x19f   : > { %v926_v4 = vpop.f32.mrf.mxu0  ;;  %v7070_v45 = vadd.f32 -1.0, %v8521_v57  ;;  %v8523_v7 = vpop.eup %8522  ;;  %1333 = vmatmul.mubr.bf16.gmra.mxu1 %v1131_v1  ;;  %v1110_v23 = vsel %vm950_vm4, %v9776_v44, %v7069_v9  ;;  %vm960_vm12 = vcmp.gt.f32.partialorder %v9844_v58, 0.0 }
 0x1a0   : > { %8534 = vpow2.f32 %v1049_v5  ;;  %v9852_v55 = vadd.f32 %v926_v4, %v9695_v42  ;;  %v1051_v30 = vmul.f32 1.442695, %v992_v2  ;;  %v993_v12 = vmin.f32 %v9848_v56, 0.0 }
 0x1a1   : > { %8536 = vpow2.f32 %v1045_v59  ;;  %v928_v35 = vpop.f32.mrf.mxu0  ;;  %v7071_v13 = vadd.f32 -1.0, %v8523_v7  ;;  %v1111_v20 = vsel %vm951_vm2, %v9783_v27, %v7070_v45  ;;  %vm961_vm2 = vcmp.gt.f32.partialorder %v9848_v56, 0.0 }
 0x1a2   : > { %v994_v46 = vmin.f32 %v9852_v55, 0.0  ;;  %v9859_v15 = vadd.f32 %v928_v35, %v9692_v41  ;;  %8538 = vpow2.f32 %v1051_v30  ;;  %v1053_v14 = vmul.f32 1.442695, %v993_v12 }
 0x1a3   : > { %v930_v16 = vpop.f32.mrf.mxu0  ;;  %v1112_v18 = vsel %vm952_vm3, %v9793_v47, %v7071_v13  ;;  %v8525_v21 = vpop.eup %8524  ;;  %v1133_v11 = vpack.c.bf16 %v1111_v20, %v1109_v29  ;;  %vm962_vm14 = vcmp.gt.f32.partialorder %v9852_v55, 0.0 }
 0x1a4   : > { %v1055_v26 = vmul.f32 1.442695, %v994_v46  ;;  %v995_v22 = vmin.f32 %v9859_v15, 0.0  ;;  %v9868_v41 = vadd.f32 %v930_v16, %v9695_v42  ;;  %v1134_v25 = vpack.c.bf16 %v1112_v18, %v1110_v23  ;;  %v8171_v46 = vld [vmem:[%s12816_s4 + $0x20] sm:$0xff]   ;;  %v8178_v18 = vld [vmem:[%s12818_s6 + $0xc] ss:$16 sps:$4 sm:$0xff]  }
 0x1a5   : > { %v8527_v24 = vpop.eup %8526  ;;  %v7073_v32 = vadd.f32 -1.0, %v8525_v21  ;;  %vm963_vm15 = vcmp.gt.f32.partialorder %v9859_v15, 0.0  ;;  %7892 = vmatprep.subr.bf16.mxu0 %v8171_v46  ;;  %7985 = vmatprep.subr.bf16.mxu1 %v8171_v46  ;;  %v8175_v16 = vld [vmem:[%s12816_s4] sm:$0xff]  }
 0x1a6   : > { %v8529_v31 = vpop.eup %8528  ;;  %v1057_v47 = vmul.f32 1.442695, %v995_v22  ;;  %8540 = vpow2.f32 %v1055_v26  ;;  %v996_v27 = vmin.f32 %v9868_v41, 0.0  ;;  %1340 = vmatprep.mubr.bf16.mxu1 %v1134_v25  ;;  %v7074_v33 = vadd.f32 -1.0, %v8527_v24  ;;  %7893 = vmatpush3.bf16.msra.mxu0 %v8171_v46  ;;  %v9917_v21 = vld [vmem:[%s12827_s15 + $0x2] ss:$0 sm:$0xff] }
 0x1a7   : > { %v8531_v36 = vpop.eup %8530  ;;  %1341 = vmatmul.mubr.bf16.gmra.mxu1 %v1133_v11  ;;  %v7072_v42 = vadd.f32 -1.0, %v8529_v31  ;;  %v1114_v50 = vsel %vm954_vm6, %v9803_v34, %v7073_v32  ;;  %vm964_vm1 = vcmp.gt.f32.partialorder %v9868_v41, 0.0 }
 0x1a8   : > { %8542 = vpow2.f32 %v1057_v47  ;;  %v1059_v44 = vmul.f32 1.442695, %v996_v27  ;;  %v7075_v39 = vadd.f32 -1.0, %v8531_v36  ;;  %v1115_v49 = vsel %vm955_vm7, %v9811_v6, %v7074_v33  ;;  %7993 = vmatpush3.bf16.msra.mxu1 %v8171_v46 }
 0x1a9   : > { %8544 = vpow2.f32 %v1053_v14  ;;  %v1113_v53 = vsel %vm953_vm9, %v9798_v52, %v7072_v42 }
 0x1aa   : > { %8546 = vpow2.f32 %v1059_v44  ;;  %v1116_v48 = vsel %vm956_vm8, %v9820_v17, %v7075_v39  ;;  %v1135_v54 = vpack.c.bf16 %v1115_v49, %v1113_v53 }
 0x1ab   : > { %v8533_v51 = vpop.eup %8532  ;;  %v1136_v8 = vpack.c.bf16 %v1116_v48, %v1114_v50 }
 0x1ac   : > { %v7077_v57 = vadd.f32 -1.0, %v8533_v51 }
 0x1ad   : > { %v8535_v3 = vpop.eup %8534  ;;  %1348 = vmatprep.mubr.bf16.mxu1 %v1136_v8 }
 0x1ae   : > { %v8537_v61 = vpop.eup %8536  ;;  %v7078_v59 = vadd.f32 -1.0, %v8535_v3  ;;  %v1118_v6 = vsel %vm958_vm10, %v9828_v28, %v7077_v57 }
 0x1af   : > { %v8539_v60 = vpop.eup %8538  ;;  %1349 = vmatmul.mubr.bf16.gmra.mxu1 %v1135_v54  ;;  %v7076_v34 = vadd.f32 -1.0, %v8537_v61 }
 0x1b0   : > { %v7079_v62 = vadd.f32 -1.0, %v8539_v60  ;;  %v1119_v52 = vsel %vm959_vm11, %v9835_v43, %v7078_v59 }
 0x1b1   : > { %v1117_v2 = vsel %vm957_vm13, %v9824_v19, %v7076_v34 }
 0x1b2   : > { %v1120_v17 = vsel %vm960_vm12, %v9844_v58, %v7079_v62  ;;  %v1137_v45 = vpack.c.bf16 %v1119_v52, %v1117_v2 }
 0x1b3   : > { %v8541_v63 = vpop.eup %8540  ;;  %v1138_v5 = vpack.c.bf16 %v1120_v17, %v1118_v6 }
 0x1b4   : > { %v7081_v7 = vadd.f32 -1.0, %v8541_v63 }
 0x1b5   : > { %v8543_v1 = vpop.eup %8542  ;;  %1356 = vmatprep.mubr.bf16.mxu1 %v1138_v5 }
 0x1b6   : > { %v8545_v4 = vpop.eup %8544  ;;  %v7082_v9 = vadd.f32 -1.0, %v8543_v1  ;;  %v1122_v43 = vsel %vm962_vm14, %v9852_v55, %v7081_v7  ;;  %v8172_v55 = vld [vmem:[%s12816_s4 + $0x18] sm:$0xff]  }
 0x1b7   : > { %v8547_v10 = vpop.eup %8546  ;;  %1357 = vmatmul.mubr.bf16.gmra.mxu1 %v1137_v45  ;;  %v7080_v28 = vadd.f32 -1.0, %v8545_v4  ;;  %7894 = vmatprep.subr.bf16.mxu0 %v8172_v55 }
 0x1b8   : > { %v7083_v30 = vadd.f32 -1.0, %v8547_v10  ;;  %v1123_v19 = vsel %vm963_vm15, %v9859_v15, %v7082_v9  ;;  %7986 = vmatprep.subr.bf16.mxu1 %v8172_v55  ;;  %7895 = vmatpush3.bf16.msra.mxu0 %v8172_v55  ;;  %v8174_v15 = vld [vmem:[%s12816_s4 + $0x8] sm:$0xff]  }
 0x1b9   : > { %v1121_v35 = vsel %vm961_vm2, %v9848_v56, %v7080_v28  ;;  %7994 = vmatpush3.bf16.msra.mxu1 %v8172_v55  ;;  %v8173_v56 = vld [vmem:[%s12816_s4 + $0x10] sm:$0xff]  }
 0x1ba   : > { %v1124_v58 = vsel %vm964_vm1, %v9868_v41, %v7083_v30  ;;  %v1139_v13 = vpack.c.bf16 %v1123_v19, %v1121_v35  ;;  %7896 = vmatprep.subr.bf16.mxu0 %v8173_v56  ;;  %7987 = vmatprep.subr.bf16.mxu1 %v8173_v56 }
 0x1bb   : > { %v1140_v12 = vpack.c.bf16 %v1124_v58, %v1122_v43 }
 0x1bc   : > { %7897 = vmatpush3.bf16.msra.mxu0 %v8173_v56 }
 0x1bd   : > { %1364 = vmatprep.mubr.bf16.mxu1 %v1140_v12  ;;  %7995 = vmatpush3.bf16.msra.mxu1 %v8173_v56 }
 0x1be   : > { %7898 = vmatprep.subr.bf16.mxu0 %v8174_v15  ;;  %7988 = vmatprep.subr.bf16.mxu1 %v8174_v15 }
 0x1bf   : > { %1365 = vmatmul.mubr.bf16.gmra.mxu1 %v1139_v13 }
 0x1c0   : > { %7899 = vmatpush3.bf16.msra.mxu0 %v8174_v15 }
 0x1c1   : > { %7996 = vmatpush3.bf16.msra.mxu1 %v8174_v15  ;;  %7900 = vmatprep.subr.bf16.mxu0 %v8175_v16 }
 0x1c2   : > { %7989 = vmatprep.subr.bf16.mxu1 %v8175_v16 }
 0x1c4   : > { %7901 = vmatpush3.bf16.msra.mxu0 %v8175_v16 }
 0x1c5   : > { %7997 = vmatpush3.bf16.msra.mxu1 %v8175_v16  ;;  %1845 = vmatprep.subr.bf16.mxu0 %v8178_v18 }
 0x247   : > { %v7662_v20 = vpop.f32.mrf.mxu1 }
 0x249   : > { %v7663_v26 = vpop.f32.mrf.mxu1 }
 0x24a   : > { %v7664_v22 = vadd.f32 %v7663_v26, %v7662_v20 }
 0x24b   : > { %v7665_v23 = vpop.f32.mrf.mxu1 }
 0x24c   : > { %v1311_v24 = vadd.f32 %v7664_v22, %v9917_v21 }
 0x24d   : > { %v7666_v14 = vpop.f32.mrf.mxu1 }
 0x24e   : > { %v1389_v41 = vmin.f32 %v1311_v24, 0.0  ;;  %v7667_v25 = vadd.f32 %v7666_v14, %v7665_v23  ;;  %vm1373_vm3 = vcmp.gt.f32.partialorder %v1311_v24, 0.0 }
 0x24f   : > { %v7668_v29 = vpop.f32.mrf.mxu1 }
 0x250   : > { %v1405_v31 = vmul.f32 1.442695, %v1389_v41  ;;  %v1314_v47 = vadd.f32 %v7667_v25, %v9917_v21 }
 0x251   : > { %v7669_v11 = vpop.f32.mrf.mxu1 }
 0x252   : > { %v1390_v27 = vmin.f32 %v1314_v47, 0.0  ;;  %v7670_v32 = vadd.f32 %v7669_v11, %v7668_v29  ;;  %8548 = vpow2.f32 %v1405_v31  ;;  %vm1374_vm4 = vcmp.gt.f32.partialorder %v1314_v47, 0.0  ;;  %v8176_v31 = vld [vmem:[%s12818_s6 + $0x8] ss:$16 sps:$4 sm:$0xff]  }
 0x253   : > { %v7671_v33 = vpop.f32.mrf.mxu1 }
 0x254   : > { %v1407_v36 = vmul.f32 1.442695, %v1390_v27  ;;  %v1319_v44 = vadd.f32 %v7670_v32, %v9917_v21 }
 0x255   : > { %v7672_v39 = vpop.f32.mrf.mxu1 }
 0x256   : > { %8550 = vpow2.f32 %v1407_v36  ;;  %v1391_v42 = vmin.f32 %v1319_v44, 0.0  ;;  %v7673_v50 = vadd.f32 %v7672_v39, %v7671_v33  ;;  %vm1375_vm5 = vcmp.gt.f32.partialorder %v1319_v44, 0.0 }
 0x257   : > { %v7674_v48 = vpop.f32.mrf.mxu1 }
 0x258   : > { %v1409_v49 = vmul.f32 1.442695, %v1391_v42  ;;  %v1322_v51 = vadd.f32 %v7673_v50, %v9917_v21 }
 0x259   : > { %v7675_v8 = vpop.f32.mrf.mxu1 }
 0x25a   : > { %8552 = vpow2.f32 %v1409_v49  ;;  %v1392_v3 = vmin.f32 %v1322_v51, 0.0  ;;  %v7676_v53 = vadd.f32 %v7675_v8, %v7674_v48  ;;  %vm1376_vm6 = vcmp.gt.f32.partialorder %v1322_v51, 0.0 }
 0x25b   : > { %v7677_v61 = vpop.f32.mrf.mxu1 }
 0x25c   : > { %v1411_v54 = vmul.f32 1.442695, %v1392_v3  ;;  %v9924_v57 = vadd.f32 %v7676_v53, %v9917_v21 }
 0x25d   : > { %v7678_v59 = vpop.f32.mrf.mxu1 }
 0x25e   : > { %8554 = vpow2.f32 %v1411_v54  ;;  %v1393_v60 = vmin.f32 %v9924_v57, 0.0  ;;  %v7679_v62 = vadd.f32 %v7678_v59, %v7677_v61  ;;  %vm1377_vm7 = vcmp.gt.f32.partialorder %v9924_v57, 0.0 }
 0x25f   : > { %v7680_v34 = vpop.f32.mrf.mxu1  ;;  %v8549_v6 = vpop.eup %8548 }
 0x260   : > { %v1413_v17 = vmul.f32 1.442695, %v1393_v60  ;;  %v9928_v52 = vadd.f32 %v7679_v62, %v9917_v21  ;;  %v7101_v45 = vadd.f32 -1.0, %v8549_v6 }
 0x261   : > { %v7681_v63 = vpop.f32.mrf.mxu1 }
 0x262   : > { %8556 = vpow2.f32 %v1413_v17  ;;  %v1394_v5 = vmin.f32 %v9928_v52, 0.0  ;;  %v7682_v1 = vadd.f32 %v7681_v63, %v7680_v34  ;;  %v1453_v12 = vsel %vm1373_vm3, %v1311_v24, %v7101_v45 }
 0x263   : > { %v8551_v2 = vpop.eup %8550  ;;  %v7683_v4 = vpop.f32.mrf.mxu1  ;;  %vm1378_vm8 = vcmp.gt.f32.partialorder %v9928_v52, 0.0 }
 0x264   : > { %v1415_v7 = vmul.f32 1.442695, %v1394_v5  ;;  %v9932_v9 = vadd.f32 %v7682_v1, %v9917_v21  ;;  %v7102_v10 = vadd.f32 -1.0, %v8551_v2 }
 0x265   : > { %v7684_v30 = vpop.f32.mrf.mxu1 }
 0x266   : > { %8558 = vpow2.f32 %v1415_v7  ;;  %v1395_v28 = vmin.f32 %v9932_v9, 0.0  ;;  %v7685_v43 = vadd.f32 %v7684_v30, %v7683_v4  ;;  %v1454_v35 = vsel %vm1374_vm4, %v1314_v47, %v7102_v10 }
 0x267   : > { %v8553_v58 = vpop.eup %8552  ;;  %v7686_v19 = vpop.f32.mrf.mxu1  ;;  %v1469_v55 = vpack.c.bf16 %v1454_v35, %v1453_v12  ;;  %vm1379_vm9 = vcmp.gt.f32.partialorder %v9932_v9, 0.0  ;;  %vm1693_vm4 = vcmask 130048  }
 0x268   : > { %v1417_v13 = vmul.f32 1.442695, %v1395_v28  ;;  %v9936_v46 = vadd.f32 %v7685_v43, %v9917_v21  ;;  %v7103_v15 = vadd.f32 -1.0, %v8553_v58 }
 0x269   : > { %v7687_v56 = vpop.f32.mrf.mxu1  ;;  %7902 = vmatprep.mubr.bf16.mxu0 %v1469_v55 }
 0x26a   : > { %v1396_v16 = vmin.f32 %v9936_v46, 0.0  ;;  %v7688_v18 = vadd.f32 %v7687_v56, %v7686_v19  ;;  %8560 = vpow2.f32 %v1417_v13  ;;  %v1455_v41 = vsel %vm1375_vm5, %v1319_v44, %v7103_v15 }
 0x26b   : > { %v8555_v20 = vpop.eup %8554  ;;  %v7689_v26 = vpop.f32.mrf.mxu1  ;;  %vm1380_vm10 = vcmp.gt.f32.partialorder %v9936_v46, 0.0  ;;  %vm2282_vm5 = vcmask 916480  }
 0x26c   : > { %v7104_v22 = vadd.f32 -1.0, %v8555_v20  ;;  %v1419_v23 = vmul.f32 1.442695, %v1396_v16  ;;  %v9940_v14 = vadd.f32 %v7688_v18, %v9917_v21 }
 0x26d   : > { %v7690_v24 = vpop.f32.mrf.mxu1 }
 0x26e   : > { %v1456_v25 = vsel %vm1376_vm6, %v1322_v51, %v7104_v22  ;;  %8562 = vpow2.f32 %v1419_v23  ;;  %v1397_v29 = vmin.f32 %v9940_v14, 0.0  ;;  %v7691_v27 = vadd.f32 %v7690_v24, %v7689_v26 }
 0x26f   : > { %v8557_v47 = vpop.eup %8556  ;;  %v1470_v11 = vpack.c.bf16 %v1456_v25, %v1455_v41  ;;  %v7692_v32 = vpop.f32.mrf.mxu1  ;;  %vm1381_vm11 = vcmp.gt.f32.partialorder %v9940_v14, 0.0 }
 0x270   : > { %v1421_v33 = vmul.f32 1.442695, %v1397_v29  ;;  %v9947_v36 = vadd.f32 %v7691_v27, %v9917_v21  ;;  %v7105_v44 = vadd.f32 -1.0, %v8557_v47 }
 0x271   : > { %v7693_v39 = vpop.f32.mrf.mxu1  ;;  %7903 = vmatmul.mubr.bf16.vlgmr.msra.gmra.mxu0 %v1470_v11 }
 0x272   : > { %v7694_v42 = vadd.f32 %v7693_v39, %v7692_v32  ;;  %1846 = vmatpush1.bf16.msra.mxu0 %v8176_v31  ;;  %8564 = vpow2.f32 %v1421_v33  ;;  %v1398_v48 = vmin.f32 %v9947_v36, 0.0  ;;  %v1457_v59 = vsel %vm1377_vm7, %v9924_v57, %v7105_v44 }
 0x273   : > { %v8559_v50 = vpop.eup %8558  ;;  %v7695_v49 = vpop.f32.mrf.mxu1  ;;  %vm1382_vm12 = vcmp.gt.f32.partialorder %v9947_v36, 0.0 }
 0x274   : > { %v9951_v51 = vadd.f32 %v7694_v42, %v9917_v21  ;;  %v7106_v8 = vadd.f32 -1.0, %v8559_v50  ;;  %v1423_v3 = vmul.f32 1.442695, %v1398_v48 }
 0x275   : > { %v7696_v53 = vpop.f32.mrf.mxu1 }
 0x276   : > { %v1399_v61 = vmin.f32 %v9951_v51, 0.0  ;;  %v7697_v54 = vadd.f32 %v7696_v53, %v7695_v49  ;;  %v1458_v60 = vsel %vm1378_vm8, %v9928_v52, %v7106_v8  ;;  %8566 = vpow2.f32 %v1423_v3 }
 0x277   : > { %v7698_v62 = vpop.f32.mrf.mxu1  ;;  %v1471_v34 = vpack.c.bf16 %v1458_v60, %v1457_v59  ;;  %v8561_v6 = vpop.eup %8560  ;;  %vm1383_vm13 = vcmp.gt.f32.partialorder %v9951_v51, 0.0 }
 0x278   : > { %v1425_v17 = vmul.f32 1.442695, %v1399_v61  ;;  %v1354_v63 = vadd.f32 %v7697_v54, %v9917_v21  ;;  %v7107_v7 = vadd.f32 -1.0, %v8561_v6 }
 0x279   : > { %v7699_v5 = vpop.f32.mrf.mxu1  ;;  %7906 = vmatprep.mubr.bf16.mxu0 %v1471_v34 }
 0x27a   : > { %8568 = vpow2.f32 %v1425_v17  ;;  %v1400_v1 = vmin.f32 %v1354_v63, 0.0  ;;  %v7700_v2 = vadd.f32 %v7699_v5, %v7698_v62  ;;  %v1459_v19 = vsel %vm1379_vm9, %v9932_v9, %v7107_v7  ;;  %v8181_v5 = vld [vmem:[%s12818_s6 + $0x4] ss:$16 sps:$4 sm:$0xff]  }
 0x27b   : > { %v8563_v4 = vpop.eup %8562  ;;  %v7701_v45 = vpop.f32.mrf.mxu1  ;;  %vm1384_vm14 = vcmp.gt.f32.partialorder %v1354_v63, 0.0  ;;  %1732 = vmatprep.subr.bf16.mxu1 %v8181_v5 }
 0x27c   : > { %v1427_v10 = vmul.f32 1.442695, %v1400_v1  ;;  %v1359_v57 = vadd.f32 %v7700_v2, %v9917_v21  ;;  %v7108_v30 = vadd.f32 -1.0, %v8563_v4  ;;  %v8184_v1 = vld [vmem:[#allocation7 + $0x64] ss:$16 sps:$4 sm:$0xff]   ;;  %v9354_v4 = vmov 0.0  }
 0x27d   : > { %v7702_v52 = vpop.f32.mrf.mxu1  ;;  %v8187_v2 = vld [vmem:[#allocation7 + $0x6c] ss:$16 sps:$4 sm:$0xff]   ;;  %6644 = vst [vmem:[%s9984_s18 + $0x10] sm:$0xff] %v9354_v4  ;;  %6642 = vst [vmem:[%s9984_s18] sm:$0xff] %v9354_v4 }
 0x27e   : > { %8570 = vpow2.f32 %v1427_v10  ;;  %v1401_v28 = vmin.f32 %v1359_v57, 0.0  ;;  %v7703_v43 = vadd.f32 %v7702_v52, %v7701_v45  ;;  %v1460_v12 = vsel %vm1380_vm10, %v9936_v46, %v7108_v30  ;;  %2145 = vmatprep.subr.bf16.mxu0 %v8187_v2  ;;  %6643 = vst [vmem:[%s9984_s18 + $0x8] sm:$0xff] %v9354_v4  ;;  %6645 = vst [vmem:[%s9984_s18 + $0x18] sm:$0xff] %v9354_v4  ;;  %v10005_v45 = vld [vmem:[%s12827_s15 + $0x3] ss:$0 sm:$0xff] }
 0x27f   : > { %v7704_v58 = vpop.f32.mrf.mxu1  ;;  %v8565_v35 = vpop.eup %8564  ;;  %v1472_v56 = vpack.c.bf16 %v1460_v12, %v1459_v19  ;;  %vm1385_vm15 = vcmp.gt.f32.partialorder %v1359_v57, 0.0  ;;  %6646 = vst [vmem:[%s9984_s18 + $0x20] sm:$0xff] %v9354_v4  ;;  %6647 = vst [vmem:[%s9984_s18 + $0x28] sm:$0xff] %v9354_v4 }
 0x280   : > { %v1429_v13 = vmul.f32 1.442695, %v1401_v28  ;;  %v1362_v55 = vadd.f32 %v7703_v43, %v9917_v21  ;;  %v7109_v26 = vadd.f32 -1.0, %v8565_v35  ;;  %6648 = vst [vmem:[%s9984_s18 + $0x30] sm:$0xff] %v9354_v4  ;;  %6649 = vst [vmem:[%s9984_s18 + $0x38] sm:$0xff] %v9354_v4 }
 0x281   : > { %v7705_v15 = vpop.f32.mrf.mxu1  ;;  %7907 = vmatmul.mubr.bf16.gmra.mxu0 %v1472_v56  ;;  %6650 = vst [vmem:[%s9984_s18 + $0x40] sm:$0xff] %v9354_v4  ;;  %6651 = vst [vmem:[%s9984_s18 + $0x48] sm:$0xff] %v9354_v4  ;;  %v2250_v28 = vld [vmem:[%s12827_s15 + $0x3] sm:$0x1f] }
 0x282   : > { %8572 = vpow2.f32 %v1429_v13  ;;  %v1402_v16 = vmin.f32 %v1362_v55, 0.0  ;;  %v7706_v18 = vadd.f32 %v7705_v15, %v7704_v58  ;;  %v1461_v31 = vsel %vm1381_vm11, %v9940_v14, %v7109_v26  ;;  %6652 = vst [vmem:[%s9984_s18 + $0x50] sm:$0xff] %v9354_v4  ;;  %6653 = vst [vmem:[%s9984_s18 + $0x58] sm:$0xff] %v9354_v4  ;;  %v8182_v56 = vld [vmem:[#allocation7 + $0x60] ss:$16 sps:$4 sm:$0xff]  }
 0x283   : > { %v7707_v20 = vpop.f32.mrf.mxu1  ;;  %v8567_v22 = vpop.eup %8566  ;;  %vm1386_vm1 = vcmp.gt.f32.partialorder %v1362_v55, 0.0  ;;  %6654 = vst [vmem:[%s9984_s18 + $0x60] sm:$0xff] %v9354_v4  ;;  %6655 = vst [vmem:[%s9984_s18 + $0x68] sm:$0xff] %v9354_v4  ;;  %v2259_v58 = vrot.slane %v2250_v28, %v9689_v40  ;;  %v2255_v19 = vrot.slane %v2250_v28, %v9683_v38  ;;  %v10023_v13 = vsub.s32 2, %v9680_v37  ;;  %v8185_v15 = vld [vmem:[#allocation7 + $0x68] ss:$16 sps:$4 sm:$0xff]  }
 0x284   : > { %v1431_v23 = vmul.f32 1.442695, %v1402_v16  ;;  %v1367_v24 = vadd.f32 %v7706_v18, %v9917_v21  ;;  %v7110_v46 = vadd.f32 -1.0, %v8567_v22  ;;  %6656 = vst [vmem:[%s9984_s18 + $0x70] sm:$0xff] %v9354_v4  ;;  %6657 = vst [vmem:[%s9984_s18 + $0x78] sm:$0xff] %v9354_v4 }
 0x285   : > { %v7708_v9 = vpop.f32.mrf.mxu1  ;;  %2274 = vrot.lane.b32.xlu0 %v2259_v58, %s9355_s24  ;;  %2272 = vrot.lane.b32.xlu1 %v2255_v19, %s9355_s24  ;;  %12922 = vst [vmem:[#allocation32_spill] sm:$0xff] %v10023_v13  ;;  %v8190_v18 = vld [vmem:[#allocation7 + $0x44] ss:$16 sps:$4 sm:$0xff]   ;;  %v2263_v26 = vrot.slane %v2250_v28, %v10023_v13 }
 0x286   : > { %8574 = vpow2.f32 %v1431_v23  ;;  %v1403_v41 = vmin.f32 %v1367_v24, 0.0  ;;  %v7709_v25 = vadd.f32 %v7708_v9, %v7707_v20  ;;  %v1462_v47 = vsel %vm1382_vm12, %v9947_v36, %v7110_v46  ;;  %v8193_v20 = vld [vmem:[#allocation7 + $0x4c] ss:$16 sps:$4 sm:$0xff]   ;;  %v8188_v23 = vld [vmem:[#allocation7 + $0x40] ss:$16 sps:$4 sm:$0xff]  }
 0x287   : > { %v8569_v29 = vpop.eup %8568  ;;  %v1473_v32 = vpack.c.bf16 %v1462_v47, %v1461_v31  ;;  %vm1387_vm2 = vcmp.gt.f32.partialorder %v1367_v24, 0.0  ;;  %v8196_v9 = vld [vmem:[#allocation7 + $0x24] ss:$16 sps:$4 sm:$0xff]   ;;  %v8199_v46 = vld [vmem:[#allocation7 + $0x2c] ss:$16 sps:$4 sm:$0xff]  }
 0x288   : > { %v1433_v11 = vmul.f32 1.442695, %v1403_v41  ;;  %v1370_v27 = vadd.f32 %v7709_v25, %v9917_v21  ;;  %v7111_v39 = vadd.f32 -1.0, %v8569_v29  ;;  %v12844_v41 = vsub.s32 4, %v9680_v37  ;;  %v8194_v31 = vld [vmem:[#allocation7 + $0x20] ss:$16 sps:$4 sm:$0xff]  }
 0x289   : > { %7910 = vmatprep.mubr.bf16.mxu0 %v1473_v32  ;;  %2276 = vrot.lane.b32.xlu0 %v2263_v26, %s9355_s24  ;;  %v8197_v47 = vld [vmem:[#allocation7 + $0x28] ss:$16 sps:$4 sm:$0xff]   ;;  %v8205_v32 = vld [vmem:[#allocation7 + $0xc] ss:$16 sps:$4 sm:$0xff]   ;;  %v9032_v58 = vld [vmem:[%s9626_s29 + $0x20] sm:$0xff]  }
 0x28a   : > { %8576 = vpow2.f32 %v1433_v11  ;;  %v1404_v33 = vmin.f32 %v1370_v27, 0.0  ;;  %v1463_v48 = vsel %vm1383_vm13, %v9951_v51, %v7111_v39  ;;  %vm1388_vm3 = vcmp.gt.f32.partialorder %v1370_v27, 0.0  ;;  %v8208_v19 = vld [vmem:[%s12819_s7 + $0x74] ss:$8 sps:$4 sm:$0xff]   ;;  %v9033_v26 = vld [vmem:[%s9626_s29 + $0x28] sm:$0xff]  }
 0x28b   : > { %v8571_v42 = vpop.eup %8570  ;;  %v2271_v39 = vrot.slane %v2250_v28, %v12844_v41 }
 0x28c   : > { %v1435_v44 = vmul.f32 1.442695, %v1404_v33  ;;  %v7112_v50 = vadd.f32 -1.0, %v8571_v42 }
 0x28d   : > { %2280 = vrot.lane.b32.xlu0 %v2271_v39, %s9355_s24  ;;  %v8238_v39 = vld [vmem:[%s12819_s7 + $0x24] ss:$8 sps:$4 sm:$0xff]  }
 0x28e   : > { %8578 = vpow2.f32 %v1435_v44  ;;  %v1464_v14 = vsel %vm1384_vm14, %v1354_v63, %v7112_v50  ;;  %v8179_v63 = vld [vmem:[%s12818_s6] ss:$16 sps:$4 sm:$0xff]  }
 0x28f   : > { %v8573_v49 = vpop.eup %8572  ;;  %v1474_v36 = vpack.c.bf16 %v1464_v14, %v1463_v48  ;;  %v8200_v50 = vld [vmem:[#allocation7] ss:$16 sps:$4 sm:$0xff]   ;;  %v8203_v48 = vld [vmem:[#allocation7 + $0x8] ss:$16 sps:$4 sm:$0xff]  }
 0x290   : > { %v7113_v8 = vadd.f32 -1.0, %v8573_v49 }
 0x291   : > { %7911 = vmatmul.mubr.bf16.gmra.mxu0 %v1474_v36 }
 0x292   : > { %1863 = vmatprep.mubr.bf16.mxu0 %v12845_v0  ;;  %v1465_v53 = vsel %vm1385_vm15, %v1359_v57, %v7113_v8 }
 0x293   : > { %v8575_v21 = vpop.eup %8574 }
 0x294   : > { %v7114_v3 = vadd.f32 -1.0, %v8575_v21 }
 0x296   : > { %v1466_v61 = vsel %vm1386_vm1, %v1362_v55, %v7114_v3  ;;  %v12843_v55 = vsub.s32 3, %v9680_v37 }
 0x297   : > { %v8577_v54 = vpop.eup %8576  ;;  %v1475_v59 = vpack.c.bf16 %v1466_v61, %v1465_v53 }
 0x298   : > { %v7115_v60 = vadd.f32 -1.0, %v8577_v54  ;;  %v2267_v22 = vrot.slane %v2250_v28, %v12843_v55  ;;  %v9030_v28 = vld [vmem:[%s9626_s29 + $0x10] sm:$0xff]  }
 0x299   : > { %7914 = vmatprep.mubr.bf16.mxu1 %v1475_v59 }
 0x29a   : > { %v1467_v51 = vsel %vm1387_vm2, %v1367_v24, %v7115_v60  ;;  %v8191_v24 = vld [vmem:[#allocation7 + $0x48] ss:$16 sps:$4 sm:$0xff]   ;;  %2278 = vrot.lane.b32.xlu1 %v2267_v22, %s9355_s24  ;;  %v8220_v22 = vld [vmem:[%s12819_s7 + $0x54] ss:$8 sps:$4 sm:$0xff]  }
 0x29b   : > { %v8579_v62 = vpop.eup %8578 }
 0x29c   : > { %v7116_v34 = vadd.f32 -1.0, %v8579_v62 }
 0x29e   : > { %v1468_v6 = vsel %vm1388_vm3, %v1370_v27, %v7116_v34  ;;  %v8202_v27 = vld [vmem:[#allocation7 + $0x4] ss:$16 sps:$4 sm:$0xff]  }
 0x29f   : > { %v1476_v17 = vpack.c.bf16 %v1468_v6, %v1467_v51 }
 0x2a1   : > { %7915 = vmatmul.mubr.bf16.vlgmr.msra.gmra.mxu1 %v1476_v17 }
 0x2a2   : > { %1750 = vmatprep.mubr.bf16.mxu1 %v12845_v0  ;;  %1733 = vmatpush1.bf16.msra.mxu1 %v8179_v63 }
 0x2a3   : > { %2032 = vmatprep.subr.bf16.mxu1 %v8184_v1 }
 0x331   : > { %v7904_v7 = vpop.f32.mrf.mxu0 }
 0x332   : > { %v1591_v10 = vadd.f32 %v7904_v7, %v10005_v45 }
 0x333   : > { %v1582_v57 = vpop.f32.mrf.mxu0 }
 0x334   : > { %v1583_v30 = vadd.f32 %v10005_v45, %v1582_v57  ;;  %6660 = vst.msk [vmem:[%s9984_s18 + $0x10] sm:$0xff] %vm1693_vm4, %v1591_v10 }
 0x335   : > { %v7905_v52 = vpop.f32.mrf.mxu0 }
 0x336   : > { %v1594_v43 = vadd.f32 %v7905_v52, %v10005_v45  ;;  %6658 = vst.msk [vmem:[%s9984_s18] sm:$0xff] %vm1693_vm4, %v1583_v30  ;;  %v9029_v52 = vld [vmem:[%s9626_s29 + $0x8] sm:$0xff]  }
 0x337   : > { %v1585_v12 = vpop.f32.mrf.mxu0 }
 0x338   : > { %v1586_v35 = vadd.f32 %v10005_v45, %v1585_v12  ;;  %6661 = vst.msk [vmem:[%s9984_s18 + $0x18] sm:$0xff] %vm1693_vm4, %v1594_v43  ;;  %v1662_v25 = vpack.c.bf16 %v1594_v43, %v1591_v10  ;;  %v9031_v43 = vld [vmem:[%s9626_s29 + $0x18] sm:$0xff]  }
 0x339   : > { %v8211_v12 = vld [vmem:[%s12819_s7 + $0x174] ss:$8 sps:$4 sm:$0xff]  }
 0x33a   : > { %v1661_v16 = vpack.c.bf16 %v1586_v35, %v1583_v30  ;;  %6659 = vst.msk [vmem:[%s9984_s18 + $0x8] sm:$0xff] %vm1693_vm4, %v1586_v35  ;;  %v8206_v35 = vld [vmem:[%s12819_s7 + $0x70] ss:$8 sps:$4 sm:$0xff]  }
 0x33c   : > { %7130 = vmatmul.mubr.msk.bf16.vlgmr.msra.gmra.mxu1 %vm1693_vm4, %v1661_v16  ;;  %7138 = vmatmul.mubr.msk.bf16.vlgmr.msra.gmra.mxu0 %vm1693_vm4, %v1661_v16  ;;  %v8217_v16 = vld [vmem:[%s12819_s7 + $0x164] ss:$8 sps:$4 sm:$0xff]  }
 0x33d   : > { %2033 = vmatpush1.bf16.msra.mxu1 %v8182_v56  ;;  %2146 = vmatpush1.bf16.msra.mxu0 %v8185_v15  ;;  %v8209_v56 = vld [vmem:[%s12819_s7 + $0x170] ss:$8 sps:$4 sm:$0xff]   ;;  %v8214_v15 = vld [vmem:[%s12819_s7 + $0x64] ss:$8 sps:$4 sm:$0xff]  }
 0x33e   : > { %1760 = vmatprep.mubr.bf16.mxu1 %v12845_v0  ;;  %1873 = vmatprep.mubr.bf16.mxu0 %v12845_v0 }
 0x33f   : > { %2034 = vmatprep.subr.bf16.mxu1 %v8190_v18  ;;  %2147 = vmatprep.subr.bf16.mxu0 %v8193_v20  ;;  %v8212_v18 = vld [vmem:[%s12819_s7 + $0x60] ss:$8 sps:$4 sm:$0xff]  }
 0x340   : > { %v8215_v20 = vld [vmem:[%s12819_s7 + $0x160] ss:$8 sps:$4 sm:$0xff]  }
 0x341   : > { %2035 = vmatpush1.bf16.msra.mxu1 %v8188_v23  ;;  %2148 = vmatpush1.bf16.msra.mxu0 %v8191_v24  ;;  %v7908_v29 = vpop.f32.mrf.mxu0  ;;  %v8223_v23 = vld [vmem:[%s12819_s7 + $0x154] ss:$8 sps:$4 sm:$0xff]   ;;  %v8218_v24 = vld [vmem:[%s12819_s7 + $0x50] ss:$8 sps:$4 sm:$0xff]  }
 0x342   : > { %2036 = vmatprep.subr.bf16.mxu1 %v8196_v9  ;;  %2149 = vmatprep.subr.bf16.mxu0 %v8199_v46  ;;  %v1607_v11 = vadd.f32 %v7908_v29, %v10005_v45  ;;  %v8221_v9 = vld [vmem:[%s12819_s7 + $0x150] ss:$8 sps:$4 sm:$0xff]   ;;  %v8226_v46 = vld [vmem:[%s12819_s7 + $0x44] ss:$8 sps:$4 sm:$0xff]   ;;  %v8224_v29 = vld [vmem:[%s12819_s7 + $0x40] ss:$8 sps:$4 sm:$0xff]  }
 0x343   : > { %v1598_v33 = vpop.f32.mrf.mxu0 }
 0x344   : > { %7131 = vmatmul.mubr.msk.bf16.gmra.mxu1 %vm1693_vm4, %v1662_v25  ;;  %7139 = vmatmul.mubr.msk.bf16.gmra.mxu0 %vm1693_vm4, %v1662_v25  ;;  %v1599_v42 = vadd.f32 %v10005_v45, %v1598_v33  ;;  %6664 = vst.msk [vmem:[%s9984_s18 + $0x30] sm:$0xff] %vm1693_vm4, %v1607_v11  ;;  %v8229_v25 = vld [vmem:[%s12819_s7 + $0x144] ss:$8 sps:$4 sm:$0xff]   ;;  %v8233_v33 = vld [vmem:[%s12819_s7 + $0x130] ss:$8 sps:$4 sm:$0xff]  }
 0x345   : > { %1770 = vmatprep.mubr.bf16.mxu1 %v12845_v0  ;;  %1883 = vmatprep.mubr.bf16.mxu0 %v12845_v0  ;;  %v7909_v44 = vpop.f32.mrf.mxu0 }
 0x346   : > { %2037 = vmatpush1.bf16.msra.mxu1 %v8194_v31  ;;  %2150 = vmatpush1.bf16.msra.mxu0 %v8197_v47  ;;  %v1610_v14 = vadd.f32 %v7909_v44, %v10005_v45  ;;  %6662 = vst.msk [vmem:[%s9984_s18 + $0x20] sm:$0xff] %vm1693_vm4, %v1599_v42  ;;  %v8227_v31 = vld [vmem:[%s12819_s7 + $0x140] ss:$8 sps:$4 sm:$0xff]   ;;  %v9034_v47 = vld [vmem:[%s9626_s29 + $0x30] sm:$0xff]  }
 0x347   : > { %2038 = vmatprep.subr.bf16.mxu1 %v8202_v27  ;;  %2151 = vmatprep.subr.bf16.mxu0 %v8205_v32  ;;  %v1601_v49 = vpop.f32.mrf.mxu0  ;;  %v8235_v27 = vld [vmem:[%s12819_s7 + $0x134] ss:$8 sps:$4 sm:$0xff]   ;;  %v8230_v32 = vld [vmem:[%s12819_s7 + $0x30] ss:$8 sps:$4 sm:$0xff]   ;;  %v8236_v44 = vld [vmem:[%s12819_s7 + $0x20] ss:$8 sps:$4 sm:$0xff]  }
 0x348   : > { %v1602_v36 = vadd.f32 %v10005_v45, %v1601_v49  ;;  %6665 = vst.msk [vmem:[%s9984_s18 + $0x38] sm:$0xff] %vm1693_vm4, %v1610_v14  ;;  %v1664_v53 = vpack.c.bf16 %v1610_v14, %v1607_v11  ;;  %v8232_v11 = vld [vmem:[%s12819_s7 + $0x34] ss:$8 sps:$4 sm:$0xff]  }
 0x349   : > { %v8244_v14 = vld [vmem:[%s12819_s7 + $0x14] ss:$8 sps:$4 sm:$0xff]  }
 0x34a   : > { %2039 = vmatpush1.bf16.msra.mxu1 %v8200_v50  ;;  %2152 = vmatpush1.bf16.msra.mxu0 %v8203_v48  ;;  %v1663_v8 = vpack.c.bf16 %v1602_v36, %v1599_v42  ;;  %6663 = vst.msk [vmem:[%s9984_s18 + $0x28] sm:$0xff] %vm1693_vm4, %v1602_v36  ;;  %v8241_v42 = vld [vmem:[%s12819_s7 + $0x124] ss:$8 sps:$4 sm:$0xff]   ;;  %v8239_v50 = vld [vmem:[%s12819_s7 + $0x120] ss:$8 sps:$4 sm:$0xff]   ;;  %v9035_v48 = vld [vmem:[%s9626_s29 + $0x38] sm:$0xff]  }
 0x34b   : > { %3179 = vmatprep.subr.bf16.mxu1 %v8208_v19  ;;  %3292 = vmatprep.subr.bf16.mxu0 %v8211_v12  ;;  %v8247_v49 = vld [vmem:[%s12819_s7 + $0x114] ss:$8 sps:$4 sm:$0xff]   ;;  %v8242_v36 = vld [vmem:[%s12819_s7 + $0x10] ss:$8 sps:$4 sm:$0xff]   ;;  %v8284_v19 = vld [vmem:[%s12819_s7 + $0xa0] ss:$8 sps:$4 sm:$0xff]  }
 0x34c   : > { %7132 = vmatmul.mubr.msk.bf16.gmra.mxu1 %vm1693_vm4, %v1663_v8  ;;  %7140 = vmatmul.mubr.msk.bf16.gmra.mxu0 %vm1693_vm4, %v1663_v8  ;;  %v8245_v8 = vld [vmem:[%s12819_s7 + $0x110] ss:$8 sps:$4 sm:$0xff]   ;;  %v8287_v12 = vld [vmem:[%s12819_s7 + $0x1a0] ss:$8 sps:$4 sm:$0xff]  }
 0x34d   : > { %1780 = vmatprep.mubr.bf16.mxu1 %v12845_v0  ;;  %1893 = vmatprep.mubr.bf16.mxu0 %v12845_v0 }
 0x351   : > { %v7912_v21 = vpop.f32.mrf.mxu0 }
 0x352   : > { %v1623_v3 = vadd.f32 %v7912_v21, %v10005_v45  ;;  %v8250_v21 = vld [vmem:[%s12819_s7 + $0x4] ss:$8 sps:$4 sm:$0xff]  }
 0x353   : > { %v1614_v61 = vpop.f32.mrf.mxu0 }
 0x354   : > { %v1615_v54 = vadd.f32 %v10005_v45, %v1614_v61  ;;  %6668 = vst.msk [vmem:[%s9984_s18 + $0x50] sm:$0xff] %vm1693_vm4, %v1623_v3  ;;  %7133 = vmatmul.mubr.msk.bf16.gmra.mxu1 %vm1693_vm4, %v1664_v53  ;;  %7141 = vmatmul.mubr.msk.bf16.gmra.mxu0 %vm1693_vm4, %v1664_v53  ;;  %v8248_v53 = vld [vmem:[%s12819_s7] ss:$8 sps:$4 sm:$0xff]  }
 0x355   : > { %v7913_v59 = vpop.f32.mrf.mxu0  ;;  %1790 = vmatprep.mubr.bf16.mxu1 %v12845_v0  ;;  %1903 = vmatprep.mubr.bf16.mxu0 %v12845_v0  ;;  %v8251_v61 = vld [vmem:[%s12819_s7 + $0x100] ss:$8 sps:$4 sm:$0xff]  }
 0x356   : > { %v1626_v60 = vadd.f32 %v7913_v59, %v10005_v45  ;;  %6666 = vst.msk [vmem:[%s9984_s18 + $0x40] sm:$0xff] %vm1693_vm4, %v1615_v54  ;;  %v8259_v59 = vld [vmem:[%s12819_s7 + $0x1f4] ss:$8 sps:$4 sm:$0xff]  }
 0x357   : > { %v1617_v62 = vpop.f32.mrf.mxu0 }
 0x358   : > { %v1618_v34 = vadd.f32 %v10005_v45, %v1617_v62  ;;  %6669 = vst.msk [vmem:[%s9984_s18 + $0x58] sm:$0xff] %vm1693_vm4, %v1626_v60  ;;  %v1666_v63 = vpack.c.bf16 %v1626_v60, %v1623_v3  ;;  %v8253_v3 = vld [vmem:[%s12819_s7 + $0x104] ss:$8 sps:$4 sm:$0xff]   ;;  %v8254_v60 = vld [vmem:[%s12819_s7 + $0xf0] ss:$8 sps:$4 sm:$0xff]  }
 0x359   : > { %v8257_v62 = vld [vmem:[%s12819_s7 + $0x1f0] ss:$8 sps:$4 sm:$0xff]  }
 0x35a   : > { %v1665_v51 = vpack.c.bf16 %v1618_v34, %v1615_v54  ;;  %6667 = vst.msk [vmem:[%s9984_s18 + $0x48] sm:$0xff] %vm1693_vm4, %v1618_v34  ;;  %v8256_v54 = vld [vmem:[%s12819_s7 + $0xf4] ss:$8 sps:$4 sm:$0xff]   ;;  %v8262_v34 = vld [vmem:[%s12819_s7 + $0xe4] ss:$8 sps:$4 sm:$0xff]  }
 0x35c   : > { %7134 = vmatmul.mubr.msk.bf16.gmra.mxu1 %vm1693_vm4, %v1665_v51  ;;  %7142 = vmatmul.mubr.msk.bf16.gmra.mxu0 %vm1693_vm4, %v1665_v51  ;;  %v8265_v51 = vld [vmem:[%s12819_s7 + $0x1e4] ss:$8 sps:$4 sm:$0xff]  }
 0x35d   : > { %1800 = vmatprep.mubr.bf16.mxu1 %v12845_v0  ;;  %1913 = vmatprep.mubr.bf16.mxu0 %v12845_v0 }
 0x361   : > { %v7916_v6 = vpop.f32.mrf.mxu1 }
 0x362   : > { %v1639_v17 = vadd.f32 %v7916_v6, %v10005_v45  ;;  %v8260_v6 = vld [vmem:[%s12819_s7 + $0xe0] ss:$8 sps:$4 sm:$0xff]  }
 0x363   : > { %v1630_v5 = vpop.f32.mrf.mxu1 }
 0x364   : > { %v1631_v1 = vadd.f32 %v10005_v45, %v1630_v5  ;;  %6672 = vst.msk [vmem:[%s9984_s18 + $0x70] sm:$0xff] %vm1693_vm4, %v1639_v17  ;;  %7135 = vmatmul.mubr.msk.bf16.gmra.mxu1 %vm1693_vm4, %v1666_v63  ;;  %7143 = vmatmul.mubr.msk.bf16.gmra.mxu0 %vm1693_vm4, %v1666_v63  ;;  %v8268_v63 = vld [vmem:[%s12819_s7 + $0xd4] ss:$8 sps:$4 sm:$0xff]  }
 0x365   : > { %v7917_v2 = vpop.f32.mrf.mxu1  ;;  %1810 = vmatprep.mubr.bf16.mxu1 %v12845_v0  ;;  %1923 = vmatprep.mubr.bf16.mxu0 %v12845_v0  ;;  %v8271_v5 = vld [vmem:[%s12819_s7 + $0x1d4] ss:$8 sps:$4 sm:$0xff]  }
 0x366   : > { %v1642_v4 = vadd.f32 %v7917_v2, %v10005_v45  ;;  %6670 = vst.msk [vmem:[%s9984_s18 + $0x60] sm:$0xff] %vm1693_vm4, %v1631_v1  ;;  %v8269_v2 = vld [vmem:[%s12819_s7 + $0x1d0] ss:$8 sps:$4 sm:$0xff]  }
 0x367   : > { %v1633_v7 = vpop.f32.mrf.mxu1 }
 0x368   : > { %v1634_v10 = vadd.f32 %v10005_v45, %v1633_v7  ;;  %6673 = vst.msk [vmem:[%s9984_s18 + $0x78] sm:$0xff] %vm1693_vm4, %v1642_v4  ;;  %v1668_v30 = vpack.c.bf16 %v1642_v4, %v1639_v17  ;;  %v9028_v45 = vld [vmem:[%s9626_s29] sm:$0xff]  }
 0x369   : > { %v8263_v17 = vld [vmem:[%s12819_s7 + $0x1e0] ss:$8 sps:$4 sm:$0xff]   ;;  %v8274_v4 = vld [vmem:[%s12819_s7 + $0xc4] ss:$8 sps:$4 sm:$0xff]  }
 0x36a   : > { %v1667_v57 = vpack.c.bf16 %v1634_v10, %v1631_v1  ;;  %6671 = vst.msk [vmem:[%s9984_s18 + $0x68] sm:$0xff] %vm1693_vm4, %v1634_v10  ;;  %v8266_v1 = vld [vmem:[%s12819_s7 + $0xd0] ss:$8 sps:$4 sm:$0xff]   ;;  %v8277_v7 = vld [vmem:[%s12819_s7 + $0x1c4] ss:$8 sps:$4 sm:$0xff]  }
 0x36b   : > { %v8272_v10 = vld [vmem:[%s12819_s7 + $0xc0] ss:$8 sps:$4 sm:$0xff]  }
 0x36c   : > { %7136 = vmatmul.mubr.msk.bf16.gmra.mxu1 %vm1693_vm4, %v1667_v57  ;;  %7144 = vmatmul.mubr.msk.bf16.gmra.mxu0 %vm1693_vm4, %v1667_v57  ;;  %v8275_v57 = vld [vmem:[%s12819_s7 + $0x1c0] ss:$8 sps:$4 sm:$0xff]  }
 0x36d   : > { %1820 = vmatprep.mubr.bf16.mxu1 %v12845_v0  ;;  %1933 = vmatprep.mubr.bf16.mxu0 %v12845_v0 }
 0x374   : > { %7137 = vmatmul.mubr.msk.bf16.gmra.mxu1 %vm1693_vm4, %v1668_v30  ;;  %7145 = vmatmul.mubr.msk.bf16.gmra.mxu0 %vm1693_vm4, %v1668_v30  ;;  %v8280_v30 = vld [vmem:[%s12819_s7 + $0xb4] ss:$8 sps:$4 sm:$0xff]  }
 0x375   : > { %2056 = vmatprep.mubr.bf16.mxu1 %v12845_v0  ;;  %2169 = vmatprep.mubr.bf16.mxu0 %v12845_v0 }
 0x37c   : > { %7162 = vmatmul.mubr.msk.bf16.vlgmr.msra.gmra.mxu1 %vm795_vm0, %v9028_v45  ;;  %7170 = vmatmul.mubr.msk.bf16.vlgmr.msra.gmra.mxu0 %vm795_vm0, %v9028_v45  ;;  %v8283_v45 = vld [vmem:[%s12819_s7 + $0x1b4] ss:$8 sps:$4 sm:$0xff]  }
 0x37d   : > { %2066 = vmatprep.mubr.bf16.mxu1 %v12845_v0  ;;  %2179 = vmatprep.mubr.bf16.mxu0 %v12845_v0 }
 0x37e   : > { %3180 = vmatpush1.bf16.msra.mxu1 %v8206_v35  ;;  %3293 = vmatpush1.bf16.msra.mxu0 %v8209_v56  ;;  %v8292_v35 = vld [vmem:[%s12819_s7 + $0x94] ss:$8 sps:$4 sm:$0xff]  }
 0x37f   : > { %3181 = vmatprep.subr.bf16.mxu1 %v8214_v15  ;;  %3294 = vmatprep.subr.bf16.mxu0 %v8217_v16  ;;  %v8295_v56 = vld [vmem:[%s12819_s7 + $0x194] ss:$8 sps:$4 sm:$0xff]   ;;  %v8290_v15 = vld [vmem:[%s12819_s7 + $0x90] ss:$8 sps:$4 sm:$0xff]  }
 0x380   : > { %v8293_v16 = vld [vmem:[%s12819_s7 + $0x190] ss:$8 sps:$4 sm:$0xff]  }
 0x382   : > { %3182 = vmatpush1.bf16.msra.mxu1 %v8212_v18  ;;  %3295 = vmatpush1.bf16.msra.mxu0 %v8215_v20  ;;  %v8298_v18 = vld [vmem:[%s12819_s7 + $0x84] ss:$8 sps:$4 sm:$0xff]  }
 0x383   : > { %3183 = vmatprep.subr.bf16.mxu1 %v8220_v22  ;;  %3296 = vmatprep.subr.bf16.mxu0 %v8223_v23  ;;  %v8301_v20 = vld [vmem:[%s12819_s7 + $0x184] ss:$8 sps:$4 sm:$0xff]   ;;  %v8299_v22 = vld [vmem:[%s12819_s7 + $0x180] ss:$8 sps:$4 sm:$0xff]  }
 0x384   : > { %7163 = vmatmul.mubr.msk.bf16.gmra.mxu1 %vm795_vm0, %v9029_v52  ;;  %7171 = vmatmul.mubr.msk.bf16.gmra.mxu0 %vm795_vm0, %v9029_v52  ;;  %v8278_v52 = vld [vmem:[%s12819_s7 + $0xb0] ss:$8 sps:$4 sm:$0xff]  }
 0x385   : > { %2076 = vmatprep.mubr.bf16.mxu1 %v12845_v0  ;;  %2189 = vmatprep.mubr.bf16.mxu0 %v12845_v0 }
 0x386   : > { %3184 = vmatpush1.bf16.msra.mxu1 %v8218_v24  ;;  %3297 = vmatpush1.bf16.msra.mxu0 %v8221_v9 }
 0x387   : > { %3185 = vmatprep.subr.bf16.mxu1 %v8226_v46  ;;  %3298 = vmatprep.subr.bf16.mxu0 %v8229_v25 }
 0x38a   : > { %3186 = vmatpush1.bf16.msra.mxu1 %v8224_v29  ;;  %3299 = vmatpush1.bf16.msra.mxu0 %v8227_v31 }
 0x38b   : > { %3187 = vmatprep.subr.bf16.mxu1 %v8232_v11  ;;  %3300 = vmatprep.subr.bf16.mxu0 %v8235_v27 }
 0x38c   : > { %7164 = vmatmul.mubr.msk.bf16.gmra.mxu1 %vm795_vm0, %v9030_v28  ;;  %7172 = vmatmul.mubr.msk.bf16.gmra.mxu0 %vm795_vm0, %v9030_v28  ;;  %v8281_v28 = vld [vmem:[%s12819_s7 + $0x1b0] ss:$8 sps:$4 sm:$0xff]  }
 0x38d   : > { %2086 = vmatprep.mubr.bf16.mxu1 %v12845_v0  ;;  %2199 = vmatprep.mubr.bf16.mxu0 %v12845_v0 }
 0x38e   : > { %3188 = vmatpush1.bf16.msra.mxu1 %v8230_v32  ;;  %3301 = vmatpush1.bf16.msra.mxu0 %v8233_v33 }
 0x38f   : > { %3189 = vmatprep.subr.bf16.mxu1 %v8238_v39  ;;  %3302 = vmatprep.subr.bf16.mxu0 %v8241_v42 }
 0x392   : > { %3190 = vmatpush1.bf16.msra.mxu1 %v8236_v44  ;;  %3303 = vmatpush1.bf16.msra.mxu0 %v8239_v50 }
 0x393   : > { %3191 = vmatprep.subr.bf16.mxu1 %v8244_v14  ;;  %3304 = vmatprep.subr.bf16.mxu0 %v8247_v49 }
 0x394   : > { %7165 = vmatmul.mubr.msk.bf16.gmra.mxu1 %vm795_vm0, %v9031_v43  ;;  %7173 = vmatmul.mubr.msk.bf16.gmra.mxu0 %vm795_vm0, %v9031_v43  ;;  %v8286_v43 = vld [vmem:[%s12819_s7 + $0xa4] ss:$8 sps:$4 sm:$0xff]  }
 0x395   : > { %2096 = vmatprep.mubr.bf16.mxu1 %v12845_v0  ;;  %2209 = vmatprep.mubr.bf16.mxu0 %v12845_v0 }
 0x396   : > { %3192 = vmatpush1.bf16.msra.mxu1 %v8242_v36  ;;  %3305 = vmatpush1.bf16.msra.mxu0 %v8245_v8 }
 0x397   : > { %3193 = vmatprep.subr.bf16.mxu1 %v8250_v21  ;;  %3306 = vmatprep.subr.bf16.mxu0 %v8253_v3 }
 0x39a   : > { %3194 = vmatpush1.bf16.msra.mxu1 %v8248_v53  ;;  %3307 = vmatpush1.bf16.msra.mxu0 %v8251_v61 }
 0x39b   : > { %3195 = vmatprep.subr.bf16.mxu1 %v8256_v54  ;;  %3308 = vmatprep.subr.bf16.mxu0 %v8259_v59 }
 0x39c   : > { %7166 = vmatmul.mubr.msk.bf16.gmra.mxu1 %vm795_vm0, %v9032_v58  ;;  %7174 = vmatmul.mubr.msk.bf16.gmra.mxu0 %vm795_vm0, %v9032_v58  ;;  %v8289_v58 = vld [vmem:[%s12819_s7 + $0x1a4] ss:$8 sps:$4 sm:$0xff]  }
 0x39d   : > { %2106 = vmatprep.mubr.bf16.mxu1 %v12845_v0  ;;  %2219 = vmatprep.mubr.bf16.mxu0 %v12845_v0 }
 0x39e   : > { %3196 = vmatpush2.bf16.msra.mxu1 %v8254_v60  ;;  %3309 = vmatpush2.bf16.msra.mxu0 %v8257_v62 }
 0x39f   : > { %3197 = vmatprep.subr.bf16.mxu1 %v8262_v34  ;;  %3310 = vmatprep.subr.bf16.mxu0 %v8265_v51 }
 0x3a2   : > { %3198 = vmatpush2.bf16.msra.mxu1 %v8260_v6  ;;  %3311 = vmatpush2.bf16.msra.mxu0 %v8263_v17 }
 0x3a3   : > { %3199 = vmatprep.subr.bf16.mxu1 %v8268_v63  ;;  %3312 = vmatprep.subr.bf16.mxu0 %v8271_v5 }
 0x3a4   : > { %7167 = vmatmul.mubr.msk.bf16.gmra.mxu1 %vm795_vm0, %v9033_v26  ;;  %7175 = vmatmul.mubr.msk.bf16.gmra.mxu0 %vm795_vm0, %v9033_v26  ;;  %v8296_v26 = vld [vmem:[%s12819_s7 + $0x80] ss:$8 sps:$4 sm:$0xff]  }
 0x3a5   : > { %2116 = vmatprep.mubr.bf16.mxu1 %v12845_v0  ;;  %2229 = vmatprep.mubr.bf16.mxu0 %v12845_v0 }
 0x3a6   : > { %3200 = vmatpush2.bf16.msra.mxu1 %v8266_v1  ;;  %3313 = vmatpush2.bf16.msra.mxu0 %v8269_v2 }
 0x3a7   : > { %3201 = vmatprep.subr.bf16.mxu1 %v8274_v4  ;;  %3314 = vmatprep.subr.bf16.mxu0 %v8277_v7 }
 0x3aa   : > { %3202 = vmatpush2.bf16.msra.mxu1 %v8272_v10  ;;  %3315 = vmatpush2.bf16.msra.mxu0 %v8275_v57 }
 0x3ab   : > { %3203 = vmatprep.subr.bf16.mxu1 %v8280_v30  ;;  %3316 = vmatprep.subr.bf16.mxu0 %v8283_v45 }
 0x3ac   : > { %7168 = vmatmul.mubr.msk.bf16.gmra.mxu1 %vm795_vm0, %v9034_v47  ;;  %7176 = vmatmul.mubr.msk.bf16.gmra.mxu0 %vm795_vm0, %v9034_v47 }
 0x3ad   : > { %2126 = vmatprep.mubr.bf16.mxu1 %v12845_v0  ;;  %2239 = vmatprep.mubr.bf16.mxu0 %v12845_v0 }
 0x3ae   : > { %3204 = vmatpush2.bf16.msra.mxu1 %v8278_v52  ;;  %3317 = vmatpush2.bf16.msra.mxu0 %v8281_v28 }
 0x3af   : > { %3205 = vmatprep.subr.bf16.mxu1 %v8286_v43  ;;  %3318 = vmatprep.subr.bf16.mxu0 %v8289_v58 }
 0x3b2   : > { %3206 = vmatpush2.bf16.msra.mxu1 %v8284_v19  ;;  %3319 = vmatpush2.bf16.msra.mxu0 %v8287_v12 }
 0x3b3   : > { %3207 = vmatprep.subr.bf16.mxu1 %v8292_v35  ;;  %3320 = vmatprep.subr.bf16.mxu0 %v8295_v56 }
 0x3b4   : > { %7169 = vmatmul.mubr.msk.bf16.gmra.mxu1 %vm795_vm0, %v9035_v48  ;;  %7177 = vmatmul.mubr.msk.bf16.gmra.mxu0 %vm795_vm0, %v9035_v48 }
 0x3b6   : > { %3208 = vmatpush2.bf16.msra.mxu1 %v8290_v15  ;;  %3321 = vmatpush2.bf16.msra.mxu0 %v8293_v16 }
 0x3b7   : > { %3209 = vmatprep.subr.bf16.mxu1 %v8298_v18  ;;  %3322 = vmatprep.subr.bf16.mxu0 %v8301_v20 }
 0x3ba   : > { %3210 = vmatpush2.bf16.msra.mxu1 %v8296_v26  ;;  %3323 = vmatpush2.bf16.msra.mxu0 %v8299_v22 }
 0x3fc   : > { %v10337_v23 = vpop.f32.mrf.mxu1  ;;  %v10339_v24 = vpop.f32.mrf.mxu0 }
 0x3fe   : > { %v10341_v9 = vpop.f32.mrf.mxu1  ;;  %v10343_v46 = vpop.f32.mrf.mxu0 }
 0x400   : > { %v10345_v25 = vpop.f32.mrf.mxu1  ;;  %v10347_v29 = vpop.f32.mrf.mxu0 }
 0x402   : > { %v10349_v31 = vpop.f32.mrf.mxu1  ;;  %v10351_v47 = vpop.f32.mrf.mxu0 }
 0x404   : > { %v10353_v11 = vpop.f32.mrf.mxu1  ;;  %v10355_v27 = vpop.f32.mrf.mxu0 }
 0x406   : > { %v10357_v32 = vpop.f32.mrf.mxu1  ;;  %v10359_v33 = vpop.f32.mrf.mxu0 }
 0x408   : > { %v10361_v39 = vpop.f32.mrf.mxu1  ;;  %v10363_v42 = vpop.f32.mrf.mxu0 }
 0x40a   : > { %v10365_v44 = vpop.f32.mrf.mxu1  ;;  %v10367_v50 = vpop.f32.mrf.mxu0 }
 0x40c   : > { %v10369_v48 = vpop.f32.mrf.mxu1  ;;  %v10371_v14 = vpop.f32.mrf.mxu0 }
 0x40e   : > { %v10373_v49 = vpop.f32.mrf.mxu1  ;;  %v10375_v36 = vpop.f32.mrf.mxu0 }
 0x410   : > { %v10377_v8 = vpop.f32.mrf.mxu1  ;;  %v10379_v21 = vpop.f32.mrf.mxu0 }
 0x412   : > { %v10381_v3 = vpop.f32.mrf.mxu1  ;;  %v10383_v53 = vpop.f32.mrf.mxu0 }
 0x414   : > { %v10385_v61 = vpop.f32.mrf.mxu1  ;;  %v10387_v54 = vpop.f32.mrf.mxu0 }
 0x416   : > { %v10389_v59 = vpop.f32.mrf.mxu1  ;;  %v10391_v60 = vpop.f32.mrf.mxu0 }
 0x418   : > { %v10393_v62 = vpop.f32.mrf.mxu1  ;;  %v10395_v34 = vpop.f32.mrf.mxu0 }
 0x41a   : > { %v10397_v51 = vpop.f32.mrf.mxu1  ;;  %v10399_v6 = vpop.f32.mrf.mxu0 }
 0x41c   : > { %v10401_v17 = vpop.f32.mrf.mxu1  ;;  %v10403_v63 = vpop.f32.mrf.mxu0 }
 0x41d   : > { %12923 = vst [vmem:[#allocation33_spill] sm:$0xff] %v10403_v63  ;;  %v8302_v63 = vld [vmem:[#allocation8 + $0x78] sm:$0xff]  }
 0x41e   : > { %v10405_v5 = vpop.f32.mrf.mxu1  ;;  %v10407_v1 = vpop.f32.mrf.mxu0  ;;  %7726 = vmatprep.subr.bf16.mxu1 %v8302_v63 }
 0x41f   : > { %12924 = vst [vmem:[#allocation34_spill] sm:$0xff] %v10405_v5  ;;  %12925 = vst [vmem:[#allocation35_spill] sm:$0xff] %v10407_v1 }
 0x420   : > { %v10409_v2 = vpop.f32.mrf.mxu1  ;;  %v10411_v4 = vpop.f32.mrf.mxu0 }
 0x421   : > { %12926 = vst [vmem:[#allocation36_spill] sm:$0xff] %v10409_v2  ;;  %12927 = vst [vmem:[#allocation37_spill] sm:$0xff] %v10411_v4 }
 0x422   : > { %v10413_v7 = vpop.f32.mrf.mxu1  ;;  %v10415_v10 = vpop.f32.mrf.mxu0 }
 0x423   : > { %12928 = vst [vmem:[#allocation38_spill] sm:$0xff] %v10413_v7  ;;  %12929 = vst [vmem:[#allocation39_spill] sm:$0xff] %v10415_v10 }
 0x424   : > { %v10417_v57 = vpop.f32.mrf.mxu1  ;;  %v10419_v30 = vpop.f32.mrf.mxu0 }
 0x425   : > { %12930 = vst [vmem:[#allocation40_spill] sm:$0xff] %v10417_v57  ;;  %12931 = vst [vmem:[#allocation41_spill] sm:$0xff] %v10419_v30 }
 0x426   : > { %v10421_v45 = vpop.f32.mrf.mxu1  ;;  %v10423_v52 = vpop.f32.mrf.mxu0 }
 0x427   : > { %12932 = vst [vmem:[#allocation42_spill] sm:$0xff] %v10421_v45  ;;  %12933 = vst [vmem:[#allocation43_spill] sm:$0xff] %v10423_v52 }
 0x428   : > { %v10425_v28 = vpop.f32.mrf.mxu1  ;;  %v10427_v43 = vpop.f32.mrf.mxu0 }
 0x429   : > { %12934 = vst [vmem:[#allocation44_spill] sm:$0xff] %v10425_v28  ;;  %12935 = vst [vmem:[#allocation45_spill] sm:$0xff] %v10427_v43 }
 0x42a   : > { %v10429_v58 = vpop.f32.mrf.mxu1  ;;  %v10431_v19 = vpop.f32.mrf.mxu0 }
 0x42b   : > { %12936 = vst [vmem:[#allocation46_spill] sm:$0xff] %v10429_v58  ;;  %12937 = vst [vmem:[#allocation47_spill] sm:$0xff] %v10431_v19 }
 0x42c   : > { %v10433_v12 = vpop.f32.mrf.mxu1  ;;  %v10435_v35 = vpop.f32.mrf.mxu0 }
 0x42d   : > { %12938 = vst [vmem:[#allocation48_spill] sm:$0xff] %v10433_v12  ;;  %12939 = vst [vmem:[#allocation49_spill] sm:$0xff] %v10435_v35 }
 0x42e   : > { %v10437_v56 = vpop.f32.mrf.mxu1  ;;  %v10439_v15 = vpop.f32.mrf.mxu0 }
 0x42f   : > { %12940 = vst [vmem:[#allocation50_spill] sm:$0xff] %v10437_v56  ;;  %12941 = vst [vmem:[#allocation51_spill] sm:$0xff] %v10439_v15 }
 0x430   : > { %v10441_v16 = vpop.f32.mrf.mxu1  ;;  %v10443_v18 = vpop.f32.mrf.mxu0 }
 0x431   : > { %12942 = vst [vmem:[#allocation52_spill] sm:$0xff] %v10441_v16  ;;  %12943 = vst [vmem:[#allocation53_spill] sm:$0xff] %v10443_v18  ;;  %v2275_v18 = vpop.permute.xlu0 %2274 }
 0x432   : > { %v10445_v20 = vpop.f32.mrf.mxu1  ;;  %v10447_v26 = vpop.f32.mrf.mxu0 }
 0x433   : > { %12944 = vst [vmem:[#allocation54_spill] sm:$0xff] %v10445_v20  ;;  %12945 = vst [vmem:[#allocation55_spill] sm:$0xff] %v10447_v26  ;;  %v2273_v20 = vpop.permute.xlu1 %2272 }
 0x434   : > { %v10449_v22 = vpop.f32.mrf.mxu1  ;;  %v10451_v55 = vpop.f32.mrf.mxu0  ;;  %v10466_v26 = vsel %vm2282_vm5, %v2273_v20, %v2275_v18 }
 0x435   : > { %12946 = vst [vmem:[#allocation56_spill] sm:$0xff] %v10449_v22  ;;  %12947 = vst [vmem:[#allocation57_spill] sm:$0xff] %v10451_v55  ;;  %v2277_v28 = vpop.permute.xlu0 %2276 }
 0x436   : > { %v10453_v41 = vpop.f32.mrf.mxu1  ;;  %v10455_v0 = vpop.f32.mrf.mxu0  ;;  %v10488_v7 = vsel %vm2282_vm5, %v2275_v18, %v2277_v28 }
 0x437   : > { %12948 = vst [vmem:[#allocation58_spill] sm:$0xff] %v10453_v41  ;;  %12949 = vst [vmem:[#allocation59_spill] sm:$0xff] %v10455_v0 }
 0x438   : > { %v10457_v37 = vpop.f32.mrf.mxu1  ;;  %v10459_v38 = vpop.f32.mrf.mxu0 }
 0x439   : > { %12950 = vst [vmem:[#allocation60_spill] sm:$0xff] %v10457_v37  ;;  %12951 = vst [vmem:[#allocation61_spill] sm:$0xff] %v10459_v38 }
 0x43a   : > { %v10461_v13 = vpop.f32.mrf.mxu1  ;;  %v10463_v40 = vpop.f32.mrf.mxu0 }
 0x43b   : > { %12952 = vst [vmem:[#allocation62_spill] sm:$0xff] %v10461_v13  ;;  %12953 = vst [vmem:[#allocation63_spill] sm:$0xff] %v10463_v40 }
 0x43c   : > { %v2058_v22 = vpop.f32.mrf.mxu1  ;;  %v2171_v55 = vpop.f32.mrf.mxu0 }
 0x43d   : > { %v2059_v41 = vadd.f32 %v2058_v22, %v10337_v23  ;;  %v2279_v23 = vpop.permute.xlu1 %2278  ;;  %v2172_v45 = vadd.f32 %v2171_v55, %v10339_v24 }
 0x43e   : > { %v2060_v16 = vpop.f32.mrf.mxu1  ;;  %v2173_v0 = vpop.f32.mrf.mxu0 }
 0x43f   : > { %v10470_v37 = vadd.f32 %v10466_v26, %v2059_v41  ;;  %v2174_v2 = vadd.f32 %v2173_v0, %v10343_v46 }
 0x440   : > { %v2062_v38 = vpop.f32.mrf.mxu1  ;;  %v2175_v15 = vpop.f32.mrf.mxu0 }
 0x441   : > { %v2419_v13 = vmin.f32 %v10470_v37, 0.0  ;;  %v2063_v40 = vadd.f32 %v2062_v38, %v10345_v25  ;;  %v10480_v25 = vsel %vm2282_vm5, %v2277_v28, %v2279_v23  ;;  %vm2355_vm6 = vcmp.gt.f32.partialorder %v10470_v37, 0.0 }
 0x442   : > { %v2064_v56 = vpop.f32.mrf.mxu1  ;;  %v2177_v35 = vpop.f32.mrf.mxu0  ;;  %v10485_v10 = vadd.f32 %v10480_v25, %v2172_v45 }
 0x443   : > { %v2483_v12 = vmul.f32 1.442695, %v2419_v13  ;;  %v10475_v20 = vadd.f32 %v10466_v26, %v2063_v40  ;;  %v2061_v40 = vadd.f32 %v2060_v16, %v10341_v9  ;;  %v2065_v24 = vadd.f32 %v2064_v56, %v10349_v31 }
 0x444   : > { %v2068_v19 = vpop.f32.mrf.mxu1  ;;  %v2181_v58 = vpop.f32.mrf.mxu0  ;;  %v2178_v16 = vadd.f32 %v2177_v35, %v10351_v47  ;;  %vm2357_vm8 = vcmp.gt.f32.partialorder %v10485_v10, 0.0 }
 0x445   : > { %8580 = vpow2.f32 %v2483_v12  ;;  %v2423_v22 = vmin.f32 %v10475_v20, 0.0  ;;  %v2176_v12 = vadd.f32 %v2175_v15, %v10347_v29  ;;  %v10491_v55 = vadd.f32 %v10488_v7, %v2061_v40 }
 0x446   : > { %v2070_v41 = vpop.f32.mrf.mxu1  ;;  %v2183_v43 = vpop.f32.mrf.mxu0  ;;  %v2421_v29 = vmin.f32 %v10485_v10, 0.0  ;;  %v2069_v45 = vadd.f32 %v2068_v19, %v10353_v11  ;;  %v2182_v28 = vadd.f32 %v2181_v58, %v10355_v27  ;;  %v10508_v56 = vadd.f32 %v10488_v7, %v2065_v24 }
 0x447   : > { %v2491_v52 = vmul.f32 1.442695, %v2423_v22  ;;  %v10495_v9 = vadd.f32 %v10480_v25, %v2176_v12  ;;  %v2420_v40 = vmin.f32 %v10491_v55, 0.0  ;;  %v2071_v58 = vadd.f32 %v2070_v41, %v10357_v32 }
 0x448   : > { %v2072_v30 = vpop.f32.mrf.mxu1  ;;  %v2185_v38 = vpop.f32.mrf.mxu0  ;;  %v2487_v11 = vmul.f32 1.442695, %v2421_v29  ;;  %v10515_v27 = vadd.f32 %v10466_v26, %v2069_v45  ;;  %v2184_v24 = vadd.f32 %v2183_v43, %v10359_v33  ;;  %v2424_v29 = vmin.f32 %v10508_v56, 0.0 }
 0x449   : > { %8582 = vpow2.f32 %v2491_v52  ;;  %v2281_v52 = vpop.permute.xlu0 %2280  ;;  %v2425_v47 = vmin.f32 %v10495_v9, 0.0  ;;  %v2073_v45 = vadd.f32 %v2072_v30, %v10361_v39  ;;  %v2186_v46 = vadd.f32 %v2185_v38, %v10363_v42 }
 0x44a   : > { %v2074_v13 = vpop.f32.mrf.mxu1  ;;  %v2187_v57 = vpop.f32.mrf.mxu0  ;;  %v10505_v31 = vsel %vm2282_vm5, %v2279_v23, %v2281_v52  ;;  %v10520_v23 = vadd.f32 %v10480_v25, %v2182_v28  ;;  %vm2359_vm7 = vcmp.gt.f32.partialorder %v10475_v20, 0.0  ;;  %8584 = vpow2.f32 %v2487_v11 }
 0x44b   : > { %v10512_v35 = vadd.f32 %v10505_v31, %v2178_v16  ;;  %v2485_v16 = vmul.f32 1.442695, %v2420_v40  ;;  %v2495_v41 = vmul.f32 1.442695, %v2425_v47  ;;  %v2427_v33 = vmin.f32 %v10515_v27, 0.0 }
 0x44c   : > { %v2078_v22 = vpop.f32.mrf.mxu1  ;;  %v2191_v4 = vpop.f32.mrf.mxu0  ;;  %v10531_v43 = vadd.f32 %v10488_v7, %v2071_v58  ;;  %v10541_v30 = vadd.f32 %v10505_v31, %v2184_v24  ;;  %v10546_v40 = vadd.f32 %v10466_v26, %v2073_v45  ;;  %v2075_v63 = vadd.f32 %v2074_v13, %v10365_v44 }
 0x44d   : > { %v2426_v0 = vmin.f32 %v10512_v35, 0.0  ;;  %8586 = vpow2.f32 %v2495_v41  ;;  %v2188_v11 = vadd.f32 %v2187_v57, %v10367_v50  ;;  %v2499_v58 = vmul.f32 1.442695, %v2427_v33 }
 0x44e   : > { %v10501_v15 = vpop.f32.mrf.mxu1  ;;  %v2193_v12 = vpop.f32.mrf.mxu0  ;;  %v2079_v24 = vadd.f32 %v2078_v22, %v10369_v48  ;;  %8588 = vpow2.f32 %v2485_v16  ;;  %v2430_v44 = vmin.f32 %v10541_v30, 0.0  ;;  %v2192_v13 = vadd.f32 %v2191_v4, %v10371_v14 }
 0x44f   : > { %v2497_v47 = vmul.f32 1.442695, %v2426_v0  ;;  %v2431_v41 = vmin.f32 %v10546_v40, 0.0  ;;  %v10562_v50 = vadd.f32 %v10488_v7, %v2075_v63  ;;  %v2081_v22 = vadd.f32 %v10501_v15, %v10373_v49 }
 0x450   : > { %v2082_v52 = vpop.f32.mrf.mxu1  ;;  %v2195_v5 = vpop.f32.mrf.mxu0  ;;  %v10572_v4 = vadd.f32 %v10466_v26, %v2079_v24  ;;  %v2194_v16 = vadd.f32 %v2193_v12, %v10375_v36  ;;  %vm2361_vm9 = vcmp.gt.f32.partialorder %v10495_v9, 0.0  ;;  %vm2356_vm10 = vcmp.gt.f32.partialorder %v10491_v55, 0.0 }
 0x451   : > { %v2196_v57 = vadd.f32 %v2195_v5, %v10379_v21  ;;  %v10576_v21 = vadd.f32 %v10480_v25, %v2192_v13  ;;  %v2083_v5 = vadd.f32 %v2082_v52, %v10377_v8  ;;  %v10586_v12 = vadd.f32 %v10488_v7, %v2081_v22 }
 0x452   : > { %v8581_v18 = vpop.eup %8580  ;;  %v2084_v42 = vpop.f32.mrf.mxu1  ;;  %12954 = vst [vmem:[#allocation64_spill] sm:$0xff] %v10572_v4  ;;  %v2435_v8 = vmin.f32 %v10572_v4, 0.0  ;;  %v10591_v52 = vadd.f32 %v10505_v31, %v2194_v16  ;;  %vm2365_vm11 = vcmp.gt.f32.partialorder %v10520_v23, 0.0  ;;  %vm2360_vm12 = vcmp.gt.f32.partialorder %v10508_v56, 0.0 }
 0x453   : > { %v7178_v19 = vadd.f32 -1.0, %v8581_v18  ;;  %v2493_v18 = vmul.f32 1.442695, %v2424_v29  ;;  %v10556_v29 = vadd.f32 %v10505_v31, %v2174_v2  ;;  %v10567_v2 = vadd.f32 %v10505_v31, %v2188_v11 }
 0x454   : > { %v10581_v49 = vadd.f32 %v10480_v25, %v2196_v57  ;;  %v2085_v11 = vadd.f32 %v2084_v42, %v10381_v3  ;;  %v10597_v24 = vadd.f32 %v10466_v26, %v2083_v5  ;;  %vm2373_vm14 = vcmp.gt.f32.partialorder %v10576_v21, 0.0 }
 0x455   : > { %v10534_v28 = vsel %vm2355_vm6, %v10470_v37, %v7178_v19  ;;  %v2197_v37 = vpop.f32.mrf.mxu0  ;;  %v2428_v19 = vmin.f32 %v10531_v43, 0.0  ;;  %8590 = vpow2.f32 %v2493_v18  ;;  %v2432_v18 = vmin.f32 %v10562_v50, 0.0 }
 0x456   : > { %v8583_v1 = vpop.eup %8582  ;;  %8592 = vpow2.f32 %v2497_v47  ;;  %v2434_v36 = vmin.f32 %v10567_v2, 0.0  ;;  %12955 = vst [vmem:[#allocation65_spill] sm:$0xff] %v10597_v24  ;;  %v2439_v16 = vmin.f32 %v10597_v24, 0.0  ;;  %vm2377_vm15 = vcmp.gt.f32.partialorder %v10581_v49, 0.0 }
 0x457   : > { %v7182_v32 = vadd.f32 -1.0, %v8583_v1  ;;  %v2429_v1 = vmin.f32 %v10520_v23, 0.0  ;;  %v2201_v0 = vpop.f32.mrf.mxu0  ;;  %8594 = vpow2.f32 %v2499_v58  ;;  %v2501_v14 = vmul.f32 1.442695, %v2428_v19  ;;  %v8585_v19 = vpop.eup %8584 }
 0x458   : > { %v2198_v58 = vadd.f32 %v2197_v37, %v10383_v53  ;;  %v2509_v42 = vmul.f32 1.442695, %v2432_v18  ;;  %v2513_v13 = vmul.f32 1.442695, %v2434_v36  ;;  %vm2364_vm1 = vcmp.gt.f32.partialorder %v10531_v43, 0.0 }
 0x459   : > { %v10537_v39 = vsel %vm2359_vm7, %v10475_v20, %v7182_v32  ;;  %v10550_v20 = vadd.f32 %v10480_v25, %v2186_v46  ;;  %v2503_v45 = vmul.f32 1.442695, %v2429_v1  ;;  %v2088_v32 = vpop.f32.mrf.mxu1  ;;  %v2505_v46 = vmul.f32 1.442695, %v2430_v44  ;;  %v2203_v63 = vpop.f32.mrf.mxu0 }
 0x45a   : > { %v2507_v1 = vmul.f32 1.442695, %v2431_v41  ;;  %v2089_v15 = vadd.f32 %v2088_v32, %v10385_v61  ;;  %v2437_v61 = vmin.f32 %v10576_v21, 0.0  ;;  %v2441_v44 = vmin.f32 %v10581_v49, 0.0  ;;  %v8587_v57 = vpop.eup %8586 }
 0x45b   : > { %v2433_v48 = vmin.f32 %v10550_v20, 0.0  ;;  %8596 = vpow2.f32 %v2503_v45  ;;  %v2090_v33 = vpop.f32.mrf.mxu1  ;;  %v2202_v45 = vadd.f32 %v2201_v0, %v10387_v54  ;;  %v2205_v37 = vpop.f32.mrf.mxu0  ;;  %v2436_v32 = vmin.f32 %v10586_v12, 0.0 }
 0x45c   : > { %8598 = vpow2.f32 %v2501_v14  ;;  %v10603_v53 = vadd.f32 %v10466_v26, %v2089_v15  ;;  %v10607_v41 = vadd.f32 %v10488_v7, %v2085_v11  ;;  %v2515_v54 = vmul.f32 1.442695, %v2435_v8  ;;  %v10619_v18 = vpop.eup %8588 }
 0x45d   : > { %v2511_v47 = vmul.f32 1.442695, %v2433_v48  ;;  %8600 = vpow2.f32 %v2505_v46  ;;  %v2092_v3 = vpop.f32.mrf.mxu1  ;;  %v2438_v0 = vmin.f32 %v10591_v52, 0.0  ;;  %v10611_v48 = vadd.f32 %v10505_v31, %v2198_v58  ;;  %v2207_v11 = vpop.f32.mrf.mxu0 }
 0x45e   : > { %8602 = vpow2.f32 %v2507_v1  ;;  %12956 = vst [vmem:[#allocation66_spill] sm:$0xff] %v10607_v41  ;;  %v2091_v22 = vadd.f32 %v2090_v33, %v10389_v59  ;;  %v2519_v14 = vmul.f32 1.442695, %v2437_v61  ;;  %v10616_v46 = vadd.f32 %v10480_v25, %v2202_v45 }
 0x45f   : > { %8604 = vpow2.f32 %v2511_v47  ;;  %12957 = vst [vmem:[#allocation67_spill] sm:$0xff] %v10611_v48  ;;  %v2204_v5 = vadd.f32 %v2203_v63, %v10391_v60  ;;  %v2094_v1 = vpop.f32.mrf.mxu1  ;;  %v7180_v15 = vadd.f32 -1.0, %v8585_v19  ;;  %v2527_v47 = vmul.f32 1.442695, %v2441_v44  ;;  %v2211_v38 = vpop.f32.mrf.mxu0 }
 0x460   : > { %8606 = vpow2.f32 %v2509_v42  ;;  %v2443_v36 = vmin.f32 %v10603_v53, 0.0  ;;  %v7184_v58 = vadd.f32 -1.0, %v8587_v57  ;;  %v2517_v59 = vmul.f32 1.442695, %v2436_v32 }
 0x461   : > { %8608 = vpow2.f32 %v2513_v13  ;;  %v2440_v33 = vmin.f32 %v10607_v41, 0.0  ;;  %v2521_v45 = vmul.f32 1.442695, %v2438_v0  ;;  %v2442_v60 = vmin.f32 %v10611_v48, 0.0  ;;  %v2098_v32 = vpop.f32.mrf.mxu1 }
 0x462   : > { %v8591_v8 = vpop.eup %8590  ;;  %8610 = vpow2.f32 %v2515_v54  ;;  %v10627_v63 = vadd.f32 %v10488_v7, %v2091_v22  ;;  %v2523_v42 = vmul.f32 1.442695, %v2439_v16  ;;  %v2445_v44 = vmin.f32 %v10616_v46, 0.0 }
 0x463   : > { %v10623_v61 = vpop.eup %8592  ;;  %8612 = vpow2.f32 %v2519_v14  ;;  %v10633_v13 = vadd.f32 %v10505_v31, %v2204_v5  ;;  %v10638_v54 = vsel %vm2357_vm8, %v10485_v10, %v7180_v15  ;;  %v2531_v0 = vmul.f32 1.442695, %v2443_v36  ;;  %v2100_v36 = vpop.f32.mrf.mxu1 }
 0x464   : > { %12958 = vst [vmem:[#allocation68_spill] sm:$0xff] %v10627_v63  ;;  %v10629_v19 = vpop.eup %8594  ;;  %8614 = vpow2.f32 %v2527_v47  ;;  %v2093_v22 = vadd.f32 %v2092_v3, %v10393_v62  ;;  %v10645_v14 = vsel %vm2361_vm9, %v10495_v9, %v7184_v58  ;;  %v2525_v16 = vmul.f32 1.442695, %v2440_v33 }
 0x465   : > { %12959 = vst [vmem:[#allocation69_spill] sm:$0xff] %v10633_v13  ;;  %8616 = vpow2.f32 %v2517_v59  ;;  %v2206_v5 = vadd.f32 %v2205_v37, %v10395_v34  ;;  %v2529_v48 = vmul.f32 1.442695, %v2442_v60  ;;  %v2444_v10 = vmin.f32 %v10627_v63, 0.0 }
 0x466   : > { %8618 = vpow2.f32 %v2521_v45  ;;  %v2095_v15 = vadd.f32 %v2094_v1, %v10397_v51  ;;  %v2535_v62 = vmul.f32 1.442695, %v2445_v44  ;;  %v2446_v3 = vmin.f32 %v10633_v13, 0.0  ;;  %v2213_v1 = vpop.f32.mrf.mxu0 }
 0x467   : > { %8620 = vpow2.f32 %v2523_v42  ;;  %v2208_v9 = vadd.f32 %v2207_v11, %v10399_v6  ;;  %v10660_v37 = vadd.f32 %v10466_v26, %v2093_v22  ;;  %v2099_v51 = vadd.f32 %v2098_v32, %v10401_v17  ;;  %v12960_v6 = vld [vmem:[#allocation33_spill] sm:$0xff] }
 0x468   : > { %v8597_v57 = vpop.eup %8596  ;;  %8622 = vpow2.f32 %v2531_v0  ;;  %v10666_v45 = vadd.f32 %v10480_v25, %v2206_v5  ;;  %v2212_v11 = vadd.f32 %v2211_v38, %v12960_v6  ;;  %v2533_v42 = vmul.f32 1.442695, %v2444_v10  ;;  %v12962_v0 = vld [vmem:[#allocation34_spill] sm:$0xff]  ;;  %v2102_v10 = vpop.f32.mrf.mxu1 }
 0x469   : > { %v10650_v47 = vpop.eup %8598  ;;  %v7188_v33 = vadd.f32 -1.0, %v8597_v57  ;;  %8624 = vpow2.f32 %v2525_v16  ;;  %v10670_v44 = vadd.f32 %v10488_v7, %v2095_v15  ;;  %v2101_v22 = vadd.f32 %v2100_v36, %v12962_v0  ;;  %v12964_v57 = vld [vmem:[#allocation35_spill] sm:$0xff]  ;;  %v2215_v6 = vpop.f32.mrf.mxu0 }
 0x46a   : > { %v10655_v58 = vpop.eup %8600  ;;  %8626 = vpow2.f32 %v2529_v48  ;;  %v2537_v17 = vmul.f32 1.442695, %v2446_v3  ;;  %v10674_v32 = vadd.f32 %v10505_v31, %v2208_v9  ;;  %v2214_v16 = vadd.f32 %v2213_v1, %v12964_v57 }
 0x46b   : > { %v10663_v59 = vpop.eup %8602  ;;  %12961 = vst [vmem:[#allocation33_spill] sm:$0xff] %v10670_v44  ;;  %8628 = vpow2.f32 %v2535_v62  ;;  %v2447_v5 = vmin.f32 %v10660_v37, 0.0  ;;  %v10679_v34 = vadd.f32 %v10466_v26, %v2099_v51  ;;  %v7179_v38 = vadd.f32 -1.0, %v10619_v18  ;;  %v2217_v4 = vpop.f32.mrf.mxu0 }
 0x46c   : > { %v8605_v60 = vpop.eup %8604  ;;  %12963 = vst [vmem:[#allocation34_spill] sm:$0xff] %v10674_v32  ;;  %v7183_v48 = vadd.f32 -1.0, %v8591_v8  ;;  %v2449_v36 = vmin.f32 %v10666_v45, 0.0  ;;  %v10686_v62 = vadd.f32 %v10480_v25, %v2212_v11  ;;  %v2422_v3 = vmin.f32 %v10556_v29, 0.0 }
 0x46d   : > { %v10682_v15 = vpop.eup %8606  ;;  %vm2369_vm13 = vcmp.gt.f32.partialorder %v10550_v20, 0.0  ;;  %v2448_v51 = vmin.f32 %v10670_v44, 0.0  ;;  %v10695_v18 = vadd.f32 %v10488_v7, %v2101_v22  ;;  %v2676_v8 = vsel %vm2356_vm10, %v10491_v55, %v7179_v38  ;;  %v8303_v22 = vld [vmem:[#allocation8 + $0x38] sm:$0xff]  }
 0x46e   : > { %12965 = vst [vmem:[#allocation35_spill] sm:$0xff] %v10686_v62  ;;  %v10690_v9 = vpop.eup %8608  ;;  %v2680_v1 = vsel %vm2360_vm12, %v10508_v56, %v7183_v48  ;;  %v2450_v0 = vmin.f32 %v10674_v32, 0.0  ;;  %v10706_v57 = vadd.f32 %v10505_v31, %v2214_v16  ;;  %v2489_v13 = vmul.f32 1.442695, %v2422_v3  ;;  %v2104_v48 = vpop.f32.mrf.mxu1  ;;  %v12972_v32 = vld [vmem:[#allocation37_spill] sm:$0xff] }
 0x46f   : > { %12966 = vst [vmem:[#allocation70_spill] sm:$0xff] %v10695_v18  ;;  %v10701_v11 = vpop.eup %8610  ;;  %v2740_v44 = vpack.c.bf16 %v2680_v1, %v2676_v8  ;;  %v10711_v55 = vsel %vm2365_vm11, %v10520_v23, %v7188_v33  ;;  %8630 = vpow2.f32 %v2533_v42  ;;  %v2539_v56 = vmul.f32 1.442695, %v2447_v5  ;;  %v12971_v42 = vld [vmem:[#allocation36_spill] sm:$0xff] }
 0x470   : > { %12967 = vst [vmem:[#allocation71_spill] sm:$0xff] %v10701_v11  ;;  %v8613_v63 = vpop.eup %8612  ;;  %12968 = vst [vmem:[#allocation72_spill] sm:$0xff] %v10711_v55  ;;  %v2451_v38 = vmin.f32 %v10679_v34, 0.0  ;;  %v8304_v11 = vld [vmem:[#allocation8 + $0x70] sm:$0xff]   ;;  %v2543_v16 = vmul.f32 1.442695, %v2449_v36  ;;  %8632 = vpow2.f32 %v2489_v13  ;;  %v12970_v33 = vpack.c.bf16 %v10537_v39, %v10534_v28  ;;  %v2108_v39 = vpop.f32.mrf.mxu1 }
 0x471   : > { %v8615_v41 = vpop.eup %8614  ;;  %v2453_v8 = vmin.f32 %v10686_v62, 0.0  ;;  %3211 = vmatprep.mubr.bf16.mxu1 %v2740_v44  ;;  %v2541_v1 = vmul.f32 1.442695, %v2448_v51  ;;  %v2452_v23 = vmin.f32 %v10695_v18, 0.0  ;;  %v2103_v5 = vadd.f32 %v2102_v10, %v12971_v42  ;;  %v8305_v51 = vld [vmem:[#allocation8 + $0x30] sm:$0xff]   ;;  %v8306_v10 = vld [vmem:[#allocation8 + $0x68] sm:$0xff]  }
 0x472   : > { %v10716_v3 = vpop.eup %8616  ;;  %3212 = vmatmul.mubr.bf16.vlgmr.msra.gmra.mxu1 %v12970_v33  ;;  %v2216_v24 = vadd.f32 %v2215_v6, %v12972_v32  ;;  %v7192_v36 = vadd.f32 -1.0, %v8605_v60  ;;  %8634 = vpow2.f32 %v2537_v17  ;;  %v2545_v44 = vmul.f32 1.442695, %v2450_v0  ;;  %v12973_v33 = vld [vmem:[#allocation38_spill] sm:$0xff]  ;;  %v12974_v17 = vld [vmem:[#allocation39_spill] sm:$0xff] }
 0x473   : > { %12969 = vst [vmem:[#allocation73_spill] sm:$0xff] %v10716_v3  ;;  %v10724_v55 = vpop.eup %8618  ;;  %v2454_v13 = vmin.f32 %v10706_v57, 0.0  ;;  %7727 = vmatpush3.bf16.msra.mxu1 %v8303_v22  ;;  %v7196_v18 = vadd.f32 -1.0, %v8613_v63  ;;  %v7200_v3 = vadd.f32 -1.0, %v8615_v41  ;;  %8636 = vpow2.f32 %v2539_v56 }
 0x474   : > { %v10727_v62 = vpop.eup %8620  ;;  %v2547_v28 = vmul.f32 1.442695, %v2451_v38  ;;  %7728 = vmatprep.subr.bf16.mxu1 %v8304_v11  ;;  %8638 = vpow2.f32 %v2543_v16  ;;  %v2551_v6 = vmul.f32 1.442695, %v2453_v8  ;;  %v2105_v60 = vadd.f32 %v2104_v48, %v12973_v33  ;;  %v2221_v38 = vpop.f32.mrf.mxu0  ;;  %v8307_v48 = vld [vmem:[#allocation8 + $0x28] sm:$0xff]  }
 0x475   : > { %v8623_v32 = vpop.eup %8622  ;;  %v2218_v0 = vadd.f32 %v2217_v4, %v12974_v17  ;;  %8640 = vpow2.f32 %v2541_v1  ;;  %v2549_v22 = vmul.f32 1.442695, %v2452_v23  ;;  %v10735_v41 = vadd.f32 %v10466_v26, %v2103_v5  ;;  %v2110_v23 = vpop.f32.mrf.mxu1 }
 0x476   : > { %v10731_v42 = vpop.eup %8624  ;;  %v10738_v63 = vadd.f32 %v10480_v25, %v2216_v24  ;;  %v10745_v56 = vsel %vm2369_vm13, %v10550_v20, %v7192_v36  ;;  %vm2379_vm2 = vcmp.gt.f32.partialorder %v10603_v53, 0.0  ;;  %8642 = vpow2.f32 %v2545_v44  ;;  %v8308_v20 = vld [vmem:[#allocation8 + $0x60] sm:$0xff]   ;;  %v12975_v44 = vld [vmem:[#allocation40_spill] sm:$0xff] }
 0x477   : > { %v10740_v11 = vpop.eup %8626  ;;  %v2553_v4 = vmul.f32 1.442695, %v2454_v13  ;;  %7729 = vmatpush3.bf16.msra.mxu1 %v8305_v51  ;;  %v10751_v24 = vsel %vm2373_vm14, %v10576_v21, %v7196_v18  ;;  %v7202_v8 = vadd.f32 -1.0, %v8623_v32  ;;  %8644 = vpow2.f32 %v2547_v28  ;;  %v2112_v33 = vpop.f32.mrf.mxu1 }
 0x478   : > { %v8629_v16 = vpop.eup %8628  ;;  %v7185_v1 = vadd.f32 -1.0, %v10623_v61  ;;  %7730 = vmatprep.subr.bf16.mxu1 %v8306_v10  ;;  %vm2366_vm3 = vcmp.gt.f32.partialorder %v10541_v30, 0.0  ;;  %v10758_v5 = vsel %vm2377_vm15, %v10581_v49, %v7200_v3  ;;  %8646 = vpow2.f32 %v2551_v6  ;;  %v2223_v3 = vpop.f32.mrf.mxu0  ;;  %v12976_v10 = vld [vmem:[#allocation41_spill] sm:$0xff]  ;;  %v12977_v6 = vld [vmem:[#allocation42_spill] sm:$0xff] }
 0x479   : > { %v10761_v36 = vadd.f32 %v10488_v7, %v2105_v60  ;;  %v10764_v21 = vadd.f32 %v10505_v31, %v2218_v0  ;;  %vm2363_vm6 = vcmp.gt.f32.partialorder %v10515_v27, 0.0  ;;  %vm2367_vm7 = vcmp.gt.f32.partialorder %v10546_v40, 0.0 }
 0x47a   : > { %8648 = vpow2.f32 %v2549_v22  ;;  %v2455_v61 = vmin.f32 %v10735_v41, 0.0  ;;  %v2457_v18 = vmin.f32 %v10738_v63, 0.0  ;;  %v2109_v13 = vadd.f32 %v2108_v39, %v12975_v44 }
 0x47b   : > { %v10771_v49 = vadd.f32 -1.0, %v8629_v16  ;;  %8650 = vpow2.f32 %v2553_v4  ;;  %vm2358_vm8 = vcmp.gt.f32.partialorder %v10556_v29, 0.0  ;;  %vm2362_vm9 = vcmp.gt.f32.partialorder %v10512_v35, 0.0  ;;  %7731 = vmatpush3.bf16.msra.mxu1 %v8307_v48 }
 0x47c   : > { %v10778_v51 = vsel %vm2379_vm2, %v10603_v53, %v7202_v8  ;;  %v2682_v28 = vsel %vm2362_vm9, %v10512_v35, %v7185_v1  ;;  %v2222_v32 = vadd.f32 %v2221_v38, %v12976_v10  ;;  %v2111_v39 = vadd.f32 %v2110_v23, %v12977_v6  ;;  %7732 = vmatprep.subr.bf16.mxu1 %v8308_v20  ;;  %v10783_v60 = vpop.eup %8630 }
 0x47d   : > { %v2456_v17 = vmin.f32 %v10761_v36, 0.0  ;;  %v2458_v0 = vmin.f32 %v10764_v21, 0.0  ;;  %v7187_v22 = vadd.f32 -1.0, %v10650_v47  ;;  %v7191_v4 = vadd.f32 -1.0, %v10682_v15  ;;  %v8633_v53 = vpop.eup %8632  ;;  %v2225_v47 = vpop.f32.mrf.mxu0 }
 0x47e   : > { %v2555_v48 = vmul.f32 1.442695, %v2455_v61  ;;  %v2559_v16 = vmul.f32 1.442695, %v2457_v18  ;;  %v10790_v35 = vadd.f32 %v10466_v26, %v2109_v13  ;;  %vm2368_vm10 = vcmp.gt.f32.partialorder %v10562_v50, 0.0  ;;  %v2114_v13 = vpop.f32.mrf.mxu1 }
 0x47f   : > { %v7181_v38 = vadd.f32 -1.0, %v8633_v53  ;;  %v2684_v8 = vsel %vm2364_vm1, %v10531_v43, %v7187_v22  ;;  %v2688_v1 = vsel %vm2368_vm10, %v10562_v50, %v7191_v4  ;;  %v7189_v23 = vadd.f32 -1.0, %v10655_v58  ;;  %v10798_v20 = vpop.eup %8634 }
 0x480   : > { %v10801_v15 = vadd.f32 %v10480_v25, %v2222_v32  ;;  %v10804_v61 = vadd.f32 %v10488_v7, %v2111_v39  ;;  %v2744_v18 = vpack.c.bf16 %v2688_v1, %v2684_v8  ;;  %v7193_v44 = vadd.f32 -1.0, %v10690_v9  ;;  %v8637_v10 = vpop.eup %8636  ;;  %v12978_v39 = vld [vmem:[#allocation43_spill] sm:$0xff]  ;;  %v12980_v1 = vld [vmem:[#allocation45_spill] sm:$0xff] }
 0x481   : > { %vm2381_vm11 = vcmp.gt.f32.partialorder %v10616_v46, 0.0  ;;  %v2678_v43 = vsel %vm2358_vm8, %v10556_v29, %v7181_v38  ;;  %vm2370_vm12 = vcmp.gt.f32.partialorder %v10567_v2, 0.0  ;;  %v7186_v50 = vadd.f32 -1.0, %v10629_v19  ;;  %v8639_v32 = vpop.eup %8638  ;;  %v2227_v38 = vpop.f32.mrf.mxu0 }
 0x482   : > { %v7190_v58 = vadd.f32 -1.0, %v10663_v59  ;;  %v2742_v6 = vpack.c.bf16 %v2682_v28, %v2678_v43  ;;  %v2224_v22 = vadd.f32 %v2223_v3, %v12978_v39  ;;  %3221 = vmatprep.mubr.bf16.mxu1 %v2744_v18  ;;  %v2686_v9 = vsel %vm2366_vm3, %v10541_v30, %v7189_v23  ;;  %v10819_v53 = vpop.eup %8640  ;;  %v12979_v3 = vld [vmem:[#allocation44_spill] sm:$0xff] }
 0x483   : > { %v2690_v4 = vsel %vm2370_vm12, %v10567_v2, %v7193_v44  ;;  %vm2383_vm13 = vcmp.gt.f32.partialorder %v10660_v37, 0.0  ;;  %v2683_v19 = vsel %vm2363_vm6, %v10515_v27, %v7186_v50  ;;  %v2113_v28 = vadd.f32 %v2112_v33, %v12979_v3  ;;  %v10829_v8 = vpop.eup %8642  ;;  %v12981_v27 = vld [vmem:[#allocation46_spill] sm:$0xff]  ;;  %v2118_v44 = vpop.f32.mrf.mxu1 }
 0x484   : > { %v2746_v29 = vpack.c.bf16 %v2690_v4, %v2686_v9  ;;  %v2687_v59 = vsel %vm2367_vm7, %v10546_v40, %v7190_v58  ;;  %vm2385_vm14 = vcmp.gt.f32.partialorder %v10666_v45, 0.0  ;;  %vm2387_vm15 = vcmp.gt.f32.partialorder %v10679_v34, 0.0  ;;  %3324 = vmatprep.mubr.bf16.mxu0 %v2742_v6  ;;  %v8645_v43 = vpop.eup %8644 }
 0x485   : > { %v2459_v30 = vmin.f32 %v10790_v35, 0.0  ;;  %v2743_v2 = vpack.c.bf16 %v2687_v59, %v2683_v19  ;;  %v2226_v23 = vadd.f32 %v2225_v47, %v12980_v1  ;;  %v2115_v18 = vadd.f32 %v2114_v13, %v12981_v27  ;;  %v8647_v6 = vpop.eup %8646  ;;  %v12984_v19 = vld [vmem:[#allocation48_spill] sm:$0xff]  ;;  %v2231_v59 = vpop.f32.mrf.mxu0 }
 0x486   : > { %v7206_v40 = vadd.f32 -1.0, %v8637_v10  ;;  %v12982_v33 = vpack.c.bf16 %v10645_v14, %v10638_v54  ;;  %v2557_v50 = vmul.f32 1.442695, %v2456_v17  ;;  %v2461_v58 = vmin.f32 %v10801_v15, 0.0  ;;  %v12983_v17 = vld [vmem:[#allocation47_spill] sm:$0xff] }
 0x487   : > { %v10841_v39 = vadd.f32 %v10466_v26, %v2113_v28  ;;  %v2561_v9 = vmul.f32 1.442695, %v2458_v0  ;;  %v2460_v4 = vmin.f32 %v10804_v61, 0.0  ;;  %v10845_v47 = vadd.f32 %v10505_v31, %v2224_v22  ;;  %3222 = vmatmul.mubr.bf16.gmra.mxu1 %v2743_v2  ;;  %v10850_v54 = vpop.eup %8648  ;;  %v2120_v2 = vpop.f32.mrf.mxu1 }
 0x488   : > { %3325 = vmatmul.mubr.bf16.vlgmr.msra.gmra.mxu0 %v12982_v33  ;;  %v10848_v13 = vadd.f32 %v10480_v25, %v2226_v23  ;;  %8652 = vpow2.f32 %v2555_v48  ;;  %v10853_v14 = vadd.f32 %v10488_v7, %v2115_v18  ;;  %v2228_v10 = vadd.f32 %v2227_v38, %v12983_v17  ;;  %v10857_v3 = vpop.eup %8650  ;;  %v2233_v33 = vpop.f32.mrf.mxu0 }
 0x489   : > { %3334 = vmatprep.mubr.bf16.mxu0 %v2746_v29  ;;  %v2119_v0 = vadd.f32 %v2118_v44, %v12984_v19  ;;  %v7208_v22 = vadd.f32 -1.0, %v8639_v32  ;;  %8654 = vpow2.f32 %v2559_v16  ;;  %v2563_v29 = vmul.f32 1.442695, %v2459_v30  ;;  %v12985_v30 = vld [vmem:[#allocation72_spill] sm:$0xff] }
 0x48a   : > { %v2463_v28 = vmin.f32 %v10841_v39, 0.0  ;;  %vm2372_vm1 = vcmp.gt.f32.partialorder %v10586_v12, 0.0  ;;  %v7210_v1 = vadd.f32 -1.0, %v8645_v43  ;;  %8656 = vpow2.f32 %v2557_v50  ;;  %v12987_v50 = vld [vmem:[#allocation49_spill] sm:$0xff] }
 0x48b   : > { %v2567_v48 = vmul.f32 1.442695, %v2461_v58  ;;  %v2465_v23 = vmin.f32 %v10848_v13, 0.0  ;;  %vm2374_vm2 = vcmp.gt.f32.partialorder %v10591_v52, 0.0  ;;  %v10867_v38 = vsel %vm2381_vm11, %v10616_v46, %v10771_v49 }
 0x48c   : > { %8658 = vpow2.f32 %v2561_v9  ;;  %v2565_v16 = vmul.f32 1.442695, %v2460_v4  ;;  %v2462_v32 = vmin.f32 %v10845_v47, 0.0  ;;  %v2745_v27 = vpack.c.bf16 %v10745_v56, %v12985_v30  ;;  %v2122_v9 = vpop.f32.mrf.mxu1  ;;  %v12988_v56 = vld [vmem:[#allocation64_spill] sm:$0xff]  ;;  %v12989_v4 = vld [vmem:[#allocation65_spill] sm:$0xff] }
 0x48d   : > { %v2464_v18 = vmin.f32 %v10853_v14, 0.0  ;;  %v10874_v44 = vadd.f32 %v10505_v31, %v2228_v10  ;;  %v10877_v43 = vadd.f32 %v10466_v26, %v2119_v0  ;;  %v10882_v46 = vsel %vm2383_vm13, %v10660_v37, %v7206_v40  ;;  %v12990_v0 = vld [vmem:[#allocation50_spill] sm:$0xff] }
 0x48e   : > { %8660 = vpow2.f32 %v2563_v29  ;;  %v2571_v49 = vmul.f32 1.442695, %v2463_v28  ;;  %v2232_v58 = vadd.f32 %v2231_v59, %v12987_v50  ;;  %vm2371_vm3 = vcmp.gt.f32.partialorder %v12988_v56, 0.0  ;;  %v2235_v50 = vpop.f32.mrf.mxu0 }
 0x48f   : > { %12986 = vst [vmem:[#allocation36_spill] sm:$0xff] %v10877_v43  ;;  %vm2375_vm6 = vcmp.gt.f32.partialorder %v12989_v4, 0.0  ;;  %v10890_v17 = vsel %vm2385_vm14, %v10666_v45, %v7208_v22  ;;  %v10895_v10 = vsel %vm2387_vm15, %v10679_v34, %v7210_v1  ;;  %8662 = vpow2.f32 %v2567_v48  ;;  %v12991_v22 = vld [vmem:[#allocation73_spill] sm:$0xff]  ;;  %v12993_v1 = vld [vmem:[#allocation51_spill] sm:$0xff] }
 0x490   : > { %3335 = vmatmul.mubr.bf16.gmra.mxu0 %v2745_v27  ;;  %v2575_v37 = vmul.f32 1.442695, %v2465_v23  ;;  %v10897_v40 = vadd.f32 -1.0, %v8647_v6  ;;  %8664 = vpow2.f32 %v2565_v16  ;;  %v2569_v19 = vmul.f32 1.442695, %v2462_v32  ;;  %v2124_v23 = vpop.f32.mrf.mxu1  ;;  %v12994_v16 = vld [vmem:[#allocation35_spill] sm:$0xff] }
 0x491   : > { %v2121_v59 = vadd.f32 %v2120_v2, %v12990_v0  ;;  %v10900_v29 = vmul.f32 1.442695, %v2464_v18  ;;  %v2466_v28 = vmin.f32 %v10874_v44, 0.0  ;;  %v2467_v45 = vmin.f32 %v10877_v43, 0.0  ;;  %v12995_v2 = vld [vmem:[#allocation66_spill] sm:$0xff]  ;;  %v12997_v0 = vld [vmem:[#allocation71_spill] sm:$0xff] }
 0x492   : > { %v7195_v30 = vadd.f32 -1.0, %v12991_v22  ;;  %8666 = vpow2.f32 %v2571_v49  ;;  %v10906_v34 = vadd.f32 %v10480_v25, %v2232_v58  ;;  %v2234_v6 = vadd.f32 %v2233_v33, %v12993_v1  ;;  %v2237_v22 = vpop.f32.mrf.mxu0 }
 0x493   : > { %v7199_v48 = vadd.f32 -1.0, %v10731_v42  ;;  %vm2389_vm7 = vcmp.gt.f32.partialorder %v12994_v16, 0.0  ;;  %8668 = vpow2.f32 %v2575_v37  ;;  %vm2376_vm8 = vcmp.gt.f32.partialorder %v12995_v2, 0.0  ;;  %v12996_v42 = vld [vmem:[#allocation67_spill] sm:$0xff] }
 0x494   : > { %12992 = vst [vmem:[#allocation37_spill] sm:$0xff] %v10906_v34  ;;  %v7197_v32 = vadd.f32 -1.0, %v10724_v55  ;;  %v7201_v27 = vadd.f32 -1.0, %v10740_v11  ;;  %v10915_v18 = vadd.f32 %v10488_v7, %v2121_v59  ;;  %v2692_v49 = vsel %vm2372_vm1, %v10586_v12, %v7195_v30 }
 0x495   : > { %v2696_v33 = vsel %vm2376_vm8, %v12995_v2, %v7199_v48  ;;  %vm2378_vm9 = vcmp.gt.f32.partialorder %v12996_v42, 0.0  ;;  %v7194_v11 = vadd.f32 -1.0, %v12997_v0  ;;  %v8653_v59 = vpop.eup %8652  ;;  %vm2391_vm10 = vcmp.gt.f32.partialorder %v10735_v41, 0.0  ;;  %v2128_v2 = vpop.f32.mrf.mxu1 }
 0x496   : > { %v2748_v58 = vpack.c.bf16 %v2696_v33, %v2692_v49  ;;  %v2694_v37 = vsel %vm2374_vm2, %v10591_v52, %v7197_v32  ;;  %v2698_v55 = vsel %vm2378_vm9, %v12996_v42, %v7201_v27  ;;  %vm2393_vm11 = vcmp.gt.f32.partialorder %v10738_v63, 0.0  ;;  %v8655_v49 = vpop.eup %8654  ;;  %v12998_v27 = vld [vmem:[#allocation52_spill] sm:$0xff]  ;;  %v12999_v42 = vld [vmem:[#allocation54_spill] sm:$0xff] }
 0x497   : > { %v2577_v12 = vmul.f32 1.442695, %v2466_v28  ;;  %v10930_v30 = vadd.f32 %v10505_v31, %v2234_v6  ;;  %v2750_v1 = vpack.c.bf16 %v2698_v55, %v2694_v37  ;;  %v7198_v48 = vadd.f32 -1.0, %v10727_v62  ;;  %v10938_v43 = vpop.eup %8656  ;;  %v13000_v6 = vld [vmem:[#allocation53_spill] sm:$0xff]  ;;  %v13001_v37 = vld [vmem:[#allocation55_spill] sm:$0xff] }
 0x498   : > { %v2469_v52 = vmin.f32 %v10906_v34, 0.0  ;;  %3231 = vmatprep.mubr.bf16.mxu1 %v2748_v58  ;;  %v2749_v32 = vpack.c.bf16 %v10758_v5, %v10751_v24  ;;  %v2123_v33 = vadd.f32 %v2122_v9, %v12998_v27  ;;  %v2125_v0 = vadd.f32 %v2124_v23, %v12999_v42  ;;  %v13010_v34 = vld [vmem:[#allocation59_spill] sm:$0xff] }
 0x499   : > { %3344 = vmatprep.mubr.bf16.mxu0 %v2750_v1  ;;  %v2691_v28 = vsel %vm2371_vm3, %v12988_v56, %v7194_v11  ;;  %v2695_v62 = vsel %vm2375_vm6, %v12989_v4, %v7198_v48  ;;  %v2236_v58 = vadd.f32 %v2235_v50, %v13000_v6  ;;  %v2238_v55 = vadd.f32 %v2237_v22, %v13001_v37  ;;  %v10948_v24 = vpop.eup %8658  ;;  %v2241_v11 = vpop.f32.mrf.mxu0  ;;  %v13006_v6 = vld [vmem:[#allocation58_spill] sm:$0xff] }
 0x49a   : > { %vm2395_vm12 = vcmp.gt.f32.partialorder %v10790_v35, 0.0  ;;  %v2468_v5 = vmin.f32 %v10915_v18, 0.0  ;;  %v2747_v9 = vpack.c.bf16 %v2695_v62, %v2691_v28  ;;  %3345 = vmatmul.mubr.bf16.gmra.mxu0 %v2749_v32  ;;  %v10953_v23 = vadd.f32 %v10466_v26, %v2123_v33  ;;  %v2130_v1 = vpop.f32.mrf.mxu1  ;;  %v13004_v32 = vld [vmem:[#allocation56_spill] sm:$0xff] }
 0x49b   : > { %v10956_v56 = vadd.f32 %v10488_v7, %v2125_v0  ;;  %8670 = vpow2.f32 %v2569_v19  ;;  %v2579_v4 = vmul.f32 1.442695, %v2467_v45  ;;  %v2470_v50 = vmin.f32 %v10930_v30, 0.0  ;;  %v8661_v48 = vpop.eup %8660 }
 0x49c   : > { %13002 = vst [vmem:[#allocation38_spill] sm:$0xff] %v10953_v23  ;;  %v10960_v22 = vadd.f32 %v10505_v31, %v2238_v55  ;;  %v7214_v27 = vadd.f32 -1.0, %v8653_v59  ;;  %v7216_v42 = vadd.f32 -1.0, %v8655_v49  ;;  %v2583_v28 = vmul.f32 1.442695, %v2469_v52  ;;  %3232 = vmatmul.mubr.bf16.gmra.mxu1 %v2747_v9  ;;  %v8663_v62 = vpop.eup %8662  ;;  %v13005_v49 = vld [vmem:[#allocation68_spill] sm:$0xff]  ;;  %v2243_v55 = vpop.f32.mrf.mxu0 }
 0x49d   : > { %v2129_v33 = vadd.f32 %v2128_v2, %v13004_v32  ;;  %v10967_v19 = vsel %vm2389_vm7, %v12994_v16, %v10897_v40  ;;  %8672 = vpow2.f32 %v10900_v29  ;;  %v2471_v45 = vmin.f32 %v10953_v23, 0.0  ;;  %v10974_v59 = vpop.eup %8664  ;;  %v13007_v32 = vld [vmem:[#allocation69_spill] sm:$0xff] }
 0x49e   : > { %13003 = vst [vmem:[#allocation39_spill] sm:$0xff] %v10960_v22  ;;  %v10972_v0 = vadd.f32 %v10480_v25, %v2236_v58  ;;  %vm2380_vm13 = vcmp.gt.f32.partialorder %v13005_v49, 0.0  ;;  %8674 = vpow2.f32 %v2577_v12  ;;  %v2581_v2 = vmul.f32 1.442695, %v2468_v5 }
 0x49f   : > { %v2472_v52 = vmin.f32 %v10956_v56, 0.0  ;;  %v2131_v37 = vadd.f32 %v2130_v1, %v13006_v6  ;;  %v7218_v40 = vadd.f32 -1.0, %v8661_v48  ;;  %8676 = vpow2.f32 %v2579_v4  ;;  %v8667_v9 = vpop.eup %8666  ;;  %v13009_v48 = vld [vmem:[#allocation57_spill] sm:$0xff] }
 0x4a0   : > { %v2585_v16 = vmul.f32 1.442695, %v2470_v50  ;;  %v2474_v29 = vmin.f32 %v10960_v22, 0.0  ;;  %vm2382_vm14 = vcmp.gt.f32.partialorder %v13007_v32, 0.0  ;;  %v10984_v58 = vsel %vm2391_vm10, %v10735_v41, %v7214_v27  ;;  %v8669_v4 = vpop.eup %8668 }
 0x4a1   : > { %v10989_v12 = vsel %vm2393_vm11, %v10738_v63, %v7216_v42  ;;  %8678 = vpow2.f32 %v2583_v28  ;;  %v10992_v5 = vadd.f32 %v10466_v26, %v2129_v33  ;;  %v2587_v50 = vmul.f32 1.442695, %v2471_v45  ;;  %v2132_v33 = vpop.f32.mrf.mxu1 }
 0x4a2   : > { %v2473_v1 = vmin.f32 %v10972_v0, 0.0  ;;  %v2242_v6 = vadd.f32 %v2241_v11, %v13009_v48  ;;  %v2244_v23 = vadd.f32 %v2243_v55, %v13010_v34  ;;  %v10997_v22 = vadd.f32 -1.0, %v8663_v62  ;;  %v2245_v11 = vpop.f32.mrf.mxu0  ;;  %v13013_v55 = vld [vmem:[#allocation70_spill] sm:$0xff] }
 0x4a3   : > { %13008 = vst [vmem:[#allocation40_spill] sm:$0xff] %v10992_v5  ;;  %8680 = vpow2.f32 %v2581_v2  ;;  %v2589_v41 = vmul.f32 1.442695, %v2472_v52  ;;  %v11000_v27 = vadd.f32 %v10488_v7, %v2131_v37  ;;  %v11005_v63 = vsel %vm2395_vm12, %v10790_v35, %v7218_v40 }
 0x4a4   : > { %v11007_v42 = vadd.f32 -1.0, %v8667_v9  ;;  %8682 = vpow2.f32 %v2585_v16  ;;  %v2593_v28 = vmul.f32 1.442695, %v2474_v29  ;;  %v11009_v45 = vadd.f32 -1.0, %v8669_v4  ;;  %v13014_v16 = vld [vmem:[#allocation33_spill] sm:$0xff]  ;;  %v2134_v4 = vpop.f32.mrf.mxu1 }
 0x4a5   : > { %13011 = vst [vmem:[#allocation41_spill] sm:$0xff] %v11000_v27  ;;  %v2475_v34 = vmin.f32 %v10992_v5, 0.0  ;;  %v11013_v62 = vadd.f32 %v10505_v31, %v2244_v23  ;;  %v7203_v2 = vadd.f32 -1.0, %v10783_v60  ;;  %8684 = vpow2.f32 %v2587_v50  ;;  %v13018_v5 = vld [vmem:[#allocation62_spill] sm:$0xff] }
 0x4a6   : > { %v2591_v52 = vmul.f32 1.442695, %v2473_v1  ;;  %v11017_v35 = vadd.f32 %v10480_v25, %v2242_v6  ;;  %v7207_v37 = vadd.f32 -1.0, %v10819_v53  ;;  %vm2388_vm15 = vcmp.gt.f32.partialorder %v13013_v55, 0.0  ;;  %v2247_v53 = vpop.f32.mrf.mxu0  ;;  %v13015_v6 = vld [vmem:[#allocation34_spill] sm:$0xff] }
 0x4a7   : > { %13012 = vst [vmem:[#allocation42_spill] sm:$0xff] %v11013_v62  ;;  %8686 = vpow2.f32 %v2589_v41  ;;  %v2476_v40 = vmin.f32 %v11000_v27, 0.0  ;;  %vm2384_vm1 = vcmp.gt.f32.partialorder %v13014_v16, 0.0  ;;  %v7205_v29 = vadd.f32 -1.0, %v10798_v20 }
 0x4a8   : > { %8688 = vpow2.f32 %v2593_v28  ;;  %v2700_v60 = vsel %vm2380_vm13, %v13005_v49, %v7203_v2  ;;  %v2704_v23 = vsel %vm2384_vm1, %v13014_v16, %v7207_v37  ;;  %v7209_v9 = vadd.f32 -1.0, %v10829_v8  ;;  %v11029_v50 = vpop.eup %8670  ;;  %v13016_v28 = vld [vmem:[#allocation60_spill] sm:$0xff]  ;;  %v13017_v2 = vld [vmem:[#allocation61_spill] sm:$0xff] }
 0x4a9   : > { %v2478_v1 = vmin.f32 %v11013_v62, 0.0  ;;  %v2752_v48 = vpack.c.bf16 %v2704_v23, %v2700_v60  ;;  %vm2386_vm2 = vcmp.gt.f32.partialorder %v13015_v6, 0.0  ;;  %v2751_v20 = vpack.c.bf16 %v10882_v46, %v10778_v51  ;;  %v13019_v51 = vld [vmem:[#allocation63_spill] sm:$0xff] }
 0x4aa   : > { %v2702_v49 = vsel %vm2382_vm14, %v13007_v32, %v7205_v29  ;;  %v2706_v41 = vsel %vm2386_vm2, %v13015_v6, %v7209_v9  ;;  %v2133_v8 = vadd.f32 %v2132_v33, %v13016_v28  ;;  %v2246_v37 = vadd.f32 %v2245_v11, %v13017_v2  ;;  %v11041_v16 = vpop.eup %8672 }
 0x4ab   : > { %vm2390_vm3 = vcmp.gt.f32.partialorder %v10706_v57, 0.0  ;;  %v2597_v60 = vmul.f32 1.442695, %v2476_v40  ;;  %3241 = vmatprep.mubr.bf16.mxu1 %v2752_v48  ;;  %v2754_v23 = vpack.c.bf16 %v2706_v41, %v2702_v49  ;;  %v2135_v62 = vadd.f32 %v2134_v4, %v13018_v5  ;;  %v11046_v27 = vpop.eup %8674 }
 0x4ac   : > { %v2248_v46 = vadd.f32 %v2247_v53, %v13019_v51  ;;  %vm2399_vm6 = vcmp.gt.f32.partialorder %v10841_v39, 0.0  ;;  %3242 = vmatmul.mubr.bf16.gmra.mxu1 %v2751_v20  ;;  %v2753_v32 = vpack.c.bf16 %v10890_v17, %v10867_v38  ;;  %v11052_v33 = vadd.f32 %v10466_v26, %v2133_v8  ;;  %v11058_v29 = vpop.eup %8676  ;;  %v8309_v8 = vld [vmem:[#allocation8 + $0x20] sm:$0xff]  }
 0x4ad   : > { %v11055_v11 = vadd.f32 %v10480_v25, %v2246_v37  ;;  %v7211_v40 = vadd.f32 -1.0, %v10850_v54  ;;  %v2601_v5 = vmul.f32 1.442695, %v2478_v1  ;;  %3354 = vmatprep.mubr.bf16.mxu0 %v2754_v23  ;;  %v11061_v9 = vadd.f32 %v10488_v7, %v2135_v62  ;;  %7733 = vmatpush3.bf16.msra.mxu1 %v8309_v8 }
 0x4ae   : > { %v11064_v4 = vadd.f32 %v10505_v31, %v2248_v46  ;;  %v7215_v38 = vadd.f32 -1.0, %v10938_v43  ;;  %v11067_v17 = vpop.eup %8678  ;;  %vm2401_vm7 = vcmp.gt.f32.partialorder %v10848_v13, 0.0  ;;  %8690 = vpow2.f32 %v2591_v52  ;;  %3355 = vmatmul.mubr.bf16.gmra.mxu0 %v2753_v32 }
 0x4af   : > { %v2595_v26 = vmul.f32 1.442695, %v2475_v34  ;;  %v2477_v25 = vmin.f32 %v11017_v35, 0.0  ;;  %v2479_v54 = vmin.f32 %v11052_v33, 0.0  ;;  %vm2396_vm8 = vcmp.gt.f32.partialorder %v10804_v61, 0.0 }
 0x4b0   : > { %vm2398_vm9 = vcmp.gt.f32.partialorder %v10845_v47, 0.0  ;;  %v2481_v7 = vmin.f32 %v11055_v11, 0.0  ;;  %v2480_v31 = vmin.f32 %v11061_v9, 0.0  ;;  %v2482_v43 = vmin.f32 %v11064_v4, 0.0  ;;  %v8681_v62 = vpop.eup %8680 }
 0x4b1   : > { %vm2392_vm10 = vcmp.gt.f32.partialorder %v10761_v36, 0.0  ;;  %8692 = vpow2.f32 %v2597_v60  ;;  %v2603_v34 = vmul.f32 1.442695, %v2479_v54  ;;  %v2708_v52 = vsel %vm2388_vm15, %v13013_v55, %v7211_v40  ;;  %v8683_v1 = vpop.eup %8682 }
 0x4b2   : > { %v2712_v53 = vsel %vm2392_vm10, %v10761_v36, %v7215_v38  ;;  %8694 = vpow2.f32 %v2601_v5  ;;  %v2605_v48 = vmul.f32 1.442695, %v2480_v31  ;;  %v2609_v6 = vmul.f32 1.442695, %v2482_v43  ;;  %v8685_v2 = vpop.eup %8684  ;;  %v13020_v5 = vld [vmem:[#allocation39_spill] sm:$0xff] }
 0x4b3   : > { %v2756_v20 = vpack.c.bf16 %v2712_v53, %v2708_v52  ;;  %vm2404_vm11 = vcmp.gt.f32.partialorder %v10915_v18, 0.0  ;;  %8696 = vpow2.f32 %v2595_v26  ;;  %v2599_v49 = vmul.f32 1.442695, %v2477_v25  ;;  %v13022_v52 = vld [vmem:[#allocation32_spill] sm:$0xff] }
 0x4b4   : > { %v7213_v41 = vadd.f32 -1.0, %v10857_v3  ;;  %v7217_v28 = vadd.f32 -1.0, %v10948_v24  ;;  %8698 = vpow2.f32 %v2603_v34  ;;  %v2607_v37 = vmul.f32 1.442695, %v2481_v7  ;;  %v8687_v55 = vpop.eup %8686 }
 0x4b5   : > { %3251 = vmatprep.mubr.bf16.mxu1 %v2756_v20  ;;  %vm2394_vm12 = vcmp.gt.f32.partialorder %v10764_v21, 0.0  ;;  %v2755_v36 = vpack.c.bf16 %v10984_v58, %v10895_v10  ;;  %vm2397_vm13 = vcmp.gt.f32.partialorder %v10801_v15, 0.0  ;;  %vm2406_vm14 = vcmp.gt.f32.partialorder %v10930_v30, 0.0  ;;  %v8689_v60 = vpop.eup %8688  ;;  %v13024_v20 = vld [vmem:[#allocation36_spill] sm:$0xff] }
 0x4b6   : > { %8700 = vpow2.f32 %v2605_v48  ;;  %v2710_v3 = vsel %vm2390_vm3, %v10706_v57, %v7213_v41  ;;  %v2714_v24 = vsel %vm2394_vm12, %v10764_v21, %v7217_v28  ;;  %v2719_v23 = vsel %vm2399_vm6, %v10841_v39, %v11007_v42  ;;  %v13026_v28 = vld [vmem:[#allocation37_spill] sm:$0xff] }
 0x4b7   : > { %8702 = vpow2.f32 %v2609_v6  ;;  %v2758_v10 = vpack.c.bf16 %v2714_v24, %v2710_v3  ;;  %3252 = vmatmul.mubr.bf16.gmra.mxu1 %v2755_v36  ;;  %v7219_v58 = vadd.f32 -1.0, %v10974_v59  ;;  %v2757_v51 = vpack.c.bf16 %v10989_v12, %v10967_v19  ;;  %v13028_v3 = vld [vmem:[#allocation42_spill] sm:$0xff] }
 0x4b8   : > { %8704 = vpow2.f32 %v2599_v49  ;;  %v7223_v57 = vadd.f32 -1.0, %v11041_v16  ;;  %v7221_v21 = vadd.f32 -1.0, %v11029_v50  ;;  %v2721_v46 = vsel %vm2401_vm7, %v10848_v13, %v11009_v45 }
 0x4b9   : > { %8706 = vpow2.f32 %v2607_v37  ;;  %3364 = vmatprep.mubr.bf16.mxu0 %v2758_v10  ;;  %vm2400_vm15 = vcmp.gt.f32.partialorder %v10853_v14, 0.0  ;;  %v7225_v39 = vadd.f32 -1.0, %v11046_v27  ;;  %v2716_v19 = vsel %vm2396_vm8, %v10804_v61, %v7219_v58 }
 0x4ba   : > { %3365 = vmatmul.mubr.bf16.gmra.mxu0 %v2757_v51  ;;  %v2720_v59 = vsel %vm2400_vm15, %v10853_v14, %v7223_v57  ;;  %vm2402_vm1 = vcmp.gt.f32.partialorder %v10874_v44, 0.0  ;;  %v2718_v12 = vsel %vm2398_vm9, %v10845_v47, %v7221_v21  ;;  %v7227_v45 = vadd.f32 -1.0, %v8681_v62  ;;  %v13021_v62 = vld [vmem:[#allocation31_spill] sm:$0xff] }
 0x4bb   : > { %v2760_v13 = vpack.c.bf16 %v2720_v59, %v2716_v19  ;;  %v2722_v42 = vsel %vm2402_vm1, %v10874_v44, %v7225_v39  ;;  %v7231_v50 = vadd.f32 -1.0, %v8687_v55  ;;  %vm2408_vm2 = vcmp.gt.f32.partialorder %v10956_v56, 0.0  ;;  %v8691_v40 = vpop.eup %8690  ;;  %v2835_v44 = vld [vmem:[%s12827_s15 + $0x7] sm:$0x7] }
 0x4bc   : > { %v2762_v16 = vpack.c.bf16 %v2722_v42, %v2718_v12  ;;  %v7229_v27 = vadd.f32 -1.0, %v8683_v1  ;;  %v7233_v32 = vadd.f32 -1.0, %v8689_v60  ;;  %v2759_v61 = vpack.c.bf16 %v2719_v23, %v11005_v63  ;;  %v13023_v1 = vld [vmem:[#allocation38_spill] sm:$0xff]  ;;  %v13027_v55 = vld [vmem:[#allocation41_spill] sm:$0xff] }
 0x4bd   : > { %3261 = vmatprep.mubr.bf16.mxu1 %v2760_v13  ;;  %v2724_v14 = vsel %vm2404_vm11, %v10915_v18, %v7227_v45  ;;  %v2728_v47 = vsel %vm2408_vm2, %v10956_v56, %v7231_v50  ;;  %vm2410_vm3 = vcmp.gt.f32.partialorder %v13020_v5, 0.0  ;;  %v7230_v38 = vadd.f32 -1.0, %v8685_v2  ;;  %v13029_v45 = vld [vmem:[#allocation40_spill] sm:$0xff] }
 0x4be   : > { %3374 = vmatprep.mubr.bf16.mxu0 %v2762_v16  ;;  %v2764_v26 = vpack.c.bf16 %v2728_v47, %v2724_v14  ;;  %v2726_v25 = vsel %vm2406_vm14, %v10930_v30, %v7229_v27  ;;  %v2730_v63 = vsel %vm2410_vm3, %v13020_v5, %v7233_v32  ;;  %v8693_v54 = vpop.eup %8692  ;;  %v2717_v18 = vsel %vm2397_vm13, %v10801_v15, %v10997_v22  ;;  %v8312_v14 = vld [vmem:[#allocation8 + $0x50] sm:$0xff]   ;;  %v8314_v5 = vld [vmem:[#allocation8 + $0x48] sm:$0xff]  }
 0x4bf   : > { %3262 = vmatmul.mubr.bf16.gmra.mxu1 %v2759_v61  ;;  %v2766_v56 = vpack.c.bf16 %v2730_v63, %v2726_v25  ;;  %v8695_v7 = vpop.eup %8694  ;;  %v7226_v31 = vadd.f32 -1.0, %v11058_v29  ;;  %v2761_v43 = vpack.c.bf16 %v2721_v46, %v2717_v18  ;;  %v2844_v34 = vrot.slane %v2835_v44, %v13021_v62  ;;  %v13025_v29 = vld [vmem:[#allocation30_spill] sm:$0xff]  ;;  %v8311_v61 = vld [vmem:[#allocation8 + $0x18] sm:$0xff]   ;;  %v8313_v47 = vld [vmem:[#allocation8 + $0x10] sm:$0xff]  }
 0x4c0   : > { %3271 = vmatprep.mubr.bf16.mxu1 %v2764_v26  ;;  %v2848_v53 = vrot.slane %v2835_v44, %v13022_v52  ;;  %v8697_v30 = vpop.eup %8696  ;;  %vm2407_vm6 = vcmp.gt.f32.partialorder %v13023_v1, 0.0  ;;  %v7232_v48 = vadd.f32 -1.0, %v8691_v40  ;;  %vm2403_vm7 = vcmp.gt.f32.partialorder %v13024_v20, 0.0  ;;  %v8320_v26 = vld [vmem:[#allocation11 + $0xc] ss:$16 sps:$4 sm:$0xff]  }
 0x4c1   : > { %v8699_v6 = vpop.eup %8698  ;;  %v2727_v15 = vsel %vm2407_vm6, %v13023_v1, %v7230_v38  ;;  %v7235_v22 = vadd.f32 -1.0, %v8693_v54  ;;  %3171 = vrot.lane.b32.xlu1 %v2844_v34, %s9355_s24  ;;  %v2840_v49 = vrot.slane %v2835_v44, %v13025_v29  ;;  %vm2405_vm8 = vcmp.gt.f32.partialorder %v13026_v28, 0.0  ;;  %v8315_v44 = vld [vmem:[#allocation8 + $0x8] sm:$0xff]   ;;  %v8317_v38 = vld [vmem:[#allocation8] sm:$0xff]  }
 0x4c2   : > { %3375 = vmatmul.mubr.bf16.gmra.mxu0 %v2761_v43  ;;  %v7228_v8 = vadd.f32 -1.0, %v11067_v17  ;;  %vm2409_vm9 = vcmp.gt.f32.partialorder %v10972_v0, 0.0  ;;  %v7237_v2 = vadd.f32 -1.0, %v8695_v7  ;;  %3173 = vrot.lane.b32.xlu0 %v2848_v53, %s9355_s24  ;;  %v2723_v36 = vsel %vm2403_vm7, %v13024_v20, %v7226_v31 }
 0x4c3   : > { %v8701_v41 = vpop.eup %8700  ;;  %3384 = vmatprep.mubr.bf16.mxu0 %v2766_v56  ;;  %vm2412_vm10 = vcmp.gt.f32.partialorder %v13027_v55, 0.0  ;;  %vm2414_vm11 = vcmp.gt.f32.partialorder %v13028_v3, 0.0  ;;  %v2729_v23 = vsel %vm2409_vm9, %v10972_v0, %v7232_v48  ;;  %v2763_v10 = vpack.c.bf16 %v2727_v15, %v2723_v36 }
 0x4c4   : > { %v8703_v37 = vpop.eup %8702  ;;  %v7239_v24 = vadd.f32 -1.0, %v8701_v41  ;;  %vm2416_vm12 = vcmp.gt.f32.partialorder %v11061_v9, 0.0  ;;  %v7238_v51 = vadd.f32 -1.0, %v8699_v6  ;;  %v2732_v57 = vsel %vm2412_vm10, %v13027_v55, %v7235_v22 }
 0x4c5   : > { %v8705_v60 = vpop.eup %8704  ;;  %v7241_v17 = vadd.f32 -1.0, %v8703_v37  ;;  %vm2418_vm13 = vcmp.gt.f32.partialorder %v11064_v4, 0.0  ;;  %3169 = vrot.lane.b32.xlu1 %v2840_v49, %s9355_s24  ;;  %v2725_v46 = vsel %vm2405_vm8, %v13026_v28, %v7228_v8  ;;  %v2734_v39 = vsel %vm2414_vm11, %v13028_v3, %v7237_v2 }
 0x4c6   : > { %v8707_v58 = vpop.eup %8706  ;;  %v2736_v21 = vsel %vm2416_vm12, %v11061_v9, %v7239_v24  ;;  %v7234_v59 = vadd.f32 -1.0, %v8697_v30  ;;  %v2765_v12 = vpack.c.bf16 %v2729_v23, %v2725_v46  ;;  %vm2415_vm14 = vcmp.gt.f32.partialorder %v11052_v33, 0.0 }
 0x4c7   : > { %3272 = vmatmul.mubr.bf16.gmra.mxu1 %v2763_v10  ;;  %v2768_v0 = vpack.c.bf16 %v2736_v21, %v2732_v57  ;;  %v2738_v19 = vsel %vm2418_vm13, %v11064_v4, %v7241_v17  ;;  %v7240_v9 = vadd.f32 -1.0, %v8707_v58  ;;  %v2735_v42 = vsel %vm2415_vm14, %v11052_v33, %v7238_v51  ;;  %v8310_v33 = vld [vmem:[#allocation8 + $0x58] sm:$0xff]  }
 0x4c8   : > { %v2770_v13 = vpack.c.bf16 %v2738_v19, %v2734_v39  ;;  %vm2411_vm15 = vcmp.gt.f32.partialorder %v13029_v45, 0.0  ;;  %v7236_v50 = vadd.f32 -1.0, %v8705_v60  ;;  %vm2417_vm1 = vcmp.gt.f32.partialorder %v11055_v11, 0.0  ;;  %7734 = vmatprep.subr.bf16.mxu1 %v8310_v33 }
 0x4c9   : > { %3281 = vmatprep.mubr.bf16.mxu1 %v2768_v0  ;;  %v2731_v16 = vsel %vm2411_vm15, %v13029_v45, %v7234_v59  ;;  %v2737_v4 = vsel %vm2417_vm1, %v11055_v11, %v7240_v9  ;;  %vm2413_vm2 = vcmp.gt.f32.partialorder %v11017_v35, 0.0  ;;  %7735 = vmatpush3.bf16.msra.mxu1 %v8311_v61  ;;  %v8316_v11 = vld [vmem:[#allocation8 + $0x40] sm:$0xff]  }
 0x4ca   : > { %3385 = vmatmul.mubr.bf16.gmra.mxu0 %v2765_v12  ;;  %v2767_v27 = vpack.c.bf16 %v2735_v42, %v2731_v16  ;;  %v2733_v32 = vsel %vm2413_vm2, %v11017_v35, %v7236_v50  ;;  %7736 = vmatprep.subr.bf16.mxu1 %v8312_v14  ;;  %v3645_v35 = vld [vmem:[%s12827_s15 + $0x9] sm:$0x3] }
 0x4cb   : > { %3394 = vmatprep.mubr.bf16.mxu0 %v2770_v13  ;;  %v2769_v40 = vpack.c.bf16 %v2737_v4, %v2733_v32  ;;  %v3650_v25 = vrot.slane %v3645_v35, %v13025_v29  ;;  %v3654_v63 = vrot.slane %v3645_v35, %v13021_v62 }
 0x4cd   : > { %7737 = vmatpush3.bf16.msra.mxu1 %v8313_v47  ;;  %3751 = vrot.lane.b32.xlu0 %v3650_v25, %s9355_s24 }
 0x4ce   : > { %7738 = vmatprep.subr.bf16.mxu1 %v8314_v5  ;;  %3753 = vrot.lane.b32.xlu1 %v3654_v63, %s9355_s24 }
 0x4cf   : > { %3282 = vmatmul.mubr.bf16.gmra.mxu1 %v2767_v27 }
 0x4d1   : > { %7739 = vmatpush3.bf16.msra.mxu1 %v8315_v44 }
 0x4d2   : > { %3395 = vmatmul.mubr.bf16.gmra.mxu0 %v2769_v40  ;;  %7740 = vmatprep.subr.bf16.mxu1 %v8316_v11 }
 0x4d5   : > { %7741 = vmatpush3.bf16.msra.mxu1 %v8317_v38 }
 0x4d6   : > { %4359 = vmatprep.subr.bf16.mxu1 %v8320_v26 }
 0x532   : > { %v3213_v18 = vpop.f32.mrf.mxu1 }
 0x533   : > { %v3172_v54 = vpop.permute.xlu1 %3171 }
 0x534   : > { %v3215_v56 = vpop.f32.mrf.mxu1  ;;  %v3174_v31 = vpop.permute.xlu0 %3173 }
 0x535   : > { %v11183_v53 = vsel %vm2282_vm5, %v3172_v54, %v3174_v31 }
 0x536   : > { %v3217_v43 = vpop.f32.mrf.mxu1  ;;  %v3216_v48 = vadd.f32 %v3215_v56, %v11183_v53 }
 0x537   : > { %v3170_v7 = vpop.permute.xlu1 %3169 }
 0x538   : > { %v11180_v34 = vsel %vm2282_vm5, %v3170_v7, %v3172_v54  ;;  %v3219_v1 = vpop.f32.mrf.mxu1 }
 0x539   : > { %v3214_v30 = vadd.f32 %v3213_v18, %v11180_v34  ;;  %v3218_v15 = vadd.f32 %v3217_v43, %v11180_v34  ;;  %v3220_v37 = vadd.f32 %v3219_v1, %v11183_v53 }
 0x547   : > { %v3223_v22 = vpop.f32.mrf.mxu1 }
 0x548   : > { %v3326_v6 = vpop.f32.mrf.mxu0  ;;  %v3224_v24 = vadd.f32 %v3223_v22, %v11180_v34 }
 0x549   : > { %v11187_v20 = vadd.f32 %v3326_v6, %v3214_v30  ;;  %v3225_v8 = vpop.f32.mrf.mxu1 }
 0x54a   : > { %v3328_v49 = vpop.f32.mrf.mxu0  ;;  %v3226_v58 = vadd.f32 %v3225_v8, %v11183_v53 }
 0x54b   : > { %v3437_v41 = vmin.f32 %v11187_v20, 0.0  ;;  %v11191_v28 = vadd.f32 %v3328_v49, %v3216_v48  ;;  %v3227_v60 = vpop.f32.mrf.mxu1  ;;  %vm3405_vm3 = vcmp.gt.f32.partialorder %v11187_v20, 0.0 }
 0x54c   : > { %v3330_v2 = vpop.f32.mrf.mxu0  ;;  %v3228_v0 = vadd.f32 %v3227_v60, %v11180_v34 }
 0x54d   : > { %v3469_v36 = vmul.f32 1.442695, %v3437_v41  ;;  %v3438_v55 = vmin.f32 %v11191_v28, 0.0  ;;  %v11195_v3 = vadd.f32 %v3330_v2, %v3218_v15  ;;  %v3229_v39 = vpop.f32.mrf.mxu1  ;;  %vm3406_vm7 = vcmp.gt.f32.partialorder %v11191_v28, 0.0 }
 0x54e   : > { %v3332_v23 = vpop.f32.mrf.mxu0  ;;  %v3230_v45 = vadd.f32 %v3229_v39, %v11183_v53 }
 0x54f   : > { %v3471_v10 = vmul.f32 1.442695, %v3438_v55  ;;  %v3439_v17 = vmin.f32 %v11195_v3, 0.0  ;;  %v11200_v51 = vadd.f32 %v3332_v23, %v3220_v37  ;;  %8708 = vpow2.f32 %v3469_v36 }
 0x550   : > { %v3336_v57 = vpop.f32.mrf.mxu0  ;;  %vm3407_vm6 = vcmp.gt.f32.partialorder %v11195_v3, 0.0 }
 0x551   : > { %v3473_v21 = vmul.f32 1.442695, %v3439_v17  ;;  %v11202_v46 = vadd.f32 %v3336_v57, %v3224_v24  ;;  %8710 = vpow2.f32 %v3471_v10  ;;  %v3440_v19 = vmin.f32 %v11200_v51, 0.0 }
 0x552   : > { %v3338_v59 = vpop.f32.mrf.mxu0  ;;  %vm3408_vm8 = vcmp.gt.f32.partialorder %v11200_v51, 0.0 }
 0x553   : > { %8712 = vpow2.f32 %v3473_v21  ;;  %v3441_v12 = vmin.f32 %v11202_v46, 0.0  ;;  %v11207_v13 = vadd.f32 %v3338_v59, %v3226_v58  ;;  %v3475_v9 = vmul.f32 1.442695, %v3440_v19 }
 0x554   : > { %v3340_v42 = vpop.f32.mrf.mxu0  ;;  %vm3409_vm10 = vcmp.gt.f32.partialorder %v11202_v46, 0.0 }
 0x555   : > { %v3477_v50 = vmul.f32 1.442695, %v3441_v12  ;;  %v3442_v16 = vmin.f32 %v11207_v13, 0.0  ;;  %v11211_v4 = vadd.f32 %v3340_v42, %v3228_v0  ;;  %8714 = vpow2.f32 %v3475_v9  ;;  %v8318_v0 = vld [vmem:[#allocation11 + $0x8] ss:$16 sps:$4 sm:$0xff]  }
 0x556   : > { %v3342_v27 = vpop.f32.mrf.mxu0  ;;  %vm3410_vm11 = vcmp.gt.f32.partialorder %v11207_v13, 0.0 }
 0x557   : > { %v3479_v32 = vmul.f32 1.442695, %v3442_v16  ;;  %v3443_v40 = vmin.f32 %v11211_v4, 0.0  ;;  %v11214_v33 = vadd.f32 %v3342_v27, %v3230_v45  ;;  %8716 = vpow2.f32 %v3477_v50 }
 0x558   : > { %vm3411_vm9 = vcmp.gt.f32.partialorder %v11211_v4, 0.0 }
 0x559   : > { %v3481_v61 = vmul.f32 1.442695, %v3443_v40  ;;  %8718 = vpow2.f32 %v3479_v32  ;;  %v3444_v14 = vmin.f32 %v11214_v33, 0.0  ;;  %vm3412_vm12 = vcmp.gt.f32.partialorder %v11214_v33, 0.0 }
 0x55a   : > { %v3346_v47 = vpop.f32.mrf.mxu0 }
 0x55b   : > { %8720 = vpow2.f32 %v3481_v61  ;;  %v3483_v5 = vmul.f32 1.442695, %v3444_v14 }
 0x55c   : > { %v3233_v44 = vpop.f32.mrf.mxu1  ;;  %v3348_v38 = vpop.f32.mrf.mxu0 }
 0x55d   : > { %v3234_v11 = vadd.f32 %v3233_v44, %v11180_v34  ;;  %v8709_v35 = vpop.eup %8708  ;;  %8722 = vpow2.f32 %v3483_v5 }
 0x55e   : > { %v3235_v26 = vpop.f32.mrf.mxu1  ;;  %v8711_v25 = vpop.eup %8710  ;;  %v7306_v15 = vadd.f32 -1.0, %v8709_v35 }
 0x55f   : > { %v11218_v63 = vadd.f32 %v3346_v47, %v3234_v11  ;;  %v3236_v54 = vadd.f32 %v3235_v26, %v11183_v53  ;;  %v3350_v43 = vpop.f32.mrf.mxu0  ;;  %v7307_v48 = vadd.f32 -1.0, %v8711_v25 }
 0x560   : > { %v8713_v18 = vpop.eup %8712  ;;  %v3237_v56 = vpop.f32.mrf.mxu1  ;;  %v3565_v57 = vsel %vm3405_vm3, %v11187_v20, %v7306_v15 }
 0x561   : > { %v7308_v7 = vadd.f32 -1.0, %v8713_v18  ;;  %v11221_v31 = vadd.f32 %v3348_v38, %v3236_v54  ;;  %v3238_v30 = vadd.f32 %v3237_v56, %v11180_v34  ;;  %v3445_v22 = vmin.f32 %v11218_v63, 0.0  ;;  %v3352_v55 = vpop.f32.mrf.mxu0 }
 0x562   : > { %v3239_v1 = vpop.f32.mrf.mxu1  ;;  %v8715_v6 = vpop.eup %8714  ;;  %v3566_v10 = vsel %vm3406_vm7, %v11191_v28, %v7307_v48  ;;  %vm3413_vm1 = vcmp.gt.f32.partialorder %v11218_v63, 0.0 }
 0x563   : > { %v3446_v49 = vmin.f32 %v11221_v31, 0.0  ;;  %v11228_v41 = vadd.f32 %v3350_v43, %v3238_v30  ;;  %v3240_v8 = vadd.f32 %v3239_v1, %v11183_v53  ;;  %v7309_v2 = vadd.f32 -1.0, %v8715_v6 }
 0x564   : > { %v3567_v37 = vsel %vm3407_vm6, %v11195_v3, %v7308_v7  ;;  %v8717_v24 = vpop.eup %8716  ;;  %v3485_v21 = vmul.f32 1.442695, %v3445_v22  ;;  %vm3414_vm15 = vcmp.gt.f32.partialorder %v11221_v31, 0.0 }
 0x565   : > { %v3487_v36 = vmul.f32 1.442695, %v3446_v49  ;;  %v3447_v60 = vmin.f32 %v11228_v41, 0.0  ;;  %v11235_v23 = vadd.f32 %v3352_v55, %v3240_v8  ;;  %v3568_v17 = vsel %vm3408_vm8, %v11200_v51, %v7309_v2 }
 0x566   : > { %v8719_v58 = vpop.eup %8718  ;;  %v3598_v3 = vpack.c.bf16 %v3568_v17, %v3566_v10  ;;  %v3597_v19 = vpack.c.bf16 %v3567_v37, %v3565_v57  ;;  %v7310_v45 = vadd.f32 -1.0, %v8717_v24  ;;  %vm3415_vm13 = vcmp.gt.f32.partialorder %v11228_v41, 0.0 }
 0x567   : > { %v3489_v59 = vmul.f32 1.442695, %v3447_v60  ;;  %v3448_v12 = vmin.f32 %v11235_v23, 0.0  ;;  %8724 = vpow2.f32 %v3487_v36  ;;  %v7311_v51 = vadd.f32 -1.0, %v8719_v58 }
 0x568   : > { %v8721_v39 = vpop.eup %8720  ;;  %3789 = vmatprep.mubr.bf16.mxu1 %v3598_v3  ;;  %v3569_v44 = vsel %vm3409_vm10, %v11202_v46, %v7310_v45  ;;  %vm3416_vm14 = vcmp.gt.f32.partialorder %v11235_v23, 0.0 }
 0x569   : > { %v7312_v9 = vadd.f32 -1.0, %v8721_v39  ;;  %8726 = vpow2.f32 %v3489_v59  ;;  %v3491_v28 = vmul.f32 1.442695, %v3448_v12  ;;  %3790 = vmatmul.mubr.bf16.vlgmr.msra.gmra.mxu1 %v3597_v19  ;;  %v3570_v47 = vsel %vm3410_vm11, %v11207_v13, %v7311_v51 }
 0x56a   : > { %v8723_v42 = vpop.eup %8722  ;;  %8728 = vpow2.f32 %v3485_v21  ;;  %4360 = vmatpush1.bf16.msra.mxu1 %v8318_v0 }
 0x56b   : > { %8730 = vpow2.f32 %v3491_v28  ;;  %v7313_v16 = vadd.f32 -1.0, %v8723_v42  ;;  %v3571_v27 = vsel %vm3411_vm9, %v11211_v4, %v7312_v9 }
 0x56c   : > { %v3243_v50 = vpop.f32.mrf.mxu1  ;;  %v3599_v26 = vpack.c.bf16 %v3571_v27, %v3569_v44 }
 0x56d   : > { %v3244_v20 = vadd.f32 %v3243_v50, %v11180_v34  ;;  %v3572_v5 = vsel %vm3412_vm12, %v11214_v33, %v7313_v16 }
 0x56e   : > { %v3356_v32 = vpop.f32.mrf.mxu0  ;;  %v3245_v40 = vpop.f32.mrf.mxu1  ;;  %v3600_v35 = vpack.c.bf16 %v3572_v5, %v3570_v47 }
 0x56f   : > { %v11249_v61 = vadd.f32 %v3356_v32, %v3244_v20  ;;  %v3246_v14 = vadd.f32 %v3245_v40, %v11183_v53 }
 0x570   : > { %v3358_v11 = vpop.f32.mrf.mxu0  ;;  %v3247_v38 = vpop.f32.mrf.mxu1  ;;  %3797 = vmatprep.mubr.bf16.mxu1 %v3600_v35 }
 0x571   : > { %v11255_v25 = vadd.f32 %v3358_v11, %v3246_v14  ;;  %v3248_v4 = vadd.f32 %v3247_v38, %v11180_v34  ;;  %v3449_v54 = vmin.f32 %v11249_v61, 0.0  ;;  %3798 = vmatmul.mubr.bf16.gmra.mxu1 %v3599_v26  ;;  %vm3417_vm7 = vcmp.gt.f32.partialorder %v11249_v61, 0.0 }
 0x572   : > { %v3360_v18 = vpop.f32.mrf.mxu0  ;;  %v3249_v56 = vpop.f32.mrf.mxu1 }
 0x573   : > { %v3450_v7 = vmin.f32 %v11255_v25, 0.0  ;;  %v11260_v13 = vadd.f32 %v3360_v18, %v3248_v4  ;;  %v3250_v46 = vadd.f32 %v3249_v56, %v11183_v53  ;;  %v3493_v1 = vmul.f32 1.442695, %v3449_v54 }
 0x574   : > { %v3362_v33 = vpop.f32.mrf.mxu0  ;;  %v8725_v15 = vpop.eup %8724  ;;  %vm3418_vm2 = vcmp.gt.f32.partialorder %v11255_v25, 0.0 }
 0x575   : > { %v3451_v43 = vmin.f32 %v11260_v13, 0.0  ;;  %v11264_v48 = vadd.f32 %v3362_v33, %v3250_v46  ;;  %v3495_v22 = vmul.f32 1.442695, %v3450_v7  ;;  %v7315_v59 = vadd.f32 -1.0, %v8725_v15 }
 0x576   : > { %v8727_v2 = vpop.eup %8726  ;;  %vm3419_vm3 = vcmp.gt.f32.partialorder %v11260_v13, 0.0 }
 0x577   : > { %v3253_v30 = vpop.f32.mrf.mxu1  ;;  %v3497_v49 = vmul.f32 1.442695, %v3451_v43  ;;  %v3452_v37 = vmin.f32 %v11264_v48, 0.0  ;;  %v8729_v24 = vpop.eup %8728  ;;  %v7316_v58 = vadd.f32 -1.0, %v8727_v2  ;;  %v3574_v5 = vsel %vm3414_vm15, %v11221_v31, %v7315_v59 }
 0x578   : > { %v3254_v6 = vadd.f32 %v3253_v30, %v11180_v34  ;;  %v8731_v17 = vpop.eup %8730  ;;  %v7314_v12 = vadd.f32 -1.0, %v8729_v24  ;;  %vm3420_vm6 = vcmp.gt.f32.partialorder %v11264_v48, 0.0 }
 0x579   : > { %v3255_v8 = vpop.f32.mrf.mxu1  ;;  %8732 = vpow2.f32 %v3497_v49  ;;  %v3499_v57 = vmul.f32 1.442695, %v3452_v37  ;;  %v7317_v51 = vadd.f32 -1.0, %v8731_v17  ;;  %v3575_v20 = vsel %vm3415_vm13, %v11228_v41, %v7316_v58 }
 0x57a   : > { %v3366_v36 = vpop.f32.mrf.mxu0  ;;  %v3256_v55 = vadd.f32 %v3255_v8, %v11183_v53  ;;  %8734 = vpow2.f32 %v3493_v1  ;;  %v3573_v44 = vsel %vm3413_vm1, %v11218_v63, %v7314_v12 }
 0x57b   : > { %v11269_v60 = vadd.f32 %v3366_v36, %v3254_v6  ;;  %v3257_v10 = vpop.f32.mrf.mxu1  ;;  %8736 = vpow2.f32 %v3495_v22  ;;  %v3576_v32 = vsel %vm3416_vm14, %v11235_v23, %v7317_v51  ;;  %v3601_v26 = vpack.c.bf16 %v3575_v20, %v3573_v44 }
 0x57c   : > { %v3368_v21 = vpop.f32.mrf.mxu0  ;;  %v3258_v3 = vadd.f32 %v3257_v10, %v11180_v34  ;;  %8738 = vpow2.f32 %v3499_v57  ;;  %v3602_v35 = vpack.c.bf16 %v3576_v32, %v3574_v5 }
 0x57d   : > { %v3453_v0 = vmin.f32 %v11269_v60, 0.0  ;;  %v11273_v39 = vadd.f32 %v3368_v21, %v3256_v55  ;;  %v3259_v19 = vpop.f32.mrf.mxu1  ;;  %vm3421_vm8 = vcmp.gt.f32.partialorder %v11269_v60, 0.0 }
 0x57e   : > { %v3370_v9 = vpop.f32.mrf.mxu0  ;;  %v3260_v28 = vadd.f32 %v3259_v19, %v11183_v53  ;;  %3805 = vmatprep.mubr.bf16.mxu1 %v3602_v35 }
 0x57f   : > { %v3454_v42 = vmin.f32 %v11273_v39, 0.0  ;;  %v11279_v45 = vadd.f32 %v3370_v9, %v3258_v3  ;;  %v3263_v50 = vpop.f32.mrf.mxu1  ;;  %v3501_v40 = vmul.f32 1.442695, %v3453_v0  ;;  %3806 = vmatmul.mubr.bf16.gmra.mxu1 %v3601_v26  ;;  %vm3422_vm9 = vcmp.gt.f32.partialorder %v11273_v39, 0.0 }
 0x580   : > { %v3372_v16 = vpop.f32.mrf.mxu0  ;;  %v3264_v27 = vadd.f32 %v3263_v50, %v11180_v34 }
 0x581   : > { %v3455_v14 = vmin.f32 %v11279_v45, 0.0  ;;  %v3265_v47 = vpop.f32.mrf.mxu1  ;;  %v11289_v11 = vadd.f32 %v3372_v16, %v3260_v28  ;;  %v3503_v4 = vmul.f32 1.442695, %v3454_v42  ;;  %8740 = vpow2.f32 %v3501_v40 }
 0x582   : > { %v3376_v38 = vpop.f32.mrf.mxu0  ;;  %v3266_v41 = vadd.f32 %v3265_v47, %v11183_v53  ;;  %vm3423_vm10 = vcmp.gt.f32.partialorder %v11279_v45, 0.0 }
 0x583   : > { %v3505_v54 = vmul.f32 1.442695, %v3455_v14  ;;  %v11292_v23 = vadd.f32 %v3376_v38, %v3264_v27  ;;  %v3267_v18 = vpop.f32.mrf.mxu1  ;;  %v3456_v56 = vmin.f32 %v11289_v11, 0.0  ;;  %vm3424_vm11 = vcmp.gt.f32.partialorder %v11289_v11, 0.0 }
 0x584   : > { %v3378_v7 = vpop.f32.mrf.mxu0  ;;  %v3268_v46 = vadd.f32 %v3267_v18, %v11180_v34 }
 0x585   : > { %v3269_v63 = vpop.f32.mrf.mxu1  ;;  %8742 = vpow2.f32 %v3505_v54  ;;  %v3507_v31 = vmul.f32 1.442695, %v3456_v56  ;;  %v11296_v33 = vadd.f32 %v3378_v7, %v3266_v41  ;;  %v3457_v1 = vmin.f32 %v11292_v23, 0.0 }
 0x586   : > { %v3380_v43 = vpop.f32.mrf.mxu0  ;;  %v3270_v30 = vadd.f32 %v3269_v63, %v11183_v53  ;;  %8744 = vpow2.f32 %v3503_v4  ;;  %v8733_v22 = vpop.eup %8732  ;;  %vm3425_vm15 = vcmp.gt.f32.partialorder %v11292_v23, 0.0 }
 0x587   : > { %v11300_v6 = vadd.f32 %v3380_v43, %v3268_v46  ;;  %v3273_v15 = vpop.f32.mrf.mxu1  ;;  %8746 = vpow2.f32 %v3507_v31  ;;  %v3458_v49 = vmin.f32 %v11296_v33, 0.0  ;;  %v8735_v37 = vpop.eup %8734  ;;  %v7320_v3 = vadd.f32 -1.0, %v8733_v22 }
 0x588   : > { %v3382_v8 = vpop.f32.mrf.mxu0  ;;  %v3274_v2 = vadd.f32 %v3273_v15, %v11180_v34  ;;  %v8737_v24 = vpop.eup %8736  ;;  %v3509_v0 = vmul.f32 1.442695, %v3457_v1  ;;  %v7318_v51 = vadd.f32 -1.0, %v8735_v37  ;;  %vm3426_vm12 = vcmp.gt.f32.partialorder %v11296_v33, 0.0 }
 0x589   : > { %v3459_v36 = vmin.f32 %v11300_v6, 0.0  ;;  %v3275_v55 = vpop.f32.mrf.mxu1  ;;  %v3511_v10 = vmul.f32 1.442695, %v3458_v49  ;;  %v11306_v17 = vadd.f32 %v3382_v8, %v3270_v30  ;;  %v8739_v21 = vpop.eup %8738  ;;  %v7319_v20 = vadd.f32 -1.0, %v8737_v24 }
 0x58a   : > { %v3386_v58 = vpop.f32.mrf.mxu0  ;;  %v3276_v57 = vadd.f32 %v3275_v55, %v11183_v53  ;;  %v7321_v14 = vadd.f32 -1.0, %v8739_v21  ;;  %v3579_v47 = vsel %vm3419_vm3, %v11260_v13, %v7320_v3  ;;  %v3577_v46 = vsel %vm3417_vm7, %v11249_v61, %v7318_v51 }
 0x58b   : > { %v3513_v19 = vmul.f32 1.442695, %v3459_v36  ;;  %v11309_v59 = vadd.f32 %v3386_v58, %v3274_v2  ;;  %v3277_v12 = vpop.f32.mrf.mxu1  ;;  %8748 = vpow2.f32 %v3511_v10  ;;  %v3460_v9 = vmin.f32 %v11306_v17, 0.0 }
 0x58c   : > { %v3388_v28 = vpop.f32.mrf.mxu0  ;;  %v3278_v27 = vadd.f32 %v3277_v12, %v11180_v34  ;;  %v3580_v4 = vsel %vm3420_vm6, %v11264_v48, %v7321_v14  ;;  %v3578_v56 = vsel %vm3418_vm2, %v11255_v25, %v7319_v20  ;;  %v3603_v1 = vpack.c.bf16 %v3579_v47, %v3577_v46 }
 0x58d   : > { %8750 = vpow2.f32 %v3513_v19  ;;  %v11314_v42 = vadd.f32 %v3388_v28, %v3276_v57  ;;  %v3279_v50 = vpop.f32.mrf.mxu1  ;;  %v3515_v16 = vmul.f32 1.442695, %v3460_v9  ;;  %v3461_v5 = vmin.f32 %v11309_v59, 0.0 }
 0x58e   : > { %v3390_v32 = vpop.f32.mrf.mxu0  ;;  %v3280_v40 = vadd.f32 %v3279_v50, %v11183_v53  ;;  %8752 = vpow2.f32 %v3509_v0  ;;  %v8741_v7 = vpop.eup %8740  ;;  %v3604_v30 = vpack.c.bf16 %v3580_v4, %v3578_v56  ;;  %vm3428_vm13 = vcmp.gt.f32.partialorder %v11306_v17, 0.0 }
 0x58f   : > { %v3462_v44 = vmin.f32 %v11314_v42, 0.0  ;;  %v3283_v38 = vpop.f32.mrf.mxu1  ;;  %8754 = vpow2.f32 %v3515_v16  ;;  %v11321_v41 = vadd.f32 %v3390_v32, %v3278_v27  ;;  %v3517_v8 = vmul.f32 1.442695, %v3461_v5 }
 0x590   : > { %v3392_v35 = vpop.f32.mrf.mxu0  ;;  %v3284_v26 = vadd.f32 %v3283_v38, %v11180_v34  ;;  %3813 = vmatprep.mubr.bf16.mxu1 %v3604_v30  ;;  %v7322_v58 = vadd.f32 -1.0, %v8741_v7  ;;  %vm3427_vm14 = vcmp.gt.f32.partialorder %v11300_v6, 0.0  ;;  %vm3430_vm1 = vcmp.gt.f32.partialorder %v11314_v42, 0.0 }
 0x591   : > { %v3519_v54 = vmul.f32 1.442695, %v3462_v44  ;;  %v11328_v13 = vadd.f32 %v3392_v35, %v3280_v40  ;;  %v3285_v18 = vpop.f32.mrf.mxu1  ;;  %v3463_v63 = vmin.f32 %v11321_v41, 0.0  ;;  %3814 = vmatmul.mubr.bf16.gmra.mxu1 %v3603_v1  ;;  %vm3431_vm3 = vcmp.gt.f32.partialorder %v11321_v41, 0.0 }
 0x592   : > { %v3396_v31 = vpop.f32.mrf.mxu0  ;;  %v3286_v43 = vadd.f32 %v3285_v18, %v11183_v53  ;;  %v8743_v48 = vpop.eup %8742  ;;  %v3581_v16 = vsel %vm3421_vm8, %v11269_v60, %v7322_v58  ;;  %vm3429_vm6 = vcmp.gt.f32.partialorder %v11309_v59, 0.0 }
 0x593   : > { %8756 = vpow2.f32 %v3519_v54  ;;  %v3464_v15 = vmin.f32 %v11328_v13, 0.0  ;;  %v3287_v22 = vpop.f32.mrf.mxu1  ;;  %v8745_v49 = vpop.eup %8744  ;;  %v3521_v2 = vmul.f32 1.442695, %v3463_v63  ;;  %v11337_v37 = vadd.f32 %v3396_v31, %v3284_v26 }
 0x594   : > { %v3398_v25 = vpop.f32.mrf.mxu0  ;;  %v3288_v61 = vadd.f32 %v3287_v22, %v11180_v34  ;;  %v8747_v36 = vpop.eup %8746  ;;  %v7324_v57 = vadd.f32 -1.0, %v8743_v48  ;;  %v7323_v19 = vadd.f32 -1.0, %v8745_v49  ;;  %vm3432_vm2 = vcmp.gt.f32.partialorder %v11328_v13, 0.0 }
 0x595   : > { %v3523_v55 = vmul.f32 1.442695, %v3464_v15  ;;  %v11340_v24 = vadd.f32 %v3398_v25, %v3286_v43  ;;  %v3289_v10 = vpop.f32.mrf.mxu1  ;;  %8758 = vpow2.f32 %v3521_v2  ;;  %v3465_v3 = vmin.f32 %v11337_v37, 0.0 }
 0x596   : > { %v3400_v21 = vpop.f32.mrf.mxu0  ;;  %v3290_v12 = vadd.f32 %v3289_v10, %v11183_v53  ;;  %v7325_v9 = vadd.f32 -1.0, %v8747_v36  ;;  %v3583_v27 = vsel %vm3423_vm10, %v11279_v45, %v7324_v57  ;;  %v3582_v14 = vsel %vm3422_vm9, %v11273_v39, %v7323_v19 }
 0x597   : > { %8760 = vpow2.f32 %v3523_v55  ;;  %v3466_v0 = vmin.f32 %v11340_v24, 0.0  ;;  %v11345_v34 = vadd.f32 %v3400_v21, %v3288_v61  ;;  %v3525_v40 = vmul.f32 1.442695, %v3465_v3 }
 0x598   : > { %8762 = vpow2.f32 %v3517_v8  ;;  %v8749_v28 = vpop.eup %8748  ;;  %v3402_v50 = vpop.f32.mrf.mxu0  ;;  %v3584_v47 = vsel %vm3424_vm11, %v11289_v11, %v7325_v9  ;;  %v3605_v60 = vpack.c.bf16 %v3583_v27, %v3581_v16  ;;  %vm3434_vm7 = vcmp.gt.f32.partialorder %v11340_v24, 0.0  ;;  %v11420_v16 = vld [vmem:[%s9654_s3 + $0x18] sm:$0xff]   ;;  %v8330_v27 = vld [vmem:[%s12821_s9 + $0x10] sm:$0xff]  }
 0x599   : > { %v3527_v51 = vmul.f32 1.442695, %v3466_v0  ;;  %v3467_v32 = vmin.f32 %v11345_v34, 0.0  ;;  %v11356_v53 = vadd.f32 %v3402_v50, %v3290_v12  ;;  %v3606_v35 = vpack.c.bf16 %v3584_v47, %v3582_v14  ;;  %v11411_v50 = vld [vmem:[%s9654_s3 + $0x10] sm:$0xff]   ;;  %v11441_v14 = vld [vmem:[%s9654_s3 + $0x28] sm:$0xff]  }
 0x59a   : > { %v8751_v20 = vpop.eup %8750  ;;  %v7327_v26 = vadd.f32 -1.0, %v8749_v28  ;;  %vm3435_vm9 = vcmp.gt.f32.partialorder %v11345_v34, 0.0  ;;  %vm3433_vm10 = vcmp.gt.f32.partialorder %v11337_v37, 0.0  ;;  %v13030_v9 = vmov 0   ;;  %v8323_v28 = vld [vmem:[%s12821_s9 + $0x30] sm:$0xff]  }
 0x59b   : > { %8764 = vpow2.f32 %v3527_v51  ;;  %v8753_v5 = vpop.eup %8752  ;;  %v3529_v44 = vmul.f32 1.442695, %v3467_v32  ;;  %v3468_v38 = vmin.f32 %v11356_v53, 0.0  ;;  %v7328_v54 = vadd.f32 -1.0, %v8751_v20  ;;  %3821 = vmatprep.mubr.bf16.mxu1 %v3606_v35  ;;  %v8327_v51 = vld [vmem:[%s12821_s9 + $0x20] sm:$0xff]   ;;  %v8328_v20 = vld [vmem:[%s12821_s9 + $0x18] sm:$0xff]  }
 0x59c   : > { %v8755_v4 = vpop.eup %8754  ;;  %3822 = vmatmul.mubr.bf16.gmra.mxu1 %v3605_v60  ;;  %v7326_v11 = vadd.f32 -1.0, %v8753_v5  ;;  %v3586_v56 = vsel %vm3426_vm12, %v11296_v33, %v7327_v26  ;;  %vm3436_vm8 = vcmp.gt.f32.partialorder %v11356_v53, 0.0  ;;  %v8331_v32 = vld [vmem:[%s12821_s9 + $0x8] sm:$0xff]   ;;  %v11447_v47 = vld [vmem:[%s9654_s3 + $0x30] sm:$0xff]   ;;  %v11453_v26 = vld [vmem:[%s9654_s3 + $0x38] sm:$0xff]  }
 0x59d   : > { %8766 = vpow2.f32 %v3529_v44  ;;  %v3531_v45 = vmul.f32 1.442695, %v3468_v38  ;;  %v7329_v18 = vadd.f32 -1.0, %v8755_v4  ;;  %v3587_v63 = vsel %vm3427_vm14, %v11300_v6, %v7328_v54  ;;  %v8338_v5 = vld [vmem:[#allocation10 + $0x6c] ss:$16 sps:$4 sm:$0xff]  }
 0x59e   : > { %8768 = vpow2.f32 %v3525_v40  ;;  %v3585_v48 = vsel %vm3425_vm15, %v11292_v23, %v7326_v11  ;;  %v8333_v40 = vld [vmem:[%s12821_s9] sm:$0xff]   ;;  %v8336_v44 = vld [vmem:[#allocation10 + $0x68] ss:$16 sps:$4 sm:$0xff]   ;;  %4659 = vmatprep.subr.bf16.mxu1 %v8338_v5  ;;  %v8341_v38 = vld [vmem:[#allocation10 + $0x4c] ss:$16 sps:$4 sm:$0xff]  }
 0x59f   : > { %8770 = vpow2.f32 %v3531_v45  ;;  %v3588_v7 = vsel %vm3428_vm13, %v11306_v17, %v7329_v18  ;;  %v3607_v15 = vpack.c.bf16 %v3587_v63, %v3585_v48  ;;  %v8339_v35 = vld [vmem:[#allocation10 + $0x48] ss:$16 sps:$4 sm:$0xff]   ;;  %v8345_v4 = vld [vmem:[#allocation10 + $0x2c] ss:$16 sps:$4 sm:$0xff]   ;;  %v11459_v18 = vld [vmem:[%s9626_s29] sm:$0xff]  }
 0x5a0   : > { %v8757_v39 = vpop.eup %8756  ;;  %v3608_v46 = vpack.c.bf16 %v3588_v7, %v3586_v56  ;;  %v8343_v60 = vld [vmem:[#allocation10 + $0x28] ss:$16 sps:$4 sm:$0xff]   ;;  %v8348_v54 = vld [vmem:[#allocation10 + $0xc] ss:$16 sps:$4 sm:$0xff]   ;;  %v11471_v56 = vld [vmem:[%s9626_s29 + $0x10] sm:$0xff]  }
 0x5a1   : > { %v7331_v43 = vadd.f32 -1.0, %v8757_v39  ;;  %v8346_v45 = vld [vmem:[#allocation10 + $0x8] ss:$16 sps:$4 sm:$0xff]   ;;  %v8351_v39 = vld [vmem:[#allocation11 + $0x4] ss:$16 sps:$4 sm:$0xff]  }
 0x5a2   : > { %v8759_v31 = vpop.eup %8758  ;;  %3829 = vmatprep.mubr.bf16.mxu1 %v3608_v46  ;;  %v11465_v11 = vld [vmem:[%s9626_s29 + $0x8] sm:$0xff]  }
 0x5a3   : > { %v7332_v33 = vadd.f32 -1.0, %v8759_v31  ;;  %v3590_v17 = vsel %vm3430_vm1, %v11314_v42, %v7331_v43  ;;  %v8321_v42 = vld [vmem:[%s12821_s9 + $0x38] sm:$0xff]   ;;  %v11479_v7 = vld [vmem:[%s12827_s15 + $0xa] sm:$0x1f]  ;;  %v13031_v43 = vld [vmem:[#allocation29_spill] sm:$0xff] }
 0x5a4   : > { %v8761_v30 = vpop.eup %8760  ;;  %3830 = vmatmul.mubr.bf16.gmra.mxu1 %v3607_v15  ;;  %7918 = vmatprep.subr.bf16.mxu0 %v8321_v42  ;;  %v4773_v46 = vrot.slane %v11479_v7, %v13021_v62  ;;  %v4769_v63 = vrot.slane %v11479_v7, %v13025_v29  ;;  %v9039_v31 = vld [vmem:[%s9626_s29 + $0x18] sm:$0xff]   ;;  %v3752_v15 = vpop.permute.xlu0 %3751 }
 0x5a5   : > { %v8763_v1 = vpop.eup %8762  ;;  %v7333_v22 = vadd.f32 -1.0, %v8761_v30  ;;  %v3591_v23 = vsel %vm3431_vm3, %v11321_v41, %v7332_v33  ;;  %7919 = vmatpush3.bf16.msra.mxu0 %v8321_v42  ;;  %v13032_v30 = vsub.s32 4, %v13031_v43 }
 0x5a6   : > { %v7330_v8 = vadd.f32 -1.0, %v8763_v1  ;;  %7920 = vmatprep.subr.bf16.mxu0 %v8323_v28  ;;  %4788 = vrot.lane.b32.xlu0 %v4773_v46, %s9356_s16  ;;  %v11496_v1 = vld [vmem:[%s12827_s15 + $0xe] sm:$0x7] }
 0x5a7   : > { %v3592_v6 = vsel %vm3432_vm2, %v11328_v13, %v7333_v22  ;;  %v4785_v48 = vrot.slane %v11479_v7, %v13032_v30  ;;  %v3754_v22 = vpop.permute.xlu1 %3753 }
 0x5a8   : > { %v8765_v49 = vpop.eup %8764  ;;  %v3610_v2 = vpack.c.bf16 %v3592_v6, %v3590_v17  ;;  %v3589_v36 = vsel %vm3429_vm6, %v11309_v59, %v7330_v8  ;;  %v5362_v17 = vrot.slane %v11496_v1, %v13022_v52  ;;  %v9040_v6 = vld [vmem:[%s9626_s29 + $0x20] sm:$0xff]   ;;  %v11504_v8 = vsel %vm2282_vm5, %v3752_v15, %v3754_v22 }
 0x5a9   : > { %v7335_v55 = vadd.f32 -1.0, %v8765_v49  ;;  %v3609_v58 = vpack.c.bf16 %v3591_v23, %v3589_v36  ;;  %7921 = vmatpush3.bf16.msra.mxu0 %v8323_v28 }
 0x5aa   : > { %3837 = vmatprep.mubr.bf16.mxu1 %v3610_v2  ;;  %v8767_v25 = vpop.eup %8766  ;;  %4786 = vrot.lane.b32.xlu0 %v4769_v63, %s9356_s16 }
 0x5ab   : > { %v8769_v61 = vpop.eup %8768  ;;  %v7336_v13 = vadd.f32 -1.0, %v8767_v25  ;;  %v3594_v21 = vsel %vm3434_vm7, %v11340_v24, %v7335_v55  ;;  %v11390_v24 = vld [vmem:[%s9654_s3] sm:$0xff]   ;;  %v11511_v25 = vld [vmem:[%s12827_s15 + $0x10] sm:$0x3] }
 0x5ac   : > { %v8771_v10 = vpop.eup %8770  ;;  %3838 = vmatmul.mubr.bf16.gmra.mxu1 %v3609_v58  ;;  %v7334_v41 = vadd.f32 -1.0, %v8769_v61  ;;  %v6164_v36 = vrot.slane %v11511_v25, %v13025_v29 }
 0x5ad   : > { %v7337_v57 = vadd.f32 -1.0, %v8771_v10  ;;  %v3595_v0 = vsel %vm3435_vm9, %v11345_v34, %v7336_v13  ;;  %v11399_v34 = vld [vmem:[%s9654_s3 + $0x8] sm:$0xff]  }
 0x5ae   : > { %v3593_v19 = vsel %vm3433_vm10, %v11337_v37, %v7334_v41  ;;  %v8325_v37 = vld [vmem:[%s12821_s9 + $0x28] sm:$0xff]   ;;  %4794 = vrot.lane.b32.xlu0 %v4785_v48, %s9356_s16 }
 0x5af   : > { %v3596_v59 = vsel %vm3436_vm8, %v11356_v53, %v7337_v57  ;;  %v3611_v12 = vpack.c.bf16 %v3595_v0, %v3593_v19  ;;  %7922 = vmatprep.subr.bf16.mxu0 %v8325_v37  ;;  %v11432_v53 = vld [vmem:[%s9654_s3 + $0x20] sm:$0xff]   ;;  %v9041_v41 = vld [vmem:[%s9626_s29 + $0x28] sm:$0xff]  }
 0x5b0   : > { %v3612_v3 = vpack.c.bf16 %v3596_v59, %v3594_v21  ;;  %7923 = vmatpush3.bf16.msra.mxu0 %v8325_v37  ;;  %v7370_v21 = vld [vmem:[%s12827_s15 + $0xa] ss:$0 sm:$0xff] }
 0x5b1   : > { %7924 = vmatprep.subr.bf16.mxu0 %v8327_v51 }
 0x5b2   : > { %3845 = vmatprep.mubr.bf16.mxu1 %v3612_v3  ;;  %5687 = vrot.lane.b32.xlu0 %v5362_v17, %s9356_s16 }
 0x5b4   : > { %3846 = vmatmul.mubr.bf16.gmra.mxu1 %v3611_v12  ;;  %7925 = vmatpush3.bf16.msra.mxu0 %v8327_v51 }
 0x5b5   : > { %4377 = vmatprep.mubr.bf16.mxu1 %v13030_v9  ;;  %7926 = vmatprep.subr.bf16.mxu0 %v8328_v20 }
 0x5b6   : > { %6265 = vrot.lane.b32.xlu0 %v6164_v36, %s9356_s16 }
 0x5b8   : > { %7927 = vmatpush3.bf16.msra.mxu0 %v8328_v20 }
 0x5b9   : > { %7928 = vmatprep.subr.bf16.mxu0 %v8330_v27 }
 0x5ba   : > { %4028 = vrot.lane.b32.xlu0 %v7370_v21, %s9355_s24  ;;  %v8349_v21 = vld [vmem:[#allocation11] ss:$16 sps:$4 sm:$0xff]   ;;  %s12772_s24 = scalar_lea.sflag [#allocation4], %s13035_s25 }
 0x5bc   : > { %7399 = vmatmul.mubr.msk.bf16.vlgmr.msra.gmra.mxu1 %vm1693_vm4, %v11390_v24  ;;  %7929 = vmatpush3.bf16.msra.mxu0 %v8330_v27 }
 0x5bd   : > { %4387 = vmatprep.mubr.bf16.mxu1 %v13030_v9  ;;  %7930 = vmatprep.subr.bf16.mxu0 %v8331_v32 }
 0x5be   : > { %4660 = vmatpush1.bf16.msra.mxu1 %v8336_v44 }
 0x5bf   : > { %4661 = vmatprep.subr.bf16.mxu1 %v8341_v38 }
 0x5c0   : > { %7931 = vmatpush3.bf16.msra.mxu0 %v8331_v32 }
 0x5c1   : > { %7932 = vmatprep.subr.bf16.mxu0 %v8333_v40 }
 0x5c2   : > { %4662 = vmatpush1.bf16.msra.mxu1 %v8339_v35 }
 0x5c3   : > { %4663 = vmatprep.subr.bf16.mxu1 %v8345_v4  ;;  %v9043_v4 = vld [vmem:[%s9626_s29 + $0x38] sm:$0xff]  }
 0x5c4   : > { %7400 = vmatmul.mubr.msk.bf16.gmra.mxu1 %vm1693_vm4, %v11399_v34  ;;  %7933 = vmatpush3.bf16.msra.mxu0 %v8333_v40  ;;  %v9042_v40 = vld [vmem:[%s9626_s29 + $0x30] sm:$0xff]  }
 0x5c5   : > { %4397 = vmatprep.mubr.bf16.mxu1 %v13030_v9  ;;  %4246 = vmatprep.subr.bf16.mxu0 %v8351_v39 }
 0x5c6   : > { %4664 = vmatpush1.bf16.msra.mxu1 %v8343_v60 }
 0x5c7   : > { %4665 = vmatprep.subr.bf16.mxu1 %v8348_v54 }
 0x5ca   : > { %4666 = vmatpush1.bf16.msra.mxu1 %v8346_v45 }
 0x5cc   : > { %7401 = vmatmul.mubr.msk.bf16.gmra.mxu1 %vm1693_vm4, %v11411_v50 }
 0x5cd   : > { %4407 = vmatprep.mubr.bf16.mxu1 %v13030_v9 }
 0x5d4   : > { %7402 = vmatmul.mubr.msk.bf16.gmra.mxu1 %vm1693_vm4, %v11420_v16 }
 0x5d5   : > { %4417 = vmatprep.mubr.bf16.mxu1 %v13030_v9 }
 0x5dc   : > { %7403 = vmatmul.mubr.msk.bf16.gmra.mxu1 %vm1693_vm4, %v11432_v53 }
 0x5dd   : > { %4427 = vmatprep.mubr.bf16.mxu1 %v13030_v9 }
 0x5e4   : > { %7404 = vmatmul.mubr.msk.bf16.gmra.mxu1 %vm1693_vm4, %v11441_v14 }
 0x5e5   : > { %4437 = vmatprep.mubr.bf16.mxu1 %v13030_v9 }
 0x5ec   : > { %7405 = vmatmul.mubr.msk.bf16.gmra.mxu1 %vm1693_vm4, %v11447_v47 }
 0x5ed   : > { %4447 = vmatprep.mubr.bf16.mxu1 %v13030_v9 }
 0x5f4   : > { %7406 = vmatmul.mubr.msk.bf16.gmra.mxu1 %vm1693_vm4, %v11453_v26 }
 0x5f5   : > { %4683 = vmatprep.mubr.bf16.mxu1 %v13030_v9 }
 0x5fc   : > { %7431 = vmatmul.mubr.msk.bf16.vlgmr.msra.gmra.mxu1 %vm795_vm0, %v11459_v18 }
 0x5fd   : > { %4693 = vmatprep.mubr.bf16.mxu1 %v13030_v9 }
 0x604   : > { %7432 = vmatmul.mubr.msk.bf16.gmra.mxu1 %vm795_vm0, %v11465_v11 }
 0x605   : > { %4703 = vmatprep.mubr.bf16.mxu1 %v13030_v9 }
 0x60c   : > { %7433 = vmatmul.mubr.msk.bf16.gmra.mxu1 %vm795_vm0, %v11471_v56 }
 0x60d   : > { %4713 = vmatprep.mubr.bf16.mxu1 %v13030_v9 }
 0x614   : > { %7434 = vmatmul.mubr.msk.bf16.gmra.mxu1 %vm795_vm0, %v9039_v31 }
 0x615   : > { %4723 = vmatprep.mubr.bf16.mxu1 %v13030_v9 }
 0x61c   : > { %7435 = vmatmul.mubr.msk.bf16.gmra.mxu1 %vm795_vm0, %v9040_v6 }
 0x61d   : > { %4733 = vmatprep.mubr.bf16.mxu1 %v13030_v9 }
 0x624   : > { %7436 = vmatmul.mubr.msk.bf16.gmra.mxu1 %vm795_vm0, %v9041_v41 }
 0x625   : > { %4743 = vmatprep.mubr.bf16.mxu1 %v13030_v9 }
 0x629   : > { %v7742_v33 = vpop.f32.mrf.mxu1 }
 0x62b   : > { %v7743_v49 = vpop.f32.mrf.mxu1 }
 0x62c   : > { %v7744_v2 = vadd.f32 %v7743_v49, %v7742_v33  ;;  %7437 = vmatmul.mubr.msk.bf16.gmra.mxu1 %vm795_vm0, %v9042_v40 }
 0x62d   : > { %v7745_v23 = vpop.f32.mrf.mxu1  ;;  %4753 = vmatprep.mubr.bf16.mxu1 %v13030_v9 }
 0x62e   : > { %v3792_v61 = vadd.f32 %v7744_v2, %v11504_v8 }
 0x62f   : > { %v7746_v55 = vpop.f32.mrf.mxu1 }
 0x630   : > { %v7747_v10 = vadd.f32 %v7746_v55, %v7745_v23  ;;  %v3870_v58 = vmin.f32 %v3792_v61, 0.0  ;;  %vm3854_vm5 = vcmp.gt.f32.partialorder %v3792_v61, 0.0 }
 0x631   : > { %v7748_v42 = vpop.f32.mrf.mxu1 }
 0x632   : > { %v3795_v13 = vadd.f32 %v7747_v10, %v11504_v8  ;;  %v3886_v57 = vmul.f32 1.442695, %v3870_v58  ;;  %v4777_v10 = vrot.slane %v11479_v7, %v13022_v52 }
 0x633   : > { %v7749_v59 = vpop.f32.mrf.mxu1 }
 0x634   : > { %v3871_v3 = vmin.f32 %v3795_v13, 0.0  ;;  %v7750_v0 = vadd.f32 %v7749_v59, %v7748_v42  ;;  %8772 = vpow2.f32 %v3886_v57  ;;  %7438 = vmatmul.mubr.msk.bf16.gmra.mxu1 %vm795_vm0, %v9043_v4  ;;  %vm3855_vm11 = vcmp.gt.f32.partialorder %v3795_v13, 0.0  ;;  %4790 = vrot.lane.b32.xlu1 %v4777_v10, %s9356_s16 }
 0x635   : > { %v7751_v19 = vpop.f32.mrf.mxu1 }
 0x636   : > { %v3888_v12 = vmul.f32 1.442695, %v3871_v3  ;;  %v3800_v28 = vadd.f32 %v7750_v0, %v11504_v8  ;;  %v8354_v0 = vld [vmem:[#allocation10 + $0x64] ss:$16 sps:$4 sm:$0xff]  }
 0x637   : > { %v7752_v37 = vpop.f32.mrf.mxu1 }
 0x638   : > { %8774 = vpow2.f32 %v3888_v12  ;;  %v3872_v51 = vmin.f32 %v3800_v28, 0.0  ;;  %v7753_v20 = vadd.f32 %v7752_v37, %v7751_v19  ;;  %vm3856_vm12 = vcmp.gt.f32.partialorder %v3800_v28, 0.0 }
 0x63a   : > { %v3890_v27 = vmul.f32 1.442695, %v3872_v51  ;;  %v3803_v32 = vadd.f32 %v7753_v20, %v11504_v8 }
 0x63c   : > { %8776 = vpow2.f32 %v3890_v27  ;;  %v3873_v5 = vmin.f32 %v3803_v32, 0.0  ;;  %vm3857_vm13 = vcmp.gt.f32.partialorder %v3803_v32, 0.0 }
 0x63e   : > { %v3892_v44 = vmul.f32 1.442695, %v3873_v5 }
 0x63f   : > { %v7754_v35 = vpop.f32.mrf.mxu1 }
 0x640   : > { %8778 = vpow2.f32 %v3892_v44 }
 0x641   : > { %v8773_v38 = vpop.eup %8772  ;;  %v7755_v60 = vpop.f32.mrf.mxu1 }
 0x642   : > { %v7756_v54 = vadd.f32 %v7755_v60, %v7754_v35  ;;  %v7354_v45 = vadd.f32 -1.0, %v8773_v38 }
 0x643   : > { %v7757_v46 = vpop.f32.mrf.mxu1 }
 0x644   : > { %v3808_v63 = vadd.f32 %v7756_v54, %v11504_v8  ;;  %v3934_v22 = vsel %vm3854_vm5, %v3792_v61, %v7354_v45  ;;  %v13033_v61 = vsub.s32 3, %v13031_v43 }
 0x645   : > { %v8775_v39 = vpop.eup %8774  ;;  %v7758_v30 = vpop.f32.mrf.mxu1 }
 0x646   : > { %v7355_v31 = vadd.f32 -1.0, %v8775_v39  ;;  %v3874_v48 = vmin.f32 %v3808_v63, 0.0  ;;  %v7759_v15 = vadd.f32 %v7758_v30, %v7757_v46  ;;  %vm3858_vm14 = vcmp.gt.f32.partialorder %v3808_v63, 0.0 }
 0x648   : > { %v3935_v33 = vsel %vm3855_vm11, %v3795_v13, %v7355_v31  ;;  %v3894_v49 = vmul.f32 1.442695, %v3874_v48  ;;  %v3811_v2 = vadd.f32 %v7759_v15, %v11504_v8  ;;  %v4781_v13 = vrot.slane %v11479_v7, %v13033_v61 }
 0x649   : > { %v8777_v17 = vpop.eup %8776  ;;  %v3950_v6 = vpack.c.bf16 %v3935_v33, %v3934_v22 }
 0x64a   : > { %v7356_v23 = vadd.f32 -1.0, %v8777_v17  ;;  %8780 = vpow2.f32 %v3894_v49  ;;  %v3875_v36 = vmin.f32 %v3811_v2, 0.0  ;;  %4792 = vrot.lane.b32.xlu1 %v4781_v13, %s9356_s16  ;;  %vm3859_vm15 = vcmp.gt.f32.partialorder %v3811_v2, 0.0 }
 0x64b   : > { %7934 = vmatprep.mubr.bf16.mxu0 %v3950_v6 }
 0x64c   : > { %v3896_v42 = vmul.f32 1.442695, %v3875_v36  ;;  %v3936_v57 = vsel %vm3856_vm12, %v3800_v28, %v7356_v23  ;;  %vm4796_vm12 = vcmask 818176  }
 0x64d   : > { %v8779_v55 = vpop.eup %8778 }
 0x64e   : > { %v7357_v58 = vadd.f32 -1.0, %v8779_v55  ;;  %8782 = vpow2.f32 %v3896_v42 }
 0x650   : > { %v3937_v41 = vsel %vm3857_vm13, %v3803_v32, %v7357_v58 }
 0x651   : > { %v3951_v59 = vpack.c.bf16 %v3937_v41, %v3936_v57  ;;  %v7760_v3 = vpop.f32.mrf.mxu1 }
 0x653   : > { %v7761_v19 = vpop.f32.mrf.mxu1  ;;  %7935 = vmatmul.mubr.bf16.vlgmr.msra.gmra.mxu0 %v3951_v59 }
 0x654   : > { %v7762_v52 = vadd.f32 %v7761_v19, %v7760_v3  ;;  %4247 = vmatpush1.bf16.msra.mxu0 %v8349_v21 }
 0x655   : > { %v7763_v12 = vpop.f32.mrf.mxu1  ;;  %4546 = vmatprep.subr.bf16.mxu0 %v8354_v0 }
 0x656   : > { %v3816_v37 = vadd.f32 %v7762_v52, %v11504_v8 }
 0x657   : > { %v7764_v43 = vpop.f32.mrf.mxu1  ;;  %v8781_v28 = vpop.eup %8780 }
 0x658   : > { %v3876_v51 = vmin.f32 %v3816_v37, 0.0  ;;  %v7765_v7 = vadd.f32 %v7764_v43, %v7763_v12  ;;  %v7358_v5 = vadd.f32 -1.0, %v8781_v28  ;;  %vm3860_vm1 = vcmp.gt.f32.partialorder %v3816_v37, 0.0 }
 0x65a   : > { %v3898_v20 = vmul.f32 1.442695, %v3876_v51  ;;  %v3819_v27 = vadd.f32 %v7765_v7, %v11504_v8  ;;  %v3938_v39 = vsel %vm3858_vm14, %v3808_v63, %v7358_v5 }
 0x65b   : > { %v8783_v44 = vpop.eup %8782 }
 0x65c   : > { %v7766_v32 = vpop.f32.mrf.mxu1  ;;  %8784 = vpow2.f32 %v3898_v20  ;;  %v3877_v40 = vmin.f32 %v3819_v27, 0.0  ;;  %v7359_v60 = vadd.f32 -1.0, %v8783_v44  ;;  %vm3861_vm2 = vcmp.gt.f32.partialorder %v3819_v27, 0.0 }
 0x65e   : > { %v7767_v38 = vpop.f32.mrf.mxu1  ;;  %v3900_v35 = vmul.f32 1.442695, %v3877_v40  ;;  %v3939_v46 = vsel %vm3859_vm15, %v3811_v2, %v7359_v60 }
 0x65f   : > { %v7768_v4 = vadd.f32 %v7767_v38, %v7766_v32  ;;  %v3952_v30 = vpack.c.bf16 %v3939_v46, %v3938_v39 }
 0x660   : > { %v7769_v54 = vpop.f32.mrf.mxu1  ;;  %8786 = vpow2.f32 %v3900_v35 }
 0x661   : > { %v11544_v45 = vadd.f32 %v7768_v4, %v11504_v8  ;;  %7938 = vmatprep.mubr.bf16.mxu0 %v3952_v30 }
 0x662   : > { %v7770_v31 = vpop.f32.mrf.mxu1 }
 0x663   : > { %v3878_v48 = vmin.f32 %v11544_v45, 0.0  ;;  %v7771_v15 = vadd.f32 %v7770_v31, %v7769_v54  ;;  %vm3862_vm3 = vcmp.gt.f32.partialorder %v11544_v45, 0.0 }
 0x664   : > { %v7772_v22 = vpop.f32.mrf.mxu1 }
 0x665   : > { %v3902_v33 = vmul.f32 1.442695, %v3878_v48  ;;  %v3827_v17 = vadd.f32 %v7771_v15, %v11504_v8 }
 0x666   : > { %v7773_v6 = vpop.f32.mrf.mxu1 }
 0x667   : > { %v3879_v49 = vmin.f32 %v3827_v17, 0.0  ;;  %v7774_v23 = vadd.f32 %v7773_v6, %v7772_v22  ;;  %8788 = vpow2.f32 %v3902_v33  ;;  %vm3863_vm6 = vcmp.gt.f32.partialorder %v3827_v17, 0.0 }
 0x668   : > { %v7775_v36 = vpop.f32.mrf.mxu1 }
 0x669   : > { %v3904_v55 = vmul.f32 1.442695, %v3879_v49  ;;  %v11549_v10 = vadd.f32 %v7774_v23, %v11504_v8  ;;  %v8785_v63 = vpop.eup %8784 }
 0x66a   : > { %v7776_v2 = vpop.f32.mrf.mxu1  ;;  %v7360_v13 = vadd.f32 -1.0, %v8785_v63 }
 0x66b   : > { %8790 = vpow2.f32 %v3904_v55  ;;  %v3880_v58 = vmin.f32 %v11549_v10, 0.0  ;;  %v7777_v42 = vadd.f32 %v7776_v2, %v7775_v36  ;;  %vm3864_vm7 = vcmp.gt.f32.partialorder %v11549_v10, 0.0 }
 0x66c   : > { %v7778_v61 = vpop.f32.mrf.mxu1  ;;  %v3940_v12 = vsel %vm3860_vm1, %v3816_v37, %v7360_v13 }
 0x66d   : > { %v3906_v57 = vmul.f32 1.442695, %v3880_v58  ;;  %v8787_v41 = vpop.eup %8786  ;;  %v3835_v21 = vadd.f32 %v7777_v42, %v11504_v8 }
 0x66e   : > { %v7779_v59 = vpop.f32.mrf.mxu1  ;;  %v7361_v3 = vadd.f32 -1.0, %v8787_v41 }
 0x66f   : > { %v7780_v0 = vadd.f32 %v7779_v59, %v7778_v61  ;;  %8792 = vpow2.f32 %v3906_v57  ;;  %v3881_v19 = vmin.f32 %v3835_v21, 0.0  ;;  %vm3865_vm8 = vcmp.gt.f32.partialorder %v3835_v21, 0.0 }
 0x670   : > { %v7781_v52 = vpop.f32.mrf.mxu1  ;;  %v3941_v43 = vsel %vm3861_vm2, %v3819_v27, %v7361_v3 }
 0x671   : > { %v3840_v51 = vadd.f32 %v7780_v0, %v11504_v8  ;;  %v3908_v7 = vmul.f32 1.442695, %v3881_v19  ;;  %v3953_v20 = vpack.c.bf16 %v3941_v43, %v3940_v12 }
 0x672   : > { %v7782_v28 = vpop.f32.mrf.mxu1 }
 0x673   : > { %v3882_v32 = vmin.f32 %v3840_v51, 0.0  ;;  %v7783_v40 = vadd.f32 %v7782_v28, %v7781_v52  ;;  %8794 = vpow2.f32 %v3908_v7  ;;  %7939 = vmatmul.mubr.bf16.gmra.mxu0 %v3953_v20  ;;  %vm3866_vm9 = vcmp.gt.f32.partialorder %v3840_v51, 0.0 }
 0x674   : > { %v7784_v5 = vpop.f32.mrf.mxu1  ;;  %v8789_v44 = vpop.eup %8788 }
 0x675   : > { %v3910_v38 = vmul.f32 1.442695, %v3882_v32  ;;  %v3843_v35 = vadd.f32 %v7783_v40, %v11504_v8  ;;  %v7362_v39 = vadd.f32 -1.0, %v8789_v44 }
 0x676   : > { %v7785_v4 = vpop.f32.mrf.mxu1 }
 0x677   : > { %8796 = vpow2.f32 %v3910_v38  ;;  %v3883_v60 = vmin.f32 %v3843_v35, 0.0  ;;  %v7786_v54 = vadd.f32 %v7785_v4, %v7784_v5  ;;  %v3942_v33 = vsel %vm3862_vm3, %v11544_v45, %v7362_v39  ;;  %v8369_v39 = vld [vmem:[#allocation13 + $0x164] ss:$8 sps:$4 sm:$0xff]  }
 0x678   : > { %v8791_v37 = vpop.eup %8790  ;;  %v7787_v27 = vpop.f32.mrf.mxu1  ;;  %vm3867_vm10 = vcmp.gt.f32.partialorder %v3843_v35, 0.0 }
 0x679   : > { %v3912_v46 = vmul.f32 1.442695, %v3883_v60  ;;  %v3848_v31 = vadd.f32 %v7786_v54, %v11504_v8  ;;  %v7363_v30 = vadd.f32 -1.0, %v8791_v37  ;;  %v5358_v60 = vrot.slane %v11496_v1, %v13021_v62  ;;  %v8364_v54 = vld [vmem:[#allocation13 + $0x170] ss:$8 sps:$4 sm:$0xff]  }
 0x67a   : > { %v7788_v48 = vpop.f32.mrf.mxu1  ;;  %v8366_v37 = vld [vmem:[#allocation13 + $0x174] ss:$8 sps:$4 sm:$0xff]  }
 0x67b   : > { %8798 = vpow2.f32 %v3912_v46  ;;  %v3884_v15 = vmin.f32 %v3848_v31, 0.0  ;;  %v7789_v22 = vadd.f32 %v7788_v48, %v7787_v27  ;;  %v3943_v6 = vsel %vm3863_vm6, %v3827_v17, %v7363_v30  ;;  %5685 = vrot.lane.b32.xlu1 %v5358_v60, %s9356_s16  ;;  %5806 = vmatprep.subr.bf16.mxu1 %v8366_v37  ;;  %v8388_v37 = vld [vmem:[#allocation13 + $0x1f0] ss:$8 sps:$4 sm:$0xff]  }
 0x67c   : > { %v8793_v49 = vpop.eup %8792  ;;  %v3954_v55 = vpack.c.bf16 %v3943_v6, %v3942_v33  ;;  %v11559_v2 = vpop.f32.mrf.mxu1  ;;  %vm3868_vm5 = vcmp.gt.f32.partialorder %v3848_v31, 0.0  ;;  %5807 = vmatpush1.bf16.msra.mxu1 %v8364_v54  ;;  %v8352_v33 = vld [vmem:[#allocation10 + $0x60] ss:$16 sps:$4 sm:$0xff]   ;;  %v8390_v54 = vld [vmem:[#allocation13 + $0x1f4] ss:$8 sps:$4 sm:$0xff]  }
 0x67d   : > { %v3914_v23 = vmul.f32 1.442695, %v3884_v15  ;;  %v3851_v36 = vadd.f32 %v7789_v22, %v11504_v8  ;;  %v7364_v58 = vadd.f32 -1.0, %v8793_v49  ;;  %v8367_v15 = vld [vmem:[#allocation13 + $0x160] ss:$8 sps:$4 sm:$0xff]   ;;  %5808 = vmatprep.subr.bf16.mxu1 %v8369_v39 }
 0x67e   : > { %7942 = vmatprep.mubr.bf16.mxu0 %v3954_v55  ;;  %v11562_v45 = vpop.f32.mrf.mxu1  ;;  %v8372_v22 = vld [vmem:[#allocation13 + $0x154] ss:$8 sps:$4 sm:$0xff]  }
 0x67f   : > { %8800 = vpow2.f32 %v3914_v23  ;;  %v3885_v63 = vmin.f32 %v3851_v36, 0.0  ;;  %v3944_v57 = vsel %vm3864_vm7, %v11549_v10, %v7364_v58  ;;  %vm3869_vm11 = vcmp.gt.f32.partialorder %v3851_v36, 0.0  ;;  %v8357_v49 = vld [vmem:[#allocation10 + $0x44] ss:$16 sps:$4 sm:$0xff]   ;;  %v8358_v58 = vld [vmem:[#allocation10 + $0x20] ss:$16 sps:$4 sm:$0xff]  }
 0x680   : > { %v8795_v42 = vpop.eup %8794  ;;  %v11565_v3 = vpop.f32.mrf.mxu1  ;;  %5809 = vmatpush1.bf16.msra.mxu1 %v8367_v15  ;;  %v8375_v23 = vld [vmem:[#allocation13 + $0x144] ss:$8 sps:$4 sm:$0xff]  }
 0x681   : > { %v3916_v61 = vmul.f32 1.442695, %v3885_v63  ;;  %v7365_v13 = vadd.f32 -1.0, %v8795_v42  ;;  %5810 = vmatprep.subr.bf16.mxu1 %v8372_v22  ;;  %v8360_v63 = vld [vmem:[#allocation10 + $0x24] ss:$16 sps:$4 sm:$0xff]  }
 0x682   : > { %v11567_v43 = vpop.f32.mrf.mxu1 }
 0x683   : > { %8802 = vpow2.f32 %v3916_v61  ;;  %v3945_v8 = vsel %vm3865_vm8, %v3835_v21, %v7365_v13  ;;  %v8363_v61 = vld [vmem:[#allocation10 + $0x4] ss:$16 sps:$4 sm:$0xff]  }
 0x684   : > { %v8797_v17 = vpop.eup %8796  ;;  %v3955_v41 = vpack.c.bf16 %v3945_v8, %v3944_v57  ;;  %v11569_v32 = vpop.f32.mrf.mxu1  ;;  %v8361_v57 = vld [vmem:[#allocation10] ss:$16 sps:$4 sm:$0xff]  }
 0x685   : > { %v7366_v59 = vadd.f32 -1.0, %v8797_v17  ;;  %v8376_v17 = vld [vmem:[#allocation13 + $0x130] ss:$8 sps:$4 sm:$0xff]  }
 0x686   : > { %7943 = vmatmul.mubr.bf16.gmra.mxu0 %v3955_v41  ;;  %v11571_v40 = vpop.f32.mrf.mxu1 }
 0x687   : > { %v3946_v52 = vsel %vm3866_vm9, %v3840_v51, %v7366_v59 }
 0x688   : > { %v8799_v0 = vpop.eup %8798  ;;  %v11573_v38 = vpop.f32.mrf.mxu1 }
 0x689   : > { %v7367_v19 = vadd.f32 -1.0, %v8799_v0 }
 0x68a   : > { %v11577_v4 = vpop.f32.mrf.mxu1 }
 0x68b   : > { %v3947_v12 = vsel %vm3867_vm10, %v3843_v35, %v7367_v19  ;;  %v11575_v35 = vpop.permute.xlu0 %4788 }
 0x68c   : > { %v8801_v7 = vpop.eup %8800  ;;  %v3956_v28 = vpack.c.bf16 %v3947_v12, %v3946_v52  ;;  %v11582_v27 = vpop.f32.mrf.mxu1 }
 0x68d   : > { %v7368_v20 = vadd.f32 -1.0, %v8801_v7  ;;  %v8379_v7 = vld [vmem:[#allocation13 + $0x120] ss:$8 sps:$4 sm:$0xff]  }
 0x68e   : > { %7946 = vmatprep.mubr.bf16.mxu0 %v3956_v28  ;;  %v11587_v30 = vpop.f32.mrf.mxu1  ;;  %v8381_v28 = vld [vmem:[#allocation13 + $0x124] ss:$8 sps:$4 sm:$0xff]  }
 0x68f   : > { %v3948_v5 = vsel %vm3868_vm5, %v3848_v31, %v7368_v20  ;;  %v4787_v46 = vpop.permute.xlu0 %4786  ;;  %v5354_v31 = vrot.slane %v11496_v1, %v13025_v29  ;;  %v6168_v29 = vrot.slane %v11511_v25, %v13021_v62  ;;  %v8370_v1 = vld [vmem:[#allocation13 + $0x150] ss:$8 sps:$4 sm:$0xff]   ;;  %v8373_v25 = vld [vmem:[#allocation13 + $0x140] ss:$8 sps:$4 sm:$0xff]  }
 0x690   : > { %v8803_v10 = vpop.eup %8802  ;;  %v11591_v48 = vsel %vm4796_vm12, %v4787_v46, %v11575_v35  ;;  %v11593_v6 = vpop.f32.mrf.mxu1  ;;  %v7631_v62 = vld [vmem:[%s12827_s15 + $0x11] ss:$0 sm:$0xff]  ;;  %5811 = vmatpush1.bf16.msra.mxu1 %v8370_v1 }
 0x691   : > { %v7369_v21 = vadd.f32 -1.0, %v8803_v10  ;;  %5683 = vrot.lane.b32.xlu1 %v5354_v31, %s9356_s16  ;;  %5812 = vmatprep.subr.bf16.mxu1 %v8375_v23  ;;  %v8382_v10 = vld [vmem:[#allocation13 + $0x110] ss:$8 sps:$4 sm:$0xff]  }
 0x692   : > { %v11601_v55 = vpop.f32.mrf.mxu1  ;;  %v8394_v23 = vld [vmem:[#allocation13 + $0x1d0] ss:$8 sps:$4 sm:$0xff]  }
 0x693   : > { %v3949_v44 = vsel %vm3869_vm11, %v3851_v36, %v7369_v21  ;;  %v8355_v36 = vld [vmem:[#allocation10 + $0x40] ss:$16 sps:$4 sm:$0xff]   ;;  %v8384_v21 = vld [vmem:[#allocation13 + $0x114] ss:$8 sps:$4 sm:$0xff]  }
 0x694   : > { %v3957_v51 = vpack.c.bf16 %v3949_v44, %v3948_v5  ;;  %v11607_v42 = vpop.f32.mrf.mxu1  ;;  %5813 = vmatpush1.bf16.msra.mxu1 %v8373_v25  ;;  %v8387_v44 = vld [vmem:[#allocation13 + $0x104] ss:$8 sps:$4 sm:$0xff]   ;;  %v8397_v25 = vld [vmem:[#allocation13 + $0x1c0] ss:$8 sps:$4 sm:$0xff]  }
 0x695   : > { %6267 = vrot.lane.b32.xlu1 %v6168_v29, %s9356_s16 }
 0x696   : > { %7947 = vmatmul.mubr.bf16.gmra.mxu0 %v3957_v51  ;;  %v11610_v13 = vpop.f32.mrf.mxu1  ;;  %v8385_v51 = vld [vmem:[#allocation13 + $0x100] ss:$8 sps:$4 sm:$0xff]  }
 0x697   : > { %4264 = vmatprep.mubr.bf16.mxu0 %v13030_v9 }
 0x698   : > { %v11615_v8 = vpop.f32.mrf.mxu1 }
 0x699   : > { %6542 = vrot.lane.b32.xlu1 %v7631_v62, %s9356_s16  ;;  %s9358_s16 = smov 28  }
 0x69a   : > { %v11617_v41 = vpop.f32.mrf.mxu1 }
 0x69c   : > { %v11619_v59 = vpop.f32.mrf.mxu1 }
 0x69e   : > { %7391 = vmatmul.mubr.msk.bf16.vlgmr.msra.gmra.mxu0 %vm1693_vm4, %v11390_v24  ;;  %v8378_v24 = vld [vmem:[#allocation13 + $0x134] ss:$8 sps:$4 sm:$0xff]   ;;  %v11621_v0 = vpop.f32.mrf.mxu1 }
 0x69f   : > { %4547 = vmatpush1.bf16.msra.mxu0 %v8352_v33  ;;  %4274 = vmatprep.mubr.bf16.mxu0 %v13030_v9  ;;  %v8391_v33 = vld [vmem:[#allocation13 + $0x1e0] ss:$8 sps:$4 sm:$0xff]  }
 0x6a0   : > { %4548 = vmatprep.subr.bf16.mxu0 %v8357_v49  ;;  %5814 = vmatprep.subr.bf16.mxu1 %v8378_v24  ;;  %v8393_v49 = vld [vmem:[#allocation13 + $0x1e4] ss:$8 sps:$4 sm:$0xff]   ;;  %v4795_v24 = vpop.permute.xlu0 %4794 }
 0x6a1   : > { %5815 = vmatpush1.bf16.msra.mxu1 %v8376_v17 }
 0x6a2   : > { %5816 = vmatprep.subr.bf16.mxu1 %v8381_v28  ;;  %v8402_v28 = vld [vmem:[#allocation13 + $0x1b4] ss:$8 sps:$4 sm:$0xff]  }
 0x6a3   : > { %4549 = vmatpush1.bf16.msra.mxu0 %v8355_v36 }
 0x6a4   : > { %4550 = vmatprep.subr.bf16.mxu0 %v8360_v63 }
 0x6a5   : > { %5817 = vmatpush1.bf16.msra.mxu1 %v8379_v7 }
 0x6a6   : > { %7392 = vmatmul.mubr.msk.bf16.gmra.mxu0 %vm1693_vm4, %v11399_v34  ;;  %v11626_v34 = vpop.f32.mrf.mxu1  ;;  %5818 = vmatprep.subr.bf16.mxu1 %v8384_v21  ;;  %v4791_v46 = vpop.permute.xlu1 %4790  ;;  %v8400_v21 = vld [vmem:[#allocation13 + $0x1b0] ss:$8 sps:$4 sm:$0xff]  }
 0x6a7   : > { %4284 = vmatprep.mubr.bf16.mxu0 %v13030_v9  ;;  %4551 = vmatpush1.bf16.msra.mxu0 %v8358_v58  ;;  %v11656_v15 = vsel %vm4796_vm12, %v11575_v35, %v4791_v46  ;;  %v8396_v35 = vld [vmem:[#allocation13 + $0x1d4] ss:$8 sps:$4 sm:$0xff]  }
 0x6a8   : > { %4552 = vmatprep.subr.bf16.mxu0 %v8363_v61  ;;  %v11628_v19 = vpop.f32.mrf.mxu1 }
 0x6a9   : > { %5819 = vmatpush1.bf16.msra.mxu1 %v8382_v10 }
 0x6aa   : > { %v11630_v52 = vpop.f32.mrf.mxu1  ;;  %5820 = vmatprep.subr.bf16.mxu1 %v8387_v44 }
 0x6ab   : > { %4553 = vmatpush1.bf16.msra.mxu0 %v8361_v57 }
 0x6ac   : > { %v11632_v12 = vpop.f32.mrf.mxu1 }
 0x6ad   : > { %5821 = vmatpush1.bf16.msra.mxu1 %v8385_v51 }
 0x6ae   : > { %7393 = vmatmul.mubr.msk.bf16.gmra.mxu0 %vm1693_vm4, %v11411_v50  ;;  %v11637_v20 = vpop.f32.mrf.mxu1  ;;  %5822 = vmatprep.subr.bf16.mxu1 %v8390_v54 }
 0x6af   : > { %4294 = vmatprep.mubr.bf16.mxu0 %v13030_v9 }
 0x6b0   : > { %v11639_v50 = vpop.f32.mrf.mxu1 }
 0x6b1   : > { %5823 = vmatpush2.bf16.msra.mxu1 %v8388_v37 }
 0x6b2   : > { %v11641_v5 = vpop.f32.mrf.mxu1  ;;  %5824 = vmatprep.subr.bf16.mxu1 %v8393_v49  ;;  %v8403_v49 = vld [vmem:[#allocation13 + $0x1a0] ss:$8 sps:$4 sm:$0xff]  }
 0x6b4   : > { %v11643_v60 = vpop.f32.mrf.mxu1 }
 0x6b5   : > { %5825 = vmatpush2.bf16.msra.mxu1 %v8391_v33 }
 0x6b6   : > { %7394 = vmatmul.mubr.msk.bf16.gmra.mxu0 %vm1693_vm4, %v11420_v16  ;;  %v11648_v16 = vpop.f32.mrf.mxu1  ;;  %5826 = vmatprep.subr.bf16.mxu1 %v8396_v35 }
 0x6b7   : > { %4304 = vmatprep.mubr.bf16.mxu0 %v13030_v9 }
 0x6b8   : > { %v11650_v39 = vpop.f32.mrf.mxu1 }
 0x6b9   : > { %5827 = vmatpush2.bf16.msra.mxu1 %v8394_v23 }
 0x6ba   : > { %v11652_v31 = vpop.f32.mrf.mxu1 }
 0x6bc   : > { %v11658_v22 = vpop.f32.mrf.mxu1  ;;  %v4793_v63 = vpop.permute.xlu1 %4792 }
 0x6bd   : > { %v11673_v57 = vsel %vm4796_vm12, %v4793_v63, %v4795_v24  ;;  %v11677_v7 = vsel %vm4796_vm12, %v4791_v46, %v4793_v63  ;;  %v8406_v24 = vld [vmem:[#allocation13 + $0x190] ss:$8 sps:$4 sm:$0xff]  }
 0x6be   : > { %7395 = vmatmul.mubr.msk.bf16.gmra.mxu0 %vm1693_vm4, %v11432_v53  ;;  %v11663_v53 = vpop.f32.mrf.mxu1 }
 0x6bf   : > { %4314 = vmatprep.mubr.bf16.mxu0 %v13030_v9 }
 0x6c0   : > { %v11665_v29 = vpop.f32.mrf.mxu1 }
 0x6c2   : > { %v4685_v1 = vpop.f32.mrf.mxu1 }
 0x6c3   : > { %v4686_v61 = vadd.f32 %v4685_v1, %v11559_v2  ;;  %v8405_v1 = vld [vmem:[#allocation13 + $0x1a4] ss:$8 sps:$4 sm:$0xff]  }
 0x6c4   : > { %v4687_v36 = vpop.f32.mrf.mxu1 }
 0x6c5   : > { %v4688_v58 = vadd.f32 %v4687_v36, %v11562_v45  ;;  %v11687_v54 = vadd.f32 %v11677_v7, %v4686_v61 }
 0x6c6   : > { %7396 = vmatmul.mubr.msk.bf16.gmra.mxu0 %vm1693_vm4, %v11441_v14  ;;  %v8399_v14 = vld [vmem:[#allocation13 + $0x1c4] ss:$8 sps:$4 sm:$0xff]   ;;  %v4689_v62 = vpop.f32.mrf.mxu1 }
 0x6c7   : > { %4324 = vmatprep.mubr.bf16.mxu0 %v13030_v9  ;;  %5828 = vmatprep.subr.bf16.mxu1 %v8399_v14  ;;  %v11681_v45 = vadd.f32 %v11673_v57, %v4688_v58  ;;  %v4690_v46 = vadd.f32 %v4689_v62, %v11565_v3  ;;  %v8408_v58 = vld [vmem:[#allocation13 + $0x194] ss:$8 sps:$4 sm:$0xff]   ;;  %vm4871_vm3 = vcmp.gt.f32.partialorder %v11687_v54, 0.0 }
 0x6c8   : > { %v4691_v17 = vpop.f32.mrf.mxu1  ;;  %5829 = vmatpush2.bf16.msra.mxu1 %v8397_v25 }
 0x6c9   : > { %5830 = vmatprep.subr.bf16.mxu1 %v8402_v28  ;;  %v4936_v37 = vmin.f32 %v11681_v45, 0.0 }
 0x6ca   : > { %v4695_v10 = vpop.f32.mrf.mxu1 }
 0x6cb   : > { %v4696_v44 = vadd.f32 %v4695_v10, %v11569_v32  ;;  %v5003_v36 = vmul.f32 1.442695, %v4936_v37 }
 0x6cc   : > { %v4697_v51 = vpop.f32.mrf.mxu1  ;;  %5831 = vmatpush2.bf16.msra.mxu1 %v8400_v21 }
 0x6cd   : > { %v11697_v23 = vadd.f32 %v11677_v7, %v4696_v44  ;;  %5832 = vmatprep.subr.bf16.mxu1 %v8405_v1  ;;  %8804 = vpow2.f32 %v5003_v36 }
 0x6ce   : > { %7397 = vmatmul.mubr.msk.bf16.gmra.mxu0 %vm1693_vm4, %v11447_v47  ;;  %v4692_v47 = vadd.f32 %v4691_v17, %v11567_v43  ;;  %v4698_v43 = vadd.f32 %v4697_v51, %v11571_v40  ;;  %v4699_v33 = vpop.f32.mrf.mxu1  ;;  %v8411_v51 = vld [vmem:[#allocation13 + $0x184] ss:$8 sps:$4 sm:$0xff]  }
 0x6cf   : > { %4334 = vmatprep.mubr.bf16.mxu0 %v13030_v9  ;;  %v4700_v35 = vadd.f32 %v4699_v33, %v11573_v38  ;;  %v11709_v38 = vadd.f32 %v11677_v7, %v4690_v46  ;;  %v4943_v61 = vmin.f32 %v11697_v23, 0.0  ;;  %vm4879_vm14 = vcmp.gt.f32.partialorder %v11697_v23, 0.0 }
 0x6d0   : > { %v11684_v2 = vadd.f32 %v11673_v57, %v4692_v47  ;;  %v4701_v40 = vpop.f32.mrf.mxu1  ;;  %v11702_v14 = vadd.f32 %v11673_v57, %v4698_v43  ;;  %5833 = vmatpush2.bf16.msra.mxu1 %v8403_v49 }
 0x6d1   : > { %v11705_v3 = vadd.f32 %v11677_v7, %v4700_v35  ;;  %v4702_v62 = vadd.f32 %v4701_v40, %v11577_v4  ;;  %5834 = vmatprep.subr.bf16.mxu1 %v8408_v58  ;;  %v5017_v46 = vmul.f32 1.442695, %v4943_v61  ;;  %vm4875_vm6 = vcmp.gt.f32.partialorder %v11709_v38, 0.0 }
 0x6d2   : > { %v4940_v32 = vmin.f32 %v11684_v2, 0.0  ;;  %v4705_v25 = vpop.f32.mrf.mxu1  ;;  %v4944_v4 = vmin.f32 %v11702_v14, 0.0  ;;  %vm4876_vm13 = vcmp.gt.f32.partialorder %v11684_v2, 0.0  ;;  %vm4880_vm15 = vcmp.gt.f32.partialorder %v11702_v14, 0.0 }
 0x6d3   : > { %v4947_v47 = vmin.f32 %v11705_v3, 0.0  ;;  %v11714_v28 = vadd.f32 %v11673_v57, %v4702_v62  ;;  %v4706_v10 = vadd.f32 %v4705_v25, %v11582_v27  ;;  %v4939_v27 = vmin.f32 %v11709_v38, 0.0 }
 0x6d4   : > { %v5011_v63 = vmul.f32 1.442695, %v4940_v32  ;;  %v4707_v21 = vpop.f32.mrf.mxu1  ;;  %5835 = vmatpush2.bf16.msra.mxu1 %v8406_v24  ;;  %v8409_v32 = vld [vmem:[#allocation13 + $0x180] ss:$8 sps:$4 sm:$0xff]   ;;  %vm4883_vm1 = vcmp.gt.f32.partialorder %v11705_v3, 0.0 }
 0x6d5   : > { %v4708_v44 = vadd.f32 %v4707_v21, %v11587_v30  ;;  %v11723_v43 = vadd.f32 %v11677_v7, %v4706_v10  ;;  %v4948_v33 = vmin.f32 %v11714_v28, 0.0  ;;  %5836 = vmatprep.subr.bf16.mxu1 %v8411_v51  ;;  %v5025_v49 = vmul.f32 1.442695, %v4947_v47 }
 0x6d6   : > { %7398 = vmatmul.mubr.msk.bf16.gmra.mxu0 %vm1693_vm4, %v11453_v26  ;;  %v4935_v26 = vmin.f32 %v11687_v54, 0.0  ;;  %8806 = vpow2.f32 %v5011_v63  ;;  %v4709_v37 = vpop.f32.mrf.mxu1  ;;  %v5009_v62 = vmul.f32 1.442695, %v4939_v27  ;;  %vm4872_vm4 = vcmp.gt.f32.partialorder %v11681_v45, 0.0 }
 0x6d7   : > { %4570 = vmatprep.mubr.bf16.mxu0 %v13030_v9  ;;  %v4951_v30 = vmin.f32 %v11723_v43, 0.0  ;;  %v11730_v1 = vadd.f32 %v11673_v57, %v4708_v44  ;;  %vm4884_vm2 = vcmp.gt.f32.partialorder %v11714_v28, 0.0  ;;  %vm4887_vm7 = vcmp.gt.f32.partialorder %v11723_v43, 0.0 }
 0x6d8   : > { %v5001_v17 = vmul.f32 1.442695, %v4935_v26  ;;  %v4711_v35 = vpop.f32.mrf.mxu1  ;;  %v5019_v26 = vmul.f32 1.442695, %v4944_v4  ;;  %5837 = vmatpush2.bf16.msra.mxu1 %v8409_v32 }
 0x6d9   : > { %v4712_v36 = vadd.f32 %v4711_v35, %v11601_v55  ;;  %v5033_v58 = vmul.f32 1.442695, %v4951_v30  ;;  %v4952_v61 = vmin.f32 %v11730_v1, 0.0  ;;  %vm4888_vm8 = vcmp.gt.f32.partialorder %v11730_v1, 0.0 }
 0x6da   : > { %8808 = vpow2.f32 %v5001_v17  ;;  %v4715_v63 = vpop.f32.mrf.mxu1  ;;  %v8805_v51 = vpop.eup %8804 }
 0x6db   : > { %8810 = vpow2.f32 %v5017_v46  ;;  %v11738_v24 = vadd.f32 %v11673_v57, %v4712_v36  ;;  %v4716_v17 = vadd.f32 %v4715_v63, %v11607_v42  ;;  %v7442_v27 = vadd.f32 -1.0, %v8805_v51 }
 0x6dc   : > { %8812 = vpow2.f32 %v5025_v49  ;;  %v4717_v47 = vpop.f32.mrf.mxu1 }
 0x6dd   : > { %8814 = vpow2.f32 %v5019_v26  ;;  %v4956_v55 = vmin.f32 %v11738_v24, 0.0  ;;  %v11747_v21 = vadd.f32 %v11677_v7, %v4716_v17  ;;  %v4718_v4 = vadd.f32 %v4717_v47, %v11610_v13 }
 0x6de   : > { %7423 = vmatmul.mubr.msk.bf16.vlgmr.msra.gmra.mxu0 %vm795_vm0, %v11459_v18  ;;  %v4710_v18 = vadd.f32 %v4709_v37, %v11593_v6  ;;  %v5027_v6 = vmul.f32 1.442695, %v4948_v33  ;;  %v4719_v44 = vpop.f32.mrf.mxu1  ;;  %8816 = vpow2.f32 %v5009_v62  ;;  %vm4892_vm9 = vcmp.gt.f32.partialorder %v11738_v24, 0.0 }
 0x6df   : > { %4580 = vmatprep.mubr.bf16.mxu0 %v13030_v9  ;;  %v4720_v42 = vadd.f32 %v4719_v44, %v11615_v8  ;;  %v4959_v37 = vmin.f32 %v11747_v21, 0.0  ;;  %v5043_v33 = vmul.f32 1.442695, %v4956_v55  ;;  %vm4895_vm5 = vcmp.gt.f32.partialorder %v11747_v21, 0.0 }
 0x6e0   : > { %v11733_v40 = vadd.f32 %v11677_v7, %v4710_v18  ;;  %8818 = vpow2.f32 %v5027_v6  ;;  %v4721_v32 = vpop.f32.mrf.mxu1  ;;  %v11754_v18 = vadd.f32 %v11673_v57, %v4718_v4  ;;  %v5192_v6 = vsel %vm4872_vm4, %v11681_v45, %v7442_v27 }
 0x6e1   : > { %8820 = vpow2.f32 %v5033_v58  ;;  %v11757_v13 = vadd.f32 %v11677_v7, %v4720_v42  ;;  %v4722_v49 = vadd.f32 %v4721_v32, %v11617_v41  ;;  %v5049_v35 = vmul.f32 1.442695, %v4959_v37 }
 0x6e2   : > { %v4955_v25 = vmin.f32 %v11733_v40, 0.0  ;;  %v4725_v8 = vpop.f32.mrf.mxu1  ;;  %vm4891_vm10 = vcmp.gt.f32.partialorder %v11733_v40, 0.0  ;;  %vm4896_vm4 = vcmp.gt.f32.partialorder %v11754_v18, 0.0 }
 0x6e3   : > { %v8807_v46 = vpop.eup %8806  ;;  %v4963_v26 = vmin.f32 %v11757_v13, 0.0  ;;  %v11762_v36 = vadd.f32 %v11673_v57, %v4722_v49  ;;  %v4726_v63 = vadd.f32 %v4725_v8, %v11619_v59  ;;  %vm4899_vm11 = vcmp.gt.f32.partialorder %v11757_v13, 0.0 }
 0x6e4   : > { %v5041_v10 = vmul.f32 1.442695, %v4955_v25  ;;  %v7446_v30 = vadd.f32 -1.0, %v8807_v46  ;;  %v4727_v62 = vpop.f32.mrf.mxu1  ;;  %v4960_v25 = vmin.f32 %v11754_v18, 0.0 }
 0x6e5   : > { %v5057_v58 = vmul.f32 1.442695, %v4963_v26  ;;  %v11775_v17 = vadd.f32 %v11677_v7, %v4726_v63  ;;  %v4728_v59 = vadd.f32 %v4727_v62, %v11621_v0 }
 0x6e6   : > { %7424 = vmatmul.mubr.msk.bf16.gmra.mxu0 %vm795_vm0, %v11465_v11  ;;  %v5035_v11 = vmul.f32 1.442695, %v4952_v61  ;;  %8822 = vpow2.f32 %v5041_v10  ;;  %v4964_v61 = vmin.f32 %v11762_v36, 0.0  ;;  %v5196_v47 = vsel %vm4876_vm13, %v11684_v2, %v7446_v30  ;;  %v4729_v45 = vpop.f32.mrf.mxu1 }
 0x6e7   : > { %4590 = vmatprep.mubr.bf16.mxu0 %v13030_v9  ;;  %v8809_v41 = vpop.eup %8808  ;;  %v11784_v10 = vadd.f32 %v11673_v57, %v4728_v59  ;;  %v5051_v51 = vmul.f32 1.442695, %v4960_v25  ;;  %v4730_v2 = vadd.f32 %v4729_v45, %v11626_v34  ;;  %v4967_v32 = vmin.f32 %v11775_v17, 0.0 }
 0x6e8   : > { %8824 = vpow2.f32 %v5035_v11  ;;  %v8811_v55 = vpop.eup %8810  ;;  %v7441_v4 = vadd.f32 -1.0, %v8809_v41  ;;  %v4731_v44 = vpop.f32.mrf.mxu1  ;;  %v5059_v37 = vmul.f32 1.442695, %v4964_v61  ;;  %v9044_v41 = vld [vmem:[%s9626_s29 + $0x18] sm:$0xff]   ;;  %vm4900_vm13 = vcmp.gt.f32.partialorder %v11762_v36, 0.0 }
 0x6e9   : > { %8826 = vpow2.f32 %v5043_v33  ;;  %v8813_v0 = vpop.eup %8812  ;;  %v4732_v42 = vadd.f32 %v4731_v44, %v11628_v19  ;;  %v4968_v33 = vmin.f32 %v11784_v10, 0.0  ;;  %v11793_v49 = vadd.f32 %v11677_v7, %v4730_v2 }
 0x6ea   : > { %8828 = vpow2.f32 %v5049_v35  ;;  %v8815_v11 = vpop.eup %8814  ;;  %v4735_v27 = vpop.f32.mrf.mxu1  ;;  %v7449_v30 = vadd.f32 -1.0, %v8811_v55  ;;  %v7453_v35 = vadd.f32 -1.0, %v8813_v0  ;;  %v5191_v63 = vsel %vm4871_vm3, %v11687_v54, %v7441_v4 }
 0x6eb   : > { %8830 = vpow2.f32 %v5057_v58  ;;  %v8817_v46 = vpop.eup %8816  ;;  %v11796_v8 = vadd.f32 %v11673_v57, %v4732_v42  ;;  %v4736_v34 = vadd.f32 %v4735_v27, %v11630_v52  ;;  %v4971_v25 = vmin.f32 %v11793_v49, 0.0 }
 0x6ec   : > { %v7445_v26 = vadd.f32 -1.0, %v8817_v46  ;;  %v4737_v62 = vpop.f32.mrf.mxu1  ;;  %8832 = vpow2.f32 %v5051_v51  ;;  %v7450_v58 = vadd.f32 -1.0, %v8815_v11  ;;  %v5065_v52 = vmul.f32 1.442695, %v4967_v32 }
 0x6ed   : > { %v8819_v19 = vpop.eup %8818  ;;  %v4972_v61 = vmin.f32 %v11796_v8, 0.0  ;;  %v11814_v59 = vadd.f32 %v11677_v7, %v4736_v34  ;;  %8834 = vpow2.f32 %v5059_v37  ;;  %v4738_v4 = vadd.f32 %v4737_v62, %v11632_v12 }
 0x6ee   : > { %7425 = vmatmul.mubr.msk.bf16.gmra.mxu0 %vm795_vm0, %v11471_v56  ;;  %v5256_v56 = vpack.c.bf16 %v5196_v47, %v5192_v6  ;;  %v8821_v6 = vpop.eup %8820  ;;  %v5195_v54 = vsel %vm4875_vm6, %v11709_v38, %v7445_v26  ;;  %v4739_v47 = vpop.f32.mrf.mxu1  ;;  %v5199_v44 = vsel %vm4879_vm14, %v11697_v23, %v7449_v30  ;;  %v5203_v38 = vsel %vm4883_vm1, %v11705_v3, %v7453_v35 }
 0x6ef   : > { %4600 = vmatprep.mubr.bf16.mxu0 %v13030_v9  ;;  %v5255_v55 = vpack.c.bf16 %v5195_v54, %v5191_v63  ;;  %v5073_v0 = vmul.f32 1.442695, %v4971_v25  ;;  %v7454_v51 = vadd.f32 -1.0, %v8819_v19  ;;  %v7457_v11 = vadd.f32 -1.0, %v8821_v6  ;;  %v9045_v6 = vld [vmem:[%s9626_s29 + $0x20] sm:$0xff]  }
 0x6f0   : > { %5838 = vmatprep.mubr.bf16.mxu1 %v5256_v56  ;;  %v5067_v56 = vmul.f32 1.442695, %v4968_v33  ;;  %v4741_v2 = vpop.f32.mrf.mxu1  ;;  %v5075_v37 = vmul.f32 1.442695, %v4972_v61  ;;  %v11826_v32 = vadd.f32 %v11673_v57, %v4738_v4  ;;  %v5200_v12 = vsel %vm4880_vm15, %v11702_v14, %v7450_v58 }
 0x6f1   : > { %5839 = vmatmul.mubr.bf16.vlgmr.msra.gmra.mxu1 %v5255_v55  ;;  %8836 = vpow2.f32 %v5065_v52  ;;  %v4975_v3 = vmin.f32 %v11814_v59, 0.0  ;;  %v5204_v46 = vsel %vm4884_vm2, %v11714_v28, %v7454_v51  ;;  %v4740_v30 = vadd.f32 %v4739_v47, %v11637_v20 }
 0x6f2   : > { %v4745_v33 = vpop.f32.mrf.mxu1  ;;  %8838 = vpow2.f32 %v5067_v56  ;;  %v4976_v34 = vmin.f32 %v11826_v32, 0.0  ;;  %v5260_v19 = vpack.c.bf16 %v5204_v46, %v5200_v12  ;;  %v5259_v14 = vpack.c.bf16 %v5203_v38, %v5199_v44  ;;  %v8414_v56 = vld [vmem:[#allocation13 + $0x74] ss:$8 sps:$4 sm:$0xff]   ;;  %v8417_v46 = vld [vmem:[#allocation13 + $0x64] ss:$8 sps:$4 sm:$0xff]  }
 0x6f3   : > { %v8823_v45 = vpop.eup %8822  ;;  %8840 = vpow2.f32 %v5073_v0  ;;  %v4742_v26 = vadd.f32 %v4741_v2, %v11639_v50  ;;  %v4746_v63 = vadd.f32 %v4745_v33, %v11641_v5  ;;  %v5081_v25 = vmul.f32 1.442695, %v4975_v3  ;;  %5693 = vmatprep.subr.bf16.mxu0 %v8414_v56  ;;  %v8415_v3 = vld [vmem:[#allocation13 + $0x60] ss:$8 sps:$4 sm:$0xff]  }
 0x6f4   : > { %v7461_v27 = vadd.f32 -1.0, %v8823_v45  ;;  %v4747_v62 = vpop.f32.mrf.mxu1  ;;  %8842 = vpow2.f32 %v5075_v37  ;;  %v5083_v28 = vmul.f32 1.442695, %v4976_v34  ;;  %5848 = vmatprep.mubr.bf16.mxu1 %v5260_v19  ;;  %v8412_v45 = vld [vmem:[#allocation13 + $0x70] ss:$8 sps:$4 sm:$0xff]   ;;  %v5207_v55 = vsel %vm4887_vm7, %v11723_v43, %v7457_v11 }
 0x6f5   : > { %v8825_v42 = vpop.eup %8824  ;;  %v4748_v20 = vadd.f32 %v4747_v62, %v11643_v60  ;;  %v11848_v50 = vadd.f32 %v11673_v57, %v4742_v26  ;;  %v11857_v4 = vadd.f32 %v11677_v7, %v4746_v63  ;;  %5694 = vmatpush1.bf16.msra.mxu0 %v8412_v45  ;;  %vm4904_vm14 = vcmp.gt.f32.partialorder %v11784_v10, 0.0 }
 0x6f6   : > { %7426 = vmatmul.mubr.msk.bf16.gmra.mxu0 %vm795_vm0, %v9044_v41  ;;  %v8827_v23 = vpop.eup %8826  ;;  %v11843_v41 = vadd.f32 %v11677_v7, %v4740_v30  ;;  %v7458_v5 = vadd.f32 -1.0, %v8825_v42  ;;  %v4749_v52 = vpop.f32.mrf.mxu1  ;;  %8844 = vpow2.f32 %v5083_v28  ;;  %v5211_v2 = vsel %vm4891_vm10, %v11733_v40, %v7461_v27  ;;  %v9046_v30 = vld [vmem:[%s9626_s29 + $0x28] sm:$0xff]   ;;  %5695 = vmatprep.subr.bf16.mxu0 %v8417_v46 }
 0x6f7   : > { %4610 = vmatprep.mubr.bf16.mxu0 %v13030_v9  ;;  %v8829_v35 = vpop.eup %8828  ;;  %v7462_v58 = vadd.f32 -1.0, %v8827_v23  ;;  %v4980_v60 = vmin.f32 %v11848_v50, 0.0  ;;  %v11861_v38 = vadd.f32 %v11673_v57, %v4748_v20  ;;  %8846 = vpow2.f32 %v5081_v25  ;;  %v8418_v25 = vld [vmem:[#allocation13 + $0x50] ss:$8 sps:$4 sm:$0xff]  }
 0x6f8   : > { %v8831_v54 = vpop.eup %8830  ;;  %v7465_v61 = vadd.f32 -1.0, %v8829_v35  ;;  %v4979_v47 = vmin.f32 %v11843_v41, 0.0  ;;  %v4751_v44 = vpop.f32.mrf.mxu1  ;;  %v5208_v0 = vsel %vm4888_vm8, %v11730_v1, %v7458_v5  ;;  %v4983_v40 = vmin.f32 %v11857_v4, 0.0  ;;  %v8420_v5 = vld [vmem:[#allocation13 + $0x54] ss:$8 sps:$4 sm:$0xff]  }
 0x6f9   : > { %5849 = vmatmul.mubr.bf16.gmra.mxu1 %v5259_v14  ;;  %v5212_v43 = vsel %vm4892_vm9, %v11738_v24, %v7462_v58  ;;  %v8833_v51 = vpop.eup %8832  ;;  %v5091_v11 = vmul.f32 1.442695, %v4980_v60  ;;  %v7469_v23 = vadd.f32 -1.0, %v8831_v54  ;;  %v4984_v24 = vmin.f32 %v11861_v38, 0.0  ;;  %5696 = vmatpush1.bf16.msra.mxu0 %v8415_v3 }
 0x6fa   : > { %v5089_v42 = vmul.f32 1.442695, %v4979_v47  ;;  %v5264_v37 = vpack.c.bf16 %v5212_v43, %v5208_v0  ;;  %v4755_v12 = vpop.f32.mrf.mxu1  ;;  %v11875_v1 = vsel %vm4895_vm5, %v11747_v21, %v7465_v61  ;;  %v8835_v33 = vpop.eup %8834  ;;  %v4750_v27 = vadd.f32 %v4749_v52, %v11648_v16  ;;  %5697 = vmatprep.subr.bf16.mxu0 %v8420_v5 }
 0x6fb   : > { %8848 = vpow2.f32 %v5091_v11  ;;  %v4752_v34 = vadd.f32 %v4751_v44, %v11650_v39  ;;  %v11883_v21 = vpop.permute.xlu0 %5687  ;;  %v5099_v35 = vmul.f32 1.442695, %v4984_v24  ;;  %v5263_v14 = vpack.c.bf16 %v5211_v2, %v5207_v55 }
 0x6fc   : > { %5858 = vmatprep.mubr.bf16.mxu1 %v5264_v37  ;;  %v4757_v19 = vpop.f32.mrf.mxu1  ;;  %v4756_v26 = vadd.f32 %v4755_v12, %v11652_v31  ;;  %8850 = vpow2.f32 %v5089_v42  ;;  %v11889_v16 = vadd.f32 %v11677_v7, %v4750_v27  ;;  %v7466_v62 = vadd.f32 -1.0, %v8833_v51  ;;  %v8421_v37 = vld [vmem:[#allocation13 + $0x40] ss:$8 sps:$4 sm:$0xff]   ;;  %v8423_v12 = vld [vmem:[#allocation13 + $0x44] ss:$8 sps:$4 sm:$0xff]  }
 0x6fd   : > { %v4758_v63 = vadd.f32 %v4757_v19, %v11658_v22  ;;  %v11892_v39 = vadd.f32 %v11673_v57, %v4752_v34  ;;  %8852 = vpow2.f32 %v5099_v35  ;;  %v7470_v22 = vadd.f32 -1.0, %v8835_v33  ;;  %5698 = vmatpush1.bf16.msra.mxu0 %v8418_v25  ;;  %v9047_v33 = vld [vmem:[%s9626_s29 + $0x30] sm:$0xff]  }
 0x6fe   : > { %7427 = vmatmul.mubr.msk.bf16.gmra.mxu0 %vm795_vm0, %v9045_v6  ;;  %v4759_v6 = vpop.f32.mrf.mxu1  ;;  %v8837_v28 = vpop.eup %8836  ;;  %v11895_v20 = vadd.f32 %v11677_v7, %v4756_v26  ;;  %v5219_v52 = vsel %vm4899_vm11, %v11757_v13, %v7469_v23  ;;  %v5097_v54 = vmul.f32 1.442695, %v4983_v40  ;;  %v4987_v61 = vmin.f32 %v11889_v16, 0.0  ;;  %5699 = vmatprep.subr.bf16.mxu0 %v8423_v12 }
 0x6ff   : > { %4620 = vmatprep.mubr.bf16.mxu0 %v13030_v9  ;;  %v11898_v31 = vadd.f32 %v11673_v57, %v4758_v63  ;;  %v8839_v58 = vpop.eup %8838  ;;  %v4988_v47 = vmin.f32 %v11892_v39, 0.0  ;;  %vm4908_vm15 = vcmp.gt.f32.partialorder %v11796_v8, 0.0  ;;  %v7473_v55 = vadd.f32 -1.0, %v8837_v28  ;;  %v11908_v43 = vpop.permute.xlu0 %6265 }
 0x700   : > { %v8841_v45 = vpop.eup %8840  ;;  %v5105_v60 = vmul.f32 1.442695, %v4987_v61  ;;  %v4761_v13 = vpop.f32.mrf.mxu1  ;;  %v4991_v51 = vmin.f32 %v11895_v20, 0.0  ;;  %v5216_v2 = vsel %vm4896_vm4, %v11754_v18, %v7466_v62  ;;  %v5220_v42 = vsel %vm4900_vm13, %v11762_v36, %v7470_v22 }
 0x701   : > { %5859 = vmatmul.mubr.bf16.gmra.mxu1 %v5263_v14  ;;  %v8843_v56 = vpop.eup %8842  ;;  %v5107_v44 = vmul.f32 1.442695, %v4988_v47  ;;  %v4992_v0 = vmin.f32 %v11898_v31, 0.0  ;;  %v5267_v11 = vpack.c.bf16 %v5219_v52, %v11875_v1  ;;  %v7477_v23 = vadd.f32 -1.0, %v8841_v45  ;;  %v11922_v36 = vpop.permute.xlu1 %5685  ;;  %5700 = vmatpush1.bf16.msra.mxu0 %v8421_v37 }
 0x702   : > { %8854 = vpow2.f32 %v5097_v54  ;;  %v5268_v3 = vpack.c.bf16 %v5220_v42, %v5216_v2  ;;  %v4760_v40 = vadd.f32 %v4759_v6, %v11663_v53  ;;  %v4762_v18 = vadd.f32 %v4761_v13, %v11665_v29  ;;  %v8430_v2 = vld [vmem:[#allocation13 + $0x10] ss:$8 sps:$4 sm:$0xff]   ;;  %v8432_v42 = vld [vmem:[#allocation13 + $0x14] ss:$8 sps:$4 sm:$0xff]  }
 0x703   : > { %v5115_v24 = vmul.f32 1.442695, %v4992_v0  ;;  %v8845_v46 = vpop.eup %8844  ;;  %8856 = vpow2.f32 %v5107_v44  ;;  %v7474_v27 = vadd.f32 -1.0, %v8839_v58  ;;  %vm4903_vm1 = vcmp.gt.f32.partialorder %v11775_v17, 0.0  ;;  %v11940_v63 = vpop.permute.xlu0 %4028  ;;  %v8427_v58 = vld [vmem:[#allocation13 + $0x20] ss:$8 sps:$4 sm:$0xff]  }
 0x704   : > { %vm4907_vm2 = vcmp.gt.f32.partialorder %v11793_v49, 0.0  ;;  %8858 = vpow2.f32 %v5105_v60  ;;  %5868 = vmatprep.mubr.bf16.mxu1 %v5268_v3  ;;  %v7478_v1 = vadd.f32 -1.0, %v8843_v56  ;;  %v5113_v34 = vmul.f32 1.442695, %v4991_v51  ;;  %v8847_v35 = vpop.eup %8846  ;;  %v8429_v56 = vld [vmem:[#allocation13 + $0x24] ss:$8 sps:$4 sm:$0xff]  }
 0x705   : > { %v11928_v19 = vadd.f32 %v11677_v7, %v4760_v40  ;;  %v11931_v53 = vadd.f32 %v11673_v57, %v4762_v18  ;;  %v5224_v29 = vsel %vm4904_vm14, %v11784_v10, %v7474_v27  ;;  %vm4912_vm3 = vcmp.gt.f32.partialorder %v11826_v32, 0.0  ;;  %v5684_v6 = vpop.permute.xlu1 %5683  ;;  %v8433_v27 = vld [vmem:[#allocation13] ss:$8 sps:$4 sm:$0xff]  }
 0x706   : > { %7428 = vmatmul.mubr.msk.bf16.gmra.mxu0 %vm795_vm0, %v9046_v30  ;;  %v8426_v30 = vld [vmem:[#allocation13 + $0x34] ss:$8 sps:$4 sm:$0xff]   ;;  %8860 = vpow2.f32 %v5115_v24  ;;  %v5228_v14 = vsel %vm4908_vm15, %v11796_v8, %v7478_v1  ;;  %v7482_v7 = vadd.f32 -1.0, %v8845_v46  ;;  %v5223_v57 = vsel %vm4903_vm1, %v11775_v17, %v7473_v55  ;;  %v8435_v1 = vld [vmem:[#allocation13 + $0x4] ss:$8 sps:$4 sm:$0xff]  }
 0x707   : > { %4630 = vmatprep.mubr.bf16.mxu0 %v13030_v9  ;;  %v5227_v10 = vsel %vm4907_vm2, %v11793_v49, %v7477_v23  ;;  %vm4916_vm6 = vcmp.gt.f32.partialorder %v11848_v50, 0.0  ;;  %v4995_v62 = vmin.f32 %v11928_v19, 0.0  ;;  %5701 = vmatprep.subr.bf16.mxu0 %v8426_v30  ;;  %v4996_v8 = vmin.f32 %v11931_v53, 0.0  ;;  %v9048_v55 = vld [vmem:[%s9626_s29 + $0x38] sm:$0xff]  }
 0x708   : > { %v8849_v26 = vpop.eup %8848  ;;  %v5272_v28 = vpack.c.bf16 %v5228_v14, %v5224_v29  ;;  %v11953_v25 = vsel %vm4796_vm12, %v5684_v6, %v11922_v36  ;;  %8862 = vpow2.f32 %v5113_v34  ;;  %v5232_v47 = vsel %vm4912_vm3, %v11826_v32, %v7482_v7 }
 0x709   : > { %5869 = vmatmul.mubr.bf16.gmra.mxu1 %v5267_v11  ;;  %v7486_v22 = vadd.f32 -1.0, %v8849_v26  ;;  %v8851_v17 = vpop.eup %8850  ;;  %v5121_v49 = vmul.f32 1.442695, %v4995_v62  ;;  %v5123_v61 = vmul.f32 1.442695, %v4996_v8  ;;  %v5271_v44 = vpack.c.bf16 %v5227_v10, %v5223_v57 }
 0x70a   : > { %v8853_v52 = vpop.eup %8852  ;;  %5878 = vmatprep.mubr.bf16.mxu1 %v5272_v28  ;;  %vm4911_vm7 = vcmp.gt.f32.partialorder %v11814_v59, 0.0  ;;  %v7481_v0 = vadd.f32 -1.0, %v8847_v35  ;;  %v7485_v13 = vadd.f32 -1.0, %v8851_v17  ;;  %vm4915_vm8 = vcmp.gt.f32.partialorder %v11843_v41, 0.0 }
 0x70b   : > { %v5236_v45 = vsel %vm4916_vm6, %v11848_v50, %v7486_v22  ;;  %8864 = vpow2.f32 %v5121_v49  ;;  %v7490_v51 = vadd.f32 -1.0, %v8853_v52  ;;  %vm4924_vm9 = vcmp.gt.f32.partialorder %v11892_v39, 0.0  ;;  %v8436_v49 = vld [vmem:[#allocation13 + $0xf0] ss:$8 sps:$4 sm:$0xff]   ;;  %v8439_v52 = vld [vmem:[#allocation13 + $0xe0] ss:$8 sps:$4 sm:$0xff]  }
 0x70c   : > { %8866 = vpow2.f32 %v5123_v61  ;;  %v5276_v50 = vpack.c.bf16 %v5236_v45, %v5232_v47  ;;  %v5231_v3 = vsel %vm4911_vm7, %v11814_v59, %v7481_v0  ;;  %v5235_v46 = vsel %vm4915_vm8, %v11843_v41, %v7485_v13  ;;  %v8442_v61 = vld [vmem:[#allocation13 + $0xd0] ss:$8 sps:$4 sm:$0xff]   ;;  %v8450_v0 = vld [vmem:[#allocation13 + $0xb4] ss:$8 sps:$4 sm:$0xff]  }
 0x70d   : > { %vm4919_vm10 = vcmp.gt.f32.partialorder %v11857_v4, 0.0  ;;  %vm4923_vm5 = vcmp.gt.f32.partialorder %v11889_v16, 0.0  ;;  %vm4928_vm11 = vcmp.gt.f32.partialorder %v11898_v31, 0.0  ;;  %vm4932_vm4 = vcmp.gt.f32.partialorder %v11931_v53, 0.0  ;;  %v8448_v13 = vld [vmem:[#allocation13 + $0xb0] ss:$8 sps:$4 sm:$0xff]  }
 0x70e   : > { %7429 = vmatmul.mubr.msk.bf16.gmra.mxu0 %vm795_vm0, %v9047_v33  ;;  %vm4927_vm13 = vcmp.gt.f32.partialorder %v11895_v20, 0.0  ;;  %vm4931_vm14 = vcmp.gt.f32.partialorder %v11928_v19, 0.0  ;;  %vm6738_vm15 = vcmask 228480  }
 0x70f   : > { %4640 = vmatprep.mubr.bf16.mxu0 %v13030_v9  ;;  %v8424_v9 = vld [vmem:[#allocation13 + $0x30] ss:$8 sps:$4 sm:$0xff]   ;;  %v8855_v12 = vpop.eup %8854 }
 0x710   : > { %5702 = vmatpush1.bf16.msra.mxu0 %v8424_v9  ;;  %v8857_v24 = vpop.eup %8856  ;;  %v5275_v9 = vpack.c.bf16 %v5235_v46, %v5231_v3  ;;  %v7489_v41 = vadd.f32 -1.0, %v8855_v12 }
 0x711   : > { %5703 = vmatprep.subr.bf16.mxu0 %v8429_v56  ;;  %5879 = vmatmul.mubr.bf16.gmra.mxu1 %v5271_v44  ;;  %v8859_v33 = vpop.eup %8858  ;;  %v7494_v40 = vadd.f32 -1.0, %v8857_v24  ;;  %v8445_v56 = vld [vmem:[#allocation13 + $0xc0] ss:$8 sps:$4 sm:$0xff]  }
 0x712   : > { %5888 = vmatprep.mubr.bf16.mxu1 %v5276_v50  ;;  %v7493_v30 = vadd.f32 -1.0, %v8859_v33  ;;  %v5239_v26 = vsel %vm4919_vm10, %v11857_v4, %v7489_v41  ;;  %v8453_v50 = vld [vmem:[#allocation13 + $0xa4] ss:$8 sps:$4 sm:$0xff]  }
 0x713   : > { %v7936_v5 = vpop.f32.mrf.mxu0  ;;  %v8861_v29 = vpop.eup %8860  ;;  %v5244_v59 = vsel %vm4924_vm9, %v11892_v39, %v7494_v40 }
 0x714   : > { %v4074_v54 = vadd.f32 %v7936_v5, %v11940_v63  ;;  %5704 = vmatpush1.bf16.msra.mxu0 %v8427_v58  ;;  %v7498_v14 = vadd.f32 -1.0, %v8861_v29  ;;  %v5243_v39 = vsel %vm4923_vm5, %v11889_v16, %v7493_v30  ;;  %v8438_v5 = vld [vmem:[#allocation13 + $0xf4] ss:$8 sps:$4 sm:$0xff]   ;;  %v8441_v58 = vld [vmem:[#allocation13 + $0xe4] ss:$8 sps:$4 sm:$0xff]  }
 0x715   : > { %v4065_v60 = vpop.f32.mrf.mxu0  ;;  %5705 = vmatprep.subr.bf16.mxu0 %v8432_v42  ;;  %v5279_v6 = vpack.c.bf16 %v5243_v39, %v5239_v26  ;;  %v8454_v42 = vld [vmem:[#allocation13 + $0x90] ss:$8 sps:$4 sm:$0xff]  }
 0x716   : > { %7430 = vmatmul.mubr.msk.bf16.gmra.mxu0 %vm795_vm0, %v9048_v55  ;;  %6694 = vrot.lane.b32.xlu0 %v4074_v54, %s9357_s20  ;;  %v4066_v11 = vadd.f32 %v4065_v60, %v11940_v63  ;;  %vm4920_vm0 = vcmp.gt.f32.partialorder %v11861_v38, 0.0  ;;  %v5248_v62 = vsel %vm4928_vm11, %v11898_v31, %v7498_v14 }
 0x717   : > { %v7937_v32 = vpop.f32.mrf.mxu0  ;;  %v5240_v18 = vsel %vm4920_vm0, %v11861_v38, %v7490_v51  ;;  %v8863_v38 = vpop.eup %8862  ;;  %v8451_v51 = vld [vmem:[#allocation13 + $0xa0] ss:$8 sps:$4 sm:$0xff]  }
 0x718   : > { %v4077_v37 = vadd.f32 %v7937_v32, %v11940_v63  ;;  %5706 = vmatpush1.bf16.msra.mxu0 %v8430_v2  ;;  %v5280_v35 = vpack.c.bf16 %v5244_v59, %v5240_v18  ;;  %v8865_v7 = vpop.eup %8864  ;;  %v7497_v8 = vadd.f32 -1.0, %v8863_v38  ;;  %v8456_v2 = vld [vmem:[#allocation13 + $0x94] ss:$8 sps:$4 sm:$0xff]  }
 0x719   : > { %v4068_v23 = vpop.f32.mrf.mxu0  ;;  %5707 = vmatprep.subr.bf16.mxu0 %v8435_v1  ;;  %5889 = vmatmul.mubr.bf16.gmra.mxu1 %v5275_v9  ;;  %v8867_v57 = vpop.eup %8866  ;;  %v7501_v28 = vadd.f32 -1.0, %v8865_v7 }
 0x71a   : > { %6696 = vrot.lane.b32.xlu1 %v4077_v37, %s9357_s20  ;;  %6690 = vrot.lane.b32.xlu0 %v4066_v11, %s9357_s20  ;;  %v4069_v34 = vadd.f32 %v4068_v23, %v11940_v63  ;;  %v7502_v10 = vadd.f32 -1.0, %v8867_v57  ;;  %v5247_v4 = vsel %vm4927_vm13, %v11895_v20, %v7497_v8  ;;  %v8459_v37 = vld [vmem:[#allocation13 + $0x84] ss:$8 sps:$4 sm:$0xff]   ;;  %v8457_v23 = vld [vmem:[#allocation13 + $0x80] ss:$8 sps:$4 sm:$0xff]  }
 0x71b   : > { %5898 = vmatprep.mubr.bf16.mxu1 %v5280_v35  ;;  %v5251_v16 = vsel %vm4931_vm14, %v11928_v19, %v7501_v28  ;;  %v8447_v19 = vld [vmem:[#allocation13 + $0xc4] ss:$8 sps:$4 sm:$0xff]  }
 0x71c   : > { %5708 = vmatpush1.bf16.msra.mxu0 %v8433_v27  ;;  %v5252_v22 = vsel %vm4932_vm4, %v11931_v53, %v7502_v10  ;;  %v5283_v31 = vpack.c.bf16 %v5251_v16, %v5247_v4  ;;  %v8444_v53 = vld [vmem:[#allocation13 + $0xd4] ss:$8 sps:$4 sm:$0xff]  }
 0x71d   : > { %v5284_v17 = vpack.c.bf16 %v5252_v22, %v5248_v62  ;;  %5709 = vmatprep.subr.bf16.mxu0 %v8438_v5 }
 0x71e   : > { %6692 = vrot.lane.b32.xlu1 %v4069_v34, %s9357_s20 }
 0x720   : > { %5710 = vmatpush2.bf16.msra.mxu0 %v8436_v49  ;;  %v12043_v49 = vpop.permute.xlu1 %6267 }
 0x721   : > { %5899 = vmatmul.mubr.bf16.gmra.mxu1 %v5279_v6  ;;  %5711 = vmatprep.subr.bf16.mxu0 %v8441_v58 }
 0x722   : > { %5908 = vmatprep.mubr.bf16.mxu1 %v5284_v17 }
 0x724   : > { %5712 = vmatpush2.bf16.msra.mxu0 %v8439_v52 }
 0x725   : > { %5713 = vmatprep.subr.bf16.mxu0 %v8444_v53 }
 0x728   : > { %5714 = vmatpush2.bf16.msra.mxu0 %v8442_v61 }
 0x729   : > { %5909 = vmatmul.mubr.bf16.gmra.mxu1 %v5283_v31  ;;  %5715 = vmatprep.subr.bf16.mxu0 %v8447_v19  ;;  %v8460_v31 = vld [vmem:[#allocation14 + $0x78] sm:$0xff]  }
 0x72c   : > { %5716 = vmatpush2.bf16.msra.mxu0 %v8445_v56 }
 0x72d   : > { %5717 = vmatprep.subr.bf16.mxu0 %v8450_v0 }
 0x730   : > { %5718 = vmatpush2.bf16.msra.mxu0 %v8448_v13 }
 0x731   : > { %5719 = vmatprep.subr.bf16.mxu0 %v8453_v50 }
 0x733   : > { %v7940_v54 = vpop.f32.mrf.mxu0 }
 0x734   : > { %v4090_v47 = vadd.f32 %v7940_v54, %v11940_v63  ;;  %5720 = vmatpush2.bf16.msra.mxu0 %v8451_v51  ;;  %v12051_v54 = vpop.permute.xlu1 %6542 }
 0x735   : > { %v4081_v20 = vpop.f32.mrf.mxu0  ;;  %5721 = vmatprep.subr.bf16.mxu0 %v8456_v2 }
 0x736   : > { %6702 = vrot.lane.b32.xlu0 %v4090_v47, %s9357_s20  ;;  %v4082_v55 = vadd.f32 %v4081_v20, %v11940_v63 }
 0x737   : > { %v7941_v45 = vpop.f32.mrf.mxu0 }
 0x738   : > { %v4093_v60 = vadd.f32 %v7941_v45, %v11940_v63  ;;  %5722 = vmatpush2.bf16.msra.mxu0 %v8454_v42 }
 0x739   : > { %v4084_v44 = vpop.f32.mrf.mxu0  ;;  %5723 = vmatprep.subr.bf16.mxu0 %v8459_v37 }
 0x73a   : > { %6704 = vrot.lane.b32.xlu1 %v4093_v60, %s9357_s20  ;;  %6698 = vrot.lane.b32.xlu0 %v4082_v55, %s9357_s20  ;;  %v4085_v32 = vadd.f32 %v4084_v44, %v11940_v63 }
 0x73c   : > { %5724 = vmatpush2.bf16.msra.mxu0 %v8457_v23 }
 0x73d   : > { %7806 = vmatprep.subr.bf16.mxu0 %v8460_v31 }
 0x73e   : > { %6700 = vrot.lane.b32.xlu1 %v4085_v32, %s9357_s20 }
 0x746   : > { %v7944_v11 = vpop.f32.mrf.mxu0 }
 0x747   : > { %v4106_v12 = vadd.f32 %v7944_v11, %v11940_v63 }
 0x748   : > { %v4097_v24 = vpop.f32.mrf.mxu0 }
 0x749   : > { %6710 = vrot.lane.b32.xlu0 %v4106_v12, %s9357_s20  ;;  %v4098_v46 = vadd.f32 %v4097_v24, %v11940_v63 }
 0x74a   : > { %v7945_v3 = vpop.f32.mrf.mxu0 }
 0x74b   : > { %v4109_v33 = vadd.f32 %v7945_v3, %v11940_v63 }
 0x74c   : > { %v4100_v40 = vpop.f32.mrf.mxu0 }
 0x74d   : > { %6712 = vrot.lane.b32.xlu1 %v4109_v33, %s9357_s20  ;;  %6706 = vrot.lane.b32.xlu0 %v4098_v46, %s9357_s20  ;;  %v4101_v18 = vadd.f32 %v4100_v40, %v11940_v63 }
 0x751   : > { %6708 = vrot.lane.b32.xlu1 %v4101_v18, %s9357_s20 }
 0x756   : > { %v7948_v27 = vpop.f32.mrf.mxu0 }
 0x757   : > { %v4122_v1 = vadd.f32 %v7948_v27, %v11940_v63 }
 0x758   : > { %v4113_v34 = vpop.f32.mrf.mxu0 }
 0x759   : > { %6718 = vrot.lane.b32.xlu0 %v4122_v1, %s9357_s20  ;;  %v4114_v9 = vadd.f32 %v4113_v34, %v11940_v63 }
 0x75a   : > { %v7949_v29 = vpop.f32.mrf.mxu0 }
 0x75b   : > { %v4125_v59 = vadd.f32 %v7949_v29, %v11940_v63 }
 0x75c   : > { %v4116_v41 = vpop.f32.mrf.mxu0 }
 0x75d   : > { %6720 = vrot.lane.b32.xlu1 %v4125_v59, %s9357_s20  ;;  %6714 = vrot.lane.b32.xlu0 %v4114_v9, %s9357_s20  ;;  %v4117_v35 = vadd.f32 %v4116_v41, %v11940_v63 }
 0x75e   : > { %v4266_v30 = vpop.f32.mrf.mxu0 }
 0x760   : > { %v4268_v38 = vpop.f32.mrf.mxu0 }
 0x761   : > { %6716 = vrot.lane.b32.xlu1 %v4117_v35, %s9357_s20  ;;  %s9359_s20 = smov [#allocation16]  }
 0x762   : > { %v4270_v14 = vpop.f32.mrf.mxu0  ;;  %s9261_s29 = sshll.u32 %s9359_s20, 4  ;;  %s9262_s29 = int_to_ptr.vmem [resolvable:$false] %s9261_s29 }
 0x763   : > { %s9263_s3 = scalar_lea.vmem %s9262_s29, 4096  ;;  %p9264_p3 = scmp.lt.s32.totalorder %s12766_s27, %s9262_s29 }
 0x764   : > { %v4272_v7 = vpop.f32.mrf.mxu0  ;;  %p9265_p2 = scmp.lt.s32.totalorder %s9263_s3, %s9257_s28 }
 0x766   : > { %v4276_v26 = vpop.f32.mrf.mxu0  ;;  %p9266_p4 = por %p9265_p2, %p9264_p3 }
 0x768   : > { %v4278_v39 = vpop.f32.mrf.mxu0  ;;  %p9267_p7 = pnand %p9266_p4, %p9260_p13 }
 0x76a   : > { %v12019_v57 = vpop.f32.mrf.mxu0 }
 0x76c   : > { %v12021_v10 = vpop.f32.mrf.mxu0 }
 0x76e   : > { %v12023_v62 = vpop.f32.mrf.mxu0 }
 0x770   : > { %v12025_v6 = vpop.f32.mrf.mxu0 }
 0x772   : > { %v12027_v8 = vpop.f32.mrf.mxu0 }
 0x774   : > { %v12029_v28 = vpop.f32.mrf.mxu0 }
 0x776   : > { %v12031_v63 = vpop.f32.mrf.mxu0 }
 0x778   : > { %v12033_v22 = vpop.f32.mrf.mxu0 }
 0x77a   : > { %v12035_v17 = vpop.f32.mrf.mxu0 }
 0x77c   : > { %v12037_v4 = vpop.f32.mrf.mxu0 }
 0x77e   : > { %v12039_v16 = vpop.f32.mrf.mxu0 }
 0x780   : > { %v12041_v5 = vpop.f32.mrf.mxu0 }
 0x782   : > { %v12045_v58 = vpop.f32.mrf.mxu0 }
 0x784   : > { %v12047_v52 = vpop.f32.mrf.mxu0 }
 0x786   : > { %v12049_v53 = vpop.f32.mrf.mxu0 }
 0x788   : > { %v12053_v61 = vpop.f32.mrf.mxu0  ;;  %v6695_v47 = vpop.permute.xlu0 %6694 }
 0x789   : > { %6741 = vst.msk [vmem:[%s9984_s18 + $0x10] sm:$0xff] %vm6738_vm15, %v6695_v47 }
 0x78a   : > { %v12055_v20 = vpop.f32.mrf.mxu0 }
 0x78c   : > { %v12059_v19 = vpop.f32.mrf.mxu0  ;;  %v6697_v45 = vpop.permute.xlu1 %6696 }
 0x78d   : > { %v6691_v56 = vpop.permute.xlu0 %6690  ;;  %6742 = vst.msk [vmem:[%s9984_s18 + $0x18] sm:$0xff] %vm6738_vm15, %v6697_v45 }
 0x78e   : > { %v12061_v55 = vpop.f32.mrf.mxu0  ;;  %6739 = vst.msk [vmem:[%s9984_s18] sm:$0xff] %vm6738_vm15, %v6691_v56 }
 0x790   : > { %v12067_v60 = vpop.f32.mrf.mxu0  ;;  %v6693_v44 = vpop.permute.xlu1 %6692 }
 0x791   : > { %6740 = vst.msk [vmem:[%s9984_s18 + $0x8] sm:$0xff] %vm6738_vm15, %v6693_v44 }
 0x792   : > { %v12069_v0 = vpop.f32.mrf.mxu0 }
 0x794   : > { %v12073_v13 = vpop.f32.mrf.mxu0 }
 0x796   : > { %v12075_v32 = vpop.f32.mrf.mxu0 }
 0x798   : > { %v12077_v50 = vpop.f32.mrf.mxu0 }
 0x79a   : > { %v12079_v51 = vpop.f32.mrf.mxu0 }
 0x79c   : > { %v12081_v2 = vpop.f32.mrf.mxu0 }
 0x79e   : > { %v4572_v42 = vpop.f32.mrf.mxu0 }
 0x79f   : > { %v4573_v11 = vadd.f32 %v4572_v42, %v4266_v30 }
 0x7a0   : > { %v4574_v37 = vpop.f32.mrf.mxu0 }
 0x7a1   : > { %v12084_v12 = vadd.f32 %v11591_v48, %v4573_v11  ;;  %v4575_v23 = vadd.f32 %v4574_v37, %v4268_v38 }
 0x7a2   : > { %v4576_v24 = vpop.f32.mrf.mxu0 }
 0x7a3   : > { %v4933_v3 = vmin.f32 %v12084_v12, 0.0  ;;  %v12088_v46 = vadd.f32 %v11656_v15, %v4575_v23  ;;  %v4577_v33 = vadd.f32 %v4576_v24, %v4270_v14  ;;  %vm4869_vm1 = vcmp.gt.f32.partialorder %v12084_v12, 0.0 }
 0x7a4   : > { %v4578_v40 = vpop.f32.mrf.mxu0 }
 0x7a5   : > { %v4997_v18 = vmul.f32 1.442695, %v4933_v3  ;;  %v4934_v27 = vmin.f32 %v12088_v46, 0.0  ;;  %v12092_v1 = vadd.f32 %v11591_v48, %v4577_v33  ;;  %v4579_v34 = vadd.f32 %v4578_v40, %v4272_v7 }
 0x7a6   : > { %v4582_v29 = vpop.f32.mrf.mxu0  ;;  %vm4870_vm3 = vcmp.gt.f32.partialorder %v12088_v46, 0.0 }
 0x7a7   : > { %8868 = vpow2.f32 %v4997_v18  ;;  %v4999_v9 = vmul.f32 1.442695, %v4934_v27  ;;  %v4937_v59 = vmin.f32 %v12092_v1, 0.0  ;;  %v12096_v41 = vadd.f32 %v11656_v15, %v4579_v34 }
 0x7a8   : > { %v4583_v30 = vadd.f32 %v4582_v29, %v4276_v26  ;;  %v4584_v35 = vpop.f32.mrf.mxu0  ;;  %v6703_v31 = vpop.permute.xlu0 %6702  ;;  %vm4873_vm2 = vcmp.gt.f32.partialorder %v12092_v1, 0.0 }
 0x7a9   : > { %v5005_v38 = vmul.f32 1.442695, %v4937_v59  ;;  %v4585_v14 = vadd.f32 %v4584_v35, %v4278_v39  ;;  %8870 = vpow2.f32 %v4999_v9  ;;  %v4938_v47 = vmin.f32 %v12096_v41, 0.0  ;;  %6745 = vst.msk [vmem:[%s9984_s18 + $0x30] sm:$0xff] %vm6738_vm15, %v6703_v31 }
 0x7aa   : > { %v12100_v45 = vadd.f32 %v11591_v48, %v4583_v30  ;;  %v4586_v7 = vpop.f32.mrf.mxu0  ;;  %vm4874_vm6 = vcmp.gt.f32.partialorder %v12096_v41, 0.0 }
 0x7ab   : > { %8872 = vpow2.f32 %v5005_v38  ;;  %v12105_v56 = vadd.f32 %v11656_v15, %v4585_v14  ;;  %v4587_v26 = vadd.f32 %v4586_v7, %v12019_v57  ;;  %v5007_v44 = vmul.f32 1.442695, %v4938_v47 }
 0x7ac   : > { %v4941_v39 = vmin.f32 %v12100_v45, 0.0  ;;  %v4588_v42 = vpop.f32.mrf.mxu0  ;;  %v6705_v24 = vpop.permute.xlu1 %6704  ;;  %vm4877_vm7 = vcmp.gt.f32.partialorder %v12100_v45, 0.0 }
 0x7ad   : > { %v4942_v11 = vmin.f32 %v12105_v56, 0.0  ;;  %v12111_v37 = vadd.f32 %v11591_v48, %v4587_v26  ;;  %v4589_v23 = vadd.f32 %v4588_v42, %v12021_v10  ;;  %v6699_v3 = vpop.permute.xlu0 %6698  ;;  %8874 = vpow2.f32 %v5007_v44  ;;  %6746 = vst.msk [vmem:[%s9984_s18 + $0x38] sm:$0xff] %vm6738_vm15, %v6705_v24 }
 0x7ae   : > { %v5013_v33 = vmul.f32 1.442695, %v4941_v39  ;;  %v4592_v40 = vpop.f32.mrf.mxu0  ;;  %6743 = vst.msk [vmem:[%s9984_s18 + $0x20] sm:$0xff] %vm6738_vm15, %v6699_v3  ;;  %vm4878_vm9 = vcmp.gt.f32.partialorder %v12105_v56, 0.0 }
 0x7af   : > { %v4945_v57 = vmin.f32 %v12111_v37, 0.0  ;;  %v12120_v18 = vadd.f32 %v11656_v15, %v4589_v23  ;;  %v5015_v27 = vmul.f32 1.442695, %v4942_v11  ;;  %v4593_v34 = vadd.f32 %v4592_v40, %v12023_v62 }
 0x7b0   : > { %8876 = vpow2.f32 %v5013_v33  ;;  %v4594_v10 = vpop.f32.mrf.mxu0  ;;  %v6701_v59 = vpop.permute.xlu1 %6700  ;;  %vm4881_vm8 = vcmp.gt.f32.partialorder %v12111_v37, 0.0 }
 0x7b1   : > { %v5021_v29 = vmul.f32 1.442695, %v4945_v57  ;;  %v4946_v9 = vmin.f32 %v12120_v18, 0.0  ;;  %v12125_v30 = vadd.f32 %v11591_v48, %v4593_v34  ;;  %v4595_v35 = vadd.f32 %v4594_v10, %v12025_v6  ;;  %6744 = vst.msk [vmem:[%s9984_s18 + $0x28] sm:$0xff] %vm6738_vm15, %v6701_v59 }
 0x7b2   : > { %v4596_v38 = vpop.f32.mrf.mxu0  ;;  %vm4882_vm0 = vcmp.gt.f32.partialorder %v12120_v18, 0.0 }
 0x7b3   : > { %8878 = vpow2.f32 %v5021_v29  ;;  %v5023_v14 = vmul.f32 1.442695, %v4946_v9  ;;  %v4597_v31 = vadd.f32 %v4596_v38, %v12027_v8  ;;  %v12132_v62 = vadd.f32 %v11656_v15, %v4595_v35 }
 0x7b4   : > { %v8869_v47 = vpop.eup %8868  ;;  %8880 = vpow2.f32 %v5015_v27  ;;  %v4598_v7 = vpop.f32.mrf.mxu0  ;;  %v4949_v39 = vmin.f32 %v12125_v30, 0.0  ;;  %vm4885_vm10 = vcmp.gt.f32.partialorder %v12125_v30, 0.0 }
 0x7b5   : > { %8882 = vpow2.f32 %v5023_v14  ;;  %v12135_v26 = vadd.f32 %v11591_v48, %v4597_v31  ;;  %v4599_v44 = vadd.f32 %v4598_v7, %v12029_v28  ;;  %v7439_v6 = vadd.f32 -1.0, %v8869_v47 }
 0x7b6   : > { %v4950_v42 = vmin.f32 %v12132_v62, 0.0  ;;  %v4602_v11 = vpop.f32.mrf.mxu0  ;;  %v8871_v23 = vpop.eup %8870  ;;  %v5029_v29 = vmul.f32 1.442695, %v4949_v39  ;;  %vm4886_vm5 = vcmp.gt.f32.partialorder %v12132_v62, 0.0 }
 0x7b7   : > { %v4953_v8 = vmin.f32 %v12135_v26, 0.0  ;;  %v12142_v24 = vadd.f32 %v11656_v15, %v4599_v44  ;;  %v4603_v40 = vadd.f32 %v4602_v11, %v12031_v63  ;;  %v12149_v10 = vsel %vm4869_vm1, %v12084_v12, %v7439_v6 }
 0x7b8   : > { %v8873_v3 = vpop.eup %8872  ;;  %v5031_v33 = vmul.f32 1.442695, %v4950_v42  ;;  %v4604_v57 = vpop.f32.mrf.mxu0  ;;  %v7440_v47 = vadd.f32 -1.0, %v8871_v23  ;;  %vm4889_vm11 = vcmp.gt.f32.partialorder %v12135_v26, 0.0 }
 0x7b9   : > { %v7443_v28 = vadd.f32 -1.0, %v8873_v3  ;;  %v5037_v27 = vmul.f32 1.442695, %v4953_v8  ;;  %v4954_v34 = vmin.f32 %v12142_v24, 0.0  ;;  %v12152_v9 = vadd.f32 %v11591_v48, %v4603_v40 }
 0x7ba   : > { %v4605_v59 = vadd.f32 %v4604_v57, %v12033_v22  ;;  %v4606_v35 = vpop.f32.mrf.mxu0  ;;  %v8875_v38 = vpop.eup %8874  ;;  %8884 = vpow2.f32 %v5031_v33  ;;  %vm4890_vm4 = vcmp.gt.f32.partialorder %v12142_v24, 0.0 }
 0x7bb   : > { %v5193_v63 = vsel %vm4873_vm2, %v12092_v1, %v7443_v28  ;;  %v5039_v14 = vmul.f32 1.442695, %v4954_v34  ;;  %v4607_v31 = vadd.f32 %v4606_v35, %v12035_v17  ;;  %v4957_v12 = vmin.f32 %v12152_v9, 0.0  ;;  %v6711_v6 = vpop.permute.xlu0 %6710 }
 0x7bc   : > { %v5253_v7 = vpack.c.bf16 %v5193_v63, %v12149_v10  ;;  %v12160_v44 = vadd.f32 %v11656_v15, %v4605_v59  ;;  %v4608_v39 = vpop.f32.mrf.mxu0  ;;  %8886 = vpow2.f32 %v5037_v27  ;;  %6749 = vst.msk [vmem:[%s9984_s18 + $0x50] sm:$0xff] %vm6738_vm15, %v6711_v6  ;;  %v7444_v1 = vadd.f32 -1.0, %v8875_v38 }
 0x7bd   : > { %v8877_v22 = vpop.eup %8876  ;;  %v12163_v42 = vadd.f32 %v11591_v48, %v4607_v31  ;;  %v4609_v17 = vadd.f32 %v4608_v39, %v12037_v4  ;;  %8888 = vpow2.f32 %v5039_v14  ;;  %v5045_v8 = vmul.f32 1.442695, %v4957_v12  ;;  %v8461_v12 = vld [vmem:[#allocation14 + $0x38] sm:$0xff]  }
 0x7be   : > { %v7447_v11 = vadd.f32 -1.0, %v8877_v22  ;;  %v4612_v23 = vpop.f32.mrf.mxu0  ;;  %8890 = vpow2.f32 %v5029_v29  ;;  %v4958_v4 = vmin.f32 %v12160_v44, 0.0  ;;  %v5194_v34 = vsel %vm4874_vm6, %v12096_v41, %v7444_v1 }
 0x7bf   : > { %v4961_v3 = vmin.f32 %v12163_v42, 0.0  ;;  %v12172_v33 = vadd.f32 %v11656_v15, %v4609_v17  ;;  %v4613_v40 = vadd.f32 %v4612_v23, %v12039_v16  ;;  %v6713_v28 = vpop.permute.xlu1 %6712  ;;  %v6707_v27 = vpop.permute.xlu0 %6706  ;;  %v5190_v29 = vsel %vm4870_vm3, %v12088_v46, %v7440_v47  ;;  %v8462_v47 = vld [vmem:[#allocation14 + $0x70] sm:$0xff]  }
 0x7c0   : > { %v8879_v57 = vpop.eup %8878  ;;  %6750 = vst.msk [vmem:[%s9984_s18 + $0x58] sm:$0xff] %vm6738_vm15, %v6713_v28  ;;  %6747 = vst.msk [vmem:[%s9984_s18 + $0x40] sm:$0xff] %vm6738_vm15, %v6707_v27  ;;  %v4614_v16 = vpop.f32.mrf.mxu0  ;;  %v5254_v31 = vpack.c.bf16 %v5194_v34, %v5190_v29  ;;  %v12194_v6 = vsel %vm4877_vm7, %v12100_v45, %v7447_v11  ;;  %8892 = vpow2.f32 %v5045_v8  ;;  %v5047_v22 = vmul.f32 1.442695, %v4958_v4  ;;  %v8464_v34 = vld [vmem:[#allocation14 + $0x68] sm:$0xff]  }
 0x7c1   : > { %v8881_v10 = vpop.eup %8880  ;;  %v7451_v59 = vadd.f32 -1.0, %v8879_v57  ;;  %v4962_v35 = vmin.f32 %v12172_v33, 0.0  ;;  %v5053_v63 = vmul.f32 1.442695, %v4961_v3  ;;  %v12188_v14 = vadd.f32 %v11591_v48, %v4613_v40  ;;  %v8463_v57 = vld [vmem:[#allocation14 + $0x30] sm:$0xff]  }
 0x7c2   : > { %v8883_v38 = vpop.eup %8882  ;;  %v4615_v41 = vadd.f32 %v4614_v16, %v12041_v5  ;;  %v4616_v46 = vpop.f32.mrf.mxu0  ;;  %5725 = vmatprep.mubr.bf16.mxu0 %v5254_v31  ;;  %v8466_v31 = vld [vmem:[#allocation14 + $0x60] sm:$0xff]   ;;  %vm4897_vm13 = vcmp.gt.f32.partialorder %v12163_v42, 0.0  ;;  %vm4894_vm14 = vcmp.gt.f32.partialorder %v12160_v44, 0.0  ;;  %vm4893_vm1 = vcmp.gt.f32.partialorder %v12152_v9, 0.0 }
 0x7c3   : > { %v12197_v39 = vsel %vm4881_vm8, %v12111_v37, %v7451_v59  ;;  %v4965_v17 = vmin.f32 %v12188_v14, 0.0  ;;  %v4617_v5 = vadd.f32 %v4616_v46, %v12045_v58  ;;  %v6709_v23 = vpop.permute.xlu1 %6708  ;;  %v5055_v3 = vmul.f32 1.442695, %v4962_v35  ;;  %5726 = vmatmul.mubr.bf16.vlgmr.msra.gmra.mxu0 %v5253_v7 }
 0x7c4   : > { %v12201_v1 = vadd.f32 %v11656_v15, %v4615_v41  ;;  %6748 = vst.msk [vmem:[%s9984_s18 + $0x48] sm:$0xff] %vm6738_vm15, %v6709_v23  ;;  %v4618_v45 = vpop.f32.mrf.mxu0  ;;  %v7448_v37 = vadd.f32 -1.0, %v8881_v10  ;;  %v7452_v11 = vadd.f32 -1.0, %v8883_v38  ;;  %v5257_v8 = vpack.c.bf16 %v12197_v39, %v12194_v6  ;;  %7807 = vmatpush3.bf16.msra.mxu0 %v8461_v12 }
 0x7c5   : > { %8894 = vpow2.f32 %v5053_v63  ;;  %v5061_v40 = vmul.f32 1.442695, %v4965_v17  ;;  %v12211_v58 = vadd.f32 %v11591_v48, %v4617_v5  ;;  %v4619_v7 = vadd.f32 %v4618_v45, %v12047_v52  ;;  %7808 = vmatprep.subr.bf16.mxu0 %v8462_v47 }
 0x7c6   : > { %v4966_v4 = vmin.f32 %v12201_v1, 0.0  ;;  %v4622_v28 = vpop.f32.mrf.mxu0  ;;  %v5202_v27 = vsel %vm4882_vm0, %v12120_v18, %v7452_v11  ;;  %8896 = vpow2.f32 %v5047_v22  ;;  %v5198_v52 = vsel %vm4878_vm9, %v12105_v56, %v7448_v37 }
 0x7c7   : > { %v4623_v10 = vadd.f32 %v4622_v28, %v12049_v53  ;;  %v8885_v59 = vpop.eup %8884  ;;  %8898 = vpow2.f32 %v5055_v3  ;;  %v4969_v35 = vmin.f32 %v12211_v58, 0.0  ;;  %v12219_v16 = vadd.f32 %v11656_v15, %v4619_v7  ;;  %v8465_v53 = vld [vmem:[#allocation14 + $0x28] sm:$0xff]  }
 0x7c8   : > { %v4624_v29 = vpop.f32.mrf.mxu0  ;;  %8900 = vpow2.f32 %v5061_v40  ;;  %v5258_v41 = vpack.c.bf16 %v5202_v27, %v5198_v52  ;;  %7809 = vmatpush3.bf16.msra.mxu0 %v8463_v57  ;;  %v5063_v6 = vmul.f32 1.442695, %v4966_v4  ;;  %v8467_v57 = vld [vmem:[#allocation14 + $0x20] sm:$0xff]   ;;  %v7456_v27 = vadd.f32 -1.0, %v8885_v59 }
 0x7c9   : > { %v8887_v38 = vpop.eup %8886  ;;  %v12223_v18 = vadd.f32 %v11591_v48, %v4623_v10  ;;  %v4625_v63 = vadd.f32 %v4624_v29, %v12053_v61  ;;  %v5069_v39 = vmul.f32 1.442695, %v4969_v35  ;;  %v4970_v46 = vmin.f32 %v12219_v16, 0.0  ;;  %7810 = vmatprep.subr.bf16.mxu0 %v8464_v34 }
 0x7ca   : > { %v8889_v12 = vpop.eup %8888  ;;  %v4626_v56 = vpop.f32.mrf.mxu0  ;;  %5735 = vmatprep.mubr.bf16.mxu0 %v5258_v41  ;;  %v7459_v45 = vadd.f32 -1.0, %v8887_v38  ;;  %vm4898_vm2 = vcmp.gt.f32.partialorder %v12172_v33, 0.0  ;;  %vm4901_vm3 = vcmp.gt.f32.partialorder %v12188_v14, 0.0  ;;  %vm4902_vm7 = vcmp.gt.f32.partialorder %v12201_v1, 0.0 }
 0x7cb   : > { %v6719_v47 = vpop.permute.xlu0 %6718  ;;  %v4973_v22 = vmin.f32 %v12223_v18, 0.0  ;;  %v12231_v61 = vadd.f32 %v11656_v15, %v4625_v63  ;;  %v4627_v17 = vadd.f32 %v4626_v56, %v12055_v20  ;;  %v8891_v5 = vpop.eup %8890  ;;  %8902 = vpow2.f32 %v5069_v39  ;;  %5736 = vmatmul.mubr.bf16.gmra.mxu0 %v5257_v8 }
 0x7cc   : > { %6753 = vst.msk [vmem:[%s9984_s18 + $0x70] sm:$0xff] %vm6738_vm15, %v6719_v47  ;;  %v5071_v23 = vmul.f32 1.442695, %v4970_v46  ;;  %v4628_v3 = vpop.f32.mrf.mxu0  ;;  %v7460_v40 = vadd.f32 -1.0, %v8889_v12  ;;  %7811 = vmatpush3.bf16.msra.mxu0 %v8465_v53  ;;  %8904 = vpow2.f32 %v5063_v6  ;;  %v7455_v34 = vadd.f32 -1.0, %v8891_v5 }
 0x7cd   : > { %v5077_v37 = vmul.f32 1.442695, %v4973_v22  ;;  %v4974_v11 = vmin.f32 %v12231_v61, 0.0  ;;  %v12240_v20 = vadd.f32 %v11591_v48, %v4627_v17  ;;  %v4629_v4 = vadd.f32 %v4628_v3, %v12059_v19  ;;  %7812 = vmatprep.subr.bf16.mxu0 %v8466_v31  ;;  %v8893_v8 = vpop.eup %8892 }
 0x7ce   : > { %v4632_v7 = vpop.f32.mrf.mxu0  ;;  %v5209_v38 = vsel %vm4889_vm11, %v12135_v26, %v7459_v45  ;;  %v5210_v41 = vsel %vm4890_vm4, %v12142_v24, %v7460_v40  ;;  %v5206_v26 = vsel %vm4886_vm5, %v12132_v62, %v7456_v27  ;;  %vm4909_vm6 = vcmp.gt.f32.partialorder %v12223_v18, 0.0 }
 0x7cf   : > { %v6721_v28 = vpop.permute.xlu1 %6720  ;;  %8906 = vpow2.f32 %v5077_v37  ;;  %v5079_v10 = vmul.f32 1.442695, %v4974_v11  ;;  %v4633_v35 = vadd.f32 %v4632_v7, %v12061_v55  ;;  %v6715_v29 = vpop.permute.xlu0 %6714  ;;  %v4977_v52 = vmin.f32 %v12240_v20, 0.0 }
 0x7d0   : > { %6754 = vst.msk [vmem:[%s9984_s18 + $0x78] sm:$0xff] %vm6738_vm15, %v6721_v28  ;;  %8908 = vpow2.f32 %v5071_v23  ;;  %v12249_v19 = vadd.f32 %v11656_v15, %v4629_v4  ;;  %6751 = vst.msk [vmem:[%s9984_s18 + $0x60] sm:$0xff] %vm6738_vm15, %v6715_v29  ;;  %v4634_v59 = vpop.f32.mrf.mxu0  ;;  %7813 = vmatpush3.bf16.msra.mxu0 %v8467_v57  ;;  %v5262_v56 = vpack.c.bf16 %v5210_v41, %v5206_v26  ;;  %v7463_v57 = vadd.f32 -1.0, %v8893_v8 }
 0x7d1   : > { %v12257_v55 = vadd.f32 %v11591_v48, %v4633_v35  ;;  %v4635_v63 = vadd.f32 %v4634_v59, %v12067_v60  ;;  %8910 = vpow2.f32 %v5079_v10  ;;  %v5085_v31 = vmul.f32 1.442695, %v4977_v52 }
 0x7d2   : > { %v8895_v53 = vpop.eup %8894  ;;  %v4978_v12 = vmin.f32 %v12249_v19, 0.0  ;;  %v4636_v6 = vpop.f32.mrf.mxu0  ;;  %v5205_v60 = vsel %vm4885_vm10, %v12125_v30, %v7455_v34  ;;  %5745 = vmatprep.mubr.bf16.mxu0 %v5262_v56  ;;  %vm4906_vm8 = vcmp.gt.f32.partialorder %v12219_v16, 0.0  ;;  %vm4913_vm0 = vcmp.gt.f32.partialorder %v12240_v20, 0.0 }
 0x7d3   : > { %v6717_v39 = vpop.permute.xlu1 %6716  ;;  %v4981_v24 = vmin.f32 %v12257_v55, 0.0  ;;  %v12274_v46 = vadd.f32 %v11656_v15, %v4635_v63  ;;  %v8897_v47 = vpop.eup %8896  ;;  %8912 = vpow2.f32 %v5085_v31  ;;  %v5261_v62 = vpack.c.bf16 %v5209_v38, %v5205_v60 }
 0x7d4   : > { %6752 = vst.msk [vmem:[%s9984_s18 + $0x68] sm:$0xff] %vm6738_vm15, %v6717_v39  ;;  %v5087_v22 = vmul.f32 1.442695, %v4978_v12  ;;  %v4637_v17 = vadd.f32 %v4636_v6, %v12069_v0  ;;  %v4638_v5 = vpop.f32.mrf.mxu0  ;;  %v8899_v23 = vpop.eup %8898  ;;  %v7467_v3 = vadd.f32 -1.0, %v8895_v53  ;;  %vm4905_vm15 = vcmp.gt.f32.partialorder %v12211_v58, 0.0 }
 0x7d5   : > { %v5093_v30 = vmul.f32 1.442695, %v4981_v24  ;;  %v4982_v45 = vmin.f32 %v12274_v46, 0.0  ;;  %v8901_v37 = vpop.eup %8900  ;;  %5746 = vmatmul.mubr.bf16.gmra.mxu0 %v5261_v62  ;;  %v4639_v0 = vadd.f32 %v4638_v5, %v12073_v13  ;;  %v7464_v28 = vadd.f32 -1.0, %v8897_v47 }
 0x7d6   : > { %8914 = vpow2.f32 %v5087_v22  ;;  %v12284_v11 = vadd.f32 %v11591_v48, %v4637_v17  ;;  %v4642_v40 = vpop.f32.mrf.mxu0  ;;  %v7468_v35 = vadd.f32 -1.0, %v8899_v23  ;;  %v5217_v52 = vsel %vm4897_vm13, %v12163_v42, %v7467_v3 }
 0x7d7   : > { %v5095_v4 = vmul.f32 1.442695, %v4982_v45  ;;  %v4643_v7 = vadd.f32 %v4642_v40, %v12075_v32  ;;  %8916 = vpow2.f32 %v5093_v30  ;;  %v12290_v34 = vadd.f32 %v11656_v15, %v4639_v0 }
 0x7d8   : > { %v4985_v27 = vmin.f32 %v12284_v11, 0.0  ;;  %v4644_v10 = vpop.f32.mrf.mxu0  ;;  %v8903_v29 = vpop.eup %8902  ;;  %v7471_v13 = vadd.f32 -1.0, %v8901_v37  ;;  %v5214_v42 = vsel %vm4894_vm14, %v12160_v44, %v7464_v28  ;;  %v5213_v6 = vsel %vm4893_vm1, %v12152_v9, %v7463_v57 }
 0x7d9   : > { %v12296_v8 = vadd.f32 %v11591_v48, %v4643_v7  ;;  %v4645_v32 = vadd.f32 %v4644_v10, %v12077_v50  ;;  %v7475_v59 = vadd.f32 -1.0, %v8903_v29  ;;  %8918 = vpow2.f32 %v5095_v4  ;;  %v8905_v53 = vpop.eup %8904 }
 0x7da   : > { %v5101_v38 = vmul.f32 1.442695, %v4985_v27  ;;  %v4986_v63 = vmin.f32 %v12290_v34, 0.0  ;;  %v4646_v41 = vpop.f32.mrf.mxu0  ;;  %v5218_v50 = vsel %vm4898_vm2, %v12172_v33, %v7468_v35  ;;  %v5265_v33 = vpack.c.bf16 %v5217_v52, %v5213_v6 }
 0x7db   : > { %v4989_v31 = vmin.f32 %v12296_v8, 0.0  ;;  %v12302_v12 = vadd.f32 %v11656_v15, %v4645_v32  ;;  %v5266_v60 = vpack.c.bf16 %v5218_v50, %v5214_v42  ;;  %v5225_v47 = vsel %vm4905_vm15, %v12211_v58, %v7475_v59 }
 0x7dc   : > { %v8907_v26 = vpop.eup %8906  ;;  %8920 = vpow2.f32 %v5101_v38  ;;  %v5103_v39 = vmul.f32 1.442695, %v4986_v63  ;;  %v4648_v24 = vpop.f32.mrf.mxu0  ;;  %v4647_v17 = vadd.f32 %v4646_v41, %v12079_v51  ;;  %v5221_v23 = vsel %vm4901_vm3, %v12188_v14, %v7471_v13 }
 0x7dd   : > { %v8909_v56 = vpop.eup %8908  ;;  %v7479_v22 = vadd.f32 -1.0, %v8907_v26  ;;  %v5109_v44 = vmul.f32 1.442695, %v4989_v31  ;;  %v4990_v62 = vmin.f32 %v12302_v12, 0.0  ;;  %5755 = vmatprep.mubr.bf16.mxu0 %v5266_v60  ;;  %v4649_v9 = vadd.f32 %v4648_v24, %v12081_v2 }
 0x7de   : > { %8922 = vpow2.f32 %v5103_v39  ;;  %v8911_v5 = vpop.eup %8910  ;;  %v7472_v58 = vadd.f32 -1.0, %v8905_v53  ;;  %5756 = vmatmul.mubr.bf16.gmra.mxu0 %v5265_v33  ;;  %v12324_v30 = vadd.f32 %v11591_v48, %v4647_v17  ;;  %v7476_v37 = vadd.f32 -1.0, %v8909_v56  ;;  %v8468_v17 = vld [vmem:[#allocation14 + $0x58] sm:$0xff]  }
 0x7df   : > { %v5111_v3 = vmul.f32 1.442695, %v4990_v62  ;;  %v12327_v45 = vadd.f32 %v11656_v15, %v4649_v9  ;;  %v5269_v51 = vpack.c.bf16 %v5225_v47, %v5221_v23  ;;  %v5229_v2 = vsel %vm4909_vm6, %v12223_v18, %v7479_v22  ;;  %v8469_v9 = vld [vmem:[#allocation14 + $0x18] sm:$0xff]   ;;  %7814 = vmatprep.subr.bf16.mxu0 %v8468_v17  ;;  %v8472_v23 = vld [vmem:[#allocation14 + $0x48] sm:$0xff]  }
 0x7e0   : > { %v8913_v0 = vpop.eup %8912  ;;  %8924 = vpow2.f32 %v5109_v44  ;;  %v4993_v40 = vmin.f32 %v12324_v30, 0.0  ;;  %v7480_v48 = vadd.f32 -1.0, %v8911_v5  ;;  %v5222_v4 = vsel %vm4902_vm7, %v12201_v1, %v7472_v58  ;;  %7815 = vmatpush3.bf16.msra.mxu0 %v8469_v9  ;;  %v8471_v5 = vld [vmem:[#allocation14 + $0x10] sm:$0xff]   ;;  %v8475_v58 = vld [vmem:[#allocation14] sm:$0xff]  }
 0x7e1   : > { %v7483_v14 = vadd.f32 -1.0, %v8913_v0  ;;  %8926 = vpow2.f32 %v5111_v3  ;;  %v4994_v15 = vmin.f32 %v12327_v45, 0.0  ;;  %v5226_v7 = vsel %vm4906_vm8, %v12219_v16, %v7476_v37  ;;  %v8473_v3 = vld [vmem:[#allocation14 + $0x8] sm:$0xff]  }
 0x7e2   : > { %v5117_v27 = vmul.f32 1.442695, %v4993_v40  ;;  %v5270_v10 = vpack.c.bf16 %v5226_v7, %v5222_v4  ;;  %vm4910_vm9 = vcmp.gt.f32.partialorder %v12231_v61, 0.0  ;;  %vm4914_vm10 = vcmp.gt.f32.partialorder %v12249_v19, 0.0 }
 0x7e3   : > { %v8915_v57 = vpop.eup %8914  ;;  %v5233_v28 = vsel %vm4913_vm0, %v12240_v20, %v7483_v14  ;;  %v5119_v29 = vmul.f32 1.442695, %v4994_v15  ;;  %v5230_v13 = vsel %vm4910_vm9, %v12231_v61, %v7480_v48  ;;  %vm4917_vm5 = vcmp.gt.f32.partialorder %v12257_v55, 0.0 }
 0x7e4   : > { %v7484_v18 = vadd.f32 -1.0, %v8915_v57  ;;  %v8917_v35 = vpop.eup %8916  ;;  %v5273_v52 = vpack.c.bf16 %v5233_v28, %v5229_v2  ;;  %8928 = vpow2.f32 %v5117_v27  ;;  %5765 = vmatprep.mubr.bf16.mxu0 %v5270_v10  ;;  %vm4921_vm11 = vcmp.gt.f32.partialorder %v12284_v11, 0.0 }
 0x7e5   : > { %8930 = vpow2.f32 %v5119_v29  ;;  %v7487_v20 = vadd.f32 -1.0, %v8917_v35  ;;  %vm4918_vm4 = vcmp.gt.f32.partialorder %v12274_v46, 0.0  ;;  %vm4922_vm13 = vcmp.gt.f32.partialorder %v12290_v34, 0.0 }
 0x7e6   : > { %v5234_v1 = vsel %vm4914_vm10, %v12249_v19, %v7484_v18  ;;  %v8919_v32 = vpop.eup %8918  ;;  %5766 = vmatmul.mubr.bf16.gmra.mxu0 %v5269_v51  ;;  %vm4925_vm14 = vcmp.gt.f32.partialorder %v12296_v8, 0.0  ;;  %vm4929_vm1 = vcmp.gt.f32.partialorder %v12324_v30, 0.0  ;;  %vm4926_vm2 = vcmp.gt.f32.partialorder %v12302_v12, 0.0 }
 0x7e7   : > { %v5274_v16 = vpack.c.bf16 %v5234_v1, %v5230_v13  ;;  %v7488_v63 = vadd.f32 -1.0, %v8919_v32  ;;  %v5237_v53 = vsel %vm4917_vm5, %v12257_v55, %v7487_v20  ;;  %vm4930_vm3 = vcmp.gt.f32.partialorder %v12327_v45, 0.0 }
 0x7e8   : > { %v12373_v27 = vsel %vm4796_vm12, %v11922_v36, %v11883_v21 }
 0x7e9   : > { %v8921_v59 = vpop.eup %8920  ;;  %5775 = vmatprep.mubr.bf16.mxu0 %v5274_v16  ;;  %v5238_v42 = vsel %vm4918_vm4, %v12274_v46, %v7488_v63 }
 0x7ea   : > { %v7491_v38 = vadd.f32 -1.0, %v8921_v59 }
 0x7eb   : > { %v8923_v41 = vpop.eup %8922 }
 0x7ec   : > { %v5241_v61 = vsel %vm4921_vm11, %v12284_v11, %v7491_v38  ;;  %v7492_v31 = vadd.f32 -1.0, %v8923_v41 }
 0x7ed   : > { %v5277_v19 = vpack.c.bf16 %v5241_v61, %v5237_v53  ;;  %v8925_v26 = vpop.eup %8924 }
 0x7ee   : > { %v5242_v50 = vsel %vm4922_vm13, %v12290_v34, %v7492_v31  ;;  %v8927_v39 = vpop.eup %8926  ;;  %5776 = vmatmul.mubr.bf16.gmra.mxu0 %v5273_v52  ;;  %v7495_v60 = vadd.f32 -1.0, %v8925_v26 }
 0x7ef   : > { %v5278_v6 = vpack.c.bf16 %v5242_v50, %v5238_v42  ;;  %v7496_v55 = vadd.f32 -1.0, %v8927_v39 }
 0x7f0   : > { %v5245_v22 = vsel %vm4925_vm14, %v12296_v8, %v7495_v60  ;;  %v8470_v8 = vld [vmem:[#allocation14 + $0x50] sm:$0xff]  }
 0x7f1   : > { %5785 = vmatprep.mubr.bf16.mxu0 %v5278_v6  ;;  %v8929_v24 = vpop.eup %8928  ;;  %v5246_v34 = vsel %vm4926_vm2, %v12302_v12, %v7496_v55  ;;  %7816 = vmatprep.subr.bf16.mxu0 %v8470_v8  ;;  %v8474_v12 = vld [vmem:[#allocation14 + $0x40] sm:$0xff]  }
 0x7f2   : > { %v8931_v56 = vpop.eup %8930  ;;  %v7499_v11 = vadd.f32 -1.0, %v8929_v24  ;;  %7817 = vmatpush3.bf16.msra.mxu0 %v8471_v5 }
 0x7f3   : > { %v7500_v47 = vadd.f32 -1.0, %v8931_v56  ;;  %7818 = vmatprep.subr.bf16.mxu0 %v8472_v23 }
 0x7f4   : > { %v5249_v46 = vsel %vm4929_vm1, %v12324_v30, %v7499_v11  ;;  %v5840_v30 = vpop.f32.mrf.mxu1 }
 0x7f5   : > { %v5250_v44 = vsel %vm4930_vm3, %v12327_v45, %v7500_v47  ;;  %v5281_v62 = vpack.c.bf16 %v5249_v46, %v5245_v22 }
 0x7f6   : > { %5786 = vmatmul.mubr.bf16.gmra.mxu0 %v5277_v19  ;;  %v5282_v33 = vpack.c.bf16 %v5250_v44, %v5246_v34  ;;  %v5842_v45 = vpop.f32.mrf.mxu1 }
 0x7f7   : > { %7819 = vmatpush3.bf16.msra.mxu0 %v8473_v3 }
 0x7f8   : > { %5795 = vmatprep.mubr.bf16.mxu0 %v5282_v33  ;;  %7820 = vmatprep.subr.bf16.mxu0 %v8474_v12  ;;  %v5844_v37 = vpop.f32.mrf.mxu1 }
 0x7fa   : > { %v5846_v51 = vpop.f32.mrf.mxu1 }
 0x7fb   : > { %7821 = vmatpush3.bf16.msra.mxu0 %v8475_v58 }
 0x7fc   : > { %v5850_v0 = vpop.f32.mrf.mxu1 }
 0x7fe   : > { %5796 = vmatmul.mubr.bf16.gmra.mxu0 %v5281_v62  ;;  %v5852_v2 = vpop.f32.mrf.mxu1 }
 0x800   : > { %v5854_v14 = vpop.f32.mrf.mxu1 }
 0x802   : > { %v5856_v40 = vpop.f32.mrf.mxu1 }
 0x804   : > { %v12358_v48 = vpop.f32.mrf.mxu1 }
 0x806   : > { %v12360_v57 = vpop.f32.mrf.mxu1 }
 0x808   : > { %v12362_v15 = vpop.f32.mrf.mxu1 }
 0x80a   : > { %v12364_v4 = vpop.f32.mrf.mxu1 }
 0x80c   : > { %v12366_v7 = vpop.f32.mrf.mxu1 }
 0x80e   : > { %v12368_v28 = vpop.f32.mrf.mxu1 }
 0x810   : > { %v12375_v10 = vpop.f32.mrf.mxu1 }
 0x812   : > { %v12381_v1 = vpop.f32.mrf.mxu1 }
 0x814   : > { %v12390_v63 = vpop.f32.mrf.mxu1 }
 0x816   : > { %v12398_v60 = vpop.f32.mrf.mxu1 }
 0x818   : > { %v12411_v17 = vpop.f32.mrf.mxu1 }
 0x883   : > { %v5727_v18 = vpop.f32.mrf.mxu0 }
 0x884   : > { %v5728_v35 = vadd.f32 %v5727_v18, %v11953_v25 }
 0x885   : > { %v5729_v29 = vpop.f32.mrf.mxu0 }
 0x886   : > { %v12378_v52 = vadd.f32 %v5840_v30, %v5728_v35  ;;  %v5730_v13 = vadd.f32 %v5729_v29, %v12373_v27  ;;  %v12417_v30 = vpop.f32.mrf.mxu1 }
 0x887   : > { %v5731_v32 = vpop.f32.mrf.mxu0 }
 0x888   : > { %v12383_v16 = vadd.f32 %v5842_v45, %v5730_v13  ;;  %v5732_v20 = vadd.f32 %v5731_v32, %v11953_v25  ;;  %v5951_v21 = vmin.f32 %v12378_v52, 0.0  ;;  %v12428_v35 = vpop.f32.mrf.mxu1  ;;  %vm5919_vm15 = vcmp.gt.f32.partialorder %v12378_v52, 0.0 }
 0x889   : > { %v5733_v36 = vpop.f32.mrf.mxu0 }
 0x88a   : > { %v5952_v59 = vmin.f32 %v12383_v16, 0.0  ;;  %v12388_v38 = vadd.f32 %v5844_v37, %v5732_v20  ;;  %v5734_v41 = vadd.f32 %v5733_v36, %v12373_v27  ;;  %v5983_v19 = vmul.f32 1.442695, %v5951_v21 }
 0x88b   : > { %v5737_v53 = vpop.f32.mrf.mxu0  ;;  %vm5920_vm8 = vcmp.gt.f32.partialorder %v12383_v16, 0.0 }
 0x88c   : > { %v5985_v61 = vmul.f32 1.442695, %v5952_v59  ;;  %v5953_v31 = vmin.f32 %v12388_v38, 0.0  ;;  %v12394_v42 = vadd.f32 %v5846_v51, %v5734_v41  ;;  %v5738_v50 = vadd.f32 %v5737_v53, %v11953_v25  ;;  %v12437_v53 = vpop.f32.mrf.mxu1 }
 0x88d   : > { %v5739_v26 = vpop.f32.mrf.mxu0  ;;  %vm5921_vm6 = vcmp.gt.f32.partialorder %v12388_v38, 0.0 }
 0x88e   : > { %v5987_v6 = vmul.f32 1.442695, %v5953_v31  ;;  %v5740_v39 = vadd.f32 %v5739_v26, %v12373_v27  ;;  %8932 = vpow2.f32 %v5985_v61  ;;  %v5954_v24 = vmin.f32 %v12394_v42, 0.0 }
 0x88f   : > { %v12401_v55 = vadd.f32 %v5850_v0, %v5738_v50  ;;  %v5741_v56 = vpop.f32.mrf.mxu0  ;;  %vm5922_vm7 = vcmp.gt.f32.partialorder %v12394_v42, 0.0 }
 0x890   : > { %8934 = vpow2.f32 %v5987_v6  ;;  %v12403_v11 = vadd.f32 %v5852_v2, %v5740_v39  ;;  %v5742_v47 = vadd.f32 %v5741_v56, %v11953_v25  ;;  %v5989_v22 = vmul.f32 1.442695, %v5954_v24 }
 0x891   : > { %8936 = vpow2.f32 %v5983_v19  ;;  %v5955_v46 = vmin.f32 %v12401_v55, 0.0  ;;  %v5743_v34 = vpop.f32.mrf.mxu0  ;;  %vm5923_vm0 = vcmp.gt.f32.partialorder %v12401_v55, 0.0 }
 0x892   : > { %v5956_v44 = vmin.f32 %v12403_v11, 0.0  ;;  %v12408_v62 = vadd.f32 %v5854_v14, %v5742_v47  ;;  %v5744_v33 = vadd.f32 %v5743_v34, %v12373_v27  ;;  %8938 = vpow2.f32 %v5989_v22  ;;  %v12451_v34 = vpop.f32.mrf.mxu1 }
 0x893   : > { %v5991_v23 = vmul.f32 1.442695, %v5955_v46  ;;  %vm5924_vm9 = vcmp.gt.f32.partialorder %v12403_v11, 0.0 }
 0x894   : > { %v5993_v9 = vmul.f32 1.442695, %v5956_v44  ;;  %v5957_v8 = vmin.f32 %v12408_v62, 0.0  ;;  %v12414_v5 = vadd.f32 %v5856_v40, %v5744_v33  ;;  %vm5925_vm10 = vcmp.gt.f32.partialorder %v12408_v62, 0.0 }
 0x895   : > { %v5747_v3 = vpop.f32.mrf.mxu0 }
 0x896   : > { %v5995_v12 = vmul.f32 1.442695, %v5957_v8  ;;  %v5958_v58 = vmin.f32 %v12414_v5, 0.0  ;;  %8940 = vpow2.f32 %v5993_v9  ;;  %v5748_v45 = vadd.f32 %v5747_v3, %v11953_v25 }
 0x897   : > { %v5749_v37 = vpop.f32.mrf.mxu0  ;;  %vm5926_vm5 = vcmp.gt.f32.partialorder %v12414_v5, 0.0 }
 0x898   : > { %8942 = vpow2.f32 %v5995_v12  ;;  %v5997_v51 = vmul.f32 1.442695, %v5958_v58  ;;  %v5750_v0 = vadd.f32 %v5749_v37, %v12373_v27  ;;  %v12422_v2 = vadd.f32 %v12358_v48, %v5748_v45 }
 0x899   : > { %8944 = vpow2.f32 %v5991_v23  ;;  %v5751_v14 = vpop.f32.mrf.mxu0 }
 0x89a   : > { %8946 = vpow2.f32 %v5997_v51  ;;  %v12425_v40 = vadd.f32 %v12360_v57, %v5750_v0  ;;  %v5752_v18 = vadd.f32 %v5751_v14, %v11953_v25  ;;  %v5959_v29 = vmin.f32 %v12422_v2, 0.0 }
 0x89b   : > { %v5753_v13 = vpop.f32.mrf.mxu0  ;;  %v8933_v32 = vpop.eup %8932  ;;  %vm5927_vm11 = vcmp.gt.f32.partialorder %v12422_v2, 0.0 }
 0x89c   : > { %v5960_v20 = vmin.f32 %v12425_v40, 0.0  ;;  %v12433_v21 = vadd.f32 %v12362_v15, %v5752_v18  ;;  %v5999_v36 = vmul.f32 1.442695, %v5959_v29  ;;  %v5754_v59 = vadd.f32 %v5753_v13, %v12373_v27  ;;  %v12469_v18 = vpop.f32.mrf.mxu1 }
 0x89d   : > { %v8935_v48 = vpop.eup %8934  ;;  %v7568_v39 = vadd.f32 -1.0, %v8933_v32  ;;  %vm5928_vm4 = vcmp.gt.f32.partialorder %v12425_v40, 0.0 }
 0x89e   : > { %v8937_v41 = vpop.eup %8936  ;;  %v5961_v57 = vmin.f32 %v12433_v21, 0.0  ;;  %v7569_v61 = vadd.f32 -1.0, %v8935_v48  ;;  %v12442_v31 = vadd.f32 %v12364_v4, %v5754_v59  ;;  %v5757_v19 = vpop.f32.mrf.mxu0  ;;  %v6001_v50 = vmul.f32 1.442695, %v5960_v20 }
 0x89f   : > { %v8939_v15 = vpop.eup %8938  ;;  %v5758_v6 = vadd.f32 %v5757_v19, %v11953_v25  ;;  %v7567_v24 = vadd.f32 -1.0, %v8937_v41  ;;  %8948 = vpow2.f32 %v5999_v36  ;;  %v6080_v12 = vsel %vm5920_vm8, %v12383_v16, %v7568_v39 }
 0x8a0   : > { %v6003_v26 = vmul.f32 1.442695, %v5961_v57  ;;  %v5962_v56 = vmin.f32 %v12442_v31, 0.0  ;;  %v5759_v47 = vpop.f32.mrf.mxu0  ;;  %v7570_v22 = vadd.f32 -1.0, %v8939_v15  ;;  %v6081_v44 = vsel %vm5921_vm6, %v12388_v38, %v7569_v61 }
 0x8a1   : > { %v12448_v46 = vadd.f32 %v12366_v7, %v5758_v6  ;;  %v5760_v4 = vadd.f32 %v5759_v47, %v12373_v27  ;;  %v6079_v45 = vsel %vm5919_vm15, %v12378_v52, %v7567_v24  ;;  %vm5929_vm13 = vcmp.gt.f32.partialorder %v12433_v21, 0.0 }
 0x8a2   : > { %8950 = vpow2.f32 %v6003_v26  ;;  %v6005_v33 = vmul.f32 1.442695, %v5962_v56  ;;  %v5761_v9 = vpop.f32.mrf.mxu0  ;;  %v6082_v8 = vsel %vm5922_vm7, %v12394_v42, %v7570_v22  ;;  %v6111_v0 = vpack.c.bf16 %v6081_v44, %v6079_v45 }
 0x8a3   : > { %v8941_v23 = vpop.eup %8940  ;;  %8952 = vpow2.f32 %v6001_v50  ;;  %v12459_v3 = vadd.f32 %v12368_v28, %v5760_v4  ;;  %v5762_v7 = vadd.f32 %v5761_v9, %v11953_v25  ;;  %v6112_v37 = vpack.c.bf16 %v6082_v8, %v6080_v12  ;;  %v12487_v50 = vpop.f32.mrf.mxu1 }
 0x8a4   : > { %8954 = vpow2.f32 %v6005_v33  ;;  %v5763_v38 = vpop.f32.mrf.mxu0  ;;  %v5963_v42 = vmin.f32 %v12448_v46, 0.0  ;;  %v7572_v48 = vadd.f32 -1.0, %v8941_v23  ;;  %vm5930_vm14 = vcmp.gt.f32.partialorder %v12442_v31, 0.0 }
 0x8a5   : > { %v8943_v58 = vpop.eup %8942  ;;  %v5964_v28 = vmin.f32 %v12459_v3, 0.0  ;;  %v12473_v29 = vadd.f32 %v12375_v10, %v5762_v7  ;;  %v5764_v52 = vadd.f32 %v5763_v38, %v12373_v27  ;;  %6303 = vmatprep.mubr.bf16.mxu0 %v6112_v37  ;;  %v12506_v23 = vpop.f32.mrf.mxu1  ;;  %vm5932_vm1 = vcmp.gt.f32.partialorder %v12459_v3, 0.0 }
 0x8a6   : > { %v8945_v51 = vpop.eup %8944  ;;  %v7573_v16 = vadd.f32 -1.0, %v8943_v58  ;;  %v5767_v13 = vpop.f32.mrf.mxu0  ;;  %6304 = vmatmul.mubr.bf16.vlgmr.msra.gmra.mxu0 %v6111_v0  ;;  %v6007_v61 = vmul.f32 1.442695, %v5963_v42  ;;  %vm5931_vm15 = vcmp.gt.f32.partialorder %v12448_v46, 0.0 }
 0x8a7   : > { %v8947_v14 = vpop.eup %8946  ;;  %v6009_v32 = vmul.f32 1.442695, %v5964_v28  ;;  %v5768_v20 = vadd.f32 %v5767_v13, %v11953_v25  ;;  %v7571_v36 = vadd.f32 -1.0, %v8945_v51  ;;  %v5965_v59 = vmin.f32 %v12473_v29, 0.0 }
 0x8a8   : > { %v12480_v41 = vadd.f32 %v12381_v1, %v5764_v52  ;;  %v5769_v57 = vpop.f32.mrf.mxu0  ;;  %v7574_v10 = vadd.f32 -1.0, %v8947_v14  ;;  %v6085_v26 = vsel %vm5925_vm10, %v12408_v62, %v7573_v16  ;;  %v5904_v14 = vpop.f32.mrf.mxu1  ;;  %vm5933_vm2 = vcmp.gt.f32.partialorder %v12473_v29, 0.0 }
 0x8a9   : > { %v12484_v19 = vadd.f32 %v12390_v63, %v5768_v20  ;;  %v5770_v15 = vadd.f32 %v5769_v57, %v12373_v27  ;;  %v6011_v6 = vmul.f32 1.442695, %v5965_v59  ;;  %8956 = vpow2.f32 %v6009_v32 }
 0x8aa   : > { %v5966_v39 = vmin.f32 %v12480_v41, 0.0  ;;  %v5771_v24 = vpop.f32.mrf.mxu0  ;;  %v6086_v1 = vsel %vm5926_vm5, %v12414_v5, %v7574_v10  ;;  %v6084_v63 = vsel %vm5924_vm9, %v12403_v11, %v7572_v48  ;;  %v6083_v62 = vsel %vm5923_vm0, %v12401_v55, %v7571_v36 }
 0x8ab   : > { %v12493_v56 = vadd.f32 %v12398_v60, %v5770_v15  ;;  %v5772_v47 = vadd.f32 %v5771_v24, %v11953_v25  ;;  %8958 = vpow2.f32 %v6011_v6  ;;  %v6114_v44 = vpack.c.bf16 %v6086_v1, %v6084_v63 }
 0x8ac   : > { %v6013_v22 = vmul.f32 1.442695, %v5966_v39  ;;  %v5773_v4 = vpop.f32.mrf.mxu0  ;;  %v8949_v33 = vpop.eup %8948  ;;  %8960 = vpow2.f32 %v6007_v61  ;;  %v5967_v5 = vmin.f32 %v12484_v19, 0.0  ;;  %v6113_v9 = vpack.c.bf16 %v6085_v26, %v6083_v62 }
 0x8ad   : > { %v12504_v60 = vadd.f32 %v12411_v17, %v5772_v47  ;;  %v5968_v11 = vmin.f32 %v12493_v56, 0.0  ;;  %v5774_v55 = vadd.f32 %v5773_v4, %v12373_v27  ;;  %6311 = vmatprep.mubr.bf16.mxu0 %v6114_v44  ;;  %v7575_v51 = vadd.f32 -1.0, %v8949_v33  ;;  %v5906_v26 = vpop.f32.mrf.mxu1 }
 0x8ae   : > { %8962 = vpow2.f32 %v6013_v22  ;;  %v5777_v7 = vpop.f32.mrf.mxu0  ;;  %6312 = vmatmul.mubr.bf16.gmra.mxu0 %v6113_v9  ;;  %v6015_v42 = vmul.f32 1.442695, %v5967_v5  ;;  %vm5934_vm3 = vcmp.gt.f32.partialorder %v12480_v41, 0.0  ;;  %vm5935_vm6 = vcmp.gt.f32.partialorder %v12484_v19, 0.0 }
 0x8af   : > { %v8951_v8 = vpop.eup %8950  ;;  %v5969_v17 = vmin.f32 %v12504_v60, 0.0  ;;  %v12515_v58 = vadd.f32 %v12417_v30, %v5774_v55  ;;  %v5778_v45 = vadd.f32 %v5777_v7, %v11953_v25  ;;  %v6017_v16 = vmul.f32 1.442695, %v5968_v11  ;;  %v5910_v11 = vpop.f32.mrf.mxu1 }
 0x8b0   : > { %v8953_v12 = vpop.eup %8952  ;;  %v5779_v38 = vpop.f32.mrf.mxu0  ;;  %v7577_v0 = vadd.f32 -1.0, %v8951_v8  ;;  %vm5936_vm7 = vcmp.gt.f32.partialorder %v12493_v56, 0.0  ;;  %vm5937_vm8 = vcmp.gt.f32.partialorder %v12504_v60, 0.0 }
 0x8b1   : > { %v8955_v37 = vpop.eup %8954  ;;  %v5780_v28 = vadd.f32 %v5779_v38, %v12373_v27  ;;  %v6019_v52 = vmul.f32 1.442695, %v5969_v17  ;;  %v5970_v13 = vmin.f32 %v12515_v58, 0.0  ;;  %v12521_v32 = vadd.f32 %v12428_v35, %v5778_v45 }
 0x8b2   : > { %v5781_v20 = vpop.f32.mrf.mxu0  ;;  %v7576_v36 = vadd.f32 -1.0, %v8953_v12  ;;  %v7578_v59 = vadd.f32 -1.0, %v8955_v37  ;;  %v6087_v35 = vsel %vm5927_vm11, %v12422_v2, %v7575_v51  ;;  %v6089_v6 = vsel %vm5929_vm13, %v12433_v21, %v7577_v0 }
 0x8b3   : > { %v12524_v30 = vadd.f32 %v12437_v53, %v5780_v28  ;;  %v5782_v48 = vadd.f32 %v5781_v20, %v11953_v25  ;;  %8964 = vpow2.f32 %v6019_v52  ;;  %v6021_v57 = vmul.f32 1.442695, %v5970_v13 }
 0x8b4   : > { %v5971_v10 = vmin.f32 %v12521_v32, 0.0  ;;  %v5783_v61 = vpop.f32.mrf.mxu0  ;;  %8966 = vpow2.f32 %v6015_v42  ;;  %v6090_v1 = vsel %vm5930_vm14, %v12442_v31, %v7578_v59  ;;  %v6115_v9 = vpack.c.bf16 %v6089_v6, %v6087_v35 }
 0x8b5   : > { %v5972_v15 = vmin.f32 %v12524_v30, 0.0  ;;  %v12534_v53 = vadd.f32 %v12451_v34, %v5782_v48  ;;  %8968 = vpow2.f32 %v6017_v16  ;;  %v5784_v39 = vadd.f32 %v5783_v61, %v12373_v27 }
 0x8b6   : > { %v5787_v24 = vpop.f32.mrf.mxu0  ;;  %8970 = vpow2.f32 %v6021_v57  ;;  %v6088_v34 = vsel %vm5928_vm4, %v12425_v40, %v7576_v36  ;;  %v8957_v63 = vpop.eup %8956  ;;  %v6023_v62 = vmul.f32 1.442695, %v5971_v10  ;;  %vm5938_vm0 = vcmp.gt.f32.partialorder %v12515_v58, 0.0 }
 0x8b7   : > { %v6025_v47 = vmul.f32 1.442695, %v5972_v15  ;;  %v5973_v2 = vmin.f32 %v12534_v53, 0.0  ;;  %v12546_v22 = vadd.f32 %v12469_v18, %v5784_v39  ;;  %v5788_v21 = vadd.f32 %v5787_v24, %v11953_v25 }
 0x8b8   : > { %v5789_v4 = vpop.f32.mrf.mxu0  ;;  %v6116_v44 = vpack.c.bf16 %v6090_v1, %v6088_v34  ;;  %v8959_v33 = vpop.eup %8958  ;;  %v7580_v38 = vadd.f32 -1.0, %v8957_v63  ;;  %vm5940_vm9 = vcmp.gt.f32.partialorder %v12524_v30, 0.0  ;;  %vm5941_vm5 = vcmp.gt.f32.partialorder %v12534_v53, 0.0 }
 0x8b9   : > { %v6027_v5 = vmul.f32 1.442695, %v5973_v2  ;;  %v5790_v31 = vadd.f32 %v5789_v4, %v12373_v27  ;;  %v8961_v8 = vpop.eup %8960  ;;  %8972 = vpow2.f32 %v6025_v47  ;;  %v5974_v40 = vmin.f32 %v12546_v22, 0.0 }
 0x8ba   : > { %v12553_v55 = vadd.f32 %v12487_v50, %v5788_v21  ;;  %6319 = vmatprep.mubr.bf16.mxu0 %v6116_v44  ;;  %v5791_v18 = vpop.f32.mrf.mxu0  ;;  %v7581_v12 = vadd.f32 -1.0, %v8959_v33  ;;  %8974 = vpow2.f32 %v6023_v62  ;;  %v7579_v28 = vadd.f32 -1.0, %v8961_v8 }
 0x8bb   : > { %v8963_v7 = vpop.eup %8962  ;;  %v12556_v17 = vadd.f32 %v12506_v23, %v5790_v31  ;;  %6320 = vmatmul.mubr.bf16.gmra.mxu0 %v6115_v9  ;;  %v5792_v45 = vadd.f32 %v5791_v18, %v11953_v25  ;;  %v6029_v37 = vmul.f32 1.442695, %v5974_v40  ;;  %8976 = vpow2.f32 %v6027_v5  ;;  %v5912_v23 = vpop.f32.mrf.mxu1 }
 0x8bc   : > { %v5975_v51 = vmin.f32 %v12553_v55, 0.0  ;;  %v5793_v0 = vpop.f32.mrf.mxu0  ;;  %v7582_v13 = vadd.f32 -1.0, %v8963_v7  ;;  %v6093_v20 = vsel %vm5933_vm2, %v12473_v29, %v7581_v12  ;;  %v6092_v59 = vsel %vm5932_vm1, %v12459_v3, %v7580_v38 }
 0x8bd   : > { %v5976_v50 = vmin.f32 %v12556_v17, 0.0  ;;  %v12563_v42 = vadd.f32 %v5904_v14, %v5792_v45  ;;  %8978 = vpow2.f32 %v6029_v37  ;;  %v5794_v16 = vadd.f32 %v5793_v0, %v12373_v27  ;;  %v5914_v1 = vpop.f32.mrf.mxu1 }
 0x8be   : > { %v5797_v52 = vpop.f32.mrf.mxu0  ;;  %v6031_v57 = vmul.f32 1.442695, %v5975_v51  ;;  %v6094_v35 = vsel %vm5934_vm3, %v12480_v41, %v7582_v13  ;;  %v6091_v3 = vsel %vm5931_vm15, %v12448_v46, %v7579_v28  ;;  %vm5942_vm10 = vcmp.gt.f32.partialorder %v12546_v22, 0.0 }
 0x8bf   : > { %v6033_v48 = vmul.f32 1.442695, %v5976_v50  ;;  %v5977_v36 = vmin.f32 %v12563_v42, 0.0  ;;  %v12571_v10 = vadd.f32 %v5906_v26, %v5794_v16  ;;  %v5798_v14 = vadd.f32 %v5797_v52, %v11953_v25  ;;  %v5916_v9 = vpop.f32.mrf.mxu1 }
 0x8c0   : > { %v5799_v61 = vpop.f32.mrf.mxu0  ;;  %v8965_v15 = vpop.eup %8964  ;;  %v6118_v39 = vpack.c.bf16 %v6094_v35, %v6092_v59  ;;  %v6117_v41 = vpack.c.bf16 %v6093_v20, %v6091_v3  ;;  %vm5939_vm11 = vcmp.gt.f32.partialorder %v12521_v32, 0.0  ;;  %vm5944_vm4 = vcmp.gt.f32.partialorder %v12556_v17, 0.0 }
 0x8c1   : > { %v6035_v29 = vmul.f32 1.442695, %v5977_v36  ;;  %v5800_v6 = vadd.f32 %v5799_v61, %v12373_v27  ;;  %v8967_v24 = vpop.eup %8966  ;;  %8980 = vpow2.f32 %v6033_v48  ;;  %v5978_v26 = vmin.f32 %v12571_v10, 0.0 }
 0x8c2   : > { %v5801_v47 = vpop.f32.mrf.mxu0  ;;  %v8969_v2 = vpop.eup %8968  ;;  %v12581_v34 = vadd.f32 %v5910_v11, %v5798_v14  ;;  %6327 = vmatprep.mubr.bf16.mxu0 %v6118_v39  ;;  %v7585_v4 = vadd.f32 -1.0, %v8965_v15  ;;  %8982 = vpow2.f32 %v6031_v57  ;;  %v7583_v8 = vadd.f32 -1.0, %v8967_v24 }
 0x8c3   : > { %v12583_v63 = vadd.f32 %v5912_v23, %v5800_v6  ;;  %v5802_v62 = vadd.f32 %v5801_v47, %v11953_v25  ;;  %v8971_v21 = vpop.eup %8970  ;;  %v6037_v44 = vmul.f32 1.442695, %v5978_v26  ;;  %8984 = vpow2.f32 %v6035_v29  ;;  %6328 = vmatmul.mubr.bf16.gmra.mxu0 %v6117_v41 }
 0x8c4   : > { %v5803_v33 = vpop.f32.mrf.mxu0  ;;  %v7584_v11 = vadd.f32 -1.0, %v8969_v2  ;;  %v5979_v25 = vmin.f32 %v12581_v34, 0.0  ;;  %v7586_v45 = vadd.f32 -1.0, %v8971_v21  ;;  %v6097_v38 = vsel %vm5937_vm8, %v12504_v60, %v7585_v4 }
 0x8c5   : > { %v5980_v46 = vmin.f32 %v12583_v63, 0.0  ;;  %v12587_v5 = vadd.f32 %v5914_v1, %v5802_v62  ;;  %v5804_v31 = vadd.f32 %v5803_v33, %v12373_v27  ;;  %8986 = vpow2.f32 %v6037_v44 }
 0x8c6   : > { %v8973_v40 = vpop.eup %8972  ;;  %v6096_v51 = vsel %vm5936_vm7, %v12493_v56, %v7584_v11  ;;  %v6098_v23 = vsel %vm5938_vm0, %v12515_v58, %v7586_v45  ;;  %v6095_v52 = vsel %vm5935_vm6, %v12484_v19, %v7583_v8  ;;  %v6039_v13 = vmul.f32 1.442695, %v5979_v25  ;;  %v8476_v11 = vld [vmem:[%s12826_s14 + $0x38] sm:$0xff]   ;;  %v8481_v25 = vld [vmem:[%s12826_s14 + $0x10] sm:$0xff]  }
 0x8c7   : > { %v6041_v18 = vmul.f32 1.442695, %v5980_v46  ;;  %v5981_v7 = vmin.f32 %v12587_v5, 0.0  ;;  %v12592_v12 = vadd.f32 %v5916_v9, %v5804_v31  ;;  %v8975_v27 = vpop.eup %8974  ;;  %v7588_v28 = vadd.f32 -1.0, %v8973_v40  ;;  %7950 = vmatprep.subr.bf16.mxu1 %v8476_v11  ;;  %v8480_v40 = vld [vmem:[%s12826_s14 + $0x18] sm:$0xff]  }
 0x8c8   : > { %v8977_v0 = vpop.eup %8976  ;;  %v6120_v20 = vpack.c.bf16 %v6098_v23, %v6096_v51  ;;  %v6119_v36 = vpack.c.bf16 %v6097_v38, %v6095_v52  ;;  %v7587_v19 = vadd.f32 -1.0, %v8975_v27  ;;  %vm5946_vm13 = vcmp.gt.f32.partialorder %v12571_v10, 0.0  ;;  %7951 = vmatpush3.bf16.msra.mxu1 %v8476_v11 }
 0x8c9   : > { %v6043_v37 = vmul.f32 1.442695, %v5981_v7  ;;  %8988 = vpow2.f32 %v6041_v18  ;;  %v5982_v50 = vmin.f32 %v12592_v12, 0.0  ;;  %v7589_v59 = vadd.f32 -1.0, %v8977_v0  ;;  %v8482_v18 = vld [vmem:[%s12826_s14 + $0x8] sm:$0xff]   ;;  %v8483_v7 = vld [vmem:[%s12826_s14] sm:$0xff]  }
 0x8ca   : > { %v8979_v16 = vpop.eup %8978  ;;  %6335 = vmatprep.mubr.bf16.mxu0 %v6120_v20  ;;  %v6100_v56 = vsel %vm5940_vm9, %v12524_v30, %v7588_v28  ;;  %v6099_v39 = vsel %vm5939_vm11, %v12521_v32, %v7587_v19  ;;  %vm5945_vm14 = vcmp.gt.f32.partialorder %v12563_v42, 0.0  ;;  %vm5943_vm1 = vcmp.gt.f32.partialorder %v12553_v55, 0.0 }
 0x8cb   : > { %v6045_v48 = vmul.f32 1.442695, %v5982_v50  ;;  %v7590_v60 = vadd.f32 -1.0, %v8979_v16  ;;  %8990 = vpow2.f32 %v6043_v37  ;;  %6336 = vmatmul.mubr.bf16.gmra.mxu0 %v6119_v36  ;;  %v6101_v35 = vsel %vm5941_vm5, %v12534_v53, %v7589_v59 }
 0x8cc   : > { %v6121_v30 = vpack.c.bf16 %v6101_v35, %v6099_v39  ;;  %vm5948_vm2 = vcmp.gt.f32.partialorder %v12583_v63, 0.0  ;;  %vm5950_vm3 = vcmp.gt.f32.partialorder %v12592_v12, 0.0  ;;  %vm5949_vm15 = vcmp.gt.f32.partialorder %v12587_v5, 0.0 }
 0x8cd   : > { %8992 = vpow2.f32 %v6045_v48  ;;  %v6102_v58 = vsel %vm5942_vm10, %v12546_v22, %v7590_v60  ;;  %vm5947_vm6 = vcmp.gt.f32.partialorder %v12581_v34, 0.0  ;;  %v12654_v45 = vsel %vm4796_vm12, %v11908_v43, %v12043_v49 }
 0x8ce   : > { %v8981_v57 = vpop.eup %8980  ;;  %8994 = vpow2.f32 %v6039_v13  ;;  %v6122_v14 = vpack.c.bf16 %v6102_v58, %v6100_v56 }
 0x8cf   : > { %v8983_v61 = vpop.eup %8982  ;;  %v7592_v29 = vadd.f32 -1.0, %v8981_v57 }
 0x8d0   : > { %6343 = vmatprep.mubr.bf16.mxu0 %v6122_v14  ;;  %v8985_v15 = vpop.eup %8984  ;;  %v7591_v26 = vadd.f32 -1.0, %v8983_v61 }
 0x8d1   : > { %v7593_v22 = vadd.f32 -1.0, %v8985_v15  ;;  %v6104_v1 = vsel %vm5944_vm4, %v12556_v17, %v7592_v29 }
 0x8d2   : > { %v8987_v6 = vpop.eup %8986  ;;  %v6103_v21 = vsel %vm5943_vm1, %v12553_v55, %v7591_v26 }
 0x8d3   : > { %v7594_v24 = vadd.f32 -1.0, %v8987_v6  ;;  %6344 = vmatmul.mubr.bf16.gmra.mxu0 %v6121_v30  ;;  %v6105_v2 = vsel %vm5945_vm14, %v12563_v42, %v7593_v22 }
 0x8d4   : > { %v6123_v44 = vpack.c.bf16 %v6105_v2, %v6103_v21 }
 0x8d5   : > { %v6106_v53 = vsel %vm5946_vm13, %v12571_v10, %v7594_v24 }
 0x8d6   : > { %v8989_v3 = vpop.eup %8988  ;;  %v6124_v47 = vpack.c.bf16 %v6106_v53, %v6104_v1 }
 0x8d7   : > { %v7596_v41 = vadd.f32 -1.0, %v8989_v3 }
 0x8d8   : > { %6351 = vmatprep.mubr.bf16.mxu0 %v6124_v47  ;;  %v8991_v32 = vpop.eup %8990 }
 0x8d9   : > { %v7597_v10 = vadd.f32 -1.0, %v8991_v32  ;;  %v6108_v33 = vsel %vm5948_vm2, %v12583_v63, %v7596_v41  ;;  %v8477_v63 = vld [vmem:[%s12826_s14 + $0x30] sm:$0xff]  }
 0x8da   : > { %v8993_v62 = vpop.eup %8992  ;;  %7952 = vmatprep.subr.bf16.mxu1 %v8477_v63 }
 0x8db   : > { %v8995_v4 = vpop.eup %8994  ;;  %v7598_v17 = vadd.f32 -1.0, %v8993_v62  ;;  %6352 = vmatmul.mubr.bf16.gmra.mxu0 %v6123_v44  ;;  %v6109_v9 = vsel %vm5949_vm15, %v12587_v5, %v7597_v10  ;;  %7953 = vmatpush3.bf16.msra.mxu1 %v8477_v63  ;;  %v8478_v5 = vld [vmem:[%s12826_s14 + $0x28] sm:$0xff]  }
 0x8dc   : > { %v7595_v46 = vadd.f32 -1.0, %v8995_v4  ;;  %7954 = vmatprep.subr.bf16.mxu1 %v8478_v5 }
 0x8dd   : > { %v6110_v42 = vsel %vm5950_vm3, %v12592_v12, %v7598_v17 }
 0x8de   : > { %v6126_v31 = vpack.c.bf16 %v6110_v42, %v6108_v33  ;;  %v6107_v55 = vsel %vm5947_vm6, %v12581_v34, %v7595_v46  ;;  %v8479_v34 = vld [vmem:[%s12826_s14 + $0x20] sm:$0xff]  }
 0x8df   : > { %v6125_v8 = vpack.c.bf16 %v6109_v9, %v6107_v55  ;;  %7955 = vmatpush3.bf16.msra.mxu1 %v8478_v5 }
 0x8e0   : > { %6359 = vmatprep.mubr.bf16.mxu0 %v6126_v31  ;;  %7956 = vmatprep.subr.bf16.mxu1 %v8479_v34 }
 0x8e3   : > { %6360 = vmatmul.mubr.bf16.gmra.mxu0 %v6125_v8  ;;  %7957 = vmatpush3.bf16.msra.mxu1 %v8479_v34 }
 0x8e4   : > { %7958 = vmatprep.subr.bf16.mxu1 %v8480_v40 }
 0x8e7   : > { %7959 = vmatpush3.bf16.msra.mxu1 %v8480_v40 }
 0x8e8   : > { %7960 = vmatprep.subr.bf16.mxu1 %v8481_v25 }
 0x8eb   : > { %7961 = vmatpush3.bf16.msra.mxu1 %v8481_v25 }
 0x8ec   : > { %7962 = vmatprep.subr.bf16.mxu1 %v8482_v18 }
 0x8ef   : > { %7963 = vmatpush3.bf16.msra.mxu1 %v8482_v18 }
 0x8f0   : > { %7964 = vmatprep.subr.bf16.mxu1 %v8483_v7 }
 0x8f3   : > { %7965 = vmatpush3.bf16.msra.mxu1 %v8483_v7 }
 0x966   : > { %v7822_v12 = vpop.f32.mrf.mxu0 }
 0x968   : > { %v7823_v27 = vpop.f32.mrf.mxu0 }
 0x969   : > { %v7824_v38 = vadd.f32 %v7823_v27, %v7822_v12 }
 0x96a   : > { %v7825_v37 = vpop.f32.mrf.mxu0 }
 0x96b   : > { %v6306_v51 = vadd.f32 %v7824_v38, %v12654_v45 }
 0x96c   : > { %v7826_v0 = vpop.f32.mrf.mxu0 }
 0x96d   : > { %v6384_v50 = vmin.f32 %v6306_v51, 0.0  ;;  %v7827_v23 = vadd.f32 %v7826_v0, %v7825_v37  ;;  %vm6368_vm12 = vcmp.gt.f32.partialorder %v6306_v51, 0.0 }
 0x96e   : > { %v7828_v28 = vpop.f32.mrf.mxu0 }
 0x96f   : > { %v6400_v16 = vmul.f32 1.442695, %v6384_v50  ;;  %v6309_v52 = vadd.f32 %v7827_v23, %v12654_v45 }
 0x970   : > { %v7829_v13 = vpop.f32.mrf.mxu0 }
 0x971   : > { %8996 = vpow2.f32 %v6400_v16  ;;  %v6385_v20 = vmin.f32 %v6309_v52, 0.0  ;;  %v7830_v48 = vadd.f32 %v7829_v13, %v7828_v28  ;;  %vm6369_vm7 = vcmp.gt.f32.partialorder %v6309_v52, 0.0 }
 0x972   : > { %v7831_v36 = vpop.f32.mrf.mxu0 }
 0x973   : > { %v6402_v60 = vmul.f32 1.442695, %v6385_v20  ;;  %v6314_v43 = vadd.f32 %v7830_v48, %v12654_v45 }
 0x974   : > { %v7832_v49 = vpop.f32.mrf.mxu0 }
 0x975   : > { %8998 = vpow2.f32 %v6402_v60  ;;  %v6386_v59 = vmin.f32 %v6314_v43, 0.0  ;;  %v7833_v56 = vadd.f32 %v7832_v49, %v7831_v36  ;;  %vm6370_vm8 = vcmp.gt.f32.partialorder %v6314_v43, 0.0 }
 0x977   : > { %v6404_v58 = vmul.f32 1.442695, %v6386_v59  ;;  %v6317_v57 = vadd.f32 %v7833_v56, %v12654_v45 }
 0x979   : > { %9000 = vpow2.f32 %v6404_v58  ;;  %v6387_v19 = vmin.f32 %v6317_v57, 0.0  ;;  %vm6371_vm0 = vcmp.gt.f32.partialorder %v6317_v57, 0.0 }
 0x97b   : > { %v7834_v14 = vpop.f32.mrf.mxu0  ;;  %v6406_v61 = vmul.f32 1.442695, %v6387_v19 }
 0x97d   : > { %v7835_v35 = vpop.f32.mrf.mxu0  ;;  %9002 = vpow2.f32 %v6406_v61 }
 0x97e   : > { %v7836_v15 = vadd.f32 %v7835_v35, %v7834_v14  ;;  %v8997_v29 = vpop.eup %8996 }
 0x97f   : > { %v7837_v6 = vpop.f32.mrf.mxu0  ;;  %v7615_v1 = vadd.f32 -1.0, %v8997_v29 }
 0x980   : > { %v12661_v39 = vadd.f32 %v7836_v15, %v12654_v45 }
 0x981   : > { %v7838_v30 = vpop.f32.mrf.mxu0  ;;  %v6448_v41 = vsel %vm6368_vm12, %v6306_v51, %v7615_v1  ;;  %vm6819_vm12 = vcmask 236768  }
 0x982   : > { %v6388_v24 = vmin.f32 %v12661_v39, 0.0  ;;  %v7839_v22 = vadd.f32 %v7838_v30, %v7837_v6  ;;  %v8999_v53 = vpop.eup %8998  ;;  %vm6372_vm9 = vcmp.gt.f32.partialorder %v12661_v39, 0.0 }
 0x983   : > { %v7616_v47 = vadd.f32 -1.0, %v8999_v53  ;;  %v7840_v2 = vpop.f32.mrf.mxu0 }
 0x984   : > { %v6408_v3 = vmul.f32 1.442695, %v6388_v24  ;;  %v6325_v26 = vadd.f32 %v7839_v22, %v12654_v45 }
 0x985   : > { %v6449_v62 = vsel %vm6369_vm7, %v6309_v52, %v7616_v47  ;;  %v7841_v4 = vpop.f32.mrf.mxu0 }
 0x986   : > { %9004 = vpow2.f32 %v6408_v3  ;;  %v6389_v32 = vmin.f32 %v6325_v26, 0.0  ;;  %v9001_v21 = vpop.eup %9000  ;;  %v6464_v44 = vpack.c.bf16 %v6449_v62, %v6448_v41  ;;  %v7842_v10 = vadd.f32 %v7841_v4, %v7840_v2 }
 0x987   : > { %v7843_v33 = vpop.f32.mrf.mxu0  ;;  %v7617_v42 = vadd.f32 -1.0, %v9001_v21  ;;  %vm6373_vm10 = vcmp.gt.f32.partialorder %v6325_v26, 0.0 }
 0x988   : > { %v6410_v17 = vmul.f32 1.442695, %v6389_v32  ;;  %7966 = vmatprep.mubr.bf16.mxu1 %v6464_v44  ;;  %v12666_v46 = vadd.f32 %v7842_v10, %v12654_v45 }
 0x989   : > { %v7844_v9 = vpop.f32.mrf.mxu0  ;;  %v6450_v63 = vsel %vm6370_vm8, %v6314_v43, %v7617_v42 }
 0x98a   : > { %9006 = vpow2.f32 %v6410_v17  ;;  %v9003_v31 = vpop.eup %9002  ;;  %v6390_v8 = vmin.f32 %v12666_v46, 0.0  ;;  %v7845_v11 = vadd.f32 %v7844_v9, %v7843_v33  ;;  %vm6374_vm11 = vcmp.gt.f32.partialorder %v12666_v46, 0.0 }
 0x98b   : > { %v7618_v55 = vadd.f32 -1.0, %v9003_v31  ;;  %v7846_v25 = vpop.f32.mrf.mxu0 }
 0x98c   : > { %v6412_v34 = vmul.f32 1.442695, %v6390_v8  ;;  %v6333_v40 = vadd.f32 %v7845_v11, %v12654_v45 }
 0x98d   : > { %v6451_v5 = vsel %vm6371_vm0, %v6317_v57, %v7618_v55  ;;  %v7847_v12 = vpop.f32.mrf.mxu0 }
 0x98e   : > { %v6465_v18 = vpack.c.bf16 %v6451_v5, %v6450_v63  ;;  %v6391_v7 = vmin.f32 %v6333_v40, 0.0  ;;  %9008 = vpow2.f32 %v6412_v34  ;;  %v7848_v27 = vadd.f32 %v7847_v12, %v7846_v25 }
 0x98f   : > { %v7849_v37 = vpop.f32.mrf.mxu0  ;;  %vm6375_vm5 = vcmp.gt.f32.partialorder %v6333_v40, 0.0 }
 0x990   : > { %7967 = vmatmul.mubr.bf16.vlgmr.msra.gmra.mxu1 %v6465_v18  ;;  %v6414_v38 = vmul.f32 1.442695, %v6391_v7  ;;  %v12671_v0 = vadd.f32 %v7848_v27, %v12654_v45 }
 0x991   : > { %v7850_v50 = vpop.f32.mrf.mxu0 }
 0x992   : > { %9010 = vpow2.f32 %v6414_v38  ;;  %v6392_v23 = vmin.f32 %v12671_v0, 0.0  ;;  %v7851_v28 = vadd.f32 %v7850_v50, %v7849_v37  ;;  %vm6376_vm4 = vcmp.gt.f32.partialorder %v12671_v0, 0.0 }
 0x993   : > { %v9005_v51 = vpop.eup %9004  ;;  %v7852_v16 = vpop.f32.mrf.mxu0 }
 0x994   : > { %v7619_v52 = vadd.f32 -1.0, %v9005_v51  ;;  %v6416_v20 = vmul.f32 1.442695, %v6392_v23  ;;  %v12675_v48 = vadd.f32 %v7851_v28, %v12654_v45 }
 0x995   : > { %v7853_v36 = vpop.f32.mrf.mxu0 }
 0x996   : > { %v6393_v43 = vmin.f32 %v12675_v48, 0.0  ;;  %v7854_v49 = vadd.f32 %v7853_v36, %v7852_v16  ;;  %9012 = vpow2.f32 %v6416_v20  ;;  %v6452_v56 = vsel %vm6372_vm9, %v12661_v39, %v7619_v52 }
 0x997   : > { %v9007_v13 = vpop.eup %9006  ;;  %v7855_v59 = vpop.f32.mrf.mxu0  ;;  %vm6377_vm13 = vcmp.gt.f32.partialorder %v12675_v48, 0.0 }
 0x998   : > { %v7620_v60 = vadd.f32 -1.0, %v9007_v13  ;;  %v6418_v57 = vmul.f32 1.442695, %v6393_v43  ;;  %v12681_v19 = vadd.f32 %v7854_v49, %v12654_v45 }
 0x999   : > { %v7856_v61 = vpop.f32.mrf.mxu0 }
 0x99a   : > { %v6453_v58 = vsel %vm6373_vm10, %v6325_v26, %v7620_v60  ;;  %9014 = vpow2.f32 %v6418_v57  ;;  %v6394_v35 = vmin.f32 %v12681_v19, 0.0  ;;  %v7857_v15 = vadd.f32 %v7856_v61, %v7855_v59 }
 0x99b   : > { %v6466_v14 = vpack.c.bf16 %v6453_v58, %v6452_v56  ;;  %v9009_v29 = vpop.eup %9008  ;;  %v7858_v6 = vpop.f32.mrf.mxu0  ;;  %vm6378_vm14 = vcmp.gt.f32.partialorder %v12681_v19, 0.0 }
 0x99c   : > { %v6420_v30 = vmul.f32 1.442695, %v6394_v35  ;;  %v6349_v24 = vadd.f32 %v7857_v15, %v12654_v45  ;;  %v7621_v39 = vadd.f32 -1.0, %v9009_v29 }
 0x99d   : > { %7970 = vmatprep.mubr.bf16.mxu1 %v6466_v14  ;;  %v7859_v22 = vpop.f32.mrf.mxu0 }
 0x99e   : > { %9016 = vpow2.f32 %v6420_v30  ;;  %v6395_v53 = vmin.f32 %v6349_v24, 0.0  ;;  %v7860_v3 = vadd.f32 %v7859_v22, %v7858_v6  ;;  %v6454_v21 = vsel %vm6374_vm11, %v12666_v46, %v7621_v39 }
 0x99f   : > { %v9011_v1 = vpop.eup %9010  ;;  %v7861_v47 = vpop.f32.mrf.mxu0  ;;  %vm6379_vm1 = vcmp.gt.f32.partialorder %v6349_v24, 0.0 }
 0x9a0   : > { %v7622_v26 = vadd.f32 -1.0, %v9011_v1  ;;  %v6422_v2 = vmul.f32 1.442695, %v6395_v53  ;;  %v6354_v32 = vadd.f32 %v7860_v3, %v12654_v45 }
 0x9a1   : > { %v7862_v62 = vpop.f32.mrf.mxu0 }
 0x9a2   : > { %v6455_v41 = vsel %vm6375_vm5, %v6333_v40, %v7622_v26  ;;  %9018 = vpow2.f32 %v6422_v2  ;;  %v6396_v4 = vmin.f32 %v6354_v32, 0.0  ;;  %v7863_v44 = vadd.f32 %v7862_v62, %v7861_v47 }
 0x9a3   : > { %v7864_v17 = vpop.f32.mrf.mxu0  ;;  %v6467_v10 = vpack.c.bf16 %v6455_v41, %v6454_v21  ;;  %v9013_v33 = vpop.eup %9012  ;;  %vm6380_vm2 = vcmp.gt.f32.partialorder %v6354_v32, 0.0 }
 0x9a4   : > { %v6424_v42 = vmul.f32 1.442695, %v6396_v4  ;;  %v6357_v31 = vadd.f32 %v7863_v44, %v12654_v45  ;;  %v7623_v5 = vadd.f32 -1.0, %v9013_v33 }
 0x9a5   : > { %v7865_v9 = vpop.f32.mrf.mxu0  ;;  %7971 = vmatmul.mubr.bf16.gmra.mxu1 %v6467_v10 }
 0x9a6   : > { %9020 = vpow2.f32 %v6424_v42  ;;  %v6397_v55 = vmin.f32 %v6357_v31, 0.0  ;;  %v7866_v8 = vadd.f32 %v7865_v9, %v7864_v17  ;;  %v6456_v27 = vsel %vm6376_vm4, %v12671_v0, %v7623_v5 }
 0x9a7   : > { %v9015_v11 = vpop.eup %9014  ;;  %v7867_v63 = vpop.f32.mrf.mxu0  ;;  %vm6381_vm3 = vcmp.gt.f32.partialorder %v6357_v31, 0.0 }
 0x9a8   : > { %v6426_v34 = vmul.f32 1.442695, %v6397_v55  ;;  %v6362_v46 = vadd.f32 %v7866_v8, %v12654_v45  ;;  %v7624_v40 = vadd.f32 -1.0, %v9015_v11 }
 0x9a9   : > { %v7868_v25 = vpop.f32.mrf.mxu0 }
 0x9aa   : > { %9022 = vpow2.f32 %v6426_v34  ;;  %v6398_v18 = vmin.f32 %v6362_v46, 0.0  ;;  %v7869_v7 = vadd.f32 %v7868_v25, %v7867_v63  ;;  %v6457_v38 = vsel %vm6377_vm13, %v12675_v48, %v7624_v40 }
 0x9ab   : > { %v9017_v12 = vpop.eup %9016  ;;  %v6468_v50 = vpack.c.bf16 %v6457_v38, %v6456_v27  ;;  %vm6382_vm15 = vcmp.gt.f32.partialorder %v6362_v46, 0.0 }
 0x9ac   : > { %v6428_v37 = vmul.f32 1.442695, %v6398_v18  ;;  %v6365_v51 = vadd.f32 %v7869_v7, %v12654_v45  ;;  %v7625_v23 = vadd.f32 -1.0, %v9017_v12 }
 0x9ad   : > { %7974 = vmatprep.mubr.bf16.mxu1 %v6468_v50 }
 0x9ae   : > { %9024 = vpow2.f32 %v6428_v37  ;;  %v6399_v28 = vmin.f32 %v6365_v51, 0.0  ;;  %v6458_v20 = vsel %vm6378_vm14, %v12681_v19, %v7625_v23  ;;  %vm6383_vm6 = vcmp.gt.f32.partialorder %v6365_v51, 0.0 }
 0x9af   : > { %v9019_v16 = vpop.eup %9018 }
 0x9b0   : > { %v7626_v52 = vadd.f32 -1.0, %v9019_v16  ;;  %v6430_v13 = vmul.f32 1.442695, %v6399_v28 }
 0x9b2   : > { %v6459_v36 = vsel %vm6379_vm1, %v6349_v24, %v7626_v52  ;;  %9026 = vpow2.f32 %v6430_v13 }
 0x9b3   : > { %v9021_v0 = vpop.eup %9020  ;;  %v6469_v48 = vpack.c.bf16 %v6459_v36, %v6458_v20 }
 0x9b4   : > { %v7627_v60 = vadd.f32 -1.0, %v9021_v0 }
 0x9b5   : > { %7975 = vmatmul.mubr.bf16.gmra.mxu1 %v6469_v48 }
 0x9b6   : > { %v6460_v49 = vsel %vm6380_vm2, %v6354_v32, %v7627_v60 }
 0x9b7   : > { %v9023_v45 = vpop.eup %9022 }
 0x9b8   : > { %v7628_v43 = vadd.f32 -1.0, %v9023_v45 }
 0x9ba   : > { %v6461_v59 = vsel %vm6381_vm3, %v6357_v31, %v7628_v43 }
 0x9bb   : > { %v9025_v56 = vpop.eup %9024  ;;  %v6470_v58 = vpack.c.bf16 %v6461_v59, %v6460_v49 }
 0x9bc   : > { %v7629_v57 = vadd.f32 -1.0, %v9025_v56 }
 0x9bd   : > { %7978 = vmatprep.mubr.bf16.mxu1 %v6470_v58 }
 0x9be   : > { %v6462_v19 = vsel %vm6382_vm15, %v6362_v46, %v7629_v57 }
 0x9bf   : > { %v9027_v14 = vpop.eup %9026 }
 0x9c0   : > { %v7630_v61 = vadd.f32 -1.0, %v9027_v14 }
 0x9c2   : > { %v6463_v35 = vsel %vm6383_vm6, %v6365_v51, %v7630_v61 }
 0x9c3   : > { %v6471_v15 = vpack.c.bf16 %v6463_v35, %v6462_v19 }
 0x9c5   : > { %7979 = vmatmul.mubr.bf16.gmra.mxu1 %v6471_v15 }
 0xa50   : > { %v7968_v29 = vpop.f32.mrf.mxu1 }
 0xa51   : > { %v6588_v6 = vadd.f32 %v7968_v29, %v12051_v54 }
 0xa52   : > { %v6579_v30 = vpop.f32.mrf.mxu1 }
 0xa53   : > { %6775 = vrot.lane.b32.xlu0 %v6588_v6, %s9358_s16  ;;  %v6580_v22 = vadd.f32 %v6579_v30, %v12051_v54 }
 0xa54   : > { %v7969_v24 = vpop.f32.mrf.mxu1 }
 0xa55   : > { %v6591_v1 = vadd.f32 %v7969_v24, %v12051_v54 }
 0xa56   : > { %v6582_v39 = vpop.f32.mrf.mxu1 }
 0xa57   : > { %6777 = vrot.lane.b32.xlu1 %v6591_v1, %s9358_s16  ;;  %6771 = vrot.lane.b32.xlu0 %v6580_v22, %s9358_s16  ;;  %v6583_v53 = vadd.f32 %v6582_v39, %v12051_v54 }
 0xa5b   : > { %6773 = vrot.lane.b32.xlu1 %v6583_v53, %s9358_s16 }
 0xa65   : > { %v7972_v3 = vpop.f32.mrf.mxu1 }
 0xa66   : > { %v6604_v26 = vadd.f32 %v7972_v3, %v12051_v54 }
 0xa67   : > { %v6595_v47 = vpop.f32.mrf.mxu1 }
 0xa68   : > { %6783 = vrot.lane.b32.xlu0 %v6604_v26, %s9358_s16  ;;  %v6596_v32 = vadd.f32 %v6595_v47, %v12051_v54 }
 0xa69   : > { %v7973_v2 = vpop.f32.mrf.mxu1 }
 0xa6a   : > { %v6607_v41 = vadd.f32 %v7973_v2, %v12051_v54 }
 0xa6b   : > { %v6598_v62 = vpop.f32.mrf.mxu1 }
 0xa6c   : > { %6785 = vrot.lane.b32.xlu1 %v6607_v41, %s9358_s16  ;;  %6779 = vrot.lane.b32.xlu0 %v6596_v32, %s9358_s16  ;;  %v6599_v21 = vadd.f32 %v6598_v62, %v12051_v54 }
 0xa70   : > { %6781 = vrot.lane.b32.xlu1 %v6599_v21, %s9358_s16 }
 0xa75   : > { %v7976_v4 = vpop.f32.mrf.mxu1 }
 0xa76   : > { %v6620_v44 = vadd.f32 %v7976_v4, %v12051_v54 }
 0xa77   : > { %v6611_v17 = vpop.f32.mrf.mxu1 }
 0xa78   : > { %6791 = vrot.lane.b32.xlu0 %v6620_v44, %s9358_s16  ;;  %v6612_v33 = vadd.f32 %v6611_v17, %v12051_v54 }
 0xa79   : > { %v7977_v10 = vpop.f32.mrf.mxu1 }
 0xa7a   : > { %v6623_v42 = vadd.f32 %v7977_v10, %v12051_v54 }
 0xa7b   : > { %v6614_v31 = vpop.f32.mrf.mxu1 }
 0xa7c   : > { %6793 = vrot.lane.b32.xlu1 %v6623_v42, %s9358_s16  ;;  %6787 = vrot.lane.b32.xlu0 %v6612_v33, %s9358_s16  ;;  %v6615_v9 = vadd.f32 %v6614_v31, %v12051_v54 }
 0xa80   : > { %6789 = vrot.lane.b32.xlu1 %v6615_v9, %s9358_s16 }
 0xa85   : > { %v7980_v55 = vpop.f32.mrf.mxu1 }
 0xa86   : > { %v6636_v34 = vadd.f32 %v7980_v55, %v12051_v54 }
 0xa87   : > { %v6627_v8 = vpop.f32.mrf.mxu1 }
 0xa88   : > { %v6628_v11 = vadd.f32 %v6627_v8, %v12051_v54 }
 0xa89   : > { %v7981_v63 = vpop.f32.mrf.mxu1 }
 0xa8a   : > { %6795 = vrot.lane.b32.xlu0 %v6628_v11, %s9358_s16  ;;  %v6639_v40 = vadd.f32 %v7981_v63, %v12051_v54 }
 0xa8b   : > { %v6630_v5 = vpop.f32.mrf.mxu1 }
 0xa8c   : > { %v6631_v46 = vadd.f32 %v6630_v5, %v12051_v54 }
 0xa8e   : > { %6797 = vrot.lane.b32.xlu1 %v6631_v46, %s9358_s16  ;;  %6799 = vrot.lane.b32.xlu0 %v6636_v34, %s9358_s16 }
 0xa92   : > { %6801 = vrot.lane.b32.xlu1 %v6639_v40, %s9358_s16 }
 0xac5   : > { %v6776_v25 = vpop.permute.xlu0 %6775 }
 0xac6   : > { %6822 = vst.msk [vmem:[%s9984_s18 + $0x10] sm:$0xff] %vm6819_vm12, %v6776_v25 }
 0xac9   : > { %v6778_v18 = vpop.permute.xlu1 %6777  ;;  %v6772_v7 = vpop.permute.xlu0 %6771 }
 0xaca   : > { %6823 = vst.msk [vmem:[%s9984_s18 + $0x18] sm:$0xff] %vm6819_vm12, %v6778_v18  ;;  %6820 = vst.msk [vmem:[%s9984_s18] sm:$0xff] %vm6819_vm12, %v6772_v7 }
 0xacd   : > { %v6774_v12 = vpop.permute.xlu1 %6773 }
 0xace   : > { %6821 = vst.msk [vmem:[%s9984_s18 + $0x8] sm:$0xff] %vm6819_vm12, %v6774_v12 }
 0xada   : > { %v6784_v54 = vpop.permute.xlu0 %6783 }
 0xadb   : > { %6826 = vst.msk [vmem:[%s9984_s18 + $0x30] sm:$0xff] %vm6819_vm12, %v6784_v54 }
 0xade   : > { %v6786_v27 = vpop.permute.xlu1 %6785  ;;  %v6780_v38 = vpop.permute.xlu0 %6779 }
 0xadf   : > { %6827 = vst.msk [vmem:[%s9984_s18 + $0x38] sm:$0xff] %vm6819_vm12, %v6786_v27  ;;  %6824 = vst.msk [vmem:[%s9984_s18 + $0x20] sm:$0xff] %vm6819_vm12, %v6780_v38 }
 0xae2   : > { %v6782_v37 = vpop.permute.xlu1 %6781 }
 0xae3   : > { %6825 = vst.msk [vmem:[%s9984_s18 + $0x28] sm:$0xff] %vm6819_vm12, %v6782_v37 }
 0xaea   : > { %v6792_v51 = vpop.permute.xlu0 %6791 }
 0xaeb   : > { %6830 = vst.msk [vmem:[%s9984_s18 + $0x50] sm:$0xff] %vm6819_vm12, %v6792_v51 }
 0xaee   : > { %v6794_v50 = vpop.permute.xlu1 %6793  ;;  %v6788_v23 = vpop.permute.xlu0 %6787 }
 0xaef   : > { %6831 = vst.msk [vmem:[%s9984_s18 + $0x58] sm:$0xff] %vm6819_vm12, %v6794_v50  ;;  %6828 = vst.msk [vmem:[%s9984_s18 + $0x40] sm:$0xff] %vm6819_vm12, %v6788_v23 }
 0xaf2   : > { %v6790_v28 = vpop.permute.xlu1 %6789 }
 0xaf3   : > { %6829 = vst.msk [vmem:[%s9984_s18 + $0x48] sm:$0xff] %vm6819_vm12, %v6790_v28 }
 0xafc   : > { %v6796_v16 = vpop.permute.xlu0 %6795 }
 0xafd   : > { %6832 = vst.msk [vmem:[%s9984_s18 + $0x60] sm:$0xff] %vm6819_vm12, %v6796_v16 }
 0xb00   : > { %v6798_v52 = vpop.permute.xlu1 %6797  ;;  %v6800_v13 = vpop.permute.xlu0 %6799 }
 0xb01   : > { %6833 = vst.msk [vmem:[%s9984_s18 + $0x68] sm:$0xff] %vm6819_vm12, %v6798_v52  ;;  %6834 = vst.msk [vmem:[%s9984_s18 + $0x70] sm:$0xff] %vm6819_vm12, %v6800_v13 }
 0xb04   : > { %v6802_v20 = vpop.permute.xlu1 %6801 }
 0xb05   : > { %6835 = vst.msk [vmem:[%s9984_s18 + $0x78] sm:$0xff] %vm6819_vm12, %v6802_v20 }
 0xb06   : > { %9270 = shalt.err (!%p9267_p7)
}
 0xb07   : > { %s9271_s18 = scalar_lea.hbm %s12764_s26, 2048  ;;  %s9275_s23 = scalar_lea.hbm %s13034_s30, 4096 }
 0xb08   : > { %p9272_p12 = scmp.ne.s32.totalorder %s12764_s26, %s9271_s18  ;;  %p9276_p8 = scmp.lt.s32.totalorder %s12764_s26, %s13034_s30 }
 0xb09   : > { %p9277_p6 = scmp.lt.s32.totalorder %s9275_s23, %s9271_s18 }
 0xb0a   : > { %p9273_p10 = pnand %p9272_p12, %p9485_p5 }
 0xb0b   : > { %p9278_p9 = por %p9277_p6, %p9276_p8 }
 0xb0c   : > { %p9274_p11 = pneg %p9273_p10 }
 0xb0e   : > { %p9279_p0 = pnand %p9278_p9, %p9274_p11 }
 0xb10   : > { %9282 = shalt.err (!%p9279_p0)
}
 0xb11   : > { %s9360_s25 = smov 128   ;;  %s9361_s28 = smov 8  }
 0xb12   : > { %8030 = dma.vmem_to_hbm [thread:$0]  (%p9485_p5), %s12766_s27, 2048, %s12764_s26, %s12772_s24, %s9360_s25, %s9360_s25, %s9361_s28  }
 0xb13 PF: > { %s13036_s20 = sld [smem:[#allocation25_spill]] }
 0xb14   : > { %s13037_s29 = sld [smem:[#allocation23_spill]] }
 0xb15   : > { %s13038_s3 = sld [smem:[#allocation28_spill]] }
 0xb19   : > { %p8077_p1 = scmp.ge.s32.totalorder %s13036_s20, 2 }
 0xb1a   : > { %s6865_s21 = sand.u32 1, %s13037_s29  }
 0xb1b   : > { %p13039_p13 = scmp.ne.s32.totalorder %s13038_s3, 0  ;;  %s6866_s18 = scalar_lea.sflag [#allocation4], %s6865_s21 }
 0xb1d   : > { %p8058_p3 = pnand %p8077_p1, %p13039_p13 }
 0xb1f   : > { %p8059_p2 = pneg %p8058_p3 }
 0xb21   : > { %9320 = dma.done.wait (%p8059_p2), %s6866_s18, 2048  }
 0xb22   : > { %9322 = vsyncadd (%p8059_p2), %s6866_s18, 4294965248  ;;  %s13040_s24 = sld [smem:[#allocation26_spill]]  ;;  %s13043_s21 = smov %s9329_s22 }
 0xb23   : > { %s13041_s16 = sld [smem:[#allocation24_spill]] }
 0xb24   : > { %s13042_s23 = sld [smem:[#allocation27_spill]] }
 0xb28   : > { %p31_p4 = scmp.ge.s32.totalorder %s13040_s24, 4  }
 0xb29   : > { %s13044_s22 = smov %s13041_s16 }
 0xb2a   :  { %33 = sbr.rel (!%p31_p4) target bundleno = 12 (0xc), region = 155 }
 0xb2f   :  { %6871 = vsyncpa [#allocation3], 1 }
 0xb30   :  { %6873 = vsyncpa [#allocation3 + $0x1], 1 }
 0xb31   :  { %6874 = vsyncpa [#allocation6], 1 }
 0xb32   :  { %6875 = vsyncpa [#allocation9], 1 }
 0xb33   :  { %6876 = vsyncpa [#allocation12], 1 }
 0xb34   :  { %6877 = vsyncpa [#allocation15], 1 }
 0xb35   :  { %6878 = vsyncpa [#allocation4], 1 }
 0xb36   :  { %6880 = vsyncpa [#allocation4 + $0x1], 1 }

</bundles_post_ra>
